<compile_context>
chip_gen: v5e
topology: v5e:2x2
jax: 0.10.0
libtpu: 0.0.40
codegen_flags: <defaults>
</compile_context>

<pallas_src>
import functools

import jax
import jax.numpy as jnp
from jax.experimental import pallas as pl
from jax.experimental.pallas import tpu as pltpu

NEG_SLOPE = 0.2
LANE = 128
TM = 512                          # M tile for the fallback im2col GEMM path
VMEM_LIMIT = 48 * 1024 * 1024     # explicit scoped-VMEM request (< v7x 64 MiB)
FUSED_BUDGET = 24 * 1024 * 1024   # per-layer estimate above which we fall back


def _round_up(x, m):
    return (x + m - 1) // m * m


# ----------------------- fused conv (main path) ---------------------------- #
def _s2d_conv_kernel(x_ref, w_ref, b_ref, o_ref, *, apply_lrelu):
    """One image per grid step.

    x_ref: (1, Ho+1, Wo+1, 4*Cin) bf16  space-to-depth input (pad=1 folded in)
    w_ref: (2, 2, 4*Cin, Cout)    bf16  weights, fully VMEM-resident
    b_ref: (1, Cout)              f32
    o_ref: (1, Ho, Wo, Cout)

    The 4x4/stride-2 conv becomes four shifted sub-GEMMs accumulated in f32;
    bias + LeakyReLU are fused into the epilogue.  No K grid axis, no scratch
    accumulator, no pl.when, no HBM im2col.
    """
    _, ho, wo, cout = o_ref.shape
    q = x_ref.shape[3]
    acc = jnp.zeros((ho * wo, cout), jnp.float32)
    for dh in range(2):
        for dw in range(2):
            a = x_ref[0, dh:dh + ho, dw:dw + wo, :]          # (ho, wo, q) bf16
            a2 = a.reshape(ho * wo, q)
            wk = w_ref[dh, dw]                               # (q, cout) bf16
            if cout == 1:
                # Cout=1 classifier: VPU multiply + lane reduction (no MXU
                # column waste).
                acc = acc + jnp.sum(
                    a2.astype(jnp.float32)
                    * wk.reshape(1, q).astype(jnp.float32),
                    axis=-1, keepdims=True)
            else:
                acc = acc + jnp.dot(a2, wk,
                                    preferred_element_type=jnp.float32)
    out = acc + b_ref[...]                                   # f32 epilogue
    if apply_lrelu:
        out = jnp.where(out >= 0.0, out, NEG_SLOPE * out)
    o_ref[...] = out.reshape(1, ho, wo, cout).astype(o_ref.dtype)


def _fused_conv(x_s2d, w2, b_row, *, ho, wo, apply_lrelu, out_dtype):
    n, hs, ws, q = x_s2d.shape
    cout = w2.shape[-1]
    return pl.pallas_call(
        functools.partial(_s2d_conv_kernel, apply_lrelu=apply_lrelu),
        out_shape=jax.ShapeDtypeStruct((n, ho, wo, cout), out_dtype),
        grid_spec=pltpu.PrefetchScalarGridSpec(
            num_scalar_prefetch=0,
            grid=(n,),
            in_specs=[
                pl.BlockSpec((1, hs, ws, q), lambda i: (i, 0, 0, 0)),
                pl.BlockSpec((2, 2, q, cout), lambda i: (0, 0, 0, 0)),
                pl.BlockSpec((1, cout), lambda i: (0, 0)),
            ],
            out_specs=pl.BlockSpec((1, ho, wo, cout), lambda i: (i, 0, 0, 0)),
        ),
        compiler_params=pltpu.CompilerParams(
            dimension_semantics=("parallel",),
            vmem_limit_bytes=VMEM_LIMIT),
    )(x_s2d, w2, b_row)


def _space_to_depth_pad(x_nhwc):
    """(N,H,W,C) -> (N, H/2+1, W/2+1, 4*C): folds pad=1 / stride=2 structure."""
    n, h, w, c = x_nhwc.shape
    xp = jnp.pad(x_nhwc, ((0, 0), (1, 1), (1, 1), (0, 0)))
    hs, ws = (h + 2) // 2, (w + 2) // 2
    xs = xp.reshape(n, hs, 2, ws, 2, c)
    xs = jnp.transpose(xs, (0, 1, 3, 2, 4, 5))               # (n,hs,ws,pr,pc,c)
    return xs.reshape(n, hs, ws, 4 * c)


def _fused_vmem_estimate(hs, ws, q, ho, wo, cout, out_bytes):
    x_blk = hs * ws * q * 2
    w_b = 4 * q * cout * 2
    o_blk = ho * wo * cout * out_bytes
    acc = ho * wo * cout * 4
    # 2x double-buffered in/out blocks + ~2 x_blk of in-kernel slab temporaries.
    return 4 * x_blk + 2 * w_b + 2 * o_blk + acc + (1 << 20)


# --------------- materialized-im2col GEMM (fallback path) ------------------ #
def _im2col_s2k4p1(x_nhwc):
    n, h, w, c = x_nhwc.shape
    ho = (h + 2 - 4) // 2 + 1
    wo = (w + 2 - 4) // 2 + 1
    xp = jnp.pad(x_nhwc, ((0, 0), (1, 1), (1, 1), (0, 0)))
    cols = []
    for kh in range(4):
        for kw in range(4):
            cols.append(xp[:, kh:kh + 2 * ho:2, kw:kw + 2 * wo:2, :])
    patches = jnp.stack(cols, axis=3)                        # (n,ho,wo,16,c)
    return patches.reshape(n * ho * wo, 16 * c), (n, ho, wo)


def _gemm_kernel(p_ref, w_ref, b_ref, o_ref, *, apply_lrelu):
    out = jnp.dot(p_ref[...], w_ref[...], preferred_element_type=jnp.float32)
    out = out + b_ref[...]
    if apply_lrelu:
        out = jnp.where(out >= 0.0, out, NEG_SLOPE * out)
    o_ref[...] = out.astype(o_ref.dtype)


def _gemm_conv_layer(x_nhwc, w_mat, b_row, *, apply_lrelu, out_dtype):
    patches, (n, ho, wo) = _im2col_s2k4p1(x_nhwc)
    m, k = patches.shape
    kp, cout = w_mat.shape
    tm = min(TM, _round_up(m, 8))
    mp = _round_up(m, tm)
    if mp != m or kp != k:
        patches = jnp.pad(patches, ((0, mp - m), (0, kp - k)))
    out = pl.pallas_call(
        functools.partial(_gemm_kernel, apply_lrelu=apply_lrelu),
        out_shape=jax.ShapeDtypeStruct((mp, cout), out_dtype),
        grid_spec=pltpu.PrefetchScalarGridSpec(
            num_scalar_prefetch=0,
            grid=(mp // tm,),
            in_specs=[
                pl.BlockSpec((tm, kp), lambda i: (i, 0)),
                pl.BlockSpec((kp, cout), lambda i: (0, 0)),   # weight-resident
                pl.BlockSpec((1, cout), lambda i: (0, 0)),
            ],
            out_specs=pl.BlockSpec((tm, cout), lambda i: (i, 0)),
        ),
        compiler_params=pltpu.CompilerParams(
            dimension_semantics=("parallel",),
            vmem_limit_bytes=VMEM_LIMIT),
    )(patches, w_mat, b_row)
    if mp != m:
        out = out[:m]
    return out.reshape(n, ho, wo, cout)


# ------------------------------ param prep --------------------------------- #
def prepare_params(raw_params):
    """One-time weight prep: (Cout,Cin,4,4) f32 -> bf16 kernels, no Cin padding."""
    prepared = []
    for w, b in raw_params:
        cout, cin, kh, kw = w.shape                           # kh = kw = 4
        # Fused (space-to-depth) weight: w2[dh, dw, (2*pr+pc)*cin+ci, co].
        w5 = w.reshape(cout, cin, 2, 2, 2, 2)                 # co,ci,dh,pr,dw,pc
        w2 = jnp.transpose(w5, (2, 4, 3, 5, 1, 0))            # dh,dw,pr,pc,ci,co
        w2 = w2.reshape(2, 2, 4 * cin, cout).astype(jnp.bfloat16)
        # Fallback GEMM weight: flattened K = 16*cin padded (post-flatten) to 128.
        w_t = jnp.transpose(w, (2, 3, 1, 0)).reshape(kh * kw * cin, cout)
        kflat = kh * kw * cin
        kp = _round_up(kflat, LANE)
        w_mat = jnp.pad(w_t, ((0, kp - kflat), (0, 0))).astype(jnp.bfloat16)
        b_row = b.reshape(1, cout).astype(jnp.float32)
        prepared.append({"w2": w2, "w_mat": w_mat, "b_row": b_row,
                         "cin": cin, "cout": cout})
    return prepared


# ------------------------------ forward pass -------------------------------- #
def fourway_asa_discriminator(x_nchw, prepared, *, force_gemm=False):
    """x_nchw: (N, 4*num_classes, H, W) f32.  Returns (N, 1, H/32, W/32) f32."""
    x = jnp.transpose(x_nchw, (0, 2, 3, 1)).astype(jnp.bfloat16)   # NHWC bf16
    n_layers = len(prepared)
    for i, layer in enumerate(prepared):
        last = i == n_layers - 1
        apply_lrelu = not last
        out_dtype = jnp.float32 if last else jnp.bfloat16
        _, h, w, c = x.shape
        cout = layer["cout"]
        use_fused = (not force_gemm) and (h % 2 == 0) and (w % 2 == 0)
        if use_fused:
            ho, wo = h // 2, w // 2
            est = _fused_vmem_estimate(ho + 1, wo + 1, 4 * c, ho, wo, cout,
                                       4 if last else 2)
            use_fused = est <= FUSED_BUDGET
        if use_fused:
            x_s2d = _space_to_depth_pad(x)
            x = _fused_conv(x_s2d, layer["w2"], layer["b_row"], ho=ho, wo=wo,
                            apply_lrelu=apply_lrelu, out_dtype=out_dtype)
        else:
            x = _gemm_conv_layer(x, layer["w_mat"], layer["b_row"],
                                 apply_lrelu=apply_lrelu, out_dtype=out_dtype)
    return jnp.transpose(x, (0, 3, 1, 2))                     # NHWC -> NCHW


# ------------------------ deterministic parameters -------------------------- #
def init_params(num_classes, ndf, key):
    shapes = [
        (ndf, 4 * num_classes, 4, 4),
        (ndf * 2, ndf, 4, 4),
        (ndf * 4, ndf * 2, 4, 4),
        (ndf * 8, ndf * 4, 4, 4),
        (1, ndf * 8, 4, 4),
    ]
    params = []
    for shape in shapes:
        key, kw_, kb_ = jax.random.split(key, 3)
        fan_in = shape[1] * shape[2] * shape[3]
        bound = 1.0 / jnp.sqrt(fan_in)
        w = jax.random.uniform(kw_, shape, jnp.float32, -bound, bound)
        b = jax.random.uniform(kb_, (shape[0],), jnp.float32, -bound, bound)
        params.append((w, b))
    return params


# ---------------------------- pure-JAX reference ---------------------------- #
def _reference_forward(x_nchw, params):
    x = x_nchw
    for i, (w, b) in enumerate(params):
        x = jax.lax.conv_general_dilated(
            x, w, window_strides=(2, 2), padding=((1, 1), (1, 1)),
            dimension_numbers=("NCHW", "OIHW", "NCHW"))
        x = x + b[None, :, None, None]
        if i < len(params) - 1:
            x = jnp.where(x >= 0.0, x, NEG_SLOPE * x)
    return x


if __name__ == "__main__":
    num_classes = 1       # -> 4 input channels
    ndf = 8               # small synthetic width
    batch, spatial = 2, 32  # 32 -> 16 -> 8 -> 4 -> 2 -> 1 spatial

    key = jax.random.PRNGKey(0)
    key, kx = jax.random.split(key)
    x = jax.random.normal(kx, (batch, 4 * num_classes, spatial, spatial),
                          jnp.float32)
    raw_params = init_params(num_classes, ndf, key)
    prepared = prepare_params(raw_params)     # one-time weight prep

    ref = jax.block_until_ready(_reference_forward(x, raw_params))

    # Fused (space-to-depth) path — the default for these shapes.
    fwd = jax.jit(lambda xx: fourway_asa_discriminator(xx, prepared))
    out = jax.block_until_ready(fwd(x))
    assert out.shape == (batch, 1, 1, 1), out.shape
    err = float(jnp.max(jnp.abs(out - ref)))
    # bf16 MXU path over 5 layers -> looser tolerance than the f32 reference.
    assert jnp.allclose(out, ref, rtol=5e-2, atol=5e-2), err

    # Also exercise the large-image fallback (tiled weight-resident im2col GEMM).
    fwd_fb = jax.jit(
        lambda xx: fourway_asa_discriminator(xx, prepared, force_gemm=True))
    out_fb = jax.block_until_ready(fwd_fb(x))
    err_fb = float(jnp.max(jnp.abs(out_fb - ref)))
    assert jnp.allclose(out_fb, ref, rtol=5e-2, atol=5e-2), err_fb

    print("KERNEL_OK")
</pallas_src>

<mosaic_0001>
module attributes {stable_mosaic.version = 11 : i64} {
  func.func @_s2d_conv_kernel(%arg0: i32, %arg1: memref<1x17x17x16xbf16, #tpu.memory_space<vmem>>, %arg2: memref<2x2x16x8xbf16, #tpu.memory_space<vmem>>, %arg3: memref<1x8xf32, #tpu.memory_space<vmem>>, %arg4: memref<1x16x16x8xbf16, #tpu.memory_space<vmem>>) attributes {dimension_semantics = [#tpu.dimension_semantics<parallel>], iteration_bounds = array<i64: 2>, scalar_prefetch = 0 : i64, scratch_operands = 0 : i64, tpu.core_type = #tpu.core_type<tc>, window_params = [{transform_indices = @transform_0, window_bounds = array<i64: 1, 17, 17, 16>}, {pipeline_mode = #tpu.pipeline_mode<synchronous>, transform_indices = @transform_1, window_bounds = array<i64: 2, 2, 16, 8>}, {pipeline_mode = #tpu.pipeline_mode<synchronous>, transform_indices = @transform_2, window_bounds = array<i64: 1, 8>}, {transform_indices = @transform_3, window_bounds = array<i64: 1, 16, 16, 8>}]} {
    %cst = arith.constant 0.000000e+00 : f32
    %0 = vector.broadcast %cst : f32 to vector<256x8xf32>
    %c0 = arith.constant 0 : index
    %c0_0 = arith.constant 0 : index
    %c0_1 = arith.constant 0 : index
    %c0_2 = arith.constant 0 : index
    %1 = vector.load %arg1[%c0, %c0_0, %c0_1, %c0_2] : memref<1x17x17x16xbf16, #tpu.memory_space<vmem>>, vector<1x16x16x16xbf16>
    %2 = vector.shape_cast %1 : vector<1x16x16x16xbf16> to vector<16x16x16xbf16>
    %3 = vector.shape_cast %2 : vector<16x16x16xbf16> to vector<256x16xbf16>
    %c0_3 = arith.constant 0 : index
    %c0_4 = arith.constant 0 : index
    %c0_5 = arith.constant 0 : index
    %c0_6 = arith.constant 0 : index
    %4 = vector.load %arg2[%c0_3, %c0_4, %c0_5, %c0_6] : memref<2x2x16x8xbf16, #tpu.memory_space<vmem>>, vector<1x1x16x8xbf16>
    %5 = vector.shape_cast %4 : vector<1x1x16x8xbf16> to vector<16x8xbf16>
    %cst_7 = arith.constant dense<0.000000e+00> : vector<256x8xf32>
    %6 = tpu.matmul %3, %5, %cst_7 {dimension_numbers = #tpu.dot_dimension_numbers<[1], [0], [0], [1], [0, 0, 1, 1], [], []>} : vector<256x16xbf16>, vector<16x8xbf16>, vector<256x8xf32> -> vector<256x8xf32>
    %7 = arith.addf %0, %6 : vector<256x8xf32>
    %c0_8 = arith.constant 0 : index
    %c0_9 = arith.constant 0 : index
    %c1 = arith.constant 1 : index
    %c0_10 = arith.constant 0 : index
    %8 = vector.load %arg1[%c0_8, %c0_9, %c1, %c0_10] : memref<1x17x17x16xbf16, #tpu.memory_space<vmem>>, vector<1x16x16x16xbf16>
    %9 = vector.shape_cast %8 : vector<1x16x16x16xbf16> to vector<16x16x16xbf16>
    %10 = vector.shape_cast %9 : vector<16x16x16xbf16> to vector<256x16xbf16>
    %c0_11 = arith.constant 0 : index
    %c1_12 = arith.constant 1 : index
    %c0_13 = arith.constant 0 : index
    %c0_14 = arith.constant 0 : index
    %11 = vector.load %arg2[%c0_11, %c1_12, %c0_13, %c0_14] : memref<2x2x16x8xbf16, #tpu.memory_space<vmem>>, vector<1x1x16x8xbf16>
    %12 = vector.shape_cast %11 : vector<1x1x16x8xbf16> to vector<16x8xbf16>
    %cst_15 = arith.constant dense<0.000000e+00> : vector<256x8xf32>
    %13 = tpu.matmul %10, %12, %cst_15 {dimension_numbers = #tpu.dot_dimension_numbers<[1], [0], [0], [1], [0, 0, 1, 1], [], []>} : vector<256x16xbf16>, vector<16x8xbf16>, vector<256x8xf32> -> vector<256x8xf32>
    %14 = arith.addf %7, %13 : vector<256x8xf32>
    %c0_16 = arith.constant 0 : index
    %c1_17 = arith.constant 1 : index
    %c0_18 = arith.constant 0 : index
    %c0_19 = arith.constant 0 : index
    %15 = vector.load %arg1[%c0_16, %c1_17, %c0_18, %c0_19] : memref<1x17x17x16xbf16, #tpu.memory_space<vmem>>, vector<1x16x16x16xbf16>
    %16 = vector.shape_cast %15 : vector<1x16x16x16xbf16> to vector<16x16x16xbf16>
    %17 = vector.shape_cast %16 : vector<16x16x16xbf16> to vector<256x16xbf16>
    %c1_20 = arith.constant 1 : index
    %c0_21 = arith.constant 0 : index
    %c0_22 = arith.constant 0 : index
    %c0_23 = arith.constant 0 : index
    %18 = vector.load %arg2[%c1_20, %c0_21, %c0_22, %c0_23] : memref<2x2x16x8xbf16, #tpu.memory_space<vmem>>, vector<1x1x16x8xbf16>
    %19 = vector.shape_cast %18 : vector<1x1x16x8xbf16> to vector<16x8xbf16>
    %cst_24 = arith.constant dense<0.000000e+00> : vector<256x8xf32>
    %20 = tpu.matmul %17, %19, %cst_24 {dimension_numbers = #tpu.dot_dimension_numbers<[1], [0], [0], [1], [0, 0, 1, 1], [], []>} : vector<256x16xbf16>, vector<16x8xbf16>, vector<256x8xf32> -> vector<256x8xf32>
    %21 = arith.addf %14, %20 : vector<256x8xf32>
    %c0_25 = arith.constant 0 : index
    %c1_26 = arith.constant 1 : index
    %c1_27 = arith.constant 1 : index
    %c0_28 = arith.constant 0 : index
    %22 = vector.load %arg1[%c0_25, %c1_26, %c1_27, %c0_28] : memref<1x17x17x16xbf16, #tpu.memory_space<vmem>>, vector<1x16x16x16xbf16>
    %23 = vector.shape_cast %22 : vector<1x16x16x16xbf16> to vector<16x16x16xbf16>
    %24 = vector.shape_cast %23 : vector<16x16x16xbf16> to vector<256x16xbf16>
    %c1_29 = arith.constant 1 : index
    %c1_30 = arith.constant 1 : index
    %c0_31 = arith.constant 0 : index
    %c0_32 = arith.constant 0 : index
    %25 = vector.load %arg2[%c1_29, %c1_30, %c0_31, %c0_32] : memref<2x2x16x8xbf16, #tpu.memory_space<vmem>>, vector<1x1x16x8xbf16>
    %26 = vector.shape_cast %25 : vector<1x1x16x8xbf16> to vector<16x8xbf16>
    %cst_33 = arith.constant dense<0.000000e+00> : vector<256x8xf32>
    %27 = tpu.matmul %24, %26, %cst_33 {dimension_numbers = #tpu.dot_dimension_numbers<[1], [0], [0], [1], [0, 0, 1, 1], [], []>} : vector<256x16xbf16>, vector<16x8xbf16>, vector<256x8xf32> -> vector<256x8xf32>
    %28 = arith.addf %21, %27 : vector<256x8xf32>
    %c0_34 = arith.constant 0 : index
    %c0_35 = arith.constant 0 : index
    %29 = vector.load %arg3[%c0_34, %c0_35] : memref<1x8xf32, #tpu.memory_space<vmem>>, vector<1x8xf32>
    %30 = vector.broadcast %29 : vector<1x8xf32> to vector<256x8xf32>
    %31 = arith.addf %28, %30 : vector<256x8xf32>
    %cst_36 = arith.constant 0.000000e+00 : f32
    %32 = vector.broadcast %cst_36 : f32 to vector<256x8xf32>
    %33 = arith.cmpf oge, %31, %32 : vector<256x8xf32>
    %cst_37 = arith.constant 2.000000e-01 : f32
    %34 = vector.broadcast %cst_37 : f32 to vector<256x8xf32>
    %35 = arith.mulf %34, %31 : vector<256x8xf32>
    %36 = arith.select %33, %31, %35 : vector<256x8xi1>, vector<256x8xf32>
    %37 = vector.shape_cast %36 : vector<256x8xf32> to vector<1x16x16x8xf32>
    %38 = arith.truncf %37 : vector<1x16x16x8xf32> to vector<1x16x16x8xbf16>
    %c0_38 = arith.constant 0 : index
    %c0_39 = arith.constant 0 : index
    %c0_40 = arith.constant 0 : index
    %c0_41 = arith.constant 0 : index
    %39 = vector.load %arg4[%c0_38, %c0_39, %c0_40, %c0_41] : memref<1x16x16x8xbf16, #tpu.memory_space<vmem>>, vector<1x16x16x8xbf16>
    tpu.vector_store %arg4[%c0_38, %c0_39, %c0_40, %c0_41], %38 {strides = array<i32>} : memref<1x16x16x8xbf16, #tpu.memory_space<vmem>>, vector<1x16x16x8xbf16>,
    return
  }
  func.func @transform_0(%arg0: i32) -> (i32, i32, i32, i32) {
    %c0_i32 = arith.constant 0 : i32
    %c0_i32_0 = arith.constant 0 : i32
    %c0_i32_1 = arith.constant 0 : i32
    %c0_i32_2 = arith.constant 0 : i32
    return %arg0, %c0_i32, %c0_i32_0, %c0_i32_1 : i32, i32, i32, i32
  }
  func.func @transform_1(%arg0: i32) -> (i32, i32, i32, i32) {
    %c0_i32 = arith.constant 0 : i32
    %c0_i32_0 = arith.constant 0 : i32
    %c0_i32_1 = arith.constant 0 : i32
    %c0_i32_2 = arith.constant 0 : i32
    %c0_i32_3 = arith.constant 0 : i32
    return %c0_i32, %c0_i32_0, %c0_i32_1, %c0_i32_2 : i32, i32, i32, i32
  }
  func.func @transform_2(%arg0: i32) -> (i32, i32) {
    %c0_i32 = arith.constant 0 : i32
    %c0_i32_0 = arith.constant 0 : i32
    %c0_i32_1 = arith.constant 0 : i32
    return %c0_i32, %c0_i32_0 : i32, i32
  }
  func.func @transform_3(%arg0: i32) -> (i32, i32, i32, i32) {
    %c0_i32 = arith.constant 0 : i32
    %c0_i32_0 = arith.constant 0 : i32
    %c0_i32_1 = arith.constant 0 : i32
    %c0_i32_2 = arith.constant 0 : i32
    return %arg0, %c0_i32, %c0_i32_0, %c0_i32_1 : i32, i32, i32, i32
  }
}

module attributes {stable_mosaic.version = 11 : i64} {
  func.func @_s2d_conv_kernel(%arg0: i32, %arg1: memref<1x9x9x32xbf16, #tpu.memory_space<vmem>>, %arg2: memref<2x2x32x16xbf16, #tpu.memory_space<vmem>>, %arg3: memref<1x16xf32, #tpu.memory_space<vmem>>, %arg4: memref<1x8x8x16xbf16, #tpu.memory_space<vmem>>) attributes {dimension_semantics = [#tpu.dimension_semantics<parallel>], iteration_bounds = array<i64: 2>, scalar_prefetch = 0 : i64, scratch_operands = 0 : i64, tpu.core_type = #tpu.core_type<tc>, window_params = [{transform_indices = @transform_0, window_bounds = array<i64: 1, 9, 9, 32>}, {pipeline_mode = #tpu.pipeline_mode<synchronous>, transform_indices = @transform_1, window_bounds = array<i64: 2, 2, 32, 16>}, {pipeline_mode = #tpu.pipeline_mode<synchronous>, transform_indices = @transform_2, window_bounds = array<i64: 1, 16>}, {transform_indices = @transform_3, window_bounds = array<i64: 1, 8, 8, 16>}]} {
    %cst = arith.constant 0.000000e+00 : f32
    %0 = vector.broadcast %cst : f32 to vector<64x16xf32>
    %c0 = arith.constant 0 : index
    %c0_0 = arith.constant 0 : index
    %c0_1 = arith.constant 0 : index
    %c0_2 = arith.constant 0 : index
    %1 = vector.load %arg1[%c0, %c0_0, %c0_1, %c0_2] : memref<1x9x9x32xbf16, #tpu.memory_space<vmem>>, vector<1x8x8x32xbf16>
    %2 = vector.shape_cast %1 : vector<1x8x8x32xbf16> to vector<8x8x32xbf16>
    %3 = vector.shape_cast %2 : vector<8x8x32xbf16> to vector<64x32xbf16>
    %c0_3 = arith.constant 0 : index
    %c0_4 = arith.constant 0 : index
    %c0_5 = arith.constant 0 : index
    %c0_6 = arith.constant 0 : index
    %4 = vector.load %arg2[%c0_3, %c0_4, %c0_5, %c0_6] : memref<2x2x32x16xbf16, #tpu.memory_space<vmem>>, vector<1x1x32x16xbf16>
    %5 = vector.shape_cast %4 : vector<1x1x32x16xbf16> to vector<32x16xbf16>
    %cst_7 = arith.constant dense<0.000000e+00> : vector<64x16xf32>
    %6 = tpu.matmul %3, %5, %cst_7 {dimension_numbers = #tpu.dot_dimension_numbers<[1], [0], [0], [1], [0, 0, 1, 1], [], []>} : vector<64x32xbf16>, vector<32x16xbf16>, vector<64x16xf32> -> vector<64x16xf32>
    %7 = arith.addf %0, %6 : vector<64x16xf32>
    %c0_8 = arith.constant 0 : index
    %c0_9 = arith.constant 0 : index
    %c1 = arith.constant 1 : index
    %c0_10 = arith.constant 0 : index
    %8 = vector.load %arg1[%c0_8, %c0_9, %c1, %c0_10] : memref<1x9x9x32xbf16, #tpu.memory_space<vmem>>, vector<1x8x8x32xbf16>
    %9 = vector.shape_cast %8 : vector<1x8x8x32xbf16> to vector<8x8x32xbf16>
    %10 = vector.shape_cast %9 : vector<8x8x32xbf16> to vector<64x32xbf16>
    %c0_11 = arith.constant 0 : index
    %c1_12 = arith.constant 1 : index
    %c0_13 = arith.constant 0 : index
    %c0_14 = arith.constant 0 : index
    %11 = vector.load %arg2[%c0_11, %c1_12, %c0_13, %c0_14] : memref<2x2x32x16xbf16, #tpu.memory_space<vmem>>, vector<1x1x32x16xbf16>
    %12 = vector.shape_cast %11 : vector<1x1x32x16xbf16> to vector<32x16xbf16>
    %cst_15 = arith.constant dense<0.000000e+00> : vector<64x16xf32>
    %13 = tpu.matmul %10, %12, %cst_15 {dimension_numbers = #tpu.dot_dimension_numbers<[1], [0], [0], [1], [0, 0, 1, 1], [], []>} : vector<64x32xbf16>, vector<32x16xbf16>, vector<64x16xf32> -> vector<64x16xf32>
    %14 = arith.addf %7, %13 : vector<64x16xf32>
    %c0_16 = arith.constant 0 : index
    %c1_17 = arith.constant 1 : index
    %c0_18 = arith.constant 0 : index
    %c0_19 = arith.constant 0 : index
    %15 = vector.load %arg1[%c0_16, %c1_17, %c0_18, %c0_19] : memref<1x9x9x32xbf16, #tpu.memory_space<vmem>>, vector<1x8x8x32xbf16>
    %16 = vector.shape_cast %15 : vector<1x8x8x32xbf16> to vector<8x8x32xbf16>
    %17 = vector.shape_cast %16 : vector<8x8x32xbf16> to vector<64x32xbf16>
    %c1_20 = arith.constant 1 : index
    %c0_21 = arith.constant 0 : index
    %c0_22 = arith.constant 0 : index
    %c0_23 = arith.constant 0 : index
    %18 = vector.load %arg2[%c1_20, %c0_21, %c0_22, %c0_23] : memref<2x2x32x16xbf16, #tpu.memory_space<vmem>>, vector<1x1x32x16xbf16>
    %19 = vector.shape_cast %18 : vector<1x1x32x16xbf16> to vector<32x16xbf16>
    %cst_24 = arith.constant dense<0.000000e+00> : vector<64x16xf32>
    %20 = tpu.matmul %17, %19, %cst_24 {dimension_numbers = #tpu.dot_dimension_numbers<[1], [0], [0], [1], [0, 0, 1, 1], [], []>} : vector<64x32xbf16>, vector<32x16xbf16>, vector<64x16xf32> -> vector<64x16xf32>
    %21 = arith.addf %14, %20 : vector<64x16xf32>
    %c0_25 = arith.constant 0 : index
    %c1_26 = arith.constant 1 : index
    %c1_27 = arith.constant 1 : index
    %c0_28 = arith.constant 0 : index
    %22 = vector.load %arg1[%c0_25, %c1_26, %c1_27, %c0_28] : memref<1x9x9x32xbf16, #tpu.memory_space<vmem>>, vector<1x8x8x32xbf16>
    %23 = vector.shape_cast %22 : vector<1x8x8x32xbf16> to vector<8x8x32xbf16>
    %24 = vector.shape_cast %23 : vector<8x8x32xbf16> to vector<64x32xbf16>
    %c1_29 = arith.constant 1 : index
    %c1_30 = arith.constant 1 : index
    %c0_31 = arith.constant 0 : index
    %c0_32 = arith.constant 0 : index
    %25 = vector.load %arg2[%c1_29, %c1_30, %c0_31, %c0_32] : memref<2x2x32x16xbf16, #tpu.memory_space<vmem>>, vector<1x1x32x16xbf16>
    %26 = vector.shape_cast %25 : vector<1x1x32x16xbf16> to vector<32x16xbf16>
    %cst_33 = arith.constant dense<0.000000e+00> : vector<64x16xf32>
    %27 = tpu.matmul %24, %26, %cst_33 {dimension_numbers = #tpu.dot_dimension_numbers<[1], [0], [0], [1], [0, 0, 1, 1], [], []>} : vector<64x32xbf16>, vector<32x16xbf16>, vector<64x16xf32> -> vector<64x16xf32>
    %28 = arith.addf %21, %27 : vector<64x16xf32>
    %c0_34 = arith.constant 0 : index
    %c0_35 = arith.constant 0 : index
    %29 = vector.load %arg3[%c0_34, %c0_35] : memref<1x16xf32, #tpu.memory_space<vmem>>, vector<1x16xf32>
    %30 = vector.broadcast %29 : vector<1x16xf32> to vector<64x16xf32>
    %31 = arith.addf %28, %30 : vector<64x16xf32>
    %cst_36 = arith.constant 0.000000e+00 : f32
    %32 = vector.broadcast %cst_36 : f32 to vector<64x16xf32>
    %33 = arith.cmpf oge, %31, %32 : vector<64x16xf32>
    %cst_37 = arith.constant 2.000000e-01 : f32
    %34 = vector.broadcast %cst_37 : f32 to vector<64x16xf32>
    %35 = arith.mulf %34, %31 : vector<64x16xf32>
    %36 = arith.select %33, %31, %35 : vector<64x16xi1>, vector<64x16xf32>
    %37 = vector.shape_cast %36 : vector<64x16xf32> to vector<1x8x8x16xf32>
    %38 = arith.truncf %37 : vector<1x8x8x16xf32> to vector<1x8x8x16xbf16>
    %c0_38 = arith.constant 0 : index
    %c0_39 = arith.constant 0 : index
    %c0_40 = arith.constant 0 : index
    %c0_41 = arith.constant 0 : index
    %39 = vector.load %arg4[%c0_38, %c0_39, %c0_40, %c0_41] : memref<1x8x8x16xbf16, #tpu.memory_space<vmem>>, vector<1x8x8x16xbf16>
    tpu.vector_store %arg4[%c0_38, %c0_39, %c0_40, %c0_41], %38 {strides = array<i32>} : memref<1x8x8x16xbf16, #tpu.memory_space<vmem>>, vector<1x8x8x16xbf16>,
    return
  }
  func.func @transform_0(%arg0: i32) -> (i32, i32, i32, i32) {
    %c0_i32 = arith.constant 0 : i32
    %c0_i32_0 = arith.constant 0 : i32
    %c0_i32_1 = arith.constant 0 : i32
    %c0_i32_2 = arith.constant 0 : i32
    return %arg0, %c0_i32, %c0_i32_0, %c0_i32_1 : i32, i32, i32, i32
  }
  func.func @transform_1(%arg0: i32) -> (i32, i32, i32, i32) {
    %c0_i32 = arith.constant 0 : i32
    %c0_i32_0 = arith.constant 0 : i32
    %c0_i32_1 = arith.constant 0 : i32
    %c0_i32_2 = arith.constant 0 : i32
    %c0_i32_3 = arith.constant 0 : i32
    return %c0_i32, %c0_i32_0, %c0_i32_1, %c0_i32_2 : i32, i32, i32, i32
  }
  func.func @transform_2(%arg0: i32) -> (i32, i32) {
    %c0_i32 = arith.constant 0 : i32
    %c0_i32_0 = arith.constant 0 : i32
    %c0_i32_1 = arith.constant 0 : i32
    return %c0_i32, %c0_i32_0 : i32, i32
  }
  func.func @transform_3(%arg0: i32) -> (i32, i32, i32, i32) {
    %c0_i32 = arith.constant 0 : i32
    %c0_i32_0 = arith.constant 0 : i32
    %c0_i32_1 = arith.constant 0 : i32
    %c0_i32_2 = arith.constant 0 : i32
    return %arg0, %c0_i32, %c0_i32_0, %c0_i32_1 : i32, i32, i32, i32
  }
}

module attributes {stable_mosaic.version = 11 : i64} {
  func.func @_s2d_conv_kernel(%arg0: i32, %arg1: memref<1x5x5x64xbf16, #tpu.memory_space<vmem>>, %arg2: memref<2x2x64x32xbf16, #tpu.memory_space<vmem>>, %arg3: memref<1x32xf32, #tpu.memory_space<vmem>>, %arg4: memref<1x4x4x32xbf16, #tpu.memory_space<vmem>>) attributes {dimension_semantics = [#tpu.dimension_semantics<parallel>], iteration_bounds = array<i64: 2>, scalar_prefetch = 0 : i64, scratch_operands = 0 : i64, tpu.core_type = #tpu.core_type<tc>, window_params = [{transform_indices = @transform_0, window_bounds = array<i64: 1, 5, 5, 64>}, {pipeline_mode = #tpu.pipeline_mode<synchronous>, transform_indices = @transform_1, window_bounds = array<i64: 2, 2, 64, 32>}, {pipeline_mode = #tpu.pipeline_mode<synchronous>, transform_indices = @transform_2, window_bounds = array<i64: 1, 32>}, {transform_indices = @transform_3, window_bounds = array<i64: 1, 4, 4, 32>}]} {
    %cst = arith.constant 0.000000e+00 : f32
    %0 = vector.broadcast %cst : f32 to vector<16x32xf32>
    %c0 = arith.constant 0 : index
    %c0_0 = arith.constant 0 : index
    %c0_1 = arith.constant 0 : index
    %c0_2 = arith.constant 0 : index
    %1 = vector.load %arg1[%c0, %c0_0, %c0_1, %c0_2] : memref<1x5x5x64xbf16, #tpu.memory_space<vmem>>, vector<1x4x4x64xbf16>
    %2 = vector.shape_cast %1 : vector<1x4x4x64xbf16> to vector<4x4x64xbf16>
    %3 = vector.shape_cast %2 : vector<4x4x64xbf16> to vector<16x64xbf16>
    %c0_3 = arith.constant 0 : index
    %c0_4 = arith.constant 0 : index
    %c0_5 = arith.constant 0 : index
    %c0_6 = arith.constant 0 : index
    %4 = vector.load %arg2[%c0_3, %c0_4, %c0_5, %c0_6] : memref<2x2x64x32xbf16, #tpu.memory_space<vmem>>, vector<1x1x64x32xbf16>
    %5 = vector.shape_cast %4 : vector<1x1x64x32xbf16> to vector<64x32xbf16>
    %cst_7 = arith.constant dense<0.000000e+00> : vector<16x32xf32>
    %6 = tpu.matmul %3, %5, %cst_7 {dimension_numbers = #tpu.dot_dimension_numbers<[1], [0], [0], [1], [0, 0, 1, 1], [], []>} : vector<16x64xbf16>, vector<64x32xbf16>, vector<16x32xf32> -> vector<16x32xf32>
    %7 = arith.addf %0, %6 : vector<16x32xf32>
    %c0_8 = arith.constant 0 : index
    %c0_9 = arith.constant 0 : index
    %c1 = arith.constant 1 : index
    %c0_10 = arith.constant 0 : index
    %8 = vector.load %arg1[%c0_8, %c0_9, %c1, %c0_10] : memref<1x5x5x64xbf16, #tpu.memory_space<vmem>>, vector<1x4x4x64xbf16>
    %9 = vector.shape_cast %8 : vector<1x4x4x64xbf16> to vector<4x4x64xbf16>
    %10 = vector.shape_cast %9 : vector<4x4x64xbf16> to vector<16x64xbf16>
    %c0_11 = arith.constant 0 : index
    %c1_12 = arith.constant 1 : index
    %c0_13 = arith.constant 0 : index
    %c0_14 = arith.constant 0 : index
    %11 = vector.load %arg2[%c0_11, %c1_12, %c0_13, %c0_14] : memref<2x2x64x32xbf16, #tpu.memory_space<vmem>>, vector<1x1x64x32xbf16>
    %12 = vector.shape_cast %11 : vector<1x1x64x32xbf16> to vector<64x32xbf16>
    %cst_15 = arith.constant dense<0.000000e+00> : vector<16x32xf32>
    %13 = tpu.matmul %10, %12, %cst_15 {dimension_numbers = #tpu.dot_dimension_numbers<[1], [0], [0], [1], [0, 0, 1, 1], [], []>} : vector<16x64xbf16>, vector<64x32xbf16>, vector<16x32xf32> -> vector<16x32xf32>
    %14 = arith.addf %7, %13 : vector<16x32xf32>
    %c0_16 = arith.constant 0 : index
    %c1_17 = arith.constant 1 : index
    %c0_18 = arith.constant 0 : index
    %c0_19 = arith.constant 0 : index
    %15 = vector.load %arg1[%c0_16, %c1_17, %c0_18, %c0_19] : memref<1x5x5x64xbf16, #tpu.memory_space<vmem>>, vector<1x4x4x64xbf16>
    %16 = vector.shape_cast %15 : vector<1x4x4x64xbf16> to vector<4x4x64xbf16>
    %17 = vector.shape_cast %16 : vector<4x4x64xbf16> to vector<16x64xbf16>
    %c1_20 = arith.constant 1 : index
    %c0_21 = arith.constant 0 : index
    %c0_22 = arith.constant 0 : index
    %c0_23 = arith.constant 0 : index
    %18 = vector.load %arg2[%c1_20, %c0_21, %c0_22, %c0_23] : memref<2x2x64x32xbf16, #tpu.memory_space<vmem>>, vector<1x1x64x32xbf16>
    %19 = vector.shape_cast %18 : vector<1x1x64x32xbf16> to vector<64x32xbf16>
    %cst_24 = arith.constant dense<0.000000e+00> : vector<16x32xf32>
    %20 = tpu.matmul %17, %19, %cst_24 {dimension_numbers = #tpu.dot_dimension_numbers<[1], [0], [0], [1], [0, 0, 1, 1], [], []>} : vector<16x64xbf16>, vector<64x32xbf16>, vector<16x32xf32> -> vector<16x32xf32>
    %21 = arith.addf %14, %20 : vector<16x32xf32>
    %c0_25 = arith.constant 0 : index
    %c1_26 = arith.constant 1 : index
    %c1_27 = arith.constant 1 : index
    %c0_28 = arith.constant 0 : index
    %22 = vector.load %arg1[%c0_25, %c1_26, %c1_27, %c0_28] : memref<1x5x5x64xbf16, #tpu.memory_space<vmem>>, vector<1x4x4x64xbf16>
    %23 = vector.shape_cast %22 : vector<1x4x4x64xbf16> to vector<4x4x64xbf16>
    %24 = vector.shape_cast %23 : vector<4x4x64xbf16> to vector<16x64xbf16>
    %c1_29 = arith.constant 1 : index
    %c1_30 = arith.constant 1 : index
    %c0_31 = arith.constant 0 : index
    %c0_32 = arith.constant 0 : index
    %25 = vector.load %arg2[%c1_29, %c1_30, %c0_31, %c0_32] : memref<2x2x64x32xbf16, #tpu.memory_space<vmem>>, vector<1x1x64x32xbf16>
    %26 = vector.shape_cast %25 : vector<1x1x64x32xbf16> to vector<64x32xbf16>
    %cst_33 = arith.constant dense<0.000000e+00> : vector<16x32xf32>
    %27 = tpu.matmul %24, %26, %cst_33 {dimension_numbers = #tpu.dot_dimension_numbers<[1], [0], [0], [1], [0, 0, 1, 1], [], []>} : vector<16x64xbf16>, vector<64x32xbf16>, vector<16x32xf32> -> vector<16x32xf32>
    %28 = arith.addf %21, %27 : vector<16x32xf32>
    %c0_34 = arith.constant 0 : index
    %c0_35 = arith.constant 0 : index
    %29 = vector.load %arg3[%c0_34, %c0_35] : memref<1x32xf32, #tpu.memory_space<vmem>>, vector<1x32xf32>
    %30 = vector.broadcast %29 : vector<1x32xf32> to vector<16x32xf32>
    %31 = arith.addf %28, %30 : vector<16x32xf32>
    %cst_36 = arith.constant 0.000000e+00 : f32
    %32 = vector.broadcast %cst_36 : f32 to vector<16x32xf32>
    %33 = arith.cmpf oge, %31, %32 : vector<16x32xf32>
    %cst_37 = arith.constant 2.000000e-01 : f32
    %34 = vector.broadcast %cst_37 : f32 to vector<16x32xf32>
    %35 = arith.mulf %34, %31 : vector<16x32xf32>
    %36 = arith.select %33, %31, %35 : vector<16x32xi1>, vector<16x32xf32>
    %37 = vector.shape_cast %36 : vector<16x32xf32> to vector<1x4x4x32xf32>
    %38 = arith.truncf %37 : vector<1x4x4x32xf32> to vector<1x4x4x32xbf16>
    %c0_38 = arith.constant 0 : index
    %c0_39 = arith.constant 0 : index
    %c0_40 = arith.constant 0 : index
    %c0_41 = arith.constant 0 : index
    %39 = vector.load %arg4[%c0_38, %c0_39, %c0_40, %c0_41] : memref<1x4x4x32xbf16, #tpu.memory_space<vmem>>, vector<1x4x4x32xbf16>
    tpu.vector_store %arg4[%c0_38, %c0_39, %c0_40, %c0_41], %38 {strides = array<i32>} : memref<1x4x4x32xbf16, #tpu.memory_space<vmem>>, vector<1x4x4x32xbf16>,
    return
  }
  func.func @transform_0(%arg0: i32) -> (i32, i32, i32, i32) {
    %c0_i32 = arith.constant 0 : i32
    %c0_i32_0 = arith.constant 0 : i32
    %c0_i32_1 = arith.constant 0 : i32
    %c0_i32_2 = arith.constant 0 : i32
    return %arg0, %c0_i32, %c0_i32_0, %c0_i32_1 : i32, i32, i32, i32
  }
  func.func @transform_1(%arg0: i32) -> (i32, i32, i32, i32) {
    %c0_i32 = arith.constant 0 : i32
    %c0_i32_0 = arith.constant 0 : i32
    %c0_i32_1 = arith.constant 0 : i32
    %c0_i32_2 = arith.constant 0 : i32
    %c0_i32_3 = arith.constant 0 : i32
    return %c0_i32, %c0_i32_0, %c0_i32_1, %c0_i32_2 : i32, i32, i32, i32
  }
  func.func @transform_2(%arg0: i32) -> (i32, i32) {
    %c0_i32 = arith.constant 0 : i32
    %c0_i32_0 = arith.constant 0 : i32
    %c0_i32_1 = arith.constant 0 : i32
    return %c0_i32, %c0_i32_0 : i32, i32
  }
  func.func @transform_3(%arg0: i32) -> (i32, i32, i32, i32) {
    %c0_i32 = arith.constant 0 : i32
    %c0_i32_0 = arith.constant 0 : i32
    %c0_i32_1 = arith.constant 0 : i32
    %c0_i32_2 = arith.constant 0 : i32
    return %arg0, %c0_i32, %c0_i32_0, %c0_i32_1 : i32, i32, i32, i32
  }
}

module attributes {stable_mosaic.version = 11 : i64} {
  func.func @_s2d_conv_kernel(%arg0: i32, %arg1: memref<1x3x3x128xbf16, #tpu.memory_space<vmem>>, %arg2: memref<2x2x128x64xbf16, #tpu.memory_space<vmem>>, %arg3: memref<1x64xf32, #tpu.memory_space<vmem>>, %arg4: memref<1x2x2x64xbf16, #tpu.memory_space<vmem>>) attributes {dimension_semantics = [#tpu.dimension_semantics<parallel>], iteration_bounds = array<i64: 2>, scalar_prefetch = 0 : i64, scratch_operands = 0 : i64, tpu.core_type = #tpu.core_type<tc>, window_params = [{transform_indices = @transform_0, window_bounds = array<i64: 1, 3, 3, 128>}, {pipeline_mode = #tpu.pipeline_mode<synchronous>, transform_indices = @transform_1, window_bounds = array<i64: 2, 2, 128, 64>}, {pipeline_mode = #tpu.pipeline_mode<synchronous>, transform_indices = @transform_2, window_bounds = array<i64: 1, 64>}, {transform_indices = @transform_3, window_bounds = array<i64: 1, 2, 2, 64>}]} {
    %cst = arith.constant 0.000000e+00 : f32
    %0 = vector.broadcast %cst : f32 to vector<4x64xf32>
    %c0 = arith.constant 0 : index
    %c0_0 = arith.constant 0 : index
    %c0_1 = arith.constant 0 : index
    %c0_2 = arith.constant 0 : index
    %1 = vector.load %arg1[%c0, %c0_0, %c0_1, %c0_2] : memref<1x3x3x128xbf16, #tpu.memory_space<vmem>>, vector<1x2x2x128xbf16>
    %2 = vector.shape_cast %1 : vector<1x2x2x128xbf16> to vector<2x2x128xbf16>
    %3 = vector.shape_cast %2 : vector<2x2x128xbf16> to vector<4x128xbf16>
    %c0_3 = arith.constant 0 : index
    %c0_4 = arith.constant 0 : index
    %c0_5 = arith.constant 0 : index
    %c0_6 = arith.constant 0 : index
    %4 = vector.load %arg2[%c0_3, %c0_4, %c0_5, %c0_6] : memref<2x2x128x64xbf16, #tpu.memory_space<vmem>>, vector<1x1x128x64xbf16>
    %5 = vector.shape_cast %4 : vector<1x1x128x64xbf16> to vector<128x64xbf16>
    %cst_7 = arith.constant dense<0.000000e+00> : vector<4x64xf32>
    %6 = tpu.matmul %3, %5, %cst_7 {dimension_numbers = #tpu.dot_dimension_numbers<[1], [0], [0], [1], [0, 0, 1, 1], [], []>} : vector<4x128xbf16>, vector<128x64xbf16>, vector<4x64xf32> -> vector<4x64xf32>
    %7 = arith.addf %0, %6 : vector<4x64xf32>
    %c0_8 = arith.constant 0 : index
    %c0_9 = arith.constant 0 : index
    %c1 = arith.constant 1 : index
    %c0_10 = arith.constant 0 : index
    %8 = vector.load %arg1[%c0_8, %c0_9, %c1, %c0_10] : memref<1x3x3x128xbf16, #tpu.memory_space<vmem>>, vector<1x2x2x128xbf16>
    %9 = vector.shape_cast %8 : vector<1x2x2x128xbf16> to vector<2x2x128xbf16>
    %10 = vector.shape_cast %9 : vector<2x2x128xbf16> to vector<4x128xbf16>
    %c0_11 = arith.constant 0 : index
    %c1_12 = arith.constant 1 : index
    %c0_13 = arith.constant 0 : index
    %c0_14 = arith.constant 0 : index
    %11 = vector.load %arg2[%c0_11, %c1_12, %c0_13, %c0_14] : memref<2x2x128x64xbf16, #tpu.memory_space<vmem>>, vector<1x1x128x64xbf16>
    %12 = vector.shape_cast %11 : vector<1x1x128x64xbf16> to vector<128x64xbf16>
    %cst_15 = arith.constant dense<0.000000e+00> : vector<4x64xf32>
    %13 = tpu.matmul %10, %12, %cst_15 {dimension_numbers = #tpu.dot_dimension_numbers<[1], [0], [0], [1], [0, 0, 1, 1], [], []>} : vector<4x128xbf16>, vector<128x64xbf16>, vector<4x64xf32> -> vector<4x64xf32>
    %14 = arith.addf %7, %13 : vector<4x64xf32>
    %c0_16 = arith.constant 0 : index
    %c1_17 = arith.constant 1 : index
    %c0_18 = arith.constant 0 : index
    %c0_19 = arith.constant 0 : index
    %15 = vector.load %arg1[%c0_16, %c1_17, %c0_18, %c0_19] : memref<1x3x3x128xbf16, #tpu.memory_space<vmem>>, vector<1x2x2x128xbf16>
    %16 = vector.shape_cast %15 : vector<1x2x2x128xbf16> to vector<2x2x128xbf16>
    %17 = vector.shape_cast %16 : vector<2x2x128xbf16> to vector<4x128xbf16>
    %c1_20 = arith.constant 1 : index
    %c0_21 = arith.constant 0 : index
    %c0_22 = arith.constant 0 : index
    %c0_23 = arith.constant 0 : index
    %18 = vector.load %arg2[%c1_20, %c0_21, %c0_22, %c0_23] : memref<2x2x128x64xbf16, #tpu.memory_space<vmem>>, vector<1x1x128x64xbf16>
    %19 = vector.shape_cast %18 : vector<1x1x128x64xbf16> to vector<128x64xbf16>
    %cst_24 = arith.constant dense<0.000000e+00> : vector<4x64xf32>
    %20 = tpu.matmul %17, %19, %cst_24 {dimension_numbers = #tpu.dot_dimension_numbers<[1], [0], [0], [1], [0, 0, 1, 1], [], []>} : vector<4x128xbf16>, vector<128x64xbf16>, vector<4x64xf32> -> vector<4x64xf32>
    %21 = arith.addf %14, %20 : vector<4x64xf32>
    %c0_25 = arith.constant 0 : index
    %c1_26 = arith.constant 1 : index
    %c1_27 = arith.constant 1 : index
    %c0_28 = arith.constant 0 : index
    %22 = vector.load %arg1[%c0_25, %c1_26, %c1_27, %c0_28] : memref<1x3x3x128xbf16, #tpu.memory_space<vmem>>, vector<1x2x2x128xbf16>
    %23 = vector.shape_cast %22 : vector<1x2x2x128xbf16> to vector<2x2x128xbf16>
    %24 = vector.shape_cast %23 : vector<2x2x128xbf16> to vector<4x128xbf16>
    %c1_29 = arith.constant 1 : index
    %c1_30 = arith.constant 1 : index
    %c0_31 = arith.constant 0 : index
    %c0_32 = arith.constant 0 : index
    %25 = vector.load %arg2[%c1_29, %c1_30, %c0_31, %c0_32] : memref<2x2x128x64xbf16, #tpu.memory_space<vmem>>, vector<1x1x128x64xbf16>
    %26 = vector.shape_cast %25 : vector<1x1x128x64xbf16> to vector<128x64xbf16>
    %cst_33 = arith.constant dense<0.000000e+00> : vector<4x64xf32>
    %27 = tpu.matmul %24, %26, %cst_33 {dimension_numbers = #tpu.dot_dimension_numbers<[1], [0], [0], [1], [0, 0, 1, 1], [], []>} : vector<4x128xbf16>, vector<128x64xbf16>, vector<4x64xf32> -> vector<4x64xf32>
    %28 = arith.addf %21, %27 : vector<4x64xf32>
    %c0_34 = arith.constant 0 : index
    %c0_35 = arith.constant 0 : index
    %29 = vector.load %arg3[%c0_34, %c0_35] : memref<1x64xf32, #tpu.memory_space<vmem>>, vector<1x64xf32>
    %30 = vector.broadcast %29 : vector<1x64xf32> to vector<4x64xf32>
    %31 = arith.addf %28, %30 : vector<4x64xf32>
    %cst_36 = arith.constant 0.000000e+00 : f32
    %32 = vector.broadcast %cst_36 : f32 to vector<4x64xf32>
    %33 = arith.cmpf oge, %31, %32 : vector<4x64xf32>
    %cst_37 = arith.constant 2.000000e-01 : f32
    %34 = vector.broadcast %cst_37 : f32 to vector<4x64xf32>
    %35 = arith.mulf %34, %31 : vector<4x64xf32>
    %36 = arith.select %33, %31, %35 : vector<4x64xi1>, vector<4x64xf32>
    %37 = vector.shape_cast %36 : vector<4x64xf32> to vector<1x2x2x64xf32>
    %38 = arith.truncf %37 : vector<1x2x2x64xf32> to vector<1x2x2x64xbf16>
    %c0_38 = arith.constant 0 : index
    %c0_39 = arith.constant 0 : index
    %c0_40 = arith.constant 0 : index
    %c0_41 = arith.constant 0 : index
    %39 = vector.load %arg4[%c0_38, %c0_39, %c0_40, %c0_41] : memref<1x2x2x64xbf16, #tpu.memory_space<vmem>>, vector<1x2x2x64xbf16>
    tpu.vector_store %arg4[%c0_38, %c0_39, %c0_40, %c0_41], %38 {strides = array<i32>} : memref<1x2x2x64xbf16, #tpu.memory_space<vmem>>, vector<1x2x2x64xbf16>,
    return
  }
  func.func @transform_0(%arg0: i32) -> (i32, i32, i32, i32) {
    %c0_i32 = arith.constant 0 : i32
    %c0_i32_0 = arith.constant 0 : i32
    %c0_i32_1 = arith.constant 0 : i32
    %c0_i32_2 = arith.constant 0 : i32
    return %arg0, %c0_i32, %c0_i32_0, %c0_i32_1 : i32, i32, i32, i32
  }
  func.func @transform_1(%arg0: i32) -> (i32, i32, i32, i32) {
    %c0_i32 = arith.constant 0 : i32
    %c0_i32_0 = arith.constant 0 : i32
    %c0_i32_1 = arith.constant 0 : i32
    %c0_i32_2 = arith.constant 0 : i32
    %c0_i32_3 = arith.constant 0 : i32
    return %c0_i32, %c0_i32_0, %c0_i32_1, %c0_i32_2 : i32, i32, i32, i32
  }
  func.func @transform_2(%arg0: i32) -> (i32, i32) {
    %c0_i32 = arith.constant 0 : i32
    %c0_i32_0 = arith.constant 0 : i32
    %c0_i32_1 = arith.constant 0 : i32
    return %c0_i32, %c0_i32_0 : i32, i32
  }
  func.func @transform_3(%arg0: i32) -> (i32, i32, i32, i32) {
    %c0_i32 = arith.constant 0 : i32
    %c0_i32_0 = arith.constant 0 : i32
    %c0_i32_1 = arith.constant 0 : i32
    %c0_i32_2 = arith.constant 0 : i32
    return %arg0, %c0_i32, %c0_i32_0, %c0_i32_1 : i32, i32, i32, i32
  }
}

module attributes {stable_mosaic.version = 11 : i64} {
  func.func @_s2d_conv_kernel(%arg0: i32, %arg1: memref<1x2x2x256xbf16, #tpu.memory_space<vmem>>, %arg2: memref<2x2x256x1xbf16, #tpu.memory_space<vmem>>, %arg3: memref<1x1xf32, #tpu.memory_space<vmem>>, %arg4: memref<1x1x1x1xf32, #tpu.memory_space<vmem>>) attributes {dimension_semantics = [#tpu.dimension_semantics<parallel>], iteration_bounds = array<i64: 2>, scalar_prefetch = 0 : i64, scratch_operands = 0 : i64, tpu.core_type = #tpu.core_type<tc>, window_params = [{transform_indices = @transform_0, window_bounds = array<i64: 1, 2, 2, 256>}, {pipeline_mode = #tpu.pipeline_mode<synchronous>, transform_indices = @transform_1, window_bounds = array<i64: 2, 2, 256, 1>}, {pipeline_mode = #tpu.pipeline_mode<synchronous>, transform_indices = @transform_2, window_bounds = array<i64: 1, 1>}, {transform_indices = @transform_3, window_bounds = array<i64: 1, 1, 1, 1>}]} {
    %cst = arith.constant 0.000000e+00 : f32
    %0 = vector.broadcast %cst : f32 to vector<1x1xf32>
    %c0 = arith.constant 0 : index
    %c0_0 = arith.constant 0 : index
    %c0_1 = arith.constant 0 : index
    %c0_2 = arith.constant 0 : index
    %1 = vector.load %arg1[%c0, %c0_0, %c0_1, %c0_2] : memref<1x2x2x256xbf16, #tpu.memory_space<vmem>>, vector<1x1x1x256xbf16>
    %2 = vector.shape_cast %1 : vector<1x1x1x256xbf16> to vector<1x1x256xbf16>
    %3 = vector.shape_cast %2 : vector<1x1x256xbf16> to vector<1x256xbf16>
    %c0_3 = arith.constant 0 : index
    %c0_4 = arith.constant 0 : index
    %c0_5 = arith.constant 0 : index
    %c0_6 = arith.constant 0 : index
    %4 = vector.load %arg2[%c0_3, %c0_4, %c0_5, %c0_6] : memref<2x2x256x1xbf16, #tpu.memory_space<vmem>>, vector<1x1x256x1xbf16>
    %5 = vector.shape_cast %4 : vector<1x1x256x1xbf16> to vector<256x1xbf16>
    %6 = arith.extf %3 : vector<1x256xbf16> to vector<1x256xf32>
    %7 = vector.shape_cast %5 : vector<256x1xbf16> to vector<1x256xbf16>
    %8 = arith.extf %7 : vector<1x256xbf16> to vector<1x256xf32>
    %9 = arith.mulf %6, %8 : vector<1x256xf32>
    %cst_7 = arith.constant dense<0.000000e+00> : vector<1xf32>
    %10 = vector.multi_reduction <add>, %9, %cst_7 [1] : vector<1x256xf32> to vector<1xf32>
    %11 = vector.shape_cast %10 : vector<1xf32> to vector<1x1xf32>
    %12 = arith.addf %0, %11 : vector<1x1xf32>
    %c0_8 = arith.constant 0 : index
    %c0_9 = arith.constant 0 : index
    %c1 = arith.constant 1 : index
    %c0_10 = arith.constant 0 : index
    %13 = vector.load %arg1[%c0_8, %c0_9, %c1, %c0_10] : memref<1x2x2x256xbf16, #tpu.memory_space<vmem>>, vector<1x1x1x256xbf16>
    %14 = vector.shape_cast %13 : vector<1x1x1x256xbf16> to vector<1x1x256xbf16>
    %15 = vector.shape_cast %14 : vector<1x1x256xbf16> to vector<1x256xbf16>
    %c0_11 = arith.constant 0 : index
    %c1_12 = arith.constant 1 : index
    %c0_13 = arith.constant 0 : index
    %c0_14 = arith.constant 0 : index
    %16 = vector.load %arg2[%c0_11, %c1_12, %c0_13, %c0_14] : memref<2x2x256x1xbf16, #tpu.memory_space<vmem>>, vector<1x1x256x1xbf16>
    %17 = vector.shape_cast %16 : vector<1x1x256x1xbf16> to vector<256x1xbf16>
    %18 = arith.extf %15 : vector<1x256xbf16> to vector<1x256xf32>
    %19 = vector.shape_cast %17 : vector<256x1xbf16> to vector<1x256xbf16>
    %20 = arith.extf %19 : vector<1x256xbf16> to vector<1x256xf32>
    %21 = arith.mulf %18, %20 : vector<1x256xf32>
    %cst_15 = arith.constant dense<0.000000e+00> : vector<1xf32>
    %22 = vector.multi_reduction <add>, %21, %cst_15 [1] : vector<1x256xf32> to vector<1xf32>
    %23 = vector.shape_cast %22 : vector<1xf32> to vector<1x1xf32>
    %24 = arith.addf %12, %23 : vector<1x1xf32>
    %c0_16 = arith.constant 0 : index
    %c1_17 = arith.constant 1 : index
    %c0_18 = arith.constant 0 : index
    %c0_19 = arith.constant 0 : index
    %25 = vector.load %arg1[%c0_16, %c1_17, %c0_18, %c0_19] : memref<1x2x2x256xbf16, #tpu.memory_space<vmem>>, vector<1x1x1x256xbf16>
    %26 = vector.shape_cast %25 : vector<1x1x1x256xbf16> to vector<1x1x256xbf16>
    %27 = vector.shape_cast %26 : vector<1x1x256xbf16> to vector<1x256xbf16>
    %c1_20 = arith.constant 1 : index
    %c0_21 = arith.constant 0 : index
    %c0_22 = arith.constant 0 : index
    %c0_23 = arith.constant 0 : index
    %28 = vector.load %arg2[%c1_20, %c0_21, %c0_22, %c0_23] : memref<2x2x256x1xbf16, #tpu.memory_space<vmem>>, vector<1x1x256x1xbf16>
    %29 = vector.shape_cast %28 : vector<1x1x256x1xbf16> to vector<256x1xbf16>
    %30 = arith.extf %27 : vector<1x256xbf16> to vector<1x256xf32>
    %31 = vector.shape_cast %29 : vector<256x1xbf16> to vector<1x256xbf16>
    %32 = arith.extf %31 : vector<1x256xbf16> to vector<1x256xf32>
    %33 = arith.mulf %30, %32 : vector<1x256xf32>
    %cst_24 = arith.constant dense<0.000000e+00> : vector<1xf32>
    %34 = vector.multi_reduction <add>, %33, %cst_24 [1] : vector<1x256xf32> to vector<1xf32>
    %35 = vector.shape_cast %34 : vector<1xf32> to vector<1x1xf32>
    %36 = arith.addf %24, %35 : vector<1x1xf32>
    %c0_25 = arith.constant 0 : index
    %c1_26 = arith.constant 1 : index
    %c1_27 = arith.constant 1 : index
    %c0_28 = arith.constant 0 : index
    %37 = vector.load %arg1[%c0_25, %c1_26, %c1_27, %c0_28] : memref<1x2x2x256xbf16, #tpu.memory_space<vmem>>, vector<1x1x1x256xbf16>
    %38 = vector.shape_cast %37 : vector<1x1x1x256xbf16> to vector<1x1x256xbf16>
    %39 = vector.shape_cast %38 : vector<1x1x256xbf16> to vector<1x256xbf16>
    %c1_29 = arith.constant 1 : index
    %c1_30 = arith.constant 1 : index
    %c0_31 = arith.constant 0 : index
    %c0_32 = arith.constant 0 : index
    %40 = vector.load %arg2[%c1_29, %c1_30, %c0_31, %c0_32] : memref<2x2x256x1xbf16, #tpu.memory_space<vmem>>, vector<1x1x256x1xbf16>
    %41 = vector.shape_cast %40 : vector<1x1x256x1xbf16> to vector<256x1xbf16>
    %42 = arith.extf %39 : vector<1x256xbf16> to vector<1x256xf32>
    %43 = vector.shape_cast %41 : vector<256x1xbf16> to vector<1x256xbf16>
    %44 = arith.extf %43 : vector<1x256xbf16> to vector<1x256xf32>
    %45 = arith.mulf %42, %44 : vector<1x256xf32>
    %cst_33 = arith.constant dense<0.000000e+00> : vector<1xf32>
    %46 = vector.multi_reduction <add>, %45, %cst_33 [1] : vector<1x256xf32> to vector<1xf32>
    %47 = vector.shape_cast %46 : vector<1xf32> to vector<1x1xf32>
    %48 = arith.addf %36, %47 : vector<1x1xf32>
    %c0_34 = arith.constant 0 : index
    %c0_35 = arith.constant 0 : index
    %49 = vector.load %arg3[%c0_34, %c0_35] : memref<1x1xf32, #tpu.memory_space<vmem>>, vector<1x1xf32>
    %50 = arith.addf %48, %49 : vector<1x1xf32>
    %51 = vector.shape_cast %50 : vector<1x1xf32> to vector<1x1x1x1xf32>
    %c0_36 = arith.constant 0 : index
    %c0_37 = arith.constant 0 : index
    %c0_38 = arith.constant 0 : index
    %c0_39 = arith.constant 0 : index
    %52 = vector.load %arg4[%c0_36, %c0_37, %c0_38, %c0_39] : memref<1x1x1x1xf32, #tpu.memory_space<vmem>>, vector<1x1x1x1xf32>
    tpu.vector_store %arg4[%c0_36, %c0_37, %c0_38, %c0_39], %51 {strides = array<i32>} : memref<1x1x1x1xf32, #tpu.memory_space<vmem>>, vector<1x1x1x1xf32>,
    return
  }
  func.func @transform_0(%arg0: i32) -> (i32, i32, i32, i32) {
    %c0_i32 = arith.constant 0 : i32
    %c0_i32_0 = arith.constant 0 : i32
    %c0_i32_1 = arith.constant 0 : i32
    %c0_i32_2 = arith.constant 0 : i32
    return %arg0, %c0_i32, %c0_i32_0, %c0_i32_1 : i32, i32, i32, i32
  }
  func.func @transform_1(%arg0: i32) -> (i32, i32, i32, i32) {
    %c0_i32 = arith.constant 0 : i32
    %c0_i32_0 = arith.constant 0 : i32
    %c0_i32_1 = arith.constant 0 : i32
    %c0_i32_2 = arith.constant 0 : i32
    %c0_i32_3 = arith.constant 0 : i32
    return %c0_i32, %c0_i32_0, %c0_i32_1, %c0_i32_2 : i32, i32, i32, i32
  }
  func.func @transform_2(%arg0: i32) -> (i32, i32) {
    %c0_i32 = arith.constant 0 : i32
    %c0_i32_0 = arith.constant 0 : i32
    %c0_i32_1 = arith.constant 0 : i32
    return %c0_i32, %c0_i32_0 : i32, i32
  }
  func.func @transform_3(%arg0: i32) -> (i32, i32, i32, i32) {
    %c0_i32 = arith.constant 0 : i32
    %c0_i32_0 = arith.constant 0 : i32
    %c0_i32_1 = arith.constant 0 : i32
    %c0_i32_2 = arith.constant 0 : i32
    return %arg0, %c0_i32, %c0_i32_0, %c0_i32_1 : i32, i32, i32, i32
  }
}

</mosaic_0001>

<bundles_post_ra>
// kernel: _lambda_.5
= control target key start
LH: loop header
LB: loop body
LE: loop exit
PB: predicated region body
PF: predicated region fallthrough
CT: control target
= control target key end

     0   :  { %s2608_s12 = smov 0   ;;  %s3170_s0 = inlined_call_operand.vmem [shape: bf16[2,17,17,16], index: 0, kind: input, shape index: {}]   ;;  %s3171_s1 = inlined_call_operand.vmem [shape: bf16[2,2,16,8], index: 1, kind: input, shape index: {}]   ;;  %s3172_s2 = inlined_call_operand.vmem [shape: f32[1,8], index: 2, kind: input, shape index: {}]   ;;  %s3173_s3 = inlined_call_operand.vmem [shape: bf16[2,16,16,8], index: 3, kind: output, shape index: {}]  }
   0x1 LB: > { %s2228_s13 = sadd.s32 4294967295, %s2586_s12   ;;  %p2232_p0 = scmp.ge.s32.totalorder %s2586_s12, 1  ;;  %s2586_s12 = sphi %s2608_s12, %s13_s12  }
   0x2   : > { %p137_p1 = scmp.lt.s32.totalorder %s2586_s12, 3 }
   0x4   : > { %p138_p2 = pnand %p2232_p0, %p137_p1 }
   0x5   : > { %p161_p3 = scmp.lt.s32.totalorder (!%p138_p2), %s2228_s13, 1 }
   0x6   : > { %141 = sbr.rel (%p138_p2) target bundleno = 423 (0x1a7), region = 32 }
   0xb   : > { %v2567_v0 = vld [vmem:[%s3171_s1 + $0x10] sm:$0xff]  ;;  %v2549_v1 = vld [vmem:[%s3171_s1] sm:$0xff]  ;;  %v2550_v2 = vld [vmem:[%s3171_s1 + $0x8] sm:$0xff]  ;;  %s3177_s13 = smov (!%p161_p3, %s2228_s13), 1  ;;  %vm666_vm0 = vcmask 130048   ;;  %vm2140_vm5 = vcmask 60416  }
   0xc   : > { %v2568_v3 = vld [vmem:[%s3171_s1 + $0x18] sm:$0xff]  ;;  %1204 = vmatpush.bf16.msra.mxu2 %v2567_v0  ;;  %945 = vmatpush.bf16.msra.mxu1 %v2549_v1  ;;  %s2569_s22 = smul.u32 204, %s3177_s13  ;;  %vm222_vm1 = vsmask.f32 3328  ;;  %vm223_vm2 = vsmask.f32 7440 }
   0xd   : > { %722 = vmatpush.bf16.msra.mxu0 %v2550_v2  ;;  %1862 = vmatpush.bf16.msra.mxu3 %v2568_v3  ;;  %vm2649_vm3 = vmor %vm222_vm1, %vm223_vm2  ;;  %s2532_s28 = sshll.u32 %s3177_s13, 7 }
   0xe   : > { %s2634_s25 = scalar_lea.vmem %s3170_s0, %s2569_s22  ;;  %s2871_s4 = scalar_lea.vmem %s3173_s3, %s2532_s28 }
   0xf   : > { %v2551_v4 = vld [vmem:[%s2634_s25 + $0xc] sm:$0xff]  ;;  %v2533_v5 = vld [vmem:[%s2634_s25] sm:$0xff]  ;;  %v206_v8 = vld [vmem:[%s2634_s25 + $0x8] sm:$0x1] }
  0x10   : > { %v172_v6 = vld [vmem:[%s2634_s25] sm:$0xf]  ;;  %v173_v7 = vld [vmem:[%s2634_s25 + $0x4] sm:$0xf]  ;;  %2444 = vmatmul.msk.bf16.vlgmr.msra.gmra.mxu2 %vm666_vm0, %v2551_v4  ;;  %2326 = vmatmul.msk.bf16.vlgmr.msra.gmra.mxu1 %vm666_vm0, %v2533_v5  ;;  %v245_v13 = vshll.u32 %v206_v8, 16  ;;  %v2552_v2 = vld [vmem:[%s2634_s25 + $0x18] sm:$0xff] }
  0x11   : > { %v226_v9 = vshrl.u32 %v172_v6, 16  ;;  %v229_v10 = vshll.u32 %v172_v6, 16  ;;  %v235_v11 = vshll.u32 %v173_v7, 16  ;;  %v239_v12 = vshrl.u32 %v173_v7, 16  ;;  %v2460_v14 = vld [vmem:[%s2634_s25 + $0xc] sm:$0xf] }
  0x12   : > { %v2461_v17 = vld [vmem:[%s2634_s25 + $0x10] sm:$0xf]  ;;  %v2462_v18 = vld [vmem:[%s2634_s25 + $0x14] sm:$0x1]  ;;  %v1367_v21 = vshrl.u32 %v2460_v14, 16  ;;  %v1370_v23 = vshll.u32 %v2460_v14, 16 }
  0x13   : > { %v228_v15 = vrot.slane %v226_v9, 4  ;;  %v231_v16 = vrot.slane %v229_v10, 5  ;;  %v237_v19 = vrot.slane %v235_v11, 5  ;;  %v241_v20 = vrot.slane %v239_v12, 4  ;;  %v174_v26 = vld [vmem:[%s2634_s25 + $0xc] sm:$0xf] }
  0x14   : > { %v1376_v24 = vshll.u32 %v2461_v17, 16  ;;  %v1380_v25 = vshrl.u32 %v2461_v17, 16  ;;  %v247_v29 = vrot.slane %v245_v13, 5  ;;  %v1369_v30 = vrot.slane %v1367_v21, 4  ;;  %v175_v32 = vld [vmem:[%s2634_s25 + $0x10] sm:$0xf] }
  0x15   : > { %v232_v22 = vor.u32 %v231_v16, %v228_v15  ;;  %v242_v28 = vor.u32 %v241_v20, %v237_v19  ;;  %v1386_v31 = vshll.u32 %v2462_v18, 16  ;;  %v1372_v34 = vrot.slane %v1370_v23, 5  ;;  %v207_v44 = vld [vmem:[%s2634_s25 + $0x14] sm:$0x1]  ;;  %v2463_v46 = vld [vmem:[%s2634_s25 + $0x18] sm:$0xf] }
  0x16   : > { %v1378_v35 = vrot.slane %v1376_v24, 5  ;;  %v1382_v36 = vrot.slane %v1380_v25, 4  ;;  %v250_v39 = vshrl.u32 %v174_v26, 16  ;;  %v253_v40 = vshll.u32 %v174_v26, 16  ;;  %v2464_v58 = vld [vmem:[%s2634_s25 + $0x1c] sm:$0xf] }
  0x17   : > { %v233_v33 = vrot.slane %v232_v22, 4  ;;  %v243_v37 = vrot.slane %v242_v28, 4  ;;  %v1388_v38 = vrot.slane %v1386_v31, 5  ;;  %v1373_v42 = vor.u32 %v1372_v34, %v1369_v30  ;;  %v2534_v3 = vld [vmem:[%s2634_s25 + $0xc] sm:$0xff]  ;;  %v2465_v5 = vld [vmem:[%s2634_s25 + $0x20] sm:$0x1] }
  0x18   : > { %v1383_v43 = vor.u32 %v1382_v36, %v1378_v35  ;;  %v259_v45 = vshll.u32 %v175_v32, 16  ;;  %v252_v49 = vrot.slane %v250_v39, 4  ;;  %v255_v50 = vrot.slane %v253_v40, 5  ;;  %v176_v10 = vld [vmem:[%s2634_s25 + $0x18] sm:$0xf] }
  0x19   : > { %v238_v41 = vsel %vm2649_vm3, %v233_v33, %v237_v19  ;;  %v248_v47 = vsel %vm2649_vm3, %v243_v37, %v247_v29  ;;  %v1374_v52 = vrot.slane %v1373_v42, 4  ;;  %v263_v56 = vshrl.u32 %v175_v32, 16  ;;  %v177_v18 = vld [vmem:[%s2634_s25 + $0x1c] sm:$0xf]  ;;  %v2466_v31 = vld [vmem:[%s2634_s25 + $0x24] sm:$0xf] }
  0x1a   : > { %v612_v48 = vunpack.c.l.b16 %v238_v41  ;;  %v613_v51 = vunpack.c.l.b16 %v248_v47  ;;  %v1384_v53 = vrot.slane %v1383_v43, 4  ;;  %v261_v54 = vrot.slane %v259_v45, 5  ;;  %v2467_v32 = vld [vmem:[%s2634_s25 + $0x28] sm:$0xf]  ;;  %v208_v45 = vld [vmem:[%s2634_s25 + $0x20] sm:$0x1] }
  0x1b   : > { %v256_v55 = vor.u32 %v255_v50, %v252_v49  ;;  %v269_v57 = vshll.u32 %v207_v44, 16  ;;  %v1391_v59 = vshrl.u32 %v2463_v46, 16  ;;  %v1379_v61 = vsel %vm2649_vm3, %v1374_v52, %v1378_v35 }
  0x1c   : > { %v644_v60 = vpack.c.b16 %v613_v51, %v612_v48  ;;  %v1389_v62 = vsel %vm2649_vm3, %v1384_v53, %v1388_v38  ;;  %v1394_v63 = vshll.u32 %v2463_v46, 16  ;;  %v1753_v0 = vunpack.c.l.b16 %v1379_v61 }
  0x1d   : > { %v1754_v1 = vunpack.c.l.b16 %v1389_v62  ;;  %v265_v4 = vrot.slane %v263_v56, 4  ;;  %v257_v6 = vrot.slane %v256_v55, 4  ;;  %v1393_v7 = vrot.slane %v1391_v59, 4  ;;  %v2468_v56 = vld [vmem:[%s2634_s25 + $0x2c] sm:$0x1] }
  0x1e   : > { %2242 = vmatmul.msk.bf16.vlgmr.msra.gmra.mxu0 %vm666_vm0, %v644_v60  ;;  %v1396_v8 = vrot.slane %v1394_v63, 5  ;;  %v1400_v9 = vshll.u32 %v2464_v58, 16  ;;  %v271_v13 = vrot.slane %v269_v57, 5  ;;  %v1404_v14 = vshrl.u32 %v2464_v58, 16  ;;  %v2553_v60 = vld [vmem:[%s2634_s25 + $0x24] sm:$0xff]  ;;  %v2535_v63 = vld [vmem:[%s2634_s25 + $0x18] sm:$0xff] }
  0x1f   : > { %v1785_v11 = vpack.c.b16 %v1754_v1, %v1753_v0  ;;  %v266_v12 = vor.u32 %v265_v4, %v261_v54  ;;  %v1410_v17 = vshll.u32 %v2465_v5, 16  ;;  %v274_v21 = vshrl.u32 %v176_v10, 16  ;;  %v178_v62 = vld [vmem:[%s2634_s25 + $0x24] sm:$0xf] }
  0x20   : > { %v1397_v15 = vor.u32 %v1396_v8, %v1393_v7  ;;  %v1402_v16 = vrot.slane %v1400_v9, 5  ;;  %2445 = vmatmul.msk.bf16.gmra.mxu2 %vm666_vm0, %v2552_v2  ;;  %v1406_v20 = vrot.slane %v1404_v14, 4  ;;  %v277_v22 = vshll.u32 %v176_v10, 16  ;;  %2327 = vmatmul.msk.bf16.gmra.mxu1 %vm666_vm0, %v2534_v3  ;;  %v179_v2 = vld [vmem:[%s2634_s25 + $0x28] sm:$0xf] }
  0x21   : > { %2514 = vmatmul.msk.bf16.vlgmr.msra.gmra.mxu3 %vm666_vm0, %v1785_v11  ;;  %v267_v19 = vrot.slane %v266_v12, 4  ;;  %v262_v23 = vsel %vm2649_vm3, %v257_v6, %v261_v54  ;;  %v1412_v25 = vrot.slane %v1410_v17, 5  ;;  %v283_v29 = vshll.u32 %v177_v18, 16 }
  0x22   : > { %v1398_v24 = vrot.slane %v1397_v15, 4  ;;  %v1407_v28 = vor.u32 %v1406_v20, %v1402_v16  ;;  %v287_v30 = vshrl.u32 %v177_v18, 16  ;;  %v614_v33 = vunpack.c.l.b16 %v262_v23  ;;  %v2470_v15 = vld [vmem:[%s2634_s25 + $0x34] sm:$0xf]  ;;  %v209_v20 = vld [vmem:[%s2634_s25 + $0x2c] sm:$0x1] }
  0x23   : > { %v272_v26 = vsel %vm2649_vm3, %v267_v19, %v271_v13  ;;  %v276_v35 = vrot.slane %v274_v21, 4  ;;  %v279_v36 = vrot.slane %v277_v22, 5  ;;  %v1415_v39 = vshrl.u32 %v2466_v31, 16  ;;  %v2469_v13 = vld [vmem:[%s2634_s25 + $0x30] sm:$0xf] }
  0x24   : > { %v1408_v34 = vrot.slane %v1407_v28, 4  ;;  %v615_v37 = vunpack.c.l.b16 %v272_v26  ;;  %v1403_v38 = vsel %vm2649_vm3, %v1398_v24, %v1402_v16  ;;  %v1418_v40 = vshll.u32 %v2466_v31, 16 }
  0x25   : > { %v285_v42 = vrot.slane %v283_v29, 5  ;;  %v289_v43 = vrot.slane %v287_v30, 4  ;;  %v1424_v44 = vshll.u32 %v2467_v32, 16  ;;  %v1417_v46 = vrot.slane %v1415_v39, 4 }
  0x26   : > { %v1413_v41 = vsel %vm2649_vm3, %v1408_v34, %v1412_v25  ;;  %v1420_v47 = vrot.slane %v1418_v40, 5  ;;  %v1755_v48 = vunpack.c.l.b16 %v1403_v38  ;;  %v280_v50 = vor.u32 %v279_v36, %v276_v35  ;;  %v2471_v35 = vld [vmem:[%s2634_s25 + $0x38] sm:$0x1] }
  0x27   : > { %v1756_v49 = vunpack.c.l.b16 %v1413_v41  ;;  %v1428_v51 = vshrl.u32 %v2467_v32, 16  ;;  %v645_v52 = vpack.c.b16 %v615_v37, %v614_v33  ;;  %v1426_v53 = vrot.slane %v1424_v44, 5  ;;  %v2554_v44 = vld [vmem:[%s2634_s25 + $0x30] sm:$0xff] }
  0x28   : > { %v290_v54 = vor.u32 %v289_v43, %v285_v42  ;;  %v293_v55 = vshll.u32 %v208_v45, 16  ;;  %v1421_v58 = vor.u32 %v1420_v47, %v1417_v46  ;;  %v281_v61 = vrot.slane %v280_v50, 4  ;;  %v180_v50 = vld [vmem:[%s2634_s25 + $0x30] sm:$0xf] }
  0x29   : > { %v1430_v57 = vrot.slane %v1428_v51, 4  ;;  %v1786_v59 = vpack.c.b16 %v1756_v49, %v1755_v48  ;;  %v1434_v1 = vshll.u32 %v2468_v56, 16  ;;  %v298_v6 = vshrl.u32 %v178_v62, 16  ;;  %v2536_v48 = vld [vmem:[%s2634_s25 + $0x24] sm:$0xff]  ;;  %v181_v51 = vld [vmem:[%s2634_s25 + $0x34] sm:$0xf] }
  0x2a   : > { %v291_v3 = vrot.slane %v290_v54, 4  ;;  %v295_v4 = vrot.slane %v293_v55, 5  ;;  %v1422_v5 = vrot.slane %v1421_v58, 4  ;;  %v301_v7 = vshll.u32 %v178_v62, 16  ;;  %v2473_v54 = vld [vmem:[%s2634_s25 + $0x40] sm:$0xf] }
  0x2b   : > { %v1431_v0 = vor.u32 %v1430_v57, %v1426_v53  ;;  %v286_v8 = vsel %vm2649_vm3, %v281_v61, %v285_v42  ;;  %v307_v9 = vshll.u32 %v179_v2, 16  ;;  %v311_v10 = vshrl.u32 %v179_v2, 16 }
  0x2c   : > { %v1436_v12 = vrot.slane %v1434_v1, 5  ;;  %v296_v14 = vsel %vm2649_vm3, %v291_v3, %v295_v4  ;;  %v616_v16 = vunpack.c.l.b16 %v286_v8  ;;  %v1427_v17 = vsel %vm2649_vm3, %v1422_v5, %v1426_v53  ;;  %v2472_v53 = vld [vmem:[%s2634_s25 + $0x3c] sm:$0xf] }
  0x2d   : > { %v1432_v11 = vrot.slane %v1431_v0, 4  ;;  %v300_v18 = vrot.slane %v298_v6, 4  ;;  %v303_v19 = vrot.slane %v301_v7, 5  ;;  %v309_v21 = vrot.slane %v307_v9, 5 }
  0x2e   : > { %2243 = vmatmul.msk.bf16.gmra.mxu0 %vm666_vm0, %v645_v52  ;;  %v313_v22 = vrot.slane %v311_v10, 4  ;;  %v1439_v23 = vshrl.u32 %v2469_v13, 16  ;;  %v1442_v24 = vshll.u32 %v2469_v13, 16  ;;  %v617_v25 = vunpack.c.l.b16 %v296_v14 }
  0x2f   : > { %v1437_v26 = vsel %vm2649_vm3, %v1432_v11, %v1436_v12  ;;  %v1448_v28 = vshll.u32 %v2470_v15, 16  ;;  %v1452_v29 = vshrl.u32 %v2470_v15, 16  ;;  %v1757_v30 = vunpack.c.l.b16 %v1427_v17  ;;  %v210_v11 = vld [vmem:[%s2634_s25 + $0x38] sm:$0x1] }
  0x30   : > { %2446 = vmatmul.msk.bf16.gmra.mxu2 %vm666_vm0, %v2553_v60  ;;  %2328 = vmatmul.msk.bf16.gmra.mxu1 %vm666_vm0, %v2535_v63  ;;  %v304_v31 = vor.u32 %v303_v19, %v300_v18  ;;  %v317_v32 = vshll.u32 %v209_v20, 16  ;;  %v1758_v33 = vunpack.c.l.b16 %v1437_v26  ;;  %v314_v34 = vor.u32 %v313_v22, %v309_v21 }
  0x31   : > { %2515 = vmatmul.msk.bf16.gmra.mxu3 %vm666_vm0, %v1786_v59  ;;  %v1441_v36 = vrot.slane %v1439_v23, 4  ;;  %v1444_v37 = vrot.slane %v1442_v24, 5  ;;  %v646_v38 = vpack.c.b16 %v617_v25, %v616_v16  ;;  %v1450_v39 = vrot.slane %v1448_v28, 5  ;;  %v2474_v16 = vld [vmem:[%s2634_s25 + $0x44] sm:$0x1]  ;;  %v2555_v28 = vld [vmem:[%s2634_s25 + $0x3c] sm:$0xff] }
  0x32   : > { %v1454_v40 = vrot.slane %v1452_v29, 4  ;;  %v319_v41 = vrot.slane %v317_v32, 5  ;;  %v1458_v42 = vshll.u32 %v2471_v35, 16  ;;  %v1787_v43 = vpack.c.b16 %v1758_v33, %v1757_v30  ;;  %v182_v29 = vld [vmem:[%s2634_s25 + $0x3c] sm:$0xf]  ;;  %v2537_v30 = vld [vmem:[%s2634_s25 + $0x30] sm:$0xff] }
  0x33   : > { %v305_v45 = vrot.slane %v304_v31, 4  ;;  %v315_v46 = vrot.slane %v314_v34, 4  ;;  %v1445_v47 = vor.u32 %v1444_v37, %v1441_v36  ;;  %v322_v58 = vshrl.u32 %v180_v50, 16  ;;  %v183_v33 = vld [vmem:[%s2634_s25 + $0x40] sm:$0xf] }
  0x34   : > { %v1455_v49 = vor.u32 %v1454_v40, %v1450_v39  ;;  %v1460_v52 = vrot.slane %v1458_v42, 5  ;;  %v325_v60 = vshll.u32 %v180_v50, 16  ;;  %v331_v61 = vshll.u32 %v181_v51, 16  ;;  %v2475_v42 = vld [vmem:[%s2634_s25 + $0x48] sm:$0xf] }
  0x35   : > { %v310_v55 = vsel %vm2649_vm3, %v305_v45, %v309_v21  ;;  %v320_v56 = vsel %vm2649_vm3, %v315_v46, %v319_v41  ;;  %v1446_v57 = vrot.slane %v1445_v47, 4  ;;  %v335_v62 = vshrl.u32 %v181_v51, 16 }
  0x36   : > { %v1456_v59 = vrot.slane %v1455_v49, 4  ;;  %v1463_v63 = vshrl.u32 %v2472_v53, 16  ;;  %v1466_v0 = vshll.u32 %v2472_v53, 16  ;;  %v1472_v1 = vshll.u32 %v2473_v54, 16 }
  0x37   : > { %v1476_v2 = vshrl.u32 %v2473_v54, 16  ;;  %v618_v3 = vunpack.c.l.b16 %v310_v55  ;;  %v619_v4 = vunpack.c.l.b16 %v320_v56  ;;  %v1451_v5 = vsel %vm2649_vm3, %v1446_v57, %v1450_v39 }
  0x38   : > { %v324_v6 = vrot.slane %v322_v58, 4  ;;  %v1461_v7 = vsel %vm2649_vm3, %v1456_v59, %v1460_v52  ;;  %v327_v8 = vrot.slane %v325_v60, 5  ;;  %v333_v9 = vrot.slane %v331_v61, 5  ;;  %v211_v52 = vld [vmem:[%s2634_s25 + $0x44] sm:$0x1] }
  0x39   : > { %v337_v10 = vrot.slane %v335_v62, 4  ;;  %v1465_v12 = vrot.slane %v1463_v63, 4  ;;  %v1468_v13 = vrot.slane %v1466_v0, 5  ;;  %v1474_v14 = vrot.slane %v1472_v1, 5  ;;  %v2477_v1 = vld [vmem:[%s2634_s25 + $0x50] sm:$0x1] }
  0x3a   : > { %v1478_v15 = vrot.slane %v1476_v2, 4  ;;  %v1759_v17 = vunpack.c.l.b16 %v1451_v5  ;;  %v1760_v18 = vunpack.c.l.b16 %v1461_v7  ;;  %v647_v19 = vpack.c.b16 %v619_v4, %v618_v3 }
  0x3b   : > { %v328_v20 = vor.u32 %v327_v8, %v324_v6  ;;  %v341_v21 = vshll.u32 %v210_v11, 16  ;;  %v338_v22 = vor.u32 %v337_v10, %v333_v9  ;;  %v1469_v23 = vor.u32 %v1468_v13, %v1465_v12 }
  0x3c   : > { %v1479_v24 = vor.u32 %v1478_v15, %v1474_v14  ;;  %v1482_v25 = vshll.u32 %v2474_v16, 16  ;;  %v1788_v26 = vpack.c.b16 %v1760_v18, %v1759_v17  ;;  %v349_v39 = vshll.u32 %v182_v29, 16  ;;  %v184_v15 = vld [vmem:[%s2634_s25 + $0x48] sm:$0xf]  ;;  %v185_v16 = vld [vmem:[%s2634_s25 + $0x4c] sm:$0xf] }
  0x3d   : > { %v329_v31 = vrot.slane %v328_v20, 4  ;;  %v343_v32 = vrot.slane %v341_v21, 5  ;;  %v339_v34 = vrot.slane %v338_v22, 4  ;;  %v1470_v35 = vrot.slane %v1469_v23, 4  ;;  %v2478_v18 = vld [vmem:[%s2634_s25 + $0x54] sm:$0xf] }
  0x3e   : > { %2244 = vmatmul.msk.bf16.gmra.mxu0 %vm666_vm0, %v646_v38  ;;  %v1480_v36 = vrot.slane %v1479_v24, 4  ;;  %v1484_v37 = vrot.slane %v1482_v25, 5  ;;  %v346_v38 = vshrl.u32 %v182_v29, 16  ;;  %v355_v40 = vshll.u32 %v183_v33, 16 }
  0x3f   : > { %v359_v41 = vshrl.u32 %v183_v33, 16  ;;  %v344_v45 = vsel %vm2649_vm3, %v339_v34, %v343_v32  ;;  %v1475_v46 = vsel %vm2649_vm3, %v1470_v35, %v1474_v14  ;;  %v351_v49 = vrot.slane %v349_v39, 5  ;;  %v2538_v14 = vld [vmem:[%s2634_s25 + $0x3c] sm:$0xff] }
  0x40   : > { %2447 = vmatmul.msk.bf16.gmra.mxu2 %vm666_vm0, %v2554_v44  ;;  %2329 = vmatmul.msk.bf16.gmra.mxu1 %vm666_vm0, %v2536_v48  ;;  %v334_v44 = vsel %vm2649_vm3, %v329_v31, %v333_v9  ;;  %v1485_v47 = vsel %vm2649_vm3, %v1480_v36, %v1484_v37  ;;  %v348_v48 = vrot.slane %v346_v38, 4  ;;  %v1487_v50 = vshrl.u32 %v2475_v42, 16  ;;  %v2556_v9 = vld [vmem:[%s2634_s25 + $0x48] sm:$0xff] }
  0x41   : > { %2516 = vmatmul.msk.bf16.gmra.mxu3 %vm666_vm0, %v1787_v43  ;;  %v2476_v43 = vld [vmem:[%s2634_s25 + $0x4c] sm:$0xf]  ;;  %v1490_v51 = vshll.u32 %v2475_v42, 16  ;;  %v357_v53 = vrot.slane %v355_v40, 5  ;;  %v361_v54 = vrot.slane %v359_v41, 4  ;;  %v620_v57 = vunpack.c.l.b16 %v334_v44 }
  0x42   : > { %v1496_v55 = vshll.u32 %v2476_v43, 16  ;;  %v1500_v56 = vshrl.u32 %v2476_v43, 16  ;;  %v621_v58 = vunpack.c.l.b16 %v344_v45  ;;  %v1761_v59 = vunpack.c.l.b16 %v1475_v46  ;;  %v212_v41 = vld [vmem:[%s2634_s25 + $0x50] sm:$0x1]  ;;  %v2480_v46 = vld [vmem:[%s2634_s25 + $0x5c] sm:$0x1] }
  0x43   : > { %v1762_v60 = vunpack.c.l.b16 %v1485_v47  ;;  %v352_v61 = vor.u32 %v351_v49, %v348_v48  ;;  %v365_v62 = vshll.u32 %v211_v52, 16  ;;  %v1489_v63 = vrot.slane %v1487_v50, 4 }
  0x44   : > { %v362_v0 = vor.u32 %v361_v54, %v357_v53  ;;  %v1492_v2 = vrot.slane %v1490_v51, 5  ;;  %v1498_v3 = vrot.slane %v1496_v55, 5  ;;  %v1502_v4 = vrot.slane %v1500_v56, 4 }
  0x45   : > { %v648_v5 = vpack.c.b16 %v621_v58, %v620_v57  ;;  %v1789_v6 = vpack.c.b16 %v1762_v60, %v1761_v59  ;;  %v367_v7 = vrot.slane %v365_v62, 5  ;;  %v1506_v8 = vshll.u32 %v2477_v1, 16  ;;  %v2557_v57 = vld [vmem:[%s2634_s25 + $0x54] sm:$0xff]  ;;  %v2539_v59 = vld [vmem:[%s2634_s25 + $0x48] sm:$0xff] }
  0x46   : > { %v353_v10 = vrot.slane %v352_v61, 4  ;;  %v363_v11 = vrot.slane %v362_v0, 4  ;;  %v1493_v12 = vor.u32 %v1492_v2, %v1489_v63  ;;  %v1503_v13 = vor.u32 %v1502_v4, %v1498_v3  ;;  %v186_v58 = vld [vmem:[%s2634_s25 + $0x54] sm:$0xf]  ;;  %v187_v62 = vld [vmem:[%s2634_s25 + $0x58] sm:$0xf] }
  0x47   : > { %v1508_v17 = vrot.slane %v1506_v8, 5  ;;  %v370_v24 = vshrl.u32 %v184_v15, 16  ;;  %v373_v25 = vshll.u32 %v184_v15, 16  ;;  %v1511_v29 = vshrl.u32 %v2478_v18, 16  ;;  %v2482_v8 = vld [vmem:[%s2634_s25 + $0x64] sm:$0xf] }
  0x48   : > { %v358_v20 = vsel %vm2649_vm3, %v353_v10, %v357_v53  ;;  %v368_v21 = vsel %vm2649_vm3, %v363_v11, %v367_v7  ;;  %v1494_v22 = vrot.slane %v1493_v12, 4  ;;  %v1504_v23 = vrot.slane %v1503_v13, 4  ;;  %v2481_v7 = vld [vmem:[%s2634_s25 + $0x60] sm:$0xf] }
  0x49   : > { %v622_v33 = vunpack.c.l.b16 %v358_v20  ;;  %v623_v34 = vunpack.c.l.b16 %v368_v21  ;;  %v372_v37 = vrot.slane %v370_v24, 4  ;;  %v375_v38 = vrot.slane %v373_v25, 5 }
  0x4a   : > { %v1499_v35 = vsel %vm2649_vm3, %v1494_v22, %v1498_v3  ;;  %v1509_v36 = vsel %vm2649_vm3, %v1504_v23, %v1508_v17  ;;  %v1513_v42 = vrot.slane %v1511_v29, 4  ;;  %v389_v51 = vshll.u32 %v212_v41, 16  ;;  %v213_v17 = vld [vmem:[%s2634_s25 + $0x5c] sm:$0x1] }
  0x4b   : > { %v1763_v47 = vunpack.c.l.b16 %v1499_v35  ;;  %v1764_v48 = vunpack.c.l.b16 %v1509_v36  ;;  %v649_v49 = vpack.c.b16 %v623_v34, %v622_v33  ;;  %v376_v50 = vor.u32 %v375_v38, %v372_v37  ;;  %v2483_v35 = vld [vmem:[%s2634_s25 + $0x68] sm:$0x1] }
  0x4c   : > { %v1530_v55 = vshll.u32 %v2480_v46, 16  ;;  %v391_v61 = vrot.slane %v389_v51, 5  ;;  %v394_v3 = vshrl.u32 %v186_v58, 16  ;;  %v397_v4 = vshll.u32 %v186_v58, 16  ;;  %v189_v46 = vld [vmem:[%s2634_s25 + $0x64] sm:$0xf] }
  0x4d   : > { %v1790_v56 = vpack.c.b16 %v1764_v48, %v1763_v47  ;;  %v377_v60 = vrot.slane %v376_v50, 4  ;;  %v1535_v15 = vshrl.u32 %v2481_v7, 16  ;;  %v1544_v20 = vshll.u32 %v2482_v8, 16  ;;  %v2484_v48 = vld [vmem:[%s2634_s25 + $0x6c] sm:$0xf] }
  0x4e   : > { %2245 = vmatmul.msk.bf16.gmra.mxu0 %vm666_vm0, %v647_v19  ;;  %v2479_v19 = vld [vmem:[%s2634_s25 + $0x58] sm:$0xf]  ;;  %v1532_v2 = vrot.slane %v1530_v55, 5  ;;  %v396_v13 = vrot.slane %v394_v3, 4  ;;  %v1548_v21 = vshrl.u32 %v2482_v8, 16  ;;  %v1559_v58 = vshrl.u32 %v2484_v48, 16 }
  0x4f   : > { %v1520_v31 = vshll.u32 %v2479_v19, 16  ;;  %v1524_v32 = vshrl.u32 %v2479_v19, 16 }
  0x50   : > { %2448 = vmatmul.msk.bf16.gmra.mxu2 %vm666_vm0, %v2555_v28  ;;  %2330 = vmatmul.msk.bf16.gmra.mxu1 %vm666_vm0, %v2537_v30  ;;  %v383_v28 = vshrl.u32 %v185_v16, 16  ;;  %v1514_v30 = vshll.u32 %v2478_v18, 16  ;;  %v1550_v33 = vrot.slane %v1548_v21, 4 }
  0x51   : > { %2517 = vmatmul.msk.bf16.gmra.mxu3 %vm666_vm0, %v1788_v26  ;;  %v379_v26 = vshll.u32 %v185_v16, 16  ;;  %v1522_v44 = vrot.slane %v1520_v31, 5  ;;  %v1526_v45 = vrot.slane %v1524_v32, 4  ;;  %v1538_v16 = vshll.u32 %v2481_v7, 16 }
  0x52   : > { %v385_v40 = vrot.slane %v383_v28, 4  ;;  %v1516_v43 = vrot.slane %v1514_v30, 5  ;;  %v1537_v28 = vrot.slane %v1535_v15, 4  ;;  %v1546_v32 = vrot.slane %v1544_v20, 5 }
  0x53   : > { %v381_v39 = vrot.slane %v379_v26, 5  ;;  %v1527_v54 = vor.u32 %v1526_v45, %v1522_v44  ;;  %v413_v26 = vshll.u32 %v213_v17, 16  ;;  %v1540_v29 = vrot.slane %v1538_v16, 5  ;;  %v188_v45 = vld [vmem:[%s2634_s25 + $0x60] sm:$0xf] }
  0x54   : > { %v1517_v53 = vor.u32 %v1516_v43, %v1513_v42  ;;  %v1551_v42 = vor.u32 %v1550_v33, %v1546_v32  ;;  %v1554_v43 = vshll.u32 %v2483_v35, 16  ;;  %v421_v55 = vshll.u32 %v188_v45, 16 }
  0x55   : > { %v386_v52 = vor.u32 %v385_v40, %v381_v39  ;;  %v1528_v1 = vrot.slane %v1527_v54, 4  ;;  %v415_v37 = vrot.slane %v413_v26, 5  ;;  %v1541_v38 = vor.u32 %v1540_v29, %v1537_v28  ;;  %v191_v29 = vld [vmem:[%s2634_s25 + $0x70] sm:$0xf] }
  0x56   : > { %v1518_v0 = vrot.slane %v1517_v53, 4  ;;  %v1556_v53 = vrot.slane %v1554_v43, 5  ;;  %v418_v54 = vshrl.u32 %v188_v45, 16  ;;  %v423_v3 = vrot.slane %v421_v55, 5 }
  0x57   : > { %v387_v63 = vrot.slane %v386_v52, 4  ;;  %v1533_v12 = vsel %vm2649_vm3, %v1528_v1, %v1532_v2  ;;  %v1542_v47 = vrot.slane %v1541_v38, 4  ;;  %v1552_v52 = vrot.slane %v1551_v42, 4  ;;  %v2487_v38 = vld [vmem:[%s2634_s25 + $0x78] sm:$0xf] }
  0x58   : > { %v1523_v11 = vsel %vm2649_vm3, %v1518_v0, %v1522_v44  ;;  %v1766_v25 = vunpack.c.l.b16 %v1533_v12  ;;  %v2540_v44 = vld [vmem:[%s2634_s25 + $0x54] sm:$0xff]  ;;  %v420_v2 = vrot.slane %v418_v54, 4 }
  0x59   : > { %v392_v10 = vsel %vm2649_vm3, %v387_v63, %v391_v61  ;;  %v1765_v24 = vunpack.c.l.b16 %v1523_v11  ;;  %v1547_v0 = vsel %vm2649_vm3, %v1542_v47, %v1546_v32  ;;  %v1557_v1 = vsel %vm2649_vm3, %v1552_v52, %v1556_v53  ;;  %v2486_v11 = vld [vmem:[%s2634_s25 + $0x74] sm:$0x1] }
  0x5a   : > { %v625_v23 = vunpack.c.l.b16 %v392_v10  ;;  %v214_v10 = vld [vmem:[%s2634_s25 + $0x68] sm:$0x1]  ;;  %v1767_v12 = vunpack.c.l.b16 %v1547_v0  ;;  %v424_v15 = vor.u32 %v423_v3, %v420_v2  ;;  %v1578_v20 = vshll.u32 %v2486_v11, 16  ;;  %v2489_v0 = vld [vmem:[%s2634_s25 + $0x80] sm:$0x1]  ;;  %v2560_v11 = vld [vmem:[%s2634_s25 + $0x78] sm:$0xff] }
  0x5b   : > { %v1791_v36 = vpack.c.b16 %v1766_v25, %v1765_v24  ;;  %v437_v17 = vshll.u32 %v214_v10, 16  ;;  %v2541_v25 = vld [vmem:[%s2634_s25 + $0x60] sm:$0xff]  ;;  %v1583_v47 = vshrl.u32 %v2487_v38, 16 }
  0x5c   : > { %v425_v26 = vrot.slane %v424_v15, 4  ;;  %v1580_v33 = vrot.slane %v1578_v20, 5  ;;  %v2542_v15 = vld [vmem:[%s2634_s25 + $0x6c] sm:$0xff] }
  0x5e   : > { %2246 = vmatmul.msk.bf16.gmra.mxu0 %vm666_vm0, %v648_v5  ;;  %v403_v5 = vshll.u32 %v187_v62, 16 }
  0x60   : > { %2449 = vmatmul.msk.bf16.gmra.mxu2 %vm666_vm0, %v2556_v9  ;;  %2331 = vmatmul.msk.bf16.gmra.mxu1 %vm666_vm0, %v2538_v14  ;;  %v382_v9 = vsel %vm2649_vm3, %v377_v60, %v381_v39  ;;  %v399_v14 = vrot.slane %v397_v4, 5  ;;  %v405_v18 = vrot.slane %v403_v5, 5  ;;  %v2558_v39 = vld [vmem:[%s2634_s25 + $0x60] sm:$0xff] }
  0x61   : > { %2518 = vmatmul.msk.bf16.gmra.mxu3 %vm666_vm0, %v1789_v6  ;;  %v407_v6 = vshrl.u32 %v187_v62, 16  ;;  %v624_v22 = vunpack.c.l.b16 %v382_v9 }
  0x62   : > { %v400_v30 = vor.u32 %v399_v14, %v396_v13  ;;  %v1768_v13 = vunpack.c.l.b16 %v1557_v1 }
  0x63   : > { %v409_v19 = vrot.slane %v407_v6, 4  ;;  %v650_v34 = vpack.c.b16 %v625_v23, %v624_v22  ;;  %v1561_v6 = vrot.slane %v1559_v58, 4  ;;  %v2559_v22 = vld [vmem:[%s2634_s25 + $0x6c] sm:$0xff] }
  0x64   : > { %v401_v40 = vrot.slane %v400_v30, 4  ;;  %v1792_v21 = vpack.c.b16 %v1768_v13, %v1767_v12  ;;  %v190_v23 = vld [vmem:[%s2634_s25 + $0x6c] sm:$0xf]  ;;  %v439_v30 = vrot.slane %v437_v17, 5  ;;  %v192_v17 = vld [vmem:[%s2634_s25 + $0x78] sm:$0xf] }
  0x65   : > { %v410_v31 = vor.u32 %v409_v19, %v405_v18  ;;  %v445_v35 = vshll.u32 %v190_v23, 16 }
  0x66   : > { %v406_v50 = vsel %vm2649_vm3, %v401_v40, %v405_v18 }
  0x67   : > { %v411_v41 = vrot.slane %v410_v31, 4  ;;  %v626_v62 = vunpack.c.l.b16 %v406_v50 }
  0x69   : > { %v416_v51 = vsel %vm2649_vm3, %v411_v41, %v415_v37  ;;  %v455_v37 = vshrl.u32 %v191_v29, 16 }
  0x6a   : > { %v627_v63 = vunpack.c.l.b16 %v416_v51 }
  0x6b   : > { %v457_v50 = vrot.slane %v455_v37, 4 }
  0x6c   : > { %v651_v14 = vpack.c.b16 %v627_v63, %v626_v62 }
  0x6e   : > { %2247 = vmatmul.msk.bf16.gmra.mxu0 %vm666_vm0, %v649_v49  ;;  %v2485_v49 = vld [vmem:[%s2634_s25 + $0x70] sm:$0xf] }
  0x6f   : > { %v1568_v60 = vshll.u32 %v2485_v49, 16  ;;  %v1572_v61 = vshrl.u32 %v2485_v49, 16 }
  0x70   : > { %2450 = vmatmul.msk.bf16.gmra.mxu2 %vm666_vm0, %v2557_v57  ;;  %2332 = vmatmul.msk.bf16.gmra.mxu1 %vm666_vm0, %v2539_v59  ;;  %v431_v57 = vshrl.u32 %v189_v46, 16  ;;  %v1562_v59 = vshll.u32 %v2484_v48, 16  ;;  %v1586_v48 = vshll.u32 %v2487_v38, 16 }
  0x71   : > { %2519 = vmatmul.msk.bf16.gmra.mxu3 %vm666_vm0, %v1790_v56  ;;  %v427_v56 = vshll.u32 %v189_v46, 16  ;;  %v1570_v8 = vrot.slane %v1568_v60, 5  ;;  %v1574_v9 = vrot.slane %v1572_v61, 4  ;;  %v447_v46 = vrot.slane %v445_v35, 5 }
  0x72   : > { %v433_v5 = vrot.slane %v431_v57, 4  ;;  %v1564_v7 = vrot.slane %v1562_v59, 5  ;;  %v1585_v60 = vrot.slane %v1583_v47, 4  ;;  %v1588_v61 = vrot.slane %v1586_v48, 5 }
  0x73   : > { %v429_v4 = vrot.slane %v427_v56, 5  ;;  %v1575_v19 = vor.u32 %v1574_v9, %v1570_v8  ;;  %v215_v56 = vld [vmem:[%s2634_s25 + $0x74] sm:$0x1]  ;;  %v1602_v9 = vshll.u32 %v2489_v0, 16 }
  0x74   : > { %v1565_v18 = vor.u32 %v1564_v7, %v1561_v6  ;;  %v461_v63 = vshll.u32 %v215_v56, 16 }
  0x75   : > { %v434_v16 = vor.u32 %v433_v5, %v429_v4  ;;  %v1576_v32 = vrot.slane %v1575_v19, 4  ;;  %v430_v40 = vsel %vm2649_vm3, %v425_v26, %v429_v4  ;;  %v1604_v20 = vrot.slane %v1602_v9, 5 }
  0x76   : > { %v1566_v31 = vrot.slane %v1565_v18, 4  ;;  %v628_v54 = vunpack.c.l.b16 %v430_v40  ;;  %v463_v13 = vrot.slane %v461_v63, 5  ;;  %v193_v18 = vld [vmem:[%s2634_s25 + $0x7c] sm:$0xf]  ;;  %v466_v26 = vshrl.u32 %v192_v17, 16 }
  0x77   : > { %v435_v28 = vrot.slane %v434_v16, 4  ;;  %v1581_v43 = vsel %vm2649_vm3, %v1576_v32, %v1580_v33  ;;  %v2849_v32 = vld [vmem:[%s3172_s2] ss:$0 sm:$0xff] }
  0x78   : > { %v1571_v42 = vsel %vm2649_vm3, %v1566_v31, %v1570_v8  ;;  %v1770_v58 = vunpack.c.l.b16 %v1581_v43  ;;  %v1589_v8 = vor.u32 %v1588_v61, %v1585_v60  ;;  %v2491_v31 = vld [vmem:[%s2634_s25 + $0x88] sm:$0xf] }
  0x79   : > { %v440_v41 = vsel %vm2649_vm3, %v435_v28, %v439_v30  ;;  %v1769_v57 = vunpack.c.l.b16 %v1571_v42  ;;  %v469_v28 = vshll.u32 %v192_v17, 16  ;;  %v479_v30 = vshrl.u32 %v193_v18, 16 }
  0x7a   : > { %v629_v55 = vunpack.c.l.b16 %v440_v41  ;;  %v1590_v19 = vrot.slane %v1589_v8, 4  ;;  %v1616_v43 = vshll.u32 %v2491_v31, 16 }
  0x7b   : > { %v1793_v5 = vpack.c.b16 %v1770_v58, %v1769_v57  ;;  %v481_v48 = vrot.slane %v479_v30, 4  ;;  %v2492_v58 = vld [vmem:[%s2634_s25 + $0x8c] sm:$0x1] }
  0x7c   : > { %v652_v3 = vpack.c.b16 %v629_v55, %v628_v54  ;;  %v2866_v60 = vrot.slane %v1616_v43, 5  ;;  %v1626_v9 = vshll.u32 %v2492_v58, 16 }
  0x7e   : > { %2248 = vmatmul.msk.bf16.gmra.mxu0 %vm666_vm0, %v650_v34  ;;  %v442_v34 = vshrl.u32 %v190_v23, 16 }
  0x80   : > { %2451 = vmatmul.msk.bf16.gmra.mxu2 %vm666_vm0, %v2558_v39  ;;  %2333 = vmatmul.msk.bf16.gmra.mxu1 %vm666_vm0, %v2540_v44  ;;  %v2488_v39 = vld [vmem:[%s2634_s25 + $0x7c] sm:$0xf]  ;;  %v444_v45 = vrot.slane %v442_v34, 4 }
  0x81   : > { %2520 = vmatmul.msk.bf16.gmra.mxu3 %vm666_vm0, %v1791_v36  ;;  %v451_v36 = vshll.u32 %v191_v29, 16  ;;  %v1592_v51 = vshll.u32 %v2488_v39, 16  ;;  %v1596_v52 = vshrl.u32 %v2488_v39, 16  ;;  %v475_v29 = vshll.u32 %v193_v18, 16 }
  0x82   : > { %v448_v59 = vor.u32 %v447_v46, %v444_v45  ;;  %v468_v45 = vrot.slane %v466_v26, 4  ;;  %v471_v46 = vrot.slane %v469_v28, 5  ;;  %v2493_v26 = vld [vmem:[%s2634_s25 + $0x90] sm:$0xf] }
  0x83   : > { %v453_v49 = vrot.slane %v451_v36, 5  ;;  %v1594_v1 = vrot.slane %v1592_v51, 5  ;;  %v1598_v2 = vrot.slane %v1596_v52, 4  ;;  %v2857_v47 = vrot.slane %v475_v29, 5  ;;  %v216_v52 = vld [vmem:[%s2634_s25 + $0x80] sm:$0x1] }
  0x84   : > { %v449_v7 = vrot.slane %v448_v59, 4  ;;  %v472_v63 = vor.u32 %v471_v46, %v468_v45  ;;  %v485_v0 = vshll.u32 %v216_v52, 16  ;;  %v1634_v46 = vshll.u32 %v2493_v26, 16 }
  0x85   : > { %v458_v62 = vor.u32 %v457_v50, %v453_v49  ;;  %v1595_v40 = vsel %vm2649_vm3, %v1590_v19, %v1594_v1 }
  0x86   : > { %v454_v23 = vsel %vm2649_vm3, %v449_v7, %v453_v49  ;;  %v1771_v56 = vunpack.c.l.b16 %v1595_v40  ;;  %v473_v17 = vrot.slane %v472_v63, 4  ;;  %v1631_v40 = vshrl.u32 %v2493_v26, 16 }
  0x87   : > { %v459_v12 = vrot.slane %v458_v62, 4  ;;  %v630_v38 = vunpack.c.l.b16 %v454_v23  ;;  %v1628_v23 = vrot.slane %v1626_v9, 5 }
  0x8d   : > { %v947_v24 = vpop.f32.mrf.mxu1 }
  0x8e   : > { %2249 = vmatmul.msk.bf16.gmra.mxu0 %vm666_vm0, %v651_v14  ;;  %v1599_v14 = vor.u32 %v1598_v2, %v1594_v1 }
  0x90   : > { %2452 = vmatmul.msk.bf16.gmra.mxu2 %vm666_vm0, %v2559_v22  ;;  %2334 = vmatmul.msk.bf16.gmra.mxu1 %vm666_vm0, %v2541_v25  ;;  %v1600_v25 = vrot.slane %v1599_v14, 4 }
  0x91   : > { %2521 = vmatmul.msk.bf16.gmra.mxu3 %vm666_vm0, %v1792_v21  ;;  %v2490_v21 = vld [vmem:[%s2634_s25 + $0x84] sm:$0xf] }
  0x92   : > { %v1607_v34 = vshrl.u32 %v2490_v21, 16  ;;  %v1610_v35 = vshll.u32 %v2490_v21, 16  ;;  %v1605_v42 = vsel %vm2649_vm3, %v1600_v25, %v1604_v20  ;;  %v487_v21 = vrot.slane %v485_v0, 5  ;;  %v2495_v0 = vld [vmem:[%s2634_s25 + $0x98] sm:$0x1] }
  0x93   : > { %v1206_v44 = vpop.f32.mrf.mxu2  ;;  %v1772_v57 = vunpack.c.l.b16 %v1605_v42 }
  0x94   : > { %v1609_v54 = vrot.slane %v1607_v34, 4  ;;  %v1612_v55 = vrot.slane %v1610_v35, 5  ;;  %v2494_v35 = vld [vmem:[%s2634_s25 + $0x94] sm:$0xf] }
  0x95   : > { %v2824_v53 = vpop.f32.mrf.mxu1 }
  0x9b   : > { %v724_v4 = vpop.f32.mrf.mxu0  ;;  %v2828_v6 = vpop.f32.mrf.mxu2 }
  0x9c   : > { %v948_v10 = vadd.f32 %v947_v24, %v724_v4  ;;  %v464_v24 = vsel %vm2649_vm3, %v459_v12, %v463_v13  ;;  %v1613_v4 = vor.u32 %v1612_v55, %v1609_v54  ;;  %v1794_v12 = vpack.c.b16 %v1772_v57, %v1771_v56  ;;  %v2561_v13 = vld [vmem:[%s2634_s25 + $0x84] sm:$0xff] }
  0x9d   : > { %v2833_v16 = vpop.f32.mrf.mxu1  ;;  %v631_v39 = vunpack.c.l.b16 %v464_v24 }
  0x9e   : > { %2250 = vmatmul.msk.bf16.gmra.mxu0 %vm666_vm0, %v652_v3  ;;  %v1286_v22 = vadd.f32 %v1206_v44, %v948_v10  ;;  %v1620_v44 = vshrl.u32 %v2491_v31, 16  ;;  %v482_v3 = vor.u32 %v481_v48, %v2857_v47  ;;  %v478_v31 = vsel %vm2649_vm3, %v473_v17, %v2857_v47 }
  0x9f   : > { %v653_v62 = vpack.c.b16 %v631_v39, %v630_v38  ;;  %v632_v52 = vunpack.c.l.b16 %v478_v31  ;;  %v1650_v17 = vshll.u32 %v2495_v0, 16 }
  0xa0   : > { %2453 = vmatmul.msk.bf16.gmra.mxu2 %vm666_vm0, %v2560_v11  ;;  %2335 = vmatmul.msk.bf16.gmra.mxu1 %vm666_vm0, %v2542_v15  ;;  %v1622_v61 = vrot.slane %v1620_v44, 4  ;;  %v2543_v15 = vld [vmem:[%s2634_s25 + $0x78] sm:$0xff]  ;;  %v483_v20 = vrot.slane %v482_v3, 4 }
  0xa1   : > { %2522 = vmatmul.msk.bf16.gmra.mxu3 %vm666_vm0, %v1793_v5 }
  0xa2   : > { %v1623_v14 = vor.u32 %v1622_v61, %v2866_v60  ;;  %v488_v39 = vsel %vm2649_vm3, %v483_v20, %v487_v21  ;;  %v217_v61 = vld [vmem:[%s2634_s25 + $0x8c] sm:$0x1] }
  0xa3   : > { %v726_v33 = vpop.f32.mrf.mxu0  ;;  %v2851_v37 = vpop.f32.mrf.mxu2  ;;  %v633_v54 = vunpack.c.l.b16 %v488_v39 }
  0xa4   : > { %v1864_v36 = vpop.f32.mrf.mxu3  ;;  %v950_v50 = vadd.f32 %v2824_v53, %v726_v33  ;;  %v1624_v30 = vrot.slane %v1623_v14, 4 }
  0xa5   : > { %v1944_v41 = vadd.f32 %v1864_v36, %v1286_v22  ;;  %v2861_v51 = vpop.f32.mrf.mxu1  ;;  %v1614_v22 = vrot.slane %v1613_v4, 4 }
  0xa6   : > { %v1287_v1 = vadd.f32 %v2828_v6, %v950_v50  ;;  %v194_v6 = vld [vmem:[%s2634_s25 + $0x84] sm:$0xf]  ;;  %v1629_v48 = vsel %vm2649_vm3, %v1624_v30, %v1628_v23  ;;  %v1644_v50 = vshrl.u32 %v2494_v35, 16 }
  0xa7   : > { %v1980_v49 = vadd.f32 %v2849_v32, %v1944_v41  ;;  %v490_v24 = vshrl.u32 %v194_v6, 16  ;;  %v493_v25 = vshll.u32 %v194_v6, 16 }
  0xa8   : > { %v1646_v4 = vrot.slane %v1644_v50, 4 }
  0xa9   : > { %vm2012_vm4 = vcmp.ge.f32.partialorder %v1980_v49, 0.0  ;;  %v2044_v59 = vmul.f32 0.2, %v1980_v49  ;;  %v492_v44 = vrot.slane %v490_v24, 4  ;;  %v495_v45 = vrot.slane %v493_v25, 5 }
  0xab   : > { %v2076_v53 = vsel %vm2012_vm4, %v1980_v49, %v2044_v59  ;;  %v729_v2 = vpop.f32.mrf.mxu0  ;;  %v2875_v8 = vpop.f32.mrf.mxu2  ;;  %v1640_v49 = vshll.u32 %v2494_v35, 16  ;;  %v496_v63 = vor.u32 %v495_v45, %v492_v44  ;;  %v1652_v35 = vrot.slane %v1650_v17, 5 }
  0xac   : > { %v2108_v5 = vpack.c.bf16 %v2076_v53, %v2076_v53  ;;  %v1866_v7 = vpop.f32.mrf.mxu3  ;;  %v953_v11 = vadd.f32 %v2833_v16, %v729_v2  ;;  %v195_v16 = vld [vmem:[%s2634_s25 + $0x88] sm:$0xf]  ;;  %v1633_v53 = vrot.slane %v1631_v40, 4 }
  0xad   : > { %v1945_v10 = vadd.f32 %v1866_v7, %v1287_v1  ;;  %v2886_v19 = vpop.f32.mrf.mxu1  ;;  %v499_v33 = vshll.u32 %v195_v16, 16  ;;  %v503_v34 = vshrl.u32 %v195_v16, 16  ;;  %v1636_v1 = vrot.slane %v1634_v46, 5  ;;  %v2562_v16 = vld [vmem:[%s2634_s25 + $0x90] sm:$0xff] }
  0xae   : > { %2141 = vst.msk [vmem:[%s2871_s4] sm:$0xf] %vm2140_vm5, %v2108_v5  ;;  %2251 = vmatmul.msk.bf16.gmra.mxu0 %vm666_vm0, %v653_v62  ;;  %v1288_v29 = vadd.f32 %v2851_v37, %v953_v11  ;;  %v1619_v37 = vsel %vm2649_vm3, %v1614_v22, %v2866_v60  ;;  %v1774_v62 = vunpack.c.l.b16 %v1629_v48  ;;  %v2915_v3 = vrot.slane %v1640_v49, 5 }
  0xaf   : > { %v1981_v18 = vadd.f32 %v2849_v32, %v1945_v10  ;;  %v2907_v55 = vrot.slane %v499_v33, 5  ;;  %v505_v56 = vrot.slane %v503_v34, 4  ;;  %v1773_v60 = vunpack.c.l.b16 %v1619_v37 }
  0xb0   : > { %2454 = vmatmul.msk.bf16.gmra.mxu2 %vm666_vm0, %v2561_v13  ;;  %2336 = vmatmul.msk.bf16.gmra.mxu1 %vm666_vm0, %v2543_v15  ;;  %v654_v5 = vpack.c.b16 %v633_v54, %v632_v52  ;;  %v497_v6 = vrot.slane %v496_v63, 4  ;;  %v1637_v15 = vor.u32 %v1636_v1, %v1633_v53  ;;  %v1647_v23 = vor.u32 %v1646_v4, %v2915_v3 }
  0xb1   : > { %vm2013_vm6 = vcmp.ge.f32.partialorder %v1981_v18, 0.0  ;;  %v2045_v28 = vmul.f32 0.2, %v1981_v18  ;;  %2523 = vmatmul.msk.bf16.gmra.mxu3 %vm666_vm0, %v1794_v12  ;;  %v506_v7 = vor.u32 %v505_v56, %v2907_v55  ;;  %v1795_v22 = vpack.c.b16 %v1774_v62, %v1773_v60 }
  0xb2   : > { %v502_v33 = vsel %vm2649_vm3, %v497_v6, %v2907_v55  ;;  %v1638_v34 = vrot.slane %v1637_v15, 4  ;;  %v1648_v39 = vrot.slane %v1647_v23, 4 }
  0xb3   : > { %v2077_v36 = vsel %vm2013_vm6, %v1981_v18, %v2045_v28  ;;  %v731_v38 = vpop.f32.mrf.mxu0  ;;  %v1216_v43 = vpop.f32.mrf.mxu2  ;;  %v196_v18 = vld [vmem:[%s2634_s25 + $0x90] sm:$0xf]  ;;  %v507_v24 = vrot.slane %v506_v7, 4  ;;  %v634_v54 = vunpack.c.l.b16 %v502_v33 }
  0xb4   : > { %v2109_v41 = vpack.c.bf16 %v2077_v36, %v2077_v36  ;;  %v1869_v42 = vpop.f32.mrf.mxu3  ;;  %v955_v58 = vadd.f32 %v2861_v51, %v731_v38  ;;  %v509_v51 = vshll.u32 %v217_v61, 16  ;;  %v514_v30 = vshrl.u32 %v196_v18, 16 }
  0xb5   : > { %v1946_v47 = vadd.f32 %v1869_v42, %v1288_v29  ;;  %v2911_v59 = vpop.f32.mrf.mxu1  ;;  %v197_v29 = vld [vmem:[%s2634_s25 + $0x94] sm:$0xf]  ;;  %v517_v31 = vshll.u32 %v196_v18, 16  ;;  %v2497_v42 = vld [vmem:[%s2634_s25 + $0xa0] sm:$0xf]  ;;  %v1643_v55 = vsel %vm2649_vm3, %v1638_v34, %v2915_v3 }
  0xb6   : > { %2142 = vst.msk [vmem:[%s2871_s4 + $0x4] sm:$0xf] %vm2140_vm5, %v2109_v41  ;;  %v1289_v10 = vadd.f32 %v2875_v8, %v955_v58  ;;  %v2544_v8 = vld [vmem:[%s2634_s25 + $0x84] sm:$0xff]  ;;  %v511_v25 = vrot.slane %v509_v51, 5  ;;  %v523_v40 = vshll.u32 %v197_v29, 16  ;;  %v527_v41 = vshrl.u32 %v197_v29, 16 }
  0xb7   : > { %v1982_v57 = vadd.f32 %v2849_v32, %v1946_v47  ;;  %v516_v47 = vrot.slane %v514_v30, 4  ;;  %v519_v48 = vrot.slane %v517_v31, 5  ;;  %v1664_v58 = vshll.u32 %v2497_v42, 16  ;;  %v218_v3 = vld [vmem:[%s2634_s25 + $0x98] sm:$0x1]  ;;  %v2563_v30 = vld [vmem:[%s2634_s25 + $0x9c] sm:$0xff] }
  0xb8   : > { %v512_v37 = vsel %vm2649_vm3, %v507_v24, %v511_v25  ;;  %v1668_v60 = vshrl.u32 %v2497_v42, 16  ;;  %v525_v62 = vrot.slane %v523_v40, 5  ;;  %v529_v63 = vrot.slane %v527_v41, 4  ;;  %v198_v24 = vld [vmem:[%s2634_s25 + $0x9c] sm:$0xf] }
  0xb9   : > { %vm2014_vm7 = vcmp.ge.f32.partialorder %v1982_v57, 0.0  ;;  %v2046_v2 = vmul.f32 0.2, %v1982_v57  ;;  %v635_v61 = vunpack.c.l.b16 %v512_v37  ;;  %v520_v4 = vor.u32 %v519_v48, %v516_v47 }
  0xba   : > { %v1775_v7 = vunpack.c.l.b16 %v1643_v55  ;;  %v530_v6 = vor.u32 %v529_v63, %v525_v62  ;;  %v533_v15 = vshll.u32 %v218_v3, 16  ;;  %v541_v40 = vshll.u32 %v198_v24, 16  ;;  %v2500_v55 = vld [vmem:[%s2634_s25 + $0xac] sm:$0xf] }
  0xbb   : > { %v2078_v9 = vsel %vm2014_vm7, %v1982_v57, %v2046_v2  ;;  %v734_v11 = vpop.f32.mrf.mxu0  ;;  %v2919_v14 = vpop.f32.mrf.mxu2  ;;  %v1653_v57 = vsel %vm2649_vm3, %v1648_v39, %v1652_v35  ;;  %v538_v39 = vshrl.u32 %v198_v24, 16 }
  0xbc   : > { %v2110_v12 = vpack.c.bf16 %v2078_v9, %v2078_v9  ;;  %v1871_v13 = vpop.f32.mrf.mxu3  ;;  %v958_v21 = vadd.f32 %v2886_v19, %v734_v11  ;;  %v2496_v19 = vld [vmem:[%s2634_s25 + $0x9c] sm:$0xf]  ;;  %v1776_v51 = vunpack.c.l.b16 %v1653_v57  ;;  %v2498_v9 = vld [vmem:[%s2634_s25 + $0xa4] sm:$0x1]  ;;  %v2956_v11 = vrot.slane %v1664_v58, 5 }
  0xbd   : > { %v1947_v20 = vadd.f32 %v1871_v13, %v1289_v10  ;;  %v2930_v28 = vpop.f32.mrf.mxu1  ;;  %v1655_v44 = vshrl.u32 %v2496_v19, 16  ;;  %v1658_v49 = vshll.u32 %v2496_v19, 16  ;;  %v655_v13 = vpack.c.b16 %v635_v61, %v634_v54  ;;  %v199_v19 = vld [vmem:[%s2634_s25 + $0xa0] sm:$0xf]  ;;  %v2499_v54 = vld [vmem:[%s2634_s25 + $0xa8] sm:$0xf] }
  0xbe   : > { %2143 = vst.msk [vmem:[%s2871_s4 + $0x8] sm:$0xf] %vm2140_vm5, %v2110_v12  ;;  %2252 = vmatmul.msk.bf16.gmra.mxu0 %vm666_vm0, %v654_v5  ;;  %v1290_v38 = vadd.f32 %v1216_v43, %v958_v21  ;;  %v1670_v12 = vrot.slane %v1668_v60, 4  ;;  %v1796_v29 = vpack.c.b16 %v1776_v51, %v1775_v7  ;;  %v531_v33 = vrot.slane %v530_v6, 4 }
  0xbf   : > { %v1983_v26 = vadd.f32 %v2849_v32, %v1947_v20  ;;  %v1657_v0 = vrot.slane %v1655_v44, 4  ;;  %v1660_v5 = vrot.slane %v1658_v49, 5  ;;  %v521_v20 = vrot.slane %v520_v4, 4 }
  0xc0   : > { %2455 = vmatmul.msk.bf16.gmra.mxu2 %vm666_vm0, %v2562_v16  ;;  %2337 = vmatmul.msk.bf16.gmra.mxu1 %vm666_vm0, %v2544_v8  ;;  %v1674_v8 = vshll.u32 %v2498_v9, 16  ;;  %v1671_v31 = vor.u32 %v1670_v12, %v2956_v11  ;;  %v535_v34 = vrot.slane %v533_v15, 5  ;;  %v547_v41 = vshll.u32 %v199_v19, 16 }
  0xc1   : > { %vm2015_vm8 = vcmp.ge.f32.partialorder %v1983_v26, 0.0  ;;  %v2047_v36 = vmul.f32 0.2, %v1983_v26  ;;  %2524 = vmatmul.msk.bf16.gmra.mxu3 %vm666_vm0, %v1795_v22  ;;  %v1661_v21 = vor.u32 %v1660_v5, %v1657_v0  ;;  %v551_v42 = vshrl.u32 %v199_v19, 16 }
  0xc2   : > { %v1676_v37 = vrot.slane %v1674_v8, 5  ;;  %v536_v47 = vsel %vm2649_vm3, %v531_v33, %v535_v34  ;;  %v2984_v60 = vrot.slane %v547_v41, 5  ;;  %v1679_v3 = vshrl.u32 %v2499_v54, 16  ;;  %v201_v33 = vld [vmem:[%s2634_s25 + $0xac] sm:$0xf] }
  0xc3   : > { %v2079_v45 = vsel %vm2015_vm8, %v1983_v26, %v2047_v36  ;;  %v736_v46 = vpop.f32.mrf.mxu0  ;;  %v1221_v52 = vpop.f32.mrf.mxu2  ;;  %v553_v61 = vrot.slane %v551_v42, 4  ;;  %v637_v63 = vunpack.c.l.b16 %v536_v47  ;;  %v1682_v4 = vshll.u32 %v2499_v54, 16  ;;  %v2502_v47 = vld [vmem:[%s2634_s25 + $0xb4] sm:$0xf] }
  0xc4   : > { %v2111_v50 = vpack.c.bf16 %v2079_v45, %v2079_v45  ;;  %v1874_v43 = vpop.f32.mrf.mxu3  ;;  %v960_v1 = vadd.f32 %v2911_v59, %v736_v46  ;;  %v1672_v46 = vrot.slane %v1671_v31, 4  ;;  %v1688_v5 = vshll.u32 %v2500_v55, 16 }
  0xc5   : > { %v1948_v56 = vadd.f32 %v1874_v43, %v1290_v38  ;;  %v2952_v2 = vpop.f32.mrf.mxu1  ;;  %v526_v38 = vsel %vm2649_vm3, %v521_v20, %v525_v62  ;;  %v540_v43 = vrot.slane %v538_v39, 4  ;;  %v1692_v7 = vshrl.u32 %v2500_v55, 16  ;;  %v2503_v55 = vld [vmem:[%s2634_s25 + $0xb8] sm:$0xf] }
  0xc6   : > { %2144 = vst.msk [vmem:[%s2871_s4 + $0xc] sm:$0xf] %vm2140_vm5, %v2111_v50  ;;  %v1291_v17 = vadd.f32 %v2919_v14, %v960_v1  ;;  %v2545_v14 = vld [vmem:[%s2634_s25 + $0x90] sm:$0xff]  ;;  %v636_v50 = vunpack.c.l.b16 %v526_v38  ;;  %v219_v1 = vld [vmem:[%s2634_s25 + $0xa4] sm:$0x1]  ;;  %v1681_v20 = vrot.slane %v1679_v3, 4 }
  0xc7   : > { %v1984_v53 = vadd.f32 %v2849_v32, %v1948_v56  ;;  %v557_v6 = vshll.u32 %v219_v1, 16 }
  0xc9   : > { %vm2016_vm9 = vcmp.ge.f32.partialorder %v1984_v53, 0.0  ;;  %v2048_v10 = vmul.f32 0.2, %v1984_v53 }
  0xcb   : > { %v2080_v59 = vsel %vm2016_vm9, %v1984_v53, %v2048_v10  ;;  %v739_v18 = vpop.f32.mrf.mxu0  ;;  %v2959_v23 = vpop.f32.mrf.mxu2  ;;  %v1677_v53 = vsel %vm2649_vm3, %v1672_v46, %v1676_v37  ;;  %v571_v46 = vshll.u32 %v201_v33, 16 }
  0xcc   : > { %v2112_v22 = vpack.c.bf16 %v2080_v59, %v2080_v59  ;;  %v1876_v16 = vpop.f32.mrf.mxu3  ;;  %v963_v26 = vadd.f32 %v2930_v28, %v739_v18  ;;  %v1662_v28 = vrot.slane %v1661_v21, 4  ;;  %v656_v59 = vpack.c.b16 %v637_v63, %v636_v50  ;;  %v2501_v18 = vld [vmem:[%s2634_s25 + $0xb0] sm:$0x1] }
  0xcd   : > { %v1949_v25 = vadd.f32 %v1876_v16, %v1291_v17  ;;  %v2971_v36 = vpop.f32.mrf.mxu1  ;;  %v1778_v17 = vunpack.c.l.b16 %v1677_v53  ;;  %v1684_v21 = vrot.slane %v1682_v4, 5  ;;  %v1698_v39 = vshll.u32 %v2501_v18, 16  ;;  %v220_v63 = vld [vmem:[%s2634_s25 + $0xb0] sm:$0x1] }
  0xce   : > { %2145 = vst.msk [vmem:[%s2871_s4 + $0x10] sm:$0xf] %vm2140_vm5, %v2112_v22  ;;  %2253 = vmatmul.msk.bf16.gmra.mxu0 %vm666_vm0, %v655_v13  ;;  %v1292_v45 = vadd.f32 %v1221_v52, %v963_v26  ;;  %v543_v52 = vrot.slane %v541_v40, 5  ;;  %v1667_v0 = vsel %vm2649_vm3, %v1662_v28, %v2956_v11  ;;  %v554_v13 = vor.u32 %v553_v61, %v2984_v60  ;;  %v2564_v28 = vld [vmem:[%s2634_s25 + $0xa8] sm:$0xff] }
  0xcf   : > { %v1985_v35 = vadd.f32 %v2849_v32, %v1949_v25  ;;  %v1777_v12 = vunpack.c.l.b16 %v1667_v0  ;;  %v3000_v22 = vrot.slane %v1688_v5, 5  ;;  %v200_v25 = vld [vmem:[%s2634_s25 + $0xa8] sm:$0xf]  ;;  %v1685_v37 = vor.u32 %v1684_v21, %v1681_v20 }
  0xd0   : > { %2456 = vmatmul.msk.bf16.gmra.mxu2 %vm666_vm0, %v2563_v30  ;;  %2338 = vmatmul.msk.bf16.gmra.mxu1 %vm666_vm0, %v2545_v14  ;;  %v544_v11 = vor.u32 %v543_v52, %v540_v43  ;;  %v555_v19 = vrot.slane %v554_v13, 4  ;;  %v559_v14 = vrot.slane %v557_v6, 5  ;;  %v562_v41 = vshrl.u32 %v200_v25, 16 }
  0xd1   : > { %vm2017_vm10 = vcmp.ge.f32.partialorder %v1985_v35, 0.0  ;;  %v2049_v44 = vmul.f32 0.2, %v1985_v35  ;;  %2525 = vmatmul.msk.bf16.gmra.mxu3 %vm666_vm0, %v1796_v29  ;;  %v1797_v38 = vpack.c.b16 %v1778_v17, %v1777_v12  ;;  %v1700_v54 = vrot.slane %v1698_v39, 5 }
  0xd2   : > { %v545_v31 = vrot.slane %v544_v11, 4  ;;  %v564_v52 = vrot.slane %v562_v41, 4  ;;  %v3029_v53 = vrot.slane %v571_v46, 5  ;;  %v1706_v5 = vshll.u32 %v2502_v47, 16  ;;  %v2565_v46 = vld [vmem:[%s2634_s25 + $0xb4] sm:$0xff] }
  0xd3   : > { %v2081_v48 = vsel %vm2017_vm10, %v1985_v35, %v2049_v44  ;;  %v741_v49 = vpop.f32.mrf.mxu0  ;;  %v2982_v58 = vpop.f32.mrf.mxu2 }
  0xd4   : > { %v2113_v56 = vpack.c.bf16 %v2081_v48, %v2081_v48  ;;  %v1879_v57 = vpop.f32.mrf.mxu3  ;;  %v965_v9 = vadd.f32 %v2952_v2, %v741_v49  ;;  %v1694_v2 = vrot.slane %v1692_v7, 4  ;;  %v550_v48 = vsel %vm2649_vm3, %v545_v31, %v2984_v60 }
  0xd5   : > { %v1950_v62 = vadd.f32 %v1879_v57, %v1292_v45  ;;  %v2996_v10 = vpop.f32.mrf.mxu1  ;;  %v565_v45 = vshll.u32 %v200_v25, 16  ;;  %v560_v49 = vsel %vm2649_vm3, %v555_v19, %v559_v14  ;;  %v1703_v60 = vshrl.u32 %v2502_v47, 16 }
  0xd6   : > { %2146 = vst.msk [vmem:[%s2871_s4 + $0x14] sm:$0xf] %vm2140_vm5, %v2113_v56  ;;  %v1293_v8 = vadd.f32 %v2959_v23, %v965_v9  ;;  %v2546_v23 = vld [vmem:[%s2634_s25 + $0x9c] sm:$0xff]  ;;  %v1695_v40 = vor.u32 %v1694_v2, %v3000_v22  ;;  %v1686_v56 = vrot.slane %v1685_v37, 4  ;;  %v1712_v7 = vshll.u32 %v2503_v55, 16 }
  0xd7   : > { %v1986_v51 = vadd.f32 %v2849_v32, %v1950_v62  ;;  %v567_v0 = vrot.slane %v565_v45, 5  ;;  %v638_v12 = vunpack.c.l.b16 %v550_v48  ;;  %v639_v11 = vunpack.c.l.b16 %v560_v49 }
  0xd8   : > { %v1696_v57 = vrot.slane %v1695_v40, 4  ;;  %v1691_v13 = vsel %vm2649_vm3, %v1686_v56, %v3000_v22  ;;  %v1705_v2 = vrot.slane %v1703_v60, 4 }
  0xd9   : > { %vm2018_vm11 = vcmp.ge.f32.partialorder %v1986_v51, 0.0  ;;  %v2050_v15 = vmul.f32 0.2, %v1986_v51  ;;  %v568_v20 = vor.u32 %v567_v0, %v564_v52  ;;  %v1779_v25 = vunpack.c.l.b16 %v1691_v13 }
  0xda   : > { %v1701_v6 = vsel %vm2649_vm3, %v1696_v57, %v1700_v54  ;;  %v657_v31 = vpack.c.b16 %v639_v11, %v638_v12  ;;  %v221_v11 = vld [vmem:[%s2634_s25 + $0xbc] sm:$0x1] }
  0xdb   : > { %v2082_v16 = vsel %vm2018_vm11, %v1986_v51, %v2050_v15  ;;  %v744_v24 = vpop.f32.mrf.mxu0  ;;  %v3004_v30 = vpop.f32.mrf.mxu2  ;;  %v1716_v51 = vshrl.u32 %v2503_v55, 16  ;;  %v581_v15 = vshll.u32 %v220_v63, 16  ;;  %v203_v55 = vld [vmem:[%s2634_s25 + $0xb8] sm:$0xf] }
  0xdc   : > { %v2114_v26 = vpack.c.bf16 %v2082_v16, %v2082_v16  ;;  %v1881_v29 = vpop.f32.mrf.mxu3  ;;  %v968_v35 = vadd.f32 %v2971_v36, %v744_v24  ;;  %v575_v36 = vshrl.u32 %v201_v33, 16  ;;  %v1708_v16 = vrot.slane %v1706_v5, 5 }
  0xdd   : > { %v1951_v34 = vadd.f32 %v1881_v29, %v1293_v8  ;;  %v3015_v44 = vpop.f32.mrf.mxu1  ;;  %v3043_v8 = vrot.slane %v1712_v7, 5  ;;  %v1718_v24 = vrot.slane %v1716_v51, 4  ;;  %v2504_v29 = vld [vmem:[%s2634_s25 + $0xbc] sm:$0x1]  ;;  %v583_v19 = vrot.slane %v581_v15, 5 }
  0xde   : > { %2147 = vst.msk [vmem:[%s2871_s4 + $0x18] sm:$0xf] %vm2140_vm5, %v2114_v26  ;;  %2254 = vmatmul.msk.bf16.gmra.mxu0 %vm666_vm0, %v656_v59  ;;  %v1294_v43 = vadd.f32 %v2982_v58, %v968_v35  ;;  %v577_v1 = vrot.slane %v575_v36, 4  ;;  %v1780_v26 = vunpack.c.l.b16 %v1701_v6  ;;  %v1722_v40 = vshll.u32 %v2504_v29, 16  ;;  %v202_v36 = vld [vmem:[%s2634_s25 + $0xb4] sm:$0xf] }
  0xdf   : > { %v1987_v42 = vadd.f32 %v2849_v32, %v1951_v34  ;;  %v569_v34 = vrot.slane %v568_v20, 4  ;;  %v1719_v37 = vor.u32 %v1718_v24, %v3043_v8  ;;  %v586_v52 = vshrl.u32 %v202_v36, 16 }
  0xe0   : > { %2457 = vmatmul.msk.bf16.gmra.mxu2 %vm666_vm0, %v2564_v28  ;;  %2339 = vmatmul.msk.bf16.gmra.mxu1 %vm666_vm0, %v2546_v23  ;;  %v578_v21 = vor.u32 %v577_v1, %v3029_v53  ;;  %v1709_v23 = vor.u32 %v1708_v16, %v1705_v2  ;;  %v1798_v45 = vpack.c.b16 %v1780_v26, %v1779_v25  ;;  %v1724_v54 = vrot.slane %v1722_v40, 5  ;;  %v2506_v1 = vld [vmem:[%s2634_s25 + $0xc4] sm:$0xf] }
  0xe1   : > { %vm2019_vm12 = vcmp.ge.f32.partialorder %v1987_v42, 0.0  ;;  %v2051_v50 = vmul.f32 0.2, %v1987_v42  ;;  %2526 = vmatmul.msk.bf16.gmra.mxu3 %vm666_vm0, %v1797_v38  ;;  %v574_v49 = vsel %vm2649_vm3, %v569_v34, %v3029_v53  ;;  %v589_v60 = vshll.u32 %v202_v36, 16  ;;  %v2548_v36 = vld [vmem:[%s2634_s25 + $0xb4] sm:$0xff] }
  0xe2   : > { %v579_v35 = vrot.slane %v578_v21, 4  ;;  %v595_v0 = vshll.u32 %v203_v55, 16  ;;  %v599_v53 = vshrl.u32 %v203_v55, 16  ;;  %v640_v7 = vunpack.c.l.b16 %v574_v49 }
  0xe3   : > { %v2083_v61 = vsel %vm2019_vm12, %v1987_v42, %v2051_v50  ;;  %v746_v62 = vpop.f32.mrf.mxu0  ;;  %v1231_v4 = vpop.f32.mrf.mxu2  ;;  %v588_v13 = vrot.slane %v586_v52, 4  ;;  %v591_v15 = vrot.slane %v589_v60, 5  ;;  %v1740_v20 = vshrl.u32 %v2506_v1, 16 }
  0xe4   : > { %v2115_v3 = vpack.c.bf16 %v2083_v61, %v2083_v61  ;;  %v1884_v58 = vpop.f32.mrf.mxu3  ;;  %v970_v17 = vadd.f32 %v2996_v10, %v746_v62  ;;  %v584_v50 = vsel %vm2649_vm3, %v579_v35, %v583_v19  ;;  %v2505_v61 = vld [vmem:[%s2634_s25 + $0xc0] sm:$0xf]  ;;  %v597_v24 = vrot.slane %v595_v0, 5 }
  0xe5   : > { %v1952_v9 = vadd.f32 %v1884_v58, %v1294_v43  ;;  %v3040_v18 = vpop.f32.mrf.mxu1  ;;  %v1720_v43 = vrot.slane %v1719_v37, 4  ;;  %v641_v51 = vunpack.c.l.b16 %v584_v50  ;;  %v1727_v6 = vshrl.u32 %v2505_v61, 16 }
  0xe6   : > { %2148 = vst.msk [vmem:[%s2871_s4 + $0x1c] sm:$0xf] %vm2140_vm5, %v2115_v3  ;;  %v1295_v14 = vadd.f32 %v3004_v30, %v970_v17  ;;  %v2547_v30 = vld [vmem:[%s2634_s25 + $0xa8] sm:$0xff]  ;;  %v1736_v17 = vshll.u32 %v2506_v1, 16 }
  0xe7   : > { %v1988_v59 = vadd.f32 %v2849_v32, %v1952_v9  ;;  %v1725_v12 = vsel %vm2649_vm3, %v1720_v43, %v1724_v54  ;;  %v1729_v19 = vrot.slane %v1727_v6, 4 }
  0xe8   : > { %v1782_v29 = vunpack.c.l.b16 %v1725_v12 }
  0xe9   : > { %vm2020_vm13 = vcmp.ge.f32.partialorder %v1988_v59, 0.0  ;;  %v2052_v22 = vmul.f32 0.2, %v1988_v59 }
  0xeb   : > { %v2084_v10 = vsel %vm2020_vm13, %v1988_v59, %v2052_v22  ;;  %v749_v33 = vpop.f32.mrf.mxu0  ;;  %v3047_v39 = vpop.f32.mrf.mxu2  ;;  %v1730_v59 = vshll.u32 %v2505_v61, 16  ;;  %v658_v22 = vpack.c.b16 %v641_v51, %v640_v7 }
  0xec   : > { %v2116_v38 = vpack.c.bf16 %v2084_v10, %v2084_v10  ;;  %v1886_v28 = vpop.f32.mrf.mxu3  ;;  %v973_v42 = vadd.f32 %v3015_v44, %v749_v33  ;;  %v1710_v44 = vrot.slane %v1709_v23, 4  ;;  %v1742_v33 = vrot.slane %v1740_v20, 4  ;;  %v2507_v23 = vld [vmem:[%s2634_s25 + $0xc8] sm:$0x1] }
  0xed   : > { %v1953_v41 = vadd.f32 %v1886_v28, %v1295_v14  ;;  %v977_v48 = vpop.f32.mrf.mxu1  ;;  %v1732_v10 = vrot.slane %v1730_v59, 5  ;;  %v1738_v14 = vrot.slane %v1736_v17, 5  ;;  %v1746_v50 = vshll.u32 %v2507_v23, 16 }
  0xee   : > { %2149 = vst.msk [vmem:[%s2871_s4 + $0x20] sm:$0xf] %vm2140_vm5, %v2116_v38  ;;  %2255 = vmatmul.msk.bf16.gmra.mxu0 %vm666_vm0, %v657_v31  ;;  %v1296_v57 = vadd.f32 %v1231_v4, %v973_v42  ;;  %v1715_v4 = vsel %vm2649_vm3, %v1710_v44, %v3043_v8  ;;  %v601_v8 = vrot.slane %v599_v53, 4  ;;  %v605_v31 = vshll.u32 %v221_v11, 16 }
  0xef   : > { %v1989_v47 = vadd.f32 %v2849_v32, %v1953_v41  ;;  %v1781_v25 = vunpack.c.l.b16 %v1715_v4  ;;  %v592_v38 = vor.u32 %v591_v15, %v588_v13  ;;  %v1743_v49 = vor.u32 %v1742_v33, %v1738_v14 }
  0xf0   : > { %2458 = vmatmul.msk.bf16.gmra.mxu2 %vm666_vm0, %v2565_v46  ;;  %2340 = vmatmul.msk.bf16.gmra.mxu1 %vm666_vm0, %v2547_v30  ;;  %v602_v28 = vor.u32 %v601_v8, %v597_v24  ;;  %v2566_v30 = vld [vmem:[%s2634_s25 + $0xc0] sm:$0xff]  ;;  %v607_v55 = vrot.slane %v605_v31, 5  ;;  %v1748_v60 = vrot.slane %v1746_v50, 5 }
  0xf1   : > { %vm2021_vm14 = vcmp.ge.f32.partialorder %v1989_v47, 0.0  ;;  %v2053_v56 = vmul.f32 0.2, %v1989_v47  ;;  %2527 = vmatmul.msk.bf16.gmra.mxu3 %vm666_vm0, %v1798_v45  ;;  %v1799_v46 = vpack.c.b16 %v1782_v29, %v1781_v25  ;;  %v593_v43 = vrot.slane %v592_v38, 4 }
  0xf2   : > { %v603_v54 = vrot.slane %v602_v28, 4  ;;  %v1744_v52 = vrot.slane %v1743_v49, 4 }
  0xf3   : > { %v2085_v62 = vsel %vm2021_vm14, %v1989_v47, %v2053_v56  ;;  %v751_v63 = vpop.f32.mrf.mxu0  ;;  %v1236_v5 = vpop.f32.mrf.mxu2  ;;  %v1733_v47 = vor.u32 %v1732_v10, %v1729_v19 }
  0xf4   : > { %v2117_v3 = vpack.c.bf16 %v2085_v62, %v2085_v62  ;;  %v1889_v58 = vpop.f32.mrf.mxu3  ;;  %v975_v2 = vadd.f32 %v3040_v18, %v751_v63  ;;  %v598_v63 = vsel %vm2649_vm3, %v593_v43, %v597_v24  ;;  %v608_v0 = vsel %vm2649_vm3, %v603_v54, %v607_v55 }
  0xf5   : > { %v1954_v9 = vadd.f32 %v1889_v58, %v1296_v57  ;;  %v979_v16 = vpop.f32.mrf.mxu1  ;;  %v1734_v57 = vrot.slane %v1733_v47, 4  ;;  %v643_v7 = vunpack.c.l.b16 %v608_v0  ;;  %v1749_v4 = vsel %vm2649_vm3, %v1744_v52, %v1748_v60 }
  0xf6   : > { %2150 = vst.msk [vmem:[%s2871_s4 + $0x24] sm:$0xf] %vm2140_vm5, %v2117_v3  ;;  %v1297_v18 = vadd.f32 %v3047_v39, %v975_v2  ;;  %v1784_v15 = vunpack.c.l.b16 %v1749_v4 }
  0xf7   : > { %v1990_v21 = vadd.f32 %v2849_v32, %v1954_v9  ;;  %v1739_v51 = vsel %vm2649_vm3, %v1734_v57, %v1738_v14  ;;  %v3117_v57 = vld [vmem:[%s3172_s2] ss:$0 sm:$0xff] }
  0xf8   : > { %v1783_v6 = vunpack.c.l.b16 %v1739_v51 }
  0xf9   : > { %vm2022_vm15 = vcmp.ge.f32.partialorder %v1990_v21, 0.0  ;;  %v2054_v26 = vmul.f32 0.2, %v1990_v21 }
  0xfa   : > { %v1800_v27 = vpack.c.b16 %v1784_v15, %v1783_v6 }
  0xfb   : > { %v2086_v34 = vsel %vm2022_vm15, %v1990_v21, %v2054_v26  ;;  %v754_v35 = vpop.f32.mrf.mxu0  ;;  %v1238_v41 = vpop.f32.mrf.mxu2 }
  0xfc   : > { %v2118_v37 = vpack.c.bf16 %v2086_v34, %v2086_v34  ;;  %v1891_v40 = vpop.f32.mrf.mxu3  ;;  %v978_v45 = vadd.f32 %v977_v48, %v754_v35 }
  0xfd   : > { %v1955_v42 = vadd.f32 %v1891_v40, %v1297_v18  ;;  %v982_v44 = vpop.f32.mrf.mxu1 }
  0xfe   : > { %2151 = vst.msk [vmem:[%s2871_s4 + $0x28] sm:$0xf] %vm2140_vm5, %v2118_v37  ;;  %2256 = vmatmul.msk.bf16.gmra.mxu0 %vm666_vm0, %v658_v22  ;;  %v1298_v48 = vadd.f32 %v1236_v5, %v978_v45  ;;  %v642_v5 = vunpack.c.l.b16 %v598_v63 }
  0xff   : > { %v1991_v39 = vadd.f32 %v2849_v32, %v1955_v42 }
 0x100   : > { %2459 = vmatmul.msk.bf16.gmra.mxu2 %vm666_vm0, %v2566_v30  ;;  %2341 = vmatmul.msk.bf16.gmra.mxu1 %vm666_vm0, %v2548_v36  ;;  %v659_v59 = vpack.c.b16 %v643_v7, %v642_v5 }
 0x101   : > { %vm2023_vm1 = vcmp.ge.f32.partialorder %v1991_v39, 0.0  ;;  %v2055_v56 = vmul.f32 0.2, %v1991_v39  ;;  %2528 = vmatmul.msk.bf16.gmra.mxu3 %vm666_vm0, %v1799_v46 }
 0x103   : > { %v2087_v61 = vsel %vm2023_vm1, %v1991_v39, %v2055_v56  ;;  %v756_v62 = vpop.f32.mrf.mxu0  ;;  %v1241_v3 = vpop.f32.mrf.mxu2 }
 0x104   : > { %v2119_v53 = vpack.c.bf16 %v2087_v61, %v2087_v61  ;;  %v1894_v1 = vpop.f32.mrf.mxu3  ;;  %v980_v12 = vadd.f32 %v979_v16, %v756_v62 }
 0x105   : > { %v1956_v58 = vadd.f32 %v1894_v1, %v1298_v48  ;;  %v984_v11 = vpop.f32.mrf.mxu1 }
 0x106   : > { %2152 = vst.msk [vmem:[%s2871_s4 + $0x2c] sm:$0xf] %vm2140_vm5, %v2119_v53  ;;  %v1299_v20 = vadd.f32 %v1238_v41, %v980_v12 }
 0x107   : > { %v1992_v9 = vadd.f32 %v2849_v32, %v1956_v58 }
 0x109   : > { %vm2024_vm2 = vcmp.ge.f32.partialorder %v1992_v9, 0.0  ;;  %v2056_v13 = vmul.f32 0.2, %v1992_v9 }
 0x10b   : > { %v2088_v17 = vsel %vm2024_vm2, %v1992_v9, %v2056_v13  ;;  %v759_v21 = vpop.f32.mrf.mxu0  ;;  %v1243_v8 = vpop.f32.mrf.mxu2 }
 0x10c   : > { %v2120_v2 = vpack.c.bf16 %v2088_v17, %v2088_v17  ;;  %v1896_v24 = vpop.f32.mrf.mxu3  ;;  %v983_v25 = vadd.f32 %v982_v44, %v759_v21 }
 0x10d   : > { %v1957_v22 = vadd.f32 %v1896_v24, %v1299_v20  ;;  %v987_v26 = vpop.f32.mrf.mxu1 }
 0x10e   : > { %2153 = vst.msk [vmem:[%s2871_s4 + $0x30] sm:$0xf] %vm2140_vm5, %v2120_v2  ;;  %2257 = vmatmul.msk.bf16.gmra.mxu0 %vm666_vm0, %v659_v59  ;;  %v1300_v31 = vadd.f32 %v1241_v3, %v983_v25 }
 0x10f   : > { %v1993_v16 = vadd.f32 %v2849_v32, %v1957_v22 }
 0x111   : > { %vm2025_vm3 = vcmp.ge.f32.partialorder %v1993_v16, 0.0  ;;  %v2057_v29 = vmul.f32 0.2, %v1993_v16  ;;  %2529 = vmatmul.msk.bf16.gmra.mxu3 %vm666_vm0, %v1800_v27 }
 0x113   : > { %v2089_v19 = vsel %vm2025_vm3, %v1993_v16, %v2057_v29  ;;  %v761_v10 = vpop.f32.mrf.mxu0  ;;  %v1246_v34 = vpop.f32.mrf.mxu2 }
 0x114   : > { %v2121_v14 = vpack.c.bf16 %v2089_v19, %v2089_v19  ;;  %v1899_v33 = vpop.f32.mrf.mxu3  ;;  %v985_v38 = vadd.f32 %v984_v11, %v761_v10 }
 0x115   : > { %v1958_v18 = vadd.f32 %v1899_v33, %v1300_v31  ;;  %v989_v28 = vpop.f32.mrf.mxu1 }
 0x116   : > { %2154 = vst.msk [vmem:[%s2871_s4 + $0x34] sm:$0xf] %vm2140_vm5, %v2121_v14  ;;  %v1301_v40 = vadd.f32 %v1243_v8, %v985_v38 }
 0x117   : > { %v1994_v35 = vadd.f32 %v2849_v32, %v1958_v18 }
 0x119   : > { %vm2026_vm4 = vcmp.ge.f32.partialorder %v1994_v35, 0.0  ;;  %v2058_v23 = vmul.f32 0.2, %v1994_v35 }
 0x11b   : > { %v2090_v37 = vsel %vm2026_vm4, %v1994_v35, %v2058_v23  ;;  %v764_v41 = vpop.f32.mrf.mxu0  ;;  %v1248_v46 = vpop.f32.mrf.mxu2 }
 0x11c   : > { %v2122_v42 = vpack.c.bf16 %v2090_v37, %v2090_v37  ;;  %v1901_v45 = vpop.f32.mrf.mxu3  ;;  %v988_v36 = vadd.f32 %v987_v26, %v764_v41 }
 0x11d   : > { %v1959_v30 = vadd.f32 %v1901_v45, %v1301_v40  ;;  %v992_v49 = vpop.f32.mrf.mxu1 }
 0x11e   : > { %2155 = vst.msk [vmem:[%s2871_s4 + $0x38] sm:$0xf] %vm2140_vm5, %v2122_v42  ;;  %v1302_v39 = vadd.f32 %v1246_v34, %v988_v36 }
 0x11f   : > { %v1995_v47 = vadd.f32 %v2849_v32, %v1959_v30 }
 0x121   : > { %vm2027_vm0 = vcmp.ge.f32.partialorder %v1995_v47, 0.0  ;;  %v2059_v50 = vmul.f32 0.2, %v1995_v47 }
 0x123   : > { %v2091_v44 = vsel %vm2027_vm0, %v1995_v47, %v2059_v50  ;;  %v766_v43 = vpop.f32.mrf.mxu0  ;;  %v1251_v56 = vpop.f32.mrf.mxu2 }
 0x124   : > { %v2123_v54 = vpack.c.bf16 %v2091_v44, %v2091_v44  ;;  %v1904_v55 = vpop.f32.mrf.mxu3  ;;  %v990_v52 = vadd.f32 %v989_v28, %v766_v43 }
 0x125   : > { %v1960_v48 = vadd.f32 %v1904_v55, %v1302_v39  ;;  %v994_v60 = vpop.f32.mrf.mxu1 }
 0x126   : > { %2156 = vst.msk [vmem:[%s2871_s4 + $0x3c] sm:$0xf] %vm2140_vm5, %v2123_v54  ;;  %v1303_v63 = vadd.f32 %v1248_v46, %v990_v52 }
 0x127   : > { %v1996_v32 = vadd.f32 %v3117_v57, %v1960_v48 }
 0x129   : > { %vm2028_vm6 = vcmp.ge.f32.partialorder %v1996_v32, 0.0  ;;  %v2060_v61 = vmul.f32 0.2, %v1996_v32 }
 0x12b   : > { %v2092_v62 = vsel %vm2028_vm6, %v1996_v32, %v2060_v61  ;;  %v769_v0 = vpop.f32.mrf.mxu0  ;;  %v1253_v3 = vpop.f32.mrf.mxu2 }
 0x12c   : > { %v2124_v53 = vpack.c.bf16 %v2092_v62, %v2092_v62  ;;  %v1906_v1 = vpop.f32.mrf.mxu3  ;;  %v993_v5 = vadd.f32 %v992_v49, %v769_v0 }
 0x12d   : > { %v1961_v58 = vadd.f32 %v1906_v1, %v1303_v63  ;;  %v997_v51 = vpop.f32.mrf.mxu1 }
 0x12e   : > { %2157 = vst.msk [vmem:[%s2871_s4 + $0x40] sm:$0xf] %vm2140_vm5, %v2124_v53  ;;  %v1304_v9 = vadd.f32 %v1251_v56, %v993_v5 }
 0x12f   : > { %v1997_v7 = vadd.f32 %v3117_v57, %v1961_v58 }
 0x131   : > { %vm2029_vm7 = vcmp.ge.f32.partialorder %v1997_v7, 0.0  ;;  %v2061_v4 = vmul.f32 0.2, %v1997_v7 }
 0x133   : > { %v2093_v12 = vsel %vm2029_vm7, %v1997_v7, %v2061_v4  ;;  %v771_v11 = vpop.f32.mrf.mxu0  ;;  %v1256_v15 = vpop.f32.mrf.mxu2 }
 0x134   : > { %v2125_v13 = vpack.c.bf16 %v2093_v12, %v2093_v12  ;;  %v1909_v6 = vpop.f32.mrf.mxu3  ;;  %v995_v20 = vadd.f32 %v994_v60, %v771_v11 }
 0x135   : > { %v1962_v59 = vadd.f32 %v1909_v6, %v1304_v9  ;;  %v999_v21 = vpop.f32.mrf.mxu1 }
 0x136   : > { %2158 = vst.msk [vmem:[%s2871_s4 + $0x44] sm:$0xf] %vm2140_vm5, %v2125_v13  ;;  %v1305_v8 = vadd.f32 %v1253_v3, %v995_v20 }
 0x137   : > { %v1998_v17 = vadd.f32 %v3117_v57, %v1962_v59 }
 0x139   : > { %vm2030_vm8 = vcmp.ge.f32.partialorder %v1998_v17, 0.0  ;;  %v2062_v2 = vmul.f32 0.2, %v1998_v17 }
 0x13b   : > { %v2094_v24 = vsel %vm2030_vm8, %v1998_v17, %v2062_v2  ;;  %v774_v22 = vpop.f32.mrf.mxu0  ;;  %v1258_v16 = vpop.f32.mrf.mxu2 }
 0x13c   : > { %v2126_v25 = vpack.c.bf16 %v2094_v24, %v2094_v24  ;;  %v1911_v27 = vpop.f32.mrf.mxu3  ;;  %v998_v29 = vadd.f32 %v997_v51, %v774_v22 }
 0x13d   : > { %v1963_v26 = vadd.f32 %v1911_v27, %v1305_v8  ;;  %v1002_v19 = vpop.f32.mrf.mxu1 }
 0x13e   : > { %2159 = vst.msk [vmem:[%s2871_s4 + $0x48] sm:$0xf] %vm2140_vm5, %v2126_v25  ;;  %v1306_v14 = vadd.f32 %v1256_v15, %v998_v29 }
 0x13f   : > { %v1999_v31 = vadd.f32 %v3117_v57, %v1963_v26 }
 0x141   : > { %vm2031_vm9 = vcmp.ge.f32.partialorder %v1999_v31, 0.0  ;;  %v2063_v10 = vmul.f32 0.2, %v1999_v31 }
 0x143   : > { %v2095_v33 = vsel %vm2031_vm9, %v1999_v31, %v2063_v10  ;;  %v776_v34 = vpop.f32.mrf.mxu0  ;;  %v1261_v38 = vpop.f32.mrf.mxu2 }
 0x144   : > { %v2127_v18 = vpack.c.bf16 %v2095_v33, %v2095_v33  ;;  %v1914_v35 = vpop.f32.mrf.mxu3  ;;  %v1000_v37 = vadd.f32 %v999_v21, %v776_v34 }
 0x145   : > { %v1964_v28 = vadd.f32 %v1914_v35, %v1306_v14  ;;  %v1004_v40 = vpop.f32.mrf.mxu1 }
 0x146   : > { %2160 = vst.msk [vmem:[%s2871_s4 + $0x4c] sm:$0xf] %vm2140_vm5, %v2127_v18  ;;  %v1307_v45 = vadd.f32 %v1258_v16, %v1000_v37 }
 0x147   : > { %v2000_v23 = vadd.f32 %v3117_v57, %v1964_v28 }
 0x149   : > { %vm2032_vm10 = vcmp.ge.f32.partialorder %v2000_v23, 0.0  ;;  %v2064_v41 = vmul.f32 0.2, %v2000_v23 }
 0x14b   : > { %v2096_v42 = vsel %vm2032_vm10, %v2000_v23, %v2064_v41  ;;  %v779_v46 = vpop.f32.mrf.mxu0  ;;  %v1263_v47 = vpop.f32.mrf.mxu2 }
 0x14c   : > { %v2128_v30 = vpack.c.bf16 %v2096_v42, %v2096_v42  ;;  %v1916_v36 = vpop.f32.mrf.mxu3  ;;  %v1003_v50 = vadd.f32 %v1002_v19, %v779_v46 }
 0x14d   : > { %v1965_v49 = vadd.f32 %v1916_v36, %v1307_v45  ;;  %v1007_v44 = vpop.f32.mrf.mxu1 }
 0x14e   : > { %2161 = vst.msk [vmem:[%s2871_s4 + $0x50] sm:$0xf] %vm2140_vm5, %v2128_v30  ;;  %v1308_v54 = vadd.f32 %v1261_v38, %v1003_v50 }
 0x14f   : > { %v2001_v39 = vadd.f32 %v3117_v57, %v1965_v49 }
 0x151   : > { %vm2033_vm11 = vcmp.ge.f32.partialorder %v2001_v39, 0.0  ;;  %v2065_v43 = vmul.f32 0.2, %v2001_v39 }
 0x153   : > { %v2097_v55 = vsel %vm2033_vm11, %v2001_v39, %v2065_v43  ;;  %v781_v56 = vpop.f32.mrf.mxu0  ;;  %v1266_v52 = vpop.f32.mrf.mxu2 }
 0x154   : > { %v2129_v48 = vpack.c.bf16 %v2097_v55, %v2097_v55  ;;  %v1919_v32 = vpop.f32.mrf.mxu3  ;;  %v1005_v62 = vadd.f32 %v1004_v40, %v781_v56 }
 0x155   : > { %v1966_v60 = vadd.f32 %v1919_v32, %v1308_v54  ;;  %v1009_v0 = vpop.f32.mrf.mxu1 }
 0x156   : > { %2162 = vst.msk [vmem:[%s2871_s4 + $0x54] sm:$0xf] %vm2140_vm5, %v2129_v48  ;;  %v1309_v1 = vadd.f32 %v1263_v47, %v1005_v62 }
 0x157   : > { %v2002_v61 = vadd.f32 %v3117_v57, %v1966_v60 }
 0x159   : > { %vm2034_vm12 = vcmp.ge.f32.partialorder %v2002_v61, 0.0  ;;  %v2066_v63 = vmul.f32 0.2, %v2002_v61 }
 0x15b   : > { %v2098_v53 = vsel %vm2034_vm12, %v2002_v61, %v2066_v63  ;;  %v784_v3 = vpop.f32.mrf.mxu0  ;;  %v1268_v4 = vpop.f32.mrf.mxu2 }
 0x15c   : > { %v2130_v58 = vpack.c.bf16 %v2098_v53, %v2098_v53  ;;  %v1921_v5 = vpop.f32.mrf.mxu3  ;;  %v1008_v51 = vadd.f32 %v1007_v44, %v784_v3 }
 0x15d   : > { %v1967_v7 = vadd.f32 %v1921_v5, %v1309_v1  ;;  %v1012_v17 = vpop.f32.mrf.mxu1 }
 0x15e   : > { %2163 = vst.msk [vmem:[%s2871_s4 + $0x58] sm:$0xf] %vm2140_vm5, %v2130_v58  ;;  %v1310_v11 = vadd.f32 %v1266_v52, %v1008_v51 }
 0x15f   : > { %v2003_v9 = vadd.f32 %v3117_v57, %v1967_v7 }
 0x161   : > { %vm2035_vm13 = vcmp.ge.f32.partialorder %v2003_v9, 0.0  ;;  %v2067_v12 = vmul.f32 0.2, %v2003_v9 }
 0x163   : > { %v2099_v13 = vsel %vm2035_vm13, %v2003_v9, %v2067_v12  ;;  %v786_v6 = vpop.f32.mrf.mxu0  ;;  %v1271_v24 = vpop.f32.mrf.mxu2 }
 0x164   : > { %v2131_v15 = vpack.c.bf16 %v2099_v13, %v2099_v13  ;;  %v1924_v59 = vpop.f32.mrf.mxu3  ;;  %v1010_v2 = vadd.f32 %v1009_v0, %v786_v6 }
 0x165   : > { %v1968_v20 = vadd.f32 %v1924_v59, %v1310_v11  ;;  %v1014_v19 = vpop.f32.mrf.mxu1 }
 0x166   : > { %2164 = vst.msk [vmem:[%s2871_s4 + $0x5c] sm:$0xf] %vm2140_vm5, %v2131_v15  ;;  %v1311_v25 = vadd.f32 %v1268_v4, %v1010_v2 }
 0x167   : > { %v2004_v21 = vadd.f32 %v3117_v57, %v1968_v20 }
 0x169   : > { %vm2036_vm14 = vcmp.ge.f32.partialorder %v2004_v21, 0.0  ;;  %v2068_v8 = vmul.f32 0.2, %v2004_v21 }
 0x16b   : > { %v2100_v22 = vsel %vm2036_vm14, %v2004_v21, %v2068_v8  ;;  %v789_v27 = vpop.f32.mrf.mxu0  ;;  %v1273_v34 = vpop.f32.mrf.mxu2 }
 0x16c   : > { %v2132_v16 = vpack.c.bf16 %v2100_v22, %v2100_v22  ;;  %v1926_v26 = vpop.f32.mrf.mxu3  ;;  %v1013_v31 = vadd.f32 %v1012_v17, %v789_v27 }
 0x16d   : > { %v1969_v29 = vadd.f32 %v1926_v26, %v1311_v25  ;;  %v1017_v41 = vpop.f32.mrf.mxu1 }
 0x16e   : > { %2165 = vst.msk [vmem:[%s2871_s4 + $0x60] sm:$0xf] %vm2140_vm5, %v2132_v16  ;;  %v1312_v33 = vadd.f32 %v1271_v24, %v1013_v31 }
 0x16f   : > { %v2005_v10 = vadd.f32 %v3117_v57, %v1969_v29 }
 0x171   : > { %vm2037_vm15 = vcmp.ge.f32.partialorder %v2005_v10, 0.0  ;;  %v2069_v14 = vmul.f32 0.2, %v2005_v10 }
 0x173   : > { %v2101_v18 = vsel %vm2037_vm15, %v2005_v10, %v2069_v14  ;;  %v791_v35 = vpop.f32.mrf.mxu0  ;;  %v1276_v47 = vpop.f32.mrf.mxu2 }
 0x174   : > { %v2133_v38 = vpack.c.bf16 %v2101_v18, %v2101_v18  ;;  %v1929_v28 = vpop.f32.mrf.mxu3  ;;  %v1015_v40 = vadd.f32 %v1014_v19, %v791_v35 }
 0x175   : > { %v1970_v23 = vadd.f32 %v1929_v28, %v1312_v33  ;;  %v1019_v55 = vpop.f32.mrf.mxu1 }
 0x176   : > { %2166 = vst.msk [vmem:[%s2871_s4 + $0x64] sm:$0xf] %vm2140_vm5, %v2133_v38  ;;  %v1313_v46 = vadd.f32 %v1273_v34, %v1015_v40 }
 0x177   : > { %v2006_v37 = vadd.f32 %v3117_v57, %v1970_v23 }
 0x179   : > { %vm2038_vm1 = vcmp.ge.f32.partialorder %v2006_v37, 0.0  ;;  %v2070_v42 = vmul.f32 0.2, %v2006_v37 }
 0x17b   : > { %v2102_v45 = vsel %vm2038_vm1, %v2006_v37, %v2070_v42  ;;  %v794_v30 = vpop.f32.mrf.mxu0  ;;  %v1278_v61 = vpop.f32.mrf.mxu2 }
 0x17c   : > { %v2134_v36 = vpack.c.bf16 %v2102_v45, %v2102_v45  ;;  %v1931_v49 = vpop.f32.mrf.mxu3  ;;  %v1018_v39 = vadd.f32 %v1017_v41, %v794_v30 }
 0x17d   : > { %v1971_v50 = vadd.f32 %v1931_v49, %v1313_v46  ;;  %v1022_v5 = vpop.f32.mrf.mxu1 }
 0x17e   : > { %2167 = vst.msk [vmem:[%s2871_s4 + $0x68] sm:$0xf] %vm2140_vm5, %v2134_v36  ;;  %v1314_v54 = vadd.f32 %v1276_v47, %v1018_v39 }
 0x17f   : > { %v2007_v44 = vadd.f32 %v3117_v57, %v1971_v50 }
 0x181   : > { %vm2039_vm2 = vcmp.ge.f32.partialorder %v2007_v44, 0.0  ;;  %v2071_v43 = vmul.f32 0.2, %v2007_v44 }
 0x183   : > { %v2103_v56 = vsel %vm2039_vm2, %v2007_v44, %v2071_v43  ;;  %v796_v48 = vpop.f32.mrf.mxu0  ;;  %v1281_v12 = vpop.f32.mrf.mxu2 }
 0x184   : > { %v2135_v32 = vpack.c.bf16 %v2103_v56, %v2103_v56  ;;  %v1934_v52 = vpop.f32.mrf.mxu3  ;;  %v1020_v63 = vadd.f32 %v1019_v55, %v796_v48 }
 0x185   : > { %v1972_v60 = vadd.f32 %v1934_v52, %v1314_v54  ;;  %v1024_v21 = vpop.f32.mrf.mxu1 }
 0x186   : > { %2168 = vst.msk [vmem:[%s2871_s4 + $0x6c] sm:$0xf] %vm2140_vm5, %v2135_v32  ;;  %v1315_v1 = vadd.f32 %v1278_v61, %v1020_v63 }
 0x187   : > { %v2008_v62 = vadd.f32 %v3117_v57, %v1972_v60 }
 0x189   : > { %vm2040_vm3 = vcmp.ge.f32.partialorder %v2008_v62, 0.0  ;;  %v2072_v0 = vmul.f32 0.2, %v2008_v62 }
 0x18b   : > { %v2104_v53 = vsel %vm2040_vm3, %v2008_v62, %v2072_v0  ;;  %v799_v3 = vpop.f32.mrf.mxu0  ;;  %v1283_v22 = vpop.f32.mrf.mxu2 }
 0x18c   : > { %v2136_v58 = vpack.c.bf16 %v2104_v53, %v2104_v53  ;;  %v1936_v7 = vpop.f32.mrf.mxu3  ;;  %v1023_v4 = vadd.f32 %v1022_v5, %v799_v3 }
 0x18d   : > { %v1973_v51 = vadd.f32 %v1936_v7, %v1315_v1 }
 0x18e   : > { %2169 = vst.msk [vmem:[%s2871_s4 + $0x70] sm:$0xf] %vm2140_vm5, %v2136_v58  ;;  %v1316_v13 = vadd.f32 %v1281_v12, %v1023_v4 }
 0x18f   : > { %v2009_v9 = vadd.f32 %v3117_v57, %v1973_v51 }
 0x191   : > { %vm2041_vm4 = vcmp.ge.f32.partialorder %v2009_v9, 0.0  ;;  %v2073_v11 = vmul.f32 0.2, %v2009_v9 }
 0x193   : > { %v2105_v6 = vsel %vm2041_vm4, %v2009_v9, %v2073_v11  ;;  %v801_v17 = vpop.f32.mrf.mxu0 }
 0x194   : > { %v2137_v15 = vpack.c.bf16 %v2105_v6, %v2105_v6  ;;  %v1939_v59 = vpop.f32.mrf.mxu3  ;;  %v1025_v24 = vadd.f32 %v1024_v21, %v801_v17 }
 0x195   : > { %v1974_v20 = vadd.f32 %v1939_v59, %v1316_v13 }
 0x196   : > { %2170 = vst.msk [vmem:[%s2871_s4 + $0x74] sm:$0xf] %vm2140_vm5, %v2137_v15  ;;  %v1317_v27 = vadd.f32 %v1283_v22, %v1025_v24 }
 0x197   : > { %v2010_v2 = vadd.f32 %v3117_v57, %v1974_v20 }
 0x199   : > { %vm2042_vm0 = vcmp.ge.f32.partialorder %v2010_v2, 0.0  ;;  %v2074_v8 = vmul.f32 0.2, %v2010_v2 }
 0x19b   : > { %v2106_v25 = vsel %vm2042_vm0, %v2010_v2, %v2074_v8 }
 0x19c   : > { %v2138_v16 = vpack.c.bf16 %v2106_v25, %v2106_v25  ;;  %v1941_v26 = vpop.f32.mrf.mxu3 }
 0x19d   : > { %v1975_v29 = vadd.f32 %v1941_v26, %v1317_v27 }
 0x19e   : > { %2171 = vst.msk [vmem:[%s2871_s4 + $0x78] sm:$0xf] %vm2140_vm5, %v2138_v16 }
 0x19f   : > { %v2011_v31 = vadd.f32 %v3117_v57, %v1975_v29 }
 0x1a1   : > { %vm2043_vm6 = vcmp.ge.f32.partialorder %v2011_v31, 0.0  ;;  %v2075_v19 = vmul.f32 0.2, %v2011_v31 }
 0x1a3   : > { %v2107_v10 = vsel %vm2043_vm6, %v2011_v31, %v2075_v19 }
 0x1a4   : > { %v2139_v14 = vpack.c.bf16 %v2107_v10, %v2107_v10 }
 0x1a6   : > { %2172 = vst.msk [vmem:[%s2871_s4 + $0x7c] sm:$0xf] %vm2140_vm5, %v2139_v14 }
 0x1a7 PF: > { %s13_s12 = sadd.s32 1, %s2586_s12  }
 0x1a8   : > { %p10_p4 = scmp.ge.s32.totalorder %s13_s12, 4  }
 0x1aa   :  { %12 = sbr.rel (!%p10_p4) target bundleno = 1 (0x1), region = 66 }

// kernel: _lambda_.6
= control target key start
LH: loop header
LB: loop body
LE: loop exit
PB: predicated region body
PF: predicated region fallthrough
CT: control target
= control target key end

     0   :  { %s1041_s12 = smov 0   ;;  %s1224_s0 = inlined_call_operand.vmem [shape: bf16[2,9,9,32], index: 0, kind: input, shape index: {}]   ;;  %s1225_s1 = inlined_call_operand.vmem [shape: bf16[2,2,32,16], index: 1, kind: input, shape index: {}]   ;;  %s1226_s2 = inlined_call_operand.vmem [shape: f32[1,16], index: 2, kind: input, shape index: {}]   ;;  %s1227_s3 = inlined_call_operand.vmem [shape: bf16[2,8,8,16], index: 3, kind: output, shape index: {}]  }
   0x1 LB: > { %s860_s13 = sadd.s32 4294967295, %s1019_s12   ;;  %p864_p0 = scmp.ge.s32.totalorder %s1019_s12, 1  ;;  %s1019_s12 = sphi %s1041_s12, %s13_s12  }
   0x2   : > { %p137_p1 = scmp.lt.s32.totalorder %s1019_s12, 3 }
   0x4   : > { %p138_p2 = pnand %p864_p0, %p137_p1 }
   0x5   : > { %p161_p3 = scmp.lt.s32.totalorder (!%p138_p2), %s860_s13, 1 }
   0x6   : > { %141 = sbr.rel (%p138_p2) target bundleno = 233 (0xe9), region = 32 }
   0xb   : > { %v1000_v0 = vld [vmem:[%s1225_s1 + $0x28] sm:$0xff]  ;;  %v994_v2 = vld [vmem:[%s1225_s1 + $0x18] sm:$0xff]  ;;  %v999_v4 = vld [vmem:[%s1225_s1 + $0x20] sm:$0xff]  ;;  %s1231_s13 = smov (!%p161_p3, %s860_s13), 1  ;;  %vm336_vm0 = vcmask 261120   ;;  %vm796_vm5 = vcmask 125952  }
   0xc   : > { %v992_v1 = vld [vmem:[%s1225_s1 + $0x8] sm:$0xff]  ;;  %v1002_v3 = vld [vmem:[%s1225_s1 + $0x38] sm:$0xff]  ;;  %515 = vmatpush.bf16.msra.mxu2 %v1000_v0  ;;  %v991_v5 = vld [vmem:[%s1225_s1] sm:$0xff]  ;;  %355 = vmatpush.bf16.msra.mxu0 %v994_v2  ;;  %s1003_s30 = smul.u32 72, %s1231_s13  ;;  %vm192_vm1 = vsmask.f32 3328 }
   0xd   : > { %428 = vmatpush.bf16.msra.mxu1 %v992_v1  ;;  %721 = vmatpush.bf16.msra.mxu3 %v1002_v3  ;;  %v993_v6 = vld [vmem:[%s1225_s1 + $0x10] sm:$0xff]  ;;  %vm193_vm2 = vsmask.f32 7440  ;;  %v1189_v39 = vld [vmem:[%s1226_s2] ss:$0 sm:$0xff]  ;;  %s986_s9 = sshll.u32 %s1231_s13, 5 }
   0xe   : > { %v1001_v7 = vld [vmem:[%s1225_s1 + $0x30] sm:$0xff]  ;;  %s1079_s6 = scalar_lea.vmem %s1224_s0, %s1003_s30  ;;  %vm1100_vm3 = vmor %vm192_vm1, %vm193_vm2  ;;  %s1196_s14 = scalar_lea.vmem %s1227_s3, %s986_s9 }
   0xf   : > { %v926_v8 = vld [vmem:[%s1079_s6 + $0x8] sm:$0xf]  ;;  %v995_v9 = vld [vmem:[%s1079_s6 + $0xc] sm:$0xf0]  ;;  %v886_v10 = vld [vmem:[%s1079_s6] sm:$0xf] }
  0x10   : > { %516 = vmatpush.bf16.msra.mxu2 %v999_v4  ;;  %356 = vmatpush.bf16.msra.mxu0 %v993_v6  ;;  %v927_v11 = vor.u32 %v995_v9, %v926_v8  ;;  %v987_v12 = vld [vmem:[%s1079_s6 + $0x4] sm:$0xf0]  ;;  %v172_v13 = vld [vmem:[%s1079_s6] sm:$0xf]  ;;  %v184_v16 = vld [vmem:[%s1079_s6 + $0x4] sm:$0x1] }
  0x11   : > { %429 = vmatpush.bf16.msra.mxu1 %v991_v5  ;;  %722 = vmatpush.bf16.msra.mxu3 %v1001_v7  ;;  %v173_v14 = vld [vmem:[%s1079_s6 + $0x8] sm:$0xf]  ;;  %v887_v15 = vor.u32 %v987_v12, %v886_v10  ;;  %v185_v17 = vld [vmem:[%s1079_s6 + $0xc] sm:$0x1]  ;;  %v196_v18 = vshrl.u32 %v172_v13, 16  ;;  %v199_v19 = vshll.u32 %v172_v13, 16 }
  0x12   : > { %v205_v20 = vshll.u32 %v184_v16, 16  ;;  %v210_v21 = vshrl.u32 %v173_v14, 16  ;;  %v213_v22 = vshll.u32 %v173_v14, 16  ;;  %v219_v23 = vshll.u32 %v185_v17, 16  ;;  %v952_v24 = vld [vmem:[%s1079_s6 + $0x8] sm:$0xf] }
  0x13   : > { %948 = vmatmul.msk.bf16.vlgmr.msra.gmra.mxu2 %vm336_vm0, %v927_v11  ;;  %v198_v25 = vrot.slane %v196_v18, 4  ;;  %v201_v26 = vrot.slane %v199_v19, 5  ;;  %v953_v27 = vld [vmem:[%s1079_s6 + $0xc] sm:$0x1]  ;;  %v954_v28 = vld [vmem:[%s1079_s6 + $0x10] sm:$0xf] }
  0x14   : > { %908 = vmatmul.msk.bf16.vlgmr.msra.gmra.mxu1 %vm336_vm0, %v887_v15  ;;  %v207_v29 = vrot.slane %v205_v20, 5  ;;  %v212_v30 = vrot.slane %v210_v21, 4  ;;  %v215_v31 = vrot.slane %v213_v22, 5  ;;  %v221_v32 = vrot.slane %v219_v23, 5  ;;  %v955_v33 = vld [vmem:[%s1079_s6 + $0x14] sm:$0x1] }
  0x15   : > { %v202_v34 = vor.u32 %v201_v26, %v198_v25  ;;  %v563_v35 = vshrl.u32 %v952_v24, 16  ;;  %v566_v36 = vshll.u32 %v952_v24, 16  ;;  %v572_v37 = vshll.u32 %v953_v27, 16  ;;  %v1096_v38 = vld [vmem:[%s1079_s6 + $0x18] sm:$0xf] }
  0x16   : > { %v216_v40 = vor.u32 %v215_v31, %v212_v30  ;;  %v577_v41 = vshrl.u32 %v954_v28, 16  ;;  %v580_v42 = vshll.u32 %v954_v28, 16  ;;  %v586_v43 = vshll.u32 %v955_v33, 16  ;;  %v996_v44 = vld [vmem:[%s1079_s6 + $0x1c] sm:$0xf0] }
  0x17   : > { %v203_v45 = vrot.slane %v202_v34, 4  ;;  %v565_v46 = vrot.slane %v563_v35, 4  ;;  %v568_v47 = vrot.slane %v566_v36, 5  ;;  %v574_v48 = vrot.slane %v572_v37, 5  ;;  %v890_v49 = vld [vmem:[%s1079_s6 + $0x10] sm:$0xf] }
  0x18   : > { %v217_v50 = vrot.slane %v216_v40, 4  ;;  %v579_v51 = vrot.slane %v577_v41, 4  ;;  %v582_v52 = vrot.slane %v580_v42, 5  ;;  %v588_v53 = vrot.slane %v586_v43, 5  ;;  %v988_v54 = vld [vmem:[%s1079_s6 + $0x14] sm:$0xf0] }
  0x19   : > { %v208_v55 = vsel %vm1100_vm3, %v203_v45, %v207_v29  ;;  %v569_v56 = vor.u32 %v568_v47, %v565_v46  ;;  %v931_v57 = vor.u32 %v996_v44, %v1096_v38  ;;  %v891_v58 = vor.u32 %v988_v54, %v890_v49  ;;  %v174_v59 = vld [vmem:[%s1079_s6 + $0x10] sm:$0xf]  ;;  %v175_v60 = vld [vmem:[%s1079_s6 + $0x18] sm:$0xf]  ;;  %v186_v61 = vld [vmem:[%s1079_s6 + $0x14] sm:$0x1] }
  0x1a   : > { %v222_v62 = vsel %vm1100_vm3, %v217_v50, %v221_v32  ;;  %v312_v63 = vunpack.c.l.b16 %v208_v55  ;;  %v583_v0 = vor.u32 %v582_v52, %v579_v51  ;;  %v224_v1 = vshrl.u32 %v174_v59, 16  ;;  %v187_v4 = vld [vmem:[%s1079_s6 + $0x1c] sm:$0x1]  ;;  %v956_v11 = vld [vmem:[%s1079_s6 + $0x18] sm:$0xf] }
  0x1b   : > { %v313_v2 = vunpack.c.l.b16 %v222_v62  ;;  %v570_v3 = vrot.slane %v569_v56, 4  ;;  %v227_v5 = vshll.u32 %v174_v59, 16  ;;  %v233_v6 = vshll.u32 %v186_v61, 16  ;;  %v957_v16 = vld [vmem:[%s1079_s6 + $0x1c] sm:$0x1] }
  0x1c   : > { %v584_v7 = vrot.slane %v583_v0, 4  ;;  %v226_v8 = vrot.slane %v224_v1, 4  ;;  %v238_v9 = vshrl.u32 %v175_v60, 16  ;;  %v241_v10 = vshll.u32 %v175_v60, 16  ;;  %v958_v17 = vld [vmem:[%s1079_s6 + $0x20] sm:$0xf] }
  0x1d   : > { %v320_v12 = vpack.c.b16 %v313_v2, %v312_v63  ;;  %v575_v13 = vsel %vm1100_vm3, %v570_v3, %v574_v48  ;;  %v229_v14 = vrot.slane %v227_v5, 5  ;;  %v235_v15 = vrot.slane %v233_v6, 5  ;;  %v959_v27 = vld [vmem:[%s1079_s6 + $0x24] sm:$0x1]  ;;  %v176_v37 = vld [vmem:[%s1079_s6 + $0x20] sm:$0xf] }
  0x1e   : > { %v589_v18 = vsel %vm1100_vm3, %v584_v7, %v588_v53  ;;  %v679_v19 = vunpack.c.l.b16 %v575_v13  ;;  %v240_v20 = vrot.slane %v238_v9, 4  ;;  %v243_v21 = vrot.slane %v241_v10, 5  ;;  %v177_v43 = vld [vmem:[%s1079_s6 + $0x28] sm:$0xf]  ;;  %v997_v51 = vld [vmem:[%s1079_s6 + $0x2c] sm:$0xf0] }
  0x1f   : > { %880 = vmatmul.msk.bf16.vlgmr.msra.gmra.mxu0 %vm336_vm0, %v320_v12  ;;  %v680_v22 = vunpack.c.l.b16 %v589_v18  ;;  %v230_v23 = vor.u32 %v229_v14, %v226_v8  ;;  %v247_v24 = vshll.u32 %v187_v4, 16  ;;  %v591_v25 = vshrl.u32 %v956_v11, 16  ;;  %v934_v47 = vld [vmem:[%s1079_s6 + $0x28] sm:$0xf]  ;;  %v188_v52 = vld [vmem:[%s1079_s6 + $0x24] sm:$0x1] }
  0x20   : > { %v244_v26 = vor.u32 %v243_v21, %v240_v20  ;;  %v594_v28 = vshll.u32 %v956_v11, 16  ;;  %v600_v29 = vshll.u32 %v957_v16, 16  ;;  %v605_v30 = vshrl.u32 %v958_v17, 16  ;;  %v189_v55 = vld [vmem:[%s1079_s6 + $0x2c] sm:$0x1] }
  0x21   : > { %v687_v31 = vpack.c.b16 %v680_v22, %v679_v19  ;;  %v231_v32 = vrot.slane %v230_v23, 4  ;;  %v249_v33 = vrot.slane %v247_v24, 5  ;;  %v593_v34 = vrot.slane %v591_v25, 4  ;;  %v960_v62 = vld [vmem:[%s1079_s6 + $0x28] sm:$0xf] }
  0x22   : > { %v245_v35 = vrot.slane %v244_v26, 4  ;;  %v596_v36 = vrot.slane %v594_v28, 5  ;;  %v607_v40 = vrot.slane %v605_v30, 4  ;;  %v608_v41 = vshll.u32 %v958_v17, 16  ;;  %v962_v3 = vld [vmem:[%s1079_s6 + $0x30] sm:$0xf] }
  0x23   : > { %949 = vmatmul.msk.bf16.gmra.mxu2 %vm336_vm0, %v931_v57  ;;  %980 = vmatmul.msk.bf16.vlgmr.msra.gmra.mxu3 %vm336_vm0, %v687_v31  ;;  %v236_v38 = vsel %vm1100_vm3, %v231_v32, %v235_v15  ;;  %v614_v42 = vshll.u32 %v959_v27, 16  ;;  %v602_v46 = vrot.slane %v600_v29, 5  ;;  %v252_v53 = vshrl.u32 %v176_v37, 16  ;;  %v961_v10 = vld [vmem:[%s1079_s6 + $0x2c] sm:$0x1] }
  0x24   : > { %909 = vmatmul.msk.bf16.gmra.mxu1 %vm336_vm0, %v891_v58  ;;  %v250_v44 = vsel %vm1100_vm3, %v245_v35, %v249_v33  ;;  %v597_v45 = vor.u32 %v596_v36, %v593_v34  ;;  %v314_v48 = vunpack.c.l.b16 %v236_v38  ;;  %v610_v50 = vrot.slane %v608_v41, 5  ;;  %v894_v15 = vld [vmem:[%s1079_s6 + $0x20] sm:$0xf]  ;;  %v963_v17 = vld [vmem:[%s1079_s6 + $0x34] sm:$0x1] }
  0x25   : > { %v315_v49 = vunpack.c.l.b16 %v250_v44  ;;  %v255_v56 = vshll.u32 %v176_v37, 16  ;;  %v266_v57 = vshrl.u32 %v177_v43, 16  ;;  %v616_v59 = vrot.slane %v614_v42, 5  ;;  %v989_v20 = vld [vmem:[%s1079_s6 + $0x24] sm:$0xf0] }
  0x26   : > { %v598_v54 = vrot.slane %v597_v45, 4  ;;  %v611_v58 = vor.u32 %v610_v50, %v607_v40  ;;  %v254_v60 = vrot.slane %v252_v53, 4  ;;  %v269_v61 = vshll.u32 %v177_v43, 16  ;;  %v178_v35 = vld [vmem:[%s1079_s6 + $0x30] sm:$0xf] }
  0x27   : > { %v257_v0 = vrot.slane %v255_v56, 5  ;;  %v261_v1 = vshll.u32 %v188_v52, 16  ;;  %v268_v2 = vrot.slane %v266_v57, 4  ;;  %v321_v4 = vpack.c.b16 %v315_v49, %v314_v48  ;;  %v179_v36 = vld [vmem:[%s1079_s6 + $0x38] sm:$0xf] }
  0x28   : > { %v603_v63 = vsel %vm1100_vm3, %v598_v54, %v602_v46  ;;  %v612_v5 = vrot.slane %v611_v58, 4  ;;  %v935_v6 = vor.u32 %v997_v51, %v934_v47  ;;  %v271_v7 = vrot.slane %v269_v61, 5  ;;  %v964_v49 = vld [vmem:[%s1079_s6 + $0x38] sm:$0xf]  ;;  %v966_v50 = vld [vmem:[%s1079_s6 + $0x40] sm:$0xf] }
  0x29   : > { %v258_v8 = vor.u32 %v257_v0, %v254_v60  ;;  %v275_v9 = vshll.u32 %v189_v55, 16  ;;  %v619_v11 = vshrl.u32 %v960_v62, 16  ;;  %v622_v12 = vshll.u32 %v960_v62, 16  ;;  %v190_v56 = vld [vmem:[%s1079_s6 + $0x34] sm:$0x1] }
  0x2a   : > { %v617_v13 = vsel %vm1100_vm3, %v612_v5, %v616_v59  ;;  %v681_v14 = vunpack.c.l.b16 %v603_v63  ;;  %v272_v16 = vor.u32 %v271_v7, %v268_v2  ;;  %v633_v18 = vshrl.u32 %v962_v3, 16  ;;  %v191_v60 = vld [vmem:[%s1079_s6 + $0x3c] sm:$0x1]  ;;  %v898_v7 = vld [vmem:[%s1079_s6 + $0x30] sm:$0xf] }
  0x2b   : > { %v682_v19 = vunpack.c.l.b16 %v617_v13  ;;  %v263_v21 = vrot.slane %v261_v1, 5  ;;  %v621_v22 = vrot.slane %v619_v11, 4  ;;  %v624_v23 = vrot.slane %v622_v12, 5  ;;  %v965_v12 = vld [vmem:[%s1079_s6 + $0x3c] sm:$0x1] }
  0x2c   : > { %v259_v24 = vrot.slane %v258_v8, 4  ;;  %v628_v25 = vshll.u32 %v961_v10, 16  ;;  %v635_v26 = vrot.slane %v633_v18, 4  ;;  %v636_v27 = vshll.u32 %v962_v3, 16  ;;  %v938_v3 = vld [vmem:[%s1079_s6 + $0x38] sm:$0xf] }
  0x2d   : > { %v273_v28 = vrot.slane %v272_v16, 4  ;;  %v277_v29 = vrot.slane %v275_v9, 5  ;;  %v625_v30 = vor.u32 %v624_v23, %v621_v22  ;;  %v642_v31 = vshll.u32 %v963_v17, 16  ;;  %v990_v8 = vld [vmem:[%s1079_s6 + $0x34] sm:$0xf0] }
  0x2e   : > { %v688_v32 = vpack.c.b16 %v682_v19, %v681_v14  ;;  %v895_v33 = vor.u32 %v989_v20, %v894_v15  ;;  %v638_v34 = vrot.slane %v636_v27, 5  ;;  %v264_v37 = vsel %vm1100_vm3, %v259_v24, %v263_v21  ;;  %v967_v17 = vld [vmem:[%s1079_s6 + $0x44] sm:$0x1] }
  0x2f   : > { %881 = vmatmul.msk.bf16.gmra.mxu0 %vm336_vm0, %v321_v4  ;;  %v630_v38 = vrot.slane %v628_v25, 5  ;;  %v278_v41 = vsel %vm1100_vm3, %v273_v28, %v277_v29  ;;  %v626_v42 = vrot.slane %v625_v30, 4  ;;  %v644_v43 = vrot.slane %v642_v31, 5  ;;  %v998_v4 = vld [vmem:[%s1079_s6 + $0x3c] sm:$0xf0] }
  0x30   : > { %v639_v40 = vor.u32 %v638_v34, %v635_v26  ;;  %v280_v44 = vshrl.u32 %v178_v35, 16  ;;  %v283_v46 = vshll.u32 %v178_v35, 16  ;;  %v294_v47 = vshrl.u32 %v179_v36, 16 }
  0x31   : > { %v297_v48 = vshll.u32 %v179_v36, 16  ;;  %v316_v51 = vunpack.c.l.b16 %v264_v37  ;;  %v317_v52 = vunpack.c.l.b16 %v278_v41  ;;  %v631_v53 = vsel %vm1100_vm3, %v626_v42, %v630_v38 }
  0x32   : > { %v640_v45 = vrot.slane %v639_v40, 4  ;;  %v282_v54 = vrot.slane %v280_v44, 4  ;;  %v285_v57 = vrot.slane %v283_v46, 5  ;;  %v296_v58 = vrot.slane %v294_v47, 4 }
  0x33   : > { %950 = vmatmul.msk.bf16.gmra.mxu2 %vm336_vm0, %v935_v6  ;;  %981 = vmatmul.msk.bf16.gmra.mxu3 %vm336_vm0, %v688_v32  ;;  %v299_v59 = vrot.slane %v297_v48, 5  ;;  %v647_v61 = vshrl.u32 %v964_v49, 16  ;;  %v650_v62 = vshll.u32 %v964_v49, 16  ;;  %v661_v63 = vshrl.u32 %v966_v50, 16 }
  0x34   : > { %910 = vmatmul.msk.bf16.gmra.mxu1 %vm336_vm0, %v895_v33  ;;  %v645_v55 = vsel %vm1100_vm3, %v640_v45, %v644_v43  ;;  %v664_v0 = vshll.u32 %v966_v50, 16  ;;  %v322_v1 = vpack.c.b16 %v317_v52, %v316_v51  ;;  %v683_v2 = vunpack.c.l.b16 %v631_v53 }
  0x35   : > { %v289_v5 = vshll.u32 %v190_v56, 16  ;;  %v684_v6 = vunpack.c.l.b16 %v645_v55  ;;  %v286_v9 = vor.u32 %v285_v57, %v282_v54  ;;  %v300_v10 = vor.u32 %v299_v59, %v296_v58 }
  0x36   : > { %v303_v11 = vshll.u32 %v191_v60, 16  ;;  %v649_v13 = vrot.slane %v647_v61, 4  ;;  %v652_v14 = vrot.slane %v650_v62, 5  ;;  %v663_v15 = vrot.slane %v661_v63, 4 }
  0x37   : > { %v666_v16 = vrot.slane %v664_v0, 5  ;;  %v939_v18 = vor.u32 %v998_v4, %v938_v3  ;;  %v899_v19 = vor.u32 %v990_v8, %v898_v7  ;;  %v291_v20 = vrot.slane %v289_v5, 5 }
  0x38   : > { %v689_v21 = vpack.c.b16 %v684_v6, %v683_v2  ;;  %v287_v22 = vrot.slane %v286_v9, 4  ;;  %v305_v23 = vrot.slane %v303_v11, 5  ;;  %v656_v24 = vshll.u32 %v965_v12, 16 }
  0x39   : > { %v301_v25 = vrot.slane %v300_v10, 4  ;;  %v653_v26 = vor.u32 %v652_v14, %v649_v13  ;;  %v667_v27 = vor.u32 %v666_v16, %v663_v15  ;;  %v670_v28 = vshll.u32 %v967_v17, 16 }
  0x3a   : > { %v292_v29 = vsel %vm1100_vm3, %v287_v22, %v291_v20  ;;  %v658_v30 = vrot.slane %v656_v24, 5 }
  0x3b   : > { %v306_v31 = vsel %vm1100_vm3, %v301_v25, %v305_v23  ;;  %v654_v32 = vrot.slane %v653_v26, 4  ;;  %v668_v33 = vrot.slane %v667_v27, 4  ;;  %v672_v34 = vrot.slane %v670_v28, 5 }
  0x3c   : > { %v318_v35 = vunpack.c.l.b16 %v292_v29  ;;  %v319_v36 = vunpack.c.l.b16 %v306_v31 }
  0x3d   : > { %v659_v37 = vsel %vm1100_vm3, %v654_v32, %v658_v30  ;;  %v673_v38 = vsel %vm1100_vm3, %v668_v33, %v672_v34 }
  0x3e   : > { %v323_v40 = vpack.c.b16 %v319_v36, %v318_v35  ;;  %v685_v41 = vunpack.c.l.b16 %v659_v37  ;;  %v686_v42 = vunpack.c.l.b16 %v673_v38 }
  0x3f   : > { %882 = vmatmul.msk.bf16.gmra.mxu0 %vm336_vm0, %v322_v1 }
  0x40   : > { %v690_v43 = vpack.c.b16 %v686_v42, %v685_v41 }
  0x43   : > { %951 = vmatmul.msk.bf16.gmra.mxu2 %vm336_vm0, %v939_v18  ;;  %982 = vmatmul.msk.bf16.gmra.mxu3 %vm336_vm0, %v689_v21 }
  0x44   : > { %911 = vmatmul.msk.bf16.gmra.mxu1 %vm336_vm0, %v899_v19 }
  0x4f   : > { %883 = vmatmul.msk.bf16.gmra.mxu0 %vm336_vm0, %v323_v40 }
  0x53   : > { %983 = vmatmul.msk.bf16.gmra.mxu3 %vm336_vm0, %v690_v43 }
  0x91   : > { %v431_v44 = vpop.f32.mrf.mxu1 }
  0x96   : > { %v518_v45 = vpop.f32.mrf.mxu2 }
  0x99   : > { %v433_v47 = vpop.f32.mrf.mxu1 }
  0x9c   : > { %v358_v46 = vpop.f32.mrf.mxu0 }
  0x9d   : > { %v432_v48 = vadd.f32 %v431_v44, %v358_v46 }
  0x9e   : > { %v520_v49 = vpop.f32.mrf.mxu2 }
  0x9f   : > { %v538_v50 = vadd.f32 %v518_v45, %v432_v48 }
  0xa1   : > { %v436_v53 = vpop.f32.mrf.mxu1 }
  0xa4   : > { %v360_v51 = vpop.f32.mrf.mxu0 }
  0xa5   : > { %v434_v56 = vadd.f32 %v433_v47, %v360_v51 }
  0xa6   : > { %v724_v52 = vpop.f32.mrf.mxu3  ;;  %v523_v57 = vpop.f32.mrf.mxu2 }
  0xa7   : > { %v744_v54 = vadd.f32 %v724_v52, %v538_v50  ;;  %v539_v61 = vadd.f32 %v520_v49, %v434_v56 }
  0xa9   : > { %v756_v55 = vadd.f32 %v1189_v39, %v744_v54  ;;  %v438_v2 = vpop.f32.mrf.mxu1 }
  0xab   : > { %vm764_vm4 = vcmp.ge.f32.partialorder %v756_v55, 0.0  ;;  %v772_v58 = vmul.f32 0.2, %v756_v55 }
  0xac   : > { %v363_v59 = vpop.f32.mrf.mxu0 }
  0xad   : > { %v780_v60 = vsel %vm764_vm4, %v756_v55, %v772_v58  ;;  %v437_v1 = vadd.f32 %v436_v53, %v363_v59 }
  0xae   : > { %v788_v62 = vpack.c.bf16 %v780_v60, %v780_v60  ;;  %v726_v63 = vpop.f32.mrf.mxu3  ;;  %v525_v6 = vpop.f32.mrf.mxu2 }
  0xaf   : > { %v745_v0 = vadd.f32 %v726_v63, %v539_v61  ;;  %v540_v5 = vadd.f32 %v523_v57, %v437_v1 }
  0xb0   : > { %797 = vst.msk [vmem:[%s1196_s14] sm:$0xf] %vm796_vm5, %v788_v62 }
  0xb1   : > { %v757_v3 = vadd.f32 %v1189_v39, %v745_v0  ;;  %v441_v14 = vpop.f32.mrf.mxu1 }
  0xb3   : > { %vm765_vm6 = vcmp.ge.f32.partialorder %v757_v3, 0.0  ;;  %v773_v4 = vmul.f32 0.2, %v757_v3 }
  0xb4   : > { %v365_v7 = vpop.f32.mrf.mxu0 }
  0xb5   : > { %v781_v8 = vsel %vm765_vm6, %v757_v3, %v773_v4  ;;  %v439_v13 = vadd.f32 %v438_v2, %v365_v7 }
  0xb6   : > { %v789_v9 = vpack.c.bf16 %v781_v8, %v781_v8  ;;  %v729_v10 = vpop.f32.mrf.mxu3  ;;  %v528_v20 = vpop.f32.mrf.mxu2 }
  0xb7   : > { %v746_v11 = vadd.f32 %v729_v10, %v540_v5  ;;  %v541_v18 = vadd.f32 %v525_v6, %v439_v13 }
  0xb8   : > { %798 = vst.msk [vmem:[%s1196_s14 + $0x4] sm:$0xf] %vm796_vm5, %v789_v9 }
  0xb9   : > { %v758_v12 = vadd.f32 %v1189_v39, %v746_v11  ;;  %v443_v27 = vpop.f32.mrf.mxu1 }
  0xbb   : > { %vm766_vm7 = vcmp.ge.f32.partialorder %v758_v12, 0.0  ;;  %v774_v15 = vmul.f32 0.2, %v758_v12 }
  0xbc   : > { %v368_v16 = vpop.f32.mrf.mxu0 }
  0xbd   : > { %v782_v17 = vsel %vm766_vm7, %v758_v12, %v774_v15  ;;  %v442_v23 = vadd.f32 %v441_v14, %v368_v16 }
  0xbe   : > { %v790_v19 = vpack.c.bf16 %v782_v17, %v782_v17  ;;  %v731_v21 = vpop.f32.mrf.mxu3  ;;  %v530_v33 = vpop.f32.mrf.mxu2 }
  0xbf   : > { %v747_v22 = vadd.f32 %v731_v21, %v541_v18  ;;  %v542_v26 = vadd.f32 %v528_v20, %v442_v23 }
  0xc0   : > { %799 = vst.msk [vmem:[%s1196_s14 + $0x8] sm:$0xf] %vm796_vm5, %v790_v19 }
  0xc1   : > { %v759_v24 = vadd.f32 %v1189_v39, %v747_v22  ;;  %v446_v42 = vpop.f32.mrf.mxu1 }
  0xc3   : > { %vm767_vm8 = vcmp.ge.f32.partialorder %v759_v24, 0.0  ;;  %v775_v25 = vmul.f32 0.2, %v759_v24 }
  0xc4   : > { %v370_v28 = vpop.f32.mrf.mxu0 }
  0xc5   : > { %v783_v29 = vsel %vm767_vm8, %v759_v24, %v775_v25  ;;  %v444_v35 = vadd.f32 %v443_v27, %v370_v28 }
  0xc6   : > { %v791_v30 = vpack.c.bf16 %v783_v29, %v783_v29  ;;  %v734_v31 = vpop.f32.mrf.mxu3  ;;  %v533_v47 = vpop.f32.mrf.mxu2 }
  0xc7   : > { %v748_v32 = vadd.f32 %v734_v31, %v542_v26  ;;  %v543_v40 = vadd.f32 %v530_v33, %v444_v35 }
  0xc8   : > { %800 = vst.msk [vmem:[%s1196_s14 + $0xc] sm:$0xf] %vm796_vm5, %v791_v30 }
  0xc9   : > { %v760_v34 = vadd.f32 %v1189_v39, %v748_v32  ;;  %v448_v55 = vpop.f32.mrf.mxu1 }
  0xcb   : > { %vm768_vm9 = vcmp.ge.f32.partialorder %v760_v34, 0.0  ;;  %v776_v36 = vmul.f32 0.2, %v760_v34 }
  0xcc   : > { %v373_v37 = vpop.f32.mrf.mxu0 }
  0xcd   : > { %v784_v38 = vsel %vm768_vm9, %v760_v34, %v776_v36  ;;  %v447_v45 = vadd.f32 %v446_v42, %v373_v37 }
  0xce   : > { %v792_v41 = vpack.c.bf16 %v784_v38, %v784_v38  ;;  %v736_v43 = vpop.f32.mrf.mxu3  ;;  %v535_v59 = vpop.f32.mrf.mxu2 }
  0xcf   : > { %v749_v44 = vadd.f32 %v736_v43, %v543_v40  ;;  %v544_v49 = vadd.f32 %v533_v47, %v447_v45 }
  0xd0   : > { %801 = vst.msk [vmem:[%s1196_s14 + $0x10] sm:$0xf] %vm796_vm5, %v792_v41 }
  0xd1   : > { %v761_v46 = vadd.f32 %v1189_v39, %v749_v44 }
  0xd3   : > { %vm769_vm10 = vcmp.ge.f32.partialorder %v761_v46, 0.0  ;;  %v777_v48 = vmul.f32 0.2, %v761_v46 }
  0xd4   : > { %v375_v53 = vpop.f32.mrf.mxu0 }
  0xd5   : > { %v785_v50 = vsel %vm769_vm10, %v761_v46, %v777_v48  ;;  %v449_v57 = vadd.f32 %v448_v55, %v375_v53 }
  0xd6   : > { %v793_v51 = vpack.c.bf16 %v785_v50, %v785_v50  ;;  %v739_v52 = vpop.f32.mrf.mxu3 }
  0xd7   : > { %v750_v54 = vadd.f32 %v739_v52, %v544_v49  ;;  %v545_v61 = vadd.f32 %v535_v59, %v449_v57 }
  0xd8   : > { %802 = vst.msk [vmem:[%s1196_s14 + $0x14] sm:$0xf] %vm796_vm5, %v793_v51 }
  0xd9   : > { %v762_v56 = vadd.f32 %v1189_v39, %v750_v54 }
  0xdb   : > { %vm770_vm11 = vcmp.ge.f32.partialorder %v762_v56, 0.0  ;;  %v778_v58 = vmul.f32 0.2, %v762_v56 }
  0xdd   : > { %v786_v60 = vsel %vm770_vm11, %v762_v56, %v778_v58 }
  0xde   : > { %v794_v62 = vpack.c.bf16 %v786_v60, %v786_v60  ;;  %v741_v63 = vpop.f32.mrf.mxu3 }
  0xdf   : > { %v751_v0 = vadd.f32 %v741_v63, %v545_v61 }
  0xe0   : > { %803 = vst.msk [vmem:[%s1196_s14 + $0x18] sm:$0xf] %vm796_vm5, %v794_v62 }
  0xe1   : > { %v763_v1 = vadd.f32 %v1189_v39, %v751_v0 }
  0xe3   : > { %vm771_vm12 = vcmp.ge.f32.partialorder %v763_v1, 0.0  ;;  %v779_v2 = vmul.f32 0.2, %v763_v1 }
  0xe5   : > { %v787_v3 = vsel %vm771_vm12, %v763_v1, %v779_v2 }
  0xe6   : > { %v795_v4 = vpack.c.bf16 %v787_v3, %v787_v3 }
  0xe8   : > { %804 = vst.msk [vmem:[%s1196_s14 + $0x1c] sm:$0xf] %vm796_vm5, %v795_v4 }
  0xe9 PF: > { %s13_s12 = sadd.s32 1, %s1019_s12  }
  0xea   : > { %p10_p4 = scmp.ge.s32.totalorder %s13_s12, 4  }
  0xec   :  { %12 = sbr.rel (!%p10_p4) target bundleno = 1 (0x1), region = 66 }

// kernel: _lambda_.7
= control target key start
LH: loop header
LB: loop body
LE: loop exit
PB: predicated region body
PF: predicated region fallthrough
CT: control target
= control target key end

     0   :  { %s861_s12 = smov 0   ;;  %s998_s0 = inlined_call_operand.vmem [shape: bf16[2,5,5,64], index: 0, kind: input, shape index: {}]   ;;  %s999_s1 = inlined_call_operand.vmem [shape: bf16[2,2,64,32], index: 1, kind: input, shape index: {}]   ;;  %s1000_s2 = inlined_call_operand.vmem [shape: f32[1,32], index: 2, kind: input, shape index: {}]   ;;  %s1001_s3 = inlined_call_operand.vmem [shape: bf16[2,4,4,32], index: 3, kind: output, shape index: {}]  }
   0x1 LB: > { %s696_s13 = sadd.s32 4294967295, %s839_s12   ;;  %p700_p0 = scmp.ge.s32.totalorder %s839_s12, 1  ;;  %s839_s12 = sphi %s861_s12, %s13_s12  }
   0x2   : > { %p137_p1 = scmp.lt.s32.totalorder %s839_s12, 3 }
   0x4   : > { %p138_p2 = pnand %p700_p0, %p137_p1 }
   0x5   : > { %p161_p3 = scmp.lt.s32.totalorder (!%p138_p2), %s696_s13, 1 }
   0x6   : > { %141 = sbr.rel (%p138_p2) target bundleno = 227 (0xe3), region = 32 }
   0xb   : > { %v818_v0 = vld [vmem:[%s999_s1 + $0x58] sm:$0xff]  ;;  %v817_v3 = vld [vmem:[%s999_s1 + $0x50] sm:$0xff]  ;;  %s1005_s13 = smov (!%p161_p3, %s696_s13), 1  ;;  %v816_v8 = vld [vmem:[%s999_s1 + $0x48] sm:$0xff]  ;;  %vm196_vm0 = vcmask 1041408   ;;  %vm200_vm1 = vcmask 1043458  }
   0xc   : > { %v814_v1 = vld [vmem:[%s999_s1 + $0x38] sm:$0xff]  ;;  %451 = vmatpush.bf16.msra.mxu2 %v818_v0  ;;  %v813_v4 = vld [vmem:[%s999_s1 + $0x30] sm:$0xff]  ;;  %s823_s30 = smul.u32 20, %s1005_s13  ;;  %v812_v9 = vld [vmem:[%s999_s1 + $0x28] sm:$0xff]  ;;  %vm222_vm2 = vsmask.f32 1280 }
   0xd   : > { %v810_v2 = vld [vmem:[%s999_s1 + $0x18] sm:$0xff]  ;;  %333 = vmatpush.bf16.msra.mxu0 %v814_v1  ;;  %v809_v6 = vld [vmem:[%s999_s1 + $0x10] sm:$0xff]  ;;  %v808_v10 = vld [vmem:[%s999_s1 + $0x8] sm:$0xff]  ;;  %vm223_vm3 = vsmask.f32 3336  ;;  %vm326_vm9 = vcmask 523264  }
   0xe   : > { %v822_v5 = vld [vmem:[%s999_s1 + $0x78] sm:$0xff]  ;;  %385 = vmatpush.bf16.msra.mxu1 %v810_v2  ;;  %v821_v7 = vld [vmem:[%s999_s1 + $0x70] sm:$0xff]  ;;  %s905_s10 = scalar_lea.vmem %s998_s0, %s823_s30  ;;  %v815_v17 = vld [vmem:[%s999_s1 + $0x40] sm:$0xff]  ;;  %vm225_vm4 = vsmask.f32 5392  ;;  %s806_s27 = sshll.u32 %s1005_s13, 3 }
   0xf   : > { %602 = vmatpush.bf16.msra.mxu3 %v822_v5  ;;  %v184_v11 = vld [vmem:[%s905_s10] sm:$0x7]  ;;  %v185_v12 = vld [vmem:[%s905_s10 + $0x4] sm:$0x7]  ;;  %v186_v13 = vld [vmem:[%s905_s10 + $0x8] sm:$0x7]  ;;  %s170_s30 = scalar_lea.vmem %s1001_s3, %s806_s27 }
  0x10   : > { %452 = vmatpush.bf16.msra.mxu2 %v817_v3  ;;  %v187_v14 = vld [vmem:[%s905_s10 + $0xc] sm:$0x7]  ;;  %v192_v15 = vrot.slane %v184_v11, 2  ;;  %v193_v16 = vrot.slane %v185_v12, 2  ;;  %v811_v18 = vld [vmem:[%s999_s1 + $0x20] sm:$0xff]  ;;  %v194_v19 = vrot.slane %v186_v13, 2  ;;  %vm224_vm5 = vmor %vm222_vm2, %vm223_vm3 }
  0x11   : > { %334 = vmatpush.bf16.msra.mxu0 %v813_v4  ;;  %v195_v20 = vrot.slane %v187_v14, 2  ;;  %v807_v21 = vld [vmem:[%s999_s1] sm:$0xff]  ;;  %vm226_vm6 = vmor %vm224_vm5, %vm225_vm4  ;;  %vm227_vm7 = vsmask.f32 7448  ;;  %vm636_vm11 = vcmask 254976  }
  0x12   : > { %386 = vmatpush.bf16.msra.mxu1 %v809_v6  ;;  %v199_v22 = vsel %vm196_vm0, %v184_v11, %v192_v15  ;;  %v201_v23 = vsel %vm200_vm1, %v184_v11, %v192_v15  ;;  %v206_v24 = vsel %vm196_vm0, %v185_v12, %v193_v16  ;;  %v207_v25 = vsel %vm200_vm1, %v185_v12, %v193_v16  ;;  %vm934_vm8 = vmor %vm226_vm6, %vm227_vm7  ;;  %v819_v11 = vld [vmem:[%s999_s1 + $0x60] sm:$0xff]  ;;  %v778_v12 = vld [vmem:[%s905_s10 + $0x10] sm:$0x7] }
  0x13   : > { %603 = vmatpush.bf16.msra.mxu3 %v821_v7  ;;  %v203_v26 = vrot.slane %v201_v23, 2  ;;  %v209_v27 = vrot.slane %v207_v25, 2  ;;  %v212_v28 = vsel %vm196_vm0, %v186_v13, %v194_v19  ;;  %v213_v29 = vsel %vm200_vm1, %v186_v13, %v194_v19  ;;  %v775_v7 = vld [vmem:[%s905_s10 + $0x4] sm:$0x7] }
  0x14   : > { %453 = vmatpush.bf16.msra.mxu2 %v816_v8  ;;  %v215_v30 = vrot.slane %v213_v29, 2  ;;  %v218_v31 = vsel %vm196_vm0, %v187_v14, %v195_v20  ;;  %v219_v32 = vsel %vm200_vm1, %v187_v14, %v195_v20  ;;  %v229_v33 = vshrl.u32 %v199_v22, 16  ;;  %v820_v8 = vld [vmem:[%s999_s1 + $0x68] sm:$0xff]  ;;  %v172_v14 = vld [vmem:[%s905_s10] sm:$0x3] }
  0x15   : > { %335 = vmatpush.bf16.msra.mxu0 %v812_v9  ;;  %v221_v34 = vrot.slane %v219_v32, 2  ;;  %v232_v35 = vshll.u32 %v199_v22, 16  ;;  %v238_v36 = vshll.u32 %v203_v26, 16  ;;  %v242_v37 = vshrl.u32 %v206_v24, 16  ;;  %v776_v9 = vld [vmem:[%s905_s10 + $0x8] sm:$0x7] }
  0x16   : > { %387 = vmatpush.bf16.msra.mxu1 %v808_v10  ;;  %v231_v38 = vrot.slane %v229_v33, 6  ;;  %v245_v39 = vshll.u32 %v206_v24, 16  ;;  %v251_v40 = vshll.u32 %v209_v27, 16  ;;  %v255_v41 = vshrl.u32 %v212_v28, 16  ;;  %v777_v10 = vld [vmem:[%s905_s10 + $0xc] sm:$0x7] }
  0x17   : > { %v234_v42 = vrot.slane %v232_v35, 7  ;;  %v244_v43 = vrot.slane %v242_v37, 6  ;;  %v258_v44 = vshll.u32 %v212_v28, 16  ;;  %v240_v45 = vrot.slane %v238_v36, 7  ;;  %604 = vmatpush.bf16.msra.mxu3 %v820_v8  ;;  %v173_v16 = vld [vmem:[%s905_s10 + $0x4] sm:$0x3] }
  0x18   : > { %454 = vmatpush.bf16.msra.mxu2 %v815_v17  ;;  %v247_v46 = vrot.slane %v245_v39, 7  ;;  %v257_v47 = vrot.slane %v255_v41, 6  ;;  %v264_v48 = vshll.u32 %v215_v30, 16  ;;  %v268_v51 = vshrl.u32 %v218_v31, 16  ;;  %v746_v37 = vld [vmem:[%s905_s10 + $0x4] sm:$0x3] }
  0x19   : > { %336 = vmatpush.bf16.msra.mxu0 %v811_v18  ;;  %v235_v49 = vor.u32 %v234_v42, %v231_v38  ;;  %v260_v50 = vrot.slane %v258_v44, 7  ;;  %v271_v52 = vshll.u32 %v218_v31, 16  ;;  %v253_v55 = vrot.slane %v251_v40, 7  ;;  %v174_v18 = vld [vmem:[%s905_s10 + $0x8] sm:$0x3] }
  0x1a   : > { %388 = vmatpush.bf16.msra.mxu1 %v807_v21  ;;  %v248_v54 = vor.u32 %v247_v46, %v244_v43  ;;  %v266_v56 = vrot.slane %v264_v48, 7  ;;  %v277_v57 = vshll.u32 %v221_v34, 16  ;;  %v270_v60 = vrot.slane %v268_v51, 6  ;;  %v175_v21 = vld [vmem:[%s905_s10 + $0xc] sm:$0x3] }
  0x1b   : > { %v236_v58 = vrot.slane %v235_v49, 2  ;;  %v261_v59 = vor.u32 %v260_v50, %v257_v47  ;;  %v273_v61 = vrot.slane %v271_v52, 7  ;;  %v471_v13 = vrot.slane %v775_v7, 2  ;;  %605 = vmatpush.bf16.msra.mxu3 %v819_v11  ;;  %v747_v42 = vld [vmem:[%s905_s10 + $0x8] sm:$0x3] }
  0x1c   : > { %v249_v62 = vrot.slane %v248_v54, 2  ;;  %v279_v2 = vrot.slane %v277_v57, 7  ;;  %v472_v15 = vrot.slane %v776_v9, 2  ;;  %v473_v17 = vrot.slane %v777_v10, 2  ;;  %v748_v46 = vld [vmem:[%s905_s10 + $0xc] sm:$0x3] }
  0x1d   : > { %v241_v63 = vsel %vm934_vm8, %v236_v58, %v240_v45  ;;  %v262_v0 = vrot.slane %v261_v59, 2  ;;  %v274_v1 = vor.u32 %v273_v61, %v270_v60  ;;  %v474_v20 = vrot.slane %v778_v12, 2 }
  0x1e   : > { %v254_v3 = vsel %vm934_vm8, %v249_v62, %v253_v55  ;;  %291 = vst [vmem:[#allocation1] ss:$4 sm:$0xff] %v241_v63  ;;  %v477_v22 = vsel %vm196_vm0, %v775_v7, %v471_v13  ;;  %v483_v23 = vsel %vm196_vm0, %v776_v9, %v472_v15  ;;  %v489_v24 = vsel %vm196_vm0, %v777_v10, %v473_v17  ;;  %v749_v55 = vld [vmem:[%s905_s10 + $0x10] sm:$0x3] }
  0x1f   : > { %v267_v4 = vsel %vm934_vm8, %v262_v0, %v266_v56  ;;  %v275_v5 = vrot.slane %v274_v1, 2  ;;  %294 = vst [vmem:[#allocation1 + $0x1] ss:$4 sm:$0xff] %v254_v3  ;;  %v495_v25 = vsel %vm196_vm0, %v778_v12, %v474_v20  ;;  %v499_v26 = vshrl.u32 %v477_v22, 16 }
  0x20   : > { %297 = vst [vmem:[#allocation1 + $0x2] ss:$4 sm:$0xff] %v267_v4  ;;  %v502_v27 = vshll.u32 %v477_v22, 16  ;;  %v478_v28 = vsel %vm200_vm1, %v775_v7, %v471_v13  ;;  %v512_v29 = vshrl.u32 %v483_v23, 16  ;;  %v515_v30 = vshll.u32 %v483_v23, 16 }
  0x21   : > { %v280_v6 = vsel %vm934_vm8, %v275_v5, %v279_v2  ;;  %v484_v31 = vsel %vm200_vm1, %v776_v9, %v472_v15  ;;  %v525_v32 = vshrl.u32 %v489_v24, 16  ;;  %v528_v33 = vshll.u32 %v489_v24, 16 }
  0x22   : > { %300 = vst [vmem:[#allocation1 + $0x3] ss:$4 sm:$0xff] %v280_v6  ;;  %v490_v34 = vsel %vm200_vm1, %v777_v10, %v473_v17  ;;  %v538_v35 = vshrl.u32 %v495_v25, 16  ;;  %v541_v36 = vshll.u32 %v495_v25, 16  ;;  %v480_v38 = vrot.slane %v478_v28, 2 }
  0x23   : > { %v496_v39 = vsel %vm200_vm1, %v778_v12, %v474_v20  ;;  %v501_v40 = vrot.slane %v499_v26, 6  ;;  %v504_v41 = vrot.slane %v502_v27, 7  ;;  %v486_v43 = vrot.slane %v484_v31, 2 }
  0x24   : > { %v514_v44 = vrot.slane %v512_v29, 6  ;;  %v517_v45 = vrot.slane %v515_v30, 7  ;;  %v492_v47 = vrot.slane %v490_v34, 2  ;;  %v527_v48 = vrot.slane %v525_v32, 6 }
  0x25   : > { %v530_v49 = vrot.slane %v528_v33, 7  ;;  %v498_v51 = vrot.slane %v496_v39, 2  ;;  %v540_v52 = vrot.slane %v538_v35, 6  ;;  %v543_v54 = vrot.slane %v541_v36, 7 }
  0x26   : > { %v505_v56 = vor.u32 %v504_v41, %v501_v40  ;;  %v508_v57 = vshll.u32 %v480_v38, 16  ;;  %v518_v58 = vor.u32 %v517_v45, %v514_v44  ;;  %v521_v59 = vshll.u32 %v486_v43, 16 }
  0x27   : > { %v531_v60 = vor.u32 %v530_v49, %v527_v48  ;;  %v534_v61 = vshll.u32 %v492_v47, 16  ;;  %v544_v62 = vor.u32 %v543_v54, %v540_v52  ;;  %v547_v63 = vshll.u32 %v498_v51, 16 }
  0x28   : > { %v506_v0 = vrot.slane %v505_v56, 2  ;;  %v510_v1 = vrot.slane %v508_v57, 7  ;;  %v519_v2 = vrot.slane %v518_v58, 2  ;;  %v523_v3 = vrot.slane %v521_v59, 7 }
  0x29   : > { %v301_v19 = vld.sshfl [vmem:[#allocation1] sm:$0xff pattern:$0x73625140]  ;;  %v532_v4 = vrot.slane %v531_v60, 2  ;;  %v536_v5 = vrot.slane %v534_v61, 7  ;;  %v545_v6 = vrot.slane %v544_v62, 2 }
  0x2a   : > { %344 = vst [vmem:[#allocation1] ss:$4 sm:$0xff] %v172_v14  ;;  %728 = vmatmul.msk.bf16.vlgmr.msra.gmra.mxu0 %vm326_vm9, %v301_v19  ;;  %v549_v7 = vrot.slane %v547_v63, 7  ;;  %v511_v8 = vsel %vm934_vm8, %v506_v0, %v510_v1  ;;  %v524_v9 = vsel %vm934_vm8, %v519_v2, %v523_v3  ;;  %v832_v19 = vld [vmem:[%s1000_s2] ss:$0 sm:$0xff] }
  0x2b   : > { %347 = vst [vmem:[#allocation1 + $0x1] ss:$4 sm:$0xff] %v173_v16  ;;  %v537_v11 = vsel %vm934_vm8, %v532_v4, %v536_v5 }
  0x2c   : > { %350 = vst [vmem:[#allocation1 + $0x2] ss:$4 sm:$0xff] %v174_v18  ;;  %v550_v12 = vsel %vm934_vm8, %v545_v6, %v549_v7 }
  0x2d   : > { %353 = vst [vmem:[#allocation1 + $0x3] ss:$4 sm:$0xff] %v175_v21 }
  0x34   : > { %v354_v50 = vld.sshfl [vmem:[#allocation1] sm:$0xff pattern:$0x73625140] }
  0x35   : > { %410 = vst [vmem:[#allocation1] ss:$4 sm:$0xff] %v746_v37  ;;  %745 = vmatmul.msk.bf16.vlgmr.msra.gmra.mxu1 %vm326_vm9, %v354_v50 }
  0x36   : > { %413 = vst [vmem:[#allocation1 + $0x1] ss:$4 sm:$0xff] %v747_v42 }
  0x37   : > { %416 = vst [vmem:[#allocation1 + $0x2] ss:$4 sm:$0xff] %v748_v46 }
  0x38   : > { %419 = vst [vmem:[#allocation1 + $0x3] ss:$4 sm:$0xff] %v749_v55 }
  0x3f   : > { %v420_v10 = vld.sshfl [vmem:[#allocation1] sm:$0xff pattern:$0x73625140] }
  0x40   : > { %774 = vmatmul.msk.bf16.vlgmr.msra.gmra.mxu2 %vm326_vm9, %v420_v10  ;;  %561 = vst [vmem:[#allocation1] ss:$4 sm:$0xff] %v511_v8 }
  0x41   : > { %564 = vst [vmem:[#allocation1 + $0x1] ss:$4 sm:$0xff] %v524_v9 }
  0x42   : > { %567 = vst [vmem:[#allocation1 + $0x2] ss:$4 sm:$0xff] %v537_v11 }
  0x43   : > { %570 = vst [vmem:[#allocation1 + $0x3] ss:$4 sm:$0xff] %v550_v12 }
  0x4a   : > { %v571_v13 = vld.sshfl [vmem:[#allocation1] sm:$0xff pattern:$0x73625140] }
  0x4b   : > { %803 = vmatmul.msk.bf16.vlgmr.msra.gmra.mxu3 %vm326_vm9, %v571_v13 }
  0xa7   : > { %v338_v14 = vpop.f32.mrf.mxu0 }
  0xaf   : > { %v340_v21 = vpop.f32.mrf.mxu0 }
  0xb2   : > { %v390_v15 = vpop.f32.mrf.mxu1 }
  0xb3   : > { %v391_v16 = vadd.f32 %v390_v15, %v338_v14 }
  0xba   : > { %v392_v22 = vpop.f32.mrf.mxu1 }
  0xbb   : > { %v393_v25 = vadd.f32 %v392_v22, %v340_v21 }
  0xc3   : > { %v456_v17 = vpop.f32.mrf.mxu2 }
  0xc4   : > { %v461_v18 = vadd.f32 %v456_v17, %v391_v16 }
  0xcb   : > { %v458_v24 = vpop.f32.mrf.mxu2 }
  0xcc   : > { %v462_v27 = vadd.f32 %v458_v24, %v393_v25 }
  0xce   : > { %v607_v20 = vpop.f32.mrf.mxu3 }
  0xcf   : > { %v612_v53 = vadd.f32 %v607_v20, %v461_v18 }
  0xd1   : > { %v618_v23 = vadd.f32 %v832_v19, %v612_v53 }
  0xd3   : > { %vm620_vm10 = vcmp.ge.f32.partialorder %v618_v23, 0.0  ;;  %v622_v26 = vmul.f32 0.2, %v618_v23 }
  0xd5   : > { %v624_v28 = vsel %vm620_vm10, %v618_v23, %v622_v26 }
  0xd6   : > { %v628_v29 = vrot.slane %v624_v28, 4  ;;  %v632_v30 = vpack.c.bf16 %v624_v28, %v624_v28  ;;  %v609_v31 = vpop.f32.mrf.mxu3 }
  0xd7   : > { %v613_v32 = vadd.f32 %v609_v31, %v462_v27 }
  0xd8   : > { %v633_v33 = vpack.c.bf16 %v628_v29, %v628_v29  ;;  %637 = vst.msk [vmem:[%s170_s30] sm:$0x3] %vm636_vm11, %v632_v30 }
  0xd9   : > { %v619_v34 = vadd.f32 %v832_v19, %v613_v32 }
  0xda   : > { %638 = vst.msk [vmem:[%s170_s30 + $0x2] sm:$0x3] %vm636_vm11, %v633_v33 }
  0xdb   : > { %vm621_vm12 = vcmp.ge.f32.partialorder %v619_v34, 0.0  ;;  %v623_v35 = vmul.f32 0.2, %v619_v34 }
  0xdd   : > { %v625_v36 = vsel %vm621_vm12, %v619_v34, %v623_v35 }
  0xde   : > { %v629_v37 = vrot.slane %v625_v36, 4  ;;  %v634_v38 = vpack.c.bf16 %v625_v36, %v625_v36 }
  0xe0   : > { %v635_v39 = vpack.c.bf16 %v629_v37, %v629_v37  ;;  %639 = vst.msk [vmem:[%s170_s30 + $0x4] sm:$0x3] %vm636_vm11, %v634_v38 }
  0xe2   : > { %640 = vst.msk [vmem:[%s170_s30 + $0x6] sm:$0x3] %vm636_vm11, %v635_v39 }
  0xe3 PF: > { %s13_s12 = sadd.s32 1, %s839_s12  }
  0xe4   : > { %p10_p4 = scmp.ge.s32.totalorder %s13_s12, 4  }
  0xe6   :  { %12 = sbr.rel (!%p10_p4) target bundleno = 1 (0x1), region = 78 }

// kernel: _lambda_.8
= control target key start
LH: loop header
LB: loop body
LE: loop exit
PB: predicated region body
PF: predicated region fallthrough
CT: control target
= control target key end

     0   :  { %s968_s12 = smov 0   ;;  %s1142_s0 = inlined_call_operand.vmem [shape: bf16[2,3,3,128], index: 0, kind: input, shape index: {}]   ;;  %s1143_s1 = inlined_call_operand.vmem [shape: bf16[2,2,128,64], index: 1, kind: input, shape index: {}]   ;;  %s1144_s2 = inlined_call_operand.vmem [shape: f32[1,64], index: 2, kind: input, shape index: {}]   ;;  %s1145_s3 = inlined_call_operand.vmem [shape: bf16[2,2,2,64], index: 3, kind: output, shape index: {}]  }
   0x1 LB: > { %s705_s13 = sadd.s32 4294967295, %s946_s12   ;;  %p709_p0 = scmp.ge.s32.totalorder %s946_s12, 1  ;;  %s946_s12 = sphi %s968_s12, %s13_s12  }
   0x2   : > { %p137_p1 = scmp.lt.s32.totalorder %s946_s12, 3 }
   0x4   : > { %p138_p2 = pnand %p709_p0, %p137_p1 }
   0x5   : > { %p160_p3 = scmp.lt.s32.totalorder (!%p138_p2), %s705_s13, 1 }
   0x6   : > { %141 = sbr.rel (%p138_p2) target bundleno = 208 (0xd0), region = 32 }
   0xb   : > { %v921_v0 = vld [vmem:[%s1143_s1 + $0xb8] sm:$0xff]  ;;  %v920_v3 = vld [vmem:[%s1143_s1 + $0xb0] sm:$0xff]  ;;  %s1149_s13 = smov (!%p160_p3, %s705_s13), 1  ;;  %v919_v8 = vld [vmem:[%s1143_s1 + $0xa8] sm:$0xff]  ;;  %vm197_vm0 = vcmask 1040384   ;;  %vm201_vm1 = vcmask 1042434  }
   0xc   : > { %v913_v1 = vld [vmem:[%s1143_s1 + $0x78] sm:$0xff]  ;;  %486 = vmatpush.bf16.msra.mxu2 %v921_v0  ;;  %v912_v4 = vld [vmem:[%s1143_s1 + $0x70] sm:$0xff]  ;;  %s930_s30 = smul.u32 6, %s1149_s13  ;;  %v911_v9 = vld [vmem:[%s1143_s1 + $0x68] sm:$0xff]  ;;  %vm205_vm2 = vcmask 1041408   ;;  %vm207_vm3 = vcmask 1041409  }
   0xd   : > { %v905_v2 = vld [vmem:[%s1143_s1 + $0x38] sm:$0xff]  ;;  %330 = vmatpush.bf16.msra.mxu0 %v913_v1  ;;  %v904_v6 = vld [vmem:[%s1143_s1 + $0x30] sm:$0xff]  ;;  %v903_v10 = vld [vmem:[%s1143_s1 + $0x28] sm:$0xff]  ;;  %vm209_vm4 = vcmask 1043459   ;;  %vm211_vm5 = vcmask 1042433   ;;  %s711_s7 = sshll.u32 %s1149_s13, 1 }
   0xe   : > { %v929_v5 = vld [vmem:[%s1143_s1 + $0xf8] sm:$0xff]  ;;  %398 = vmatpush.bf16.msra.mxu1 %v905_v2  ;;  %v928_v7 = vld [vmem:[%s1143_s1 + $0xf0] sm:$0xff]  ;;  %s1015_s14 = scalar_lea.vmem %s1142_s0, %s930_s30  ;;  %v927_v11 = vld [vmem:[%s1143_s1 + $0xe8] sm:$0xff]  ;;  %vm227_vm6 = vsmask.f32 256  ;;  %s168_s10 = scalar_lea.vmem %s1145_s3, %s711_s7 }
   0xf   : > { %622 = vmatpush.bf16.msra.mxu3 %v929_v5  ;;  %vm228_vm7 = vsmask.f32 1284  ;;  %v918_v12 = vld [vmem:[%s1143_s1 + $0xa0] sm:$0xff]  ;;  %vm230_vm8 = vsmask.f32 2312  ;;  %v917_v28 = vld [vmem:[%s1143_s1 + $0x98] sm:$0xff] }
  0x10   : > { %487 = vmatpush.bf16.msra.mxu2 %v920_v3  ;;  %v910_v13 = vld [vmem:[%s1143_s1 + $0x60] sm:$0xff]  ;;  %vm232_vm9 = vsmask.f32 3340  ;;  %vm234_vm10 = vsmask.f32 4368  ;;  %vm229_vm12 = vmor %vm227_vm6, %vm228_vm7  ;;  %v909_v29 = vld [vmem:[%s1143_s1 + $0x58] sm:$0xff] }
  0x11   : > { %331 = vmatpush.bf16.msra.mxu0 %v912_v4  ;;  %v187_v14 = vld [vmem:[%s1015_s14] sm:$0x3]  ;;  %vm236_vm11 = vsmask.f32 5396  ;;  %v188_v16 = vld [vmem:[%s1015_s14 + $0x2] sm:$0x3]  ;;  %vm231_vm13 = vmor %vm229_vm12, %vm230_vm8 }
  0x12   : > { %399 = vmatpush.bf16.msra.mxu1 %v904_v6  ;;  %v902_v15 = vld [vmem:[%s1143_s1 + $0x20] sm:$0xff]  ;;  %v191_v17 = vrot.slane %v187_v14, 1  ;;  %v192_v18 = vrot.slane %v187_v14, 2  ;;  %v193_v19 = vrot.slane %v187_v14, 3  ;;  %v194_v21 = vrot.slane %v188_v16, 1  ;;  %vm233_vm15 = vmor %vm231_vm13, %vm232_vm9  ;;  %v901_v33 = vld [vmem:[%s1143_s1 + $0x18] sm:$0xff] }
  0x13   : > { %623 = vmatpush.bf16.msra.mxu3 %v928_v7  ;;  %v926_v20 = vld [vmem:[%s1143_s1 + $0xe0] sm:$0xff]  ;;  %v195_v22 = vrot.slane %v188_v16, 2  ;;  %v196_v23 = vrot.slane %v188_v16, 3  ;;  %vm238_vm14 = vsmask.f32 6424  ;;  %vm235_vm6 = vmor %vm233_vm15, %vm234_vm10  ;;  %v925_v38 = vld [vmem:[%s1143_s1 + $0xd8] sm:$0xff] }
  0x14   : > { %488 = vmatpush.bf16.msra.mxu2 %v919_v8  ;;  %v200_v24 = vsel %vm197_vm0, %v187_v14, %v191_v17  ;;  %v204_v25 = vsel %vm201_vm1, %v192_v18, %v193_v19  ;;  %v208_v26 = vsel %vm207_vm3, %v187_v14, %v191_v17  ;;  %v210_v27 = vsel %vm209_vm4, %v192_v18, %v193_v19  ;;  %vm237_vm8 = vmor %vm235_vm6, %vm236_vm11  ;;  %v916_v46 = vld [vmem:[%s1143_s1 + $0x90] sm:$0xff]  ;;  %v915_v53 = vld [vmem:[%s1143_s1 + $0x88] sm:$0xff] }
  0x15   : > { %332 = vmatpush.bf16.msra.mxu0 %v911_v9  ;;  %v206_v30 = vsel %vm205_vm2, %v200_v24, %v204_v25  ;;  %v212_v31 = vsel %vm211_vm5, %v208_v26, %v210_v27  ;;  %v217_v32 = vsel %vm197_vm0, %v188_v16, %v194_v21  ;;  %vm240_vm7 = vsmask.f32 7452  ;;  %vm239_vm9 = vmor %vm237_vm8, %vm238_vm14  ;;  %v908_v47 = vld [vmem:[%s1143_s1 + $0x50] sm:$0xff]  ;;  %v907_v54 = vld [vmem:[%s1143_s1 + $0x48] sm:$0xff] }
  0x16   : > { %400 = vmatpush.bf16.msra.mxu1 %v903_v10  ;;  %v214_v34 = vrot.slane %v212_v31, 1  ;;  %v220_v35 = vsel %vm201_vm1, %v195_v22, %v196_v23  ;;  %v222_v36 = vsel %vm207_vm3, %v188_v16, %v194_v21  ;;  %v223_v37 = vsel %vm209_vm4, %v195_v22, %v196_v23  ;;  %vm1066_vm10 = vmor %vm239_vm9, %vm240_vm7  ;;  %v900_v48 = vld [vmem:[%s1143_s1 + $0x10] sm:$0xff]  ;;  %v899_v55 = vld [vmem:[%s1143_s1 + $0x8] sm:$0xff] }
  0x17   : > { %624 = vmatpush.bf16.msra.mxu3 %v927_v11  ;;  %v221_v39 = vsel %vm205_vm2, %v217_v32, %v220_v35  ;;  %v224_v40 = vsel %vm211_vm5, %v222_v36, %v223_v37  ;;  %v242_v41 = vshrl.u32 %v206_v30, 16  ;;  %v924_v51 = vld [vmem:[%s1143_s1 + $0xd0] sm:$0xff]  ;;  %v844_v56 = vld [vmem:[%s1015_s14 + $0x2] sm:$0x3]  ;;  %v923_v57 = vld [vmem:[%s1143_s1 + $0xc8] sm:$0xff] }
  0x18   : > { %489 = vmatpush.bf16.msra.mxu2 %v918_v12  ;;  %v226_v42 = vrot.slane %v224_v40, 1  ;;  %v247_v44 = vshll.u32 %v214_v34, 16  ;;  %v250_v45 = vshrl.u32 %v221_v39, 16  ;;  %v845_v58 = vld [vmem:[%s1015_s14 + $0x4] sm:$0x3]  ;;  %v504_v63 = vrot.slane %v844_v56, 1 }
  0x19   : > { %333 = vmatpush.bf16.msra.mxu0 %v910_v13  ;;  %v914_v59 = vld [vmem:[%s1143_s1 + $0x80] sm:$0xff]  ;;  %v505_v0 = vrot.slane %v844_v56, 2  ;;  %v506_v1 = vrot.slane %v844_v56, 3  ;;  %v507_v3 = vrot.slane %v845_v58, 1  ;;  %v508_v4 = vrot.slane %v845_v58, 2 }
  0x1a   : > { %401 = vmatpush.bf16.msra.mxu1 %v902_v15  ;;  %v249_v49 = vsel %vm1066_vm10, %v242_v41, %v247_v44  ;;  %v255_v50 = vshll.u32 %v226_v42, 16  ;;  %v906_v60 = vld [vmem:[%s1143_s1 + $0x40] sm:$0xff]  ;;  %v509_v5 = vrot.slane %v845_v58, 3  ;;  %v517_v8 = vsel %vm207_vm3, %v844_v56, %v504_v63 }
  0x1b   : > { %625 = vmatpush.bf16.msra.mxu3 %v926_v20  ;;  %276 = vst [vmem:[#allocation1] ss:$9 sm:$0xff] %v249_v49  ;;  %v898_v61 = vld [vmem:[%s1143_s1] sm:$0xff]  ;;  %v518_v9 = vsel %vm209_vm4, %v505_v0, %v506_v1  ;;  %v529_v10 = vsel %vm207_vm3, %v845_v58, %v507_v3  ;;  %v512_v13 = vsel %vm197_vm0, %v844_v56, %v504_v63 }
  0x1c   : > { %490 = vmatpush.bf16.msra.mxu2 %v917_v28  ;;  %v257_v52 = vsel %vm1066_vm10, %v250_v45, %v255_v50  ;;  %v169_v62 = vld [vmem:[%s1015_s14] sm:$0x1]  ;;  %v170_v2 = vld [vmem:[%s1015_s14 + $0x2] sm:$0x1]  ;;  %v530_v11 = vsel %vm209_vm4, %v508_v4, %v509_v5  ;;  %v519_v12 = vsel %vm211_vm5, %v517_v8, %v518_v9  ;;  %v515_v14 = vsel %vm201_vm1, %v505_v0, %v506_v1  ;;  %v795_v19 = vld [vmem:[%s1015_s14 + $0x4] sm:$0x1] }
  0x1d   : > { %334 = vmatpush.bf16.msra.mxu0 %v909_v29  ;;  %279 = vst [vmem:[#allocation1 + $0x1] ss:$9 sm:$0xff] %v257_v52  ;;  %v922_v6 = vld [vmem:[%s1143_s1 + $0xc0] sm:$0xff]  ;;  %v531_v15 = vsel %vm211_vm5, %v529_v10, %v530_v11  ;;  %v524_v17 = vsel %vm197_vm0, %v845_v58, %v507_v3  ;;  %v527_v18 = vsel %vm201_vm1, %v508_v4, %v509_v5  ;;  %v521_v20 = vrot.slane %v519_v12, 1 }
  0x1e   : > { %402 = vmatpush.bf16.msra.mxu1 %v901_v33  ;;  %v794_v16 = vld [vmem:[%s1015_s14 + $0x2] sm:$0x1]  ;;  %v516_v22 = vsel %vm205_vm2, %v512_v13, %v515_v14  ;;  %v533_v23 = vrot.slane %v531_v15, 1  ;;  %v528_v24 = vsel %vm205_vm2, %v524_v17, %v527_v18  ;;  %v939_v41 = vld [vmem:[%s1144_s2] ss:$0 sm:$0xff]  ;;  %vm649_vm1 = vcmask 516096  }
  0x1f   : > { %626 = vmatpush.bf16.msra.mxu3 %v925_v38  ;;  %v534_v25 = vshrl.u32 %v516_v22, 16  ;;  %v539_v26 = vshll.u32 %v521_v20, 16  ;;  %v542_v27 = vshrl.u32 %v528_v24, 16 }
  0x20   : > { %491 = vmatpush.bf16.msra.mxu2 %v916_v46  ;;  %v547_v28 = vshll.u32 %v533_v23, 16 }
  0x21   : > { %335 = vmatpush.bf16.msra.mxu0 %v908_v47  ;;  %v541_v29 = vsel %vm1066_vm10, %v534_v25, %v539_v26 }
  0x22   : > { %403 = vmatpush.bf16.msra.mxu1 %v900_v48  ;;  %v549_v30 = vsel %vm1066_vm10, %v542_v27, %v547_v28 }
  0x23   : > { %627 = vmatpush.bf16.msra.mxu3 %v924_v51 }
  0x24   : > { %492 = vmatpush.bf16.msra.mxu2 %v915_v53  ;;  %v280_v7 = vld [vmem:[#allocation1] sm:$0xff] }
  0x25   : > { %336 = vmatpush.bf16.msra.mxu0 %v907_v54  ;;  %344 = vst [vmem:[#allocation1] ss:$9 sm:$0xff] %v169_v62 }
  0x26   : > { %404 = vmatpush.bf16.msra.mxu1 %v899_v55  ;;  %347 = vst [vmem:[#allocation1 + $0x1] ss:$9 sm:$0xff] %v170_v2 }
  0x27   : > { %628 = vmatpush.bf16.msra.mxu3 %v923_v57 }
  0x28   : > { %493 = vmatpush.bf16.msra.mxu2 %v914_v59 }
  0x29   : > { %337 = vmatpush.bf16.msra.mxu0 %v906_v60 }
  0x2a   : > { %405 = vmatpush.bf16.msra.mxu1 %v898_v61 }
  0x2b   : > { %629 = vmatpush.bf16.msra.mxu3 %v922_v6 }
  0x2c   : > { %338 = vmatmul.bf16.vlgmr.msra.gmra.mxu0 %v280_v7 }
  0x2d   : > { %v348_v21 = vld [vmem:[#allocation1] sm:$0xff] }
  0x2e   : > { %432 = vst [vmem:[#allocation1] ss:$9 sm:$0xff] %v794_v16  ;;  %406 = vmatmul.bf16.vlgmr.msra.gmra.mxu1 %v348_v21 }
  0x2f   : > { %435 = vst [vmem:[#allocation1 + $0x1] ss:$9 sm:$0xff] %v795_v19 }
  0x36   : > { %v436_v31 = vld [vmem:[#allocation1] sm:$0xff] }
  0x37   : > { %494 = vmatmul.bf16.vlgmr.msra.gmra.mxu2 %v436_v31  ;;  %568 = vst [vmem:[#allocation1] ss:$9 sm:$0xff] %v541_v29 }
  0x38   : > { %571 = vst [vmem:[#allocation1 + $0x1] ss:$9 sm:$0xff] %v549_v30 }
  0x3f   : > { %v572_v32 = vld [vmem:[#allocation1] sm:$0xff] }
  0x40   : > { %630 = vmatmul.bf16.vlgmr.msra.gmra.mxu3 %v572_v32 }
  0xa9   : > { %v339_v33 = vpop.f32.mrf.mxu0 }
  0xab   : > { %v407_v34 = vpop.f32.mrf.mxu1 }
  0xac   : > { %v408_v38 = vadd.f32 %v407_v34, %v339_v33 }
  0xb1   : > { %v341_v35 = vpop.f32.mrf.mxu0 }
  0xb3   : > { %v409_v36 = vpop.f32.mrf.mxu1 }
  0xba   : > { %v495_v37 = vpop.f32.mrf.mxu2 }
  0xbb   : > { %v499_v39 = vadd.f32 %v495_v37, %v408_v38 }
  0xc2   : > { %v497_v40 = vpop.f32.mrf.mxu2 }
  0xc3   : > { %v631_v42 = vpop.f32.mrf.mxu3 }
  0xc4   : > { %v635_v43 = vadd.f32 %v631_v42, %v499_v39 }
  0xc6   : > { %v640_v44 = vadd.f32 %v939_v41, %v635_v43 }
  0xc8   : > { %vm641_vm0 = vcmp.ge.f32.partialorder %v640_v44, 0.0  ;;  %v642_v45 = vmul.f32 0.2, %v640_v44 }
  0xca   : > { %v643_v46 = vsel %vm641_vm0, %v640_v44, %v642_v45 }
  0xcb   : > { %v645_v47 = vrot.slane %v643_v46, 2  ;;  %v647_v48 = vpack.c.bf16 %v643_v46, %v643_v46  ;;  %v633_v49 = vpop.f32.mrf.mxu3 }
  0xcd   : > { %v648_v50 = vpack.c.bf16 %v645_v47, %v645_v47  ;;  %650 = vst.msk [vmem:[%s168_s10] sm:$0x1] %vm649_vm1, %v647_v48 }
  0xcf   : > { %651 = vst.msk [vmem:[%s168_s10 + $0x1] sm:$0x1] %vm649_vm1, %v648_v50 }
  0xd0 PF: > { %s13_s12 = sadd.s32 1, %s946_s12  }
  0xd1   : > { %p10_p4 = scmp.ge.s32.totalorder %s13_s12, 4  }
  0xd3   :  { %12 = sbr.rel (!%p10_p4) target bundleno = 1 (0x1), region = 70 }

// kernel: _lambda_.9
= control target key start
LH: loop header
LB: loop body
LE: loop exit
PB: predicated region body
PF: predicated region fallthrough
CT: control target
= control target key end

     0   :  { %s3189_s14 = smov 0   ;;  %s3845_s0 = inlined_call_operand.vmem [shape: bf16[2,2,2,256], index: 0, kind: input, shape index: {}]   ;;  %s3846_s1 = inlined_call_operand.vmem [shape: bf16[2,2,256,1], index: 1, kind: input, shape index: {}]   ;;  %s3847_s2 = inlined_call_operand.<no memory space> [shape: f32[1,1], index: 2, kind: input, shape index: {}]   ;;  %s3848_s3 = inlined_call_operand.vmem [shape: f32[2,1,1,1], index: 3, kind: output, shape index: {}]  }
   0x1   :  { %v8_v0 = vstv %s3847_s2 }
   0x2   :  { %9 = vst [vmem:[#allocation2] sm:$0x1] %v8_v0 }
   0x3 LB: > { %s2400_s15 = sadd.s32 4294967295, %s3163_s14   ;;  %p2404_p0 = scmp.ge.s32.totalorder %s3163_s14, 1  ;;  %s3163_s14 = sphi %s3189_s14, %s15_s14  }
   0x4   : > { %p138_p1 = scmp.lt.s32.totalorder %s3163_s14, 3 }
   0x6   : > { %p139_p2 = pnand %p2404_p0, %p138_p1 }
   0x7   : > { %p3410_p3 = scmp.lt.s32.totalorder (!%p139_p2), %s2400_s15, 1 }
   0x8   : > { %142 = sbr.rel (%p139_p2) target bundleno = 983 (0x3d7), region = 32 }
   0xd   : > { %v2507_v1 = vld [vmem:[%s3846_s1] sm:$0xff]   ;;  %v3165_v2 = vmov 0   ;;  %v2762_v10 = vld [vmem:[%s3846_s1 + $0x8] sm:$0xff]   ;;  %v2763_v18 = vld [vmem:[%s3846_s1 + $0x10] sm:$0xff]   ;;  %vm628_vm0 = vcmask 130112   ;;  %vm632_vm1 = vcmask 195712  }
   0xe   : > { %2834 = vset.pattern.permute.xlu0 %v3165_v2  ;;  %v2508_v3 = vunpack.c.l.bf16 %v2507_v1  ;;  %v2509_v4 = vunpack.c.h.bf16 %v2507_v1  ;;  %2845 = vset.pattern.permute.xlu1 %v3165_v2  ;;  %v2512_v12 = vunpack.c.l.bf16 %v2762_v10  ;;  %v2513_v13 = vunpack.c.h.bf16 %v2762_v10  ;;  %v2764_v31 = vld [vmem:[%s3846_s1 + $0x18] sm:$0xff]   ;;  %v2765_v43 = vld [vmem:[%s3846_s1 + $0x20] sm:$0xff]   ;;  %v2766_v54 = vld [vmem:[%s3846_s1 + $0x28] sm:$0xff]   ;;  %s3867_s15 = smov (!%p3410_p3, %s2400_s15), 1 }
   0xf   : > { %2856 = vset.pattern.permute.xlu2 %v3165_v2  ;;  %v2516_v24 = vunpack.c.l.bf16 %v2763_v18  ;;  %v2517_v25 = vunpack.c.h.bf16 %v2763_v18  ;;  %v2520_v36 = vunpack.c.l.bf16 %v2764_v31  ;;  %v2521_v37 = vunpack.c.h.bf16 %v2764_v31  ;;  %v2767_v2 = vld [vmem:[%s3846_s1 + $0x30] sm:$0xff]   ;;  %s2405_s26 = sshll.u32 %s3867_s15, 2  ;;  %s165_s21 = scalar_lea.vmem %s3848_s3, %s3867_s15 }
  0x10   : > { %v264_v5 = vrot.slane %v2508_v3, 2  ;;  %v265_v6 = vrot.slane %v2508_v3, 4  ;;  %v266_v7 = vrot.slane %v2508_v3, 6  ;;  %360 = vst [vmem:[#allocation1] ss:$4 sm:$0xff] %v2508_v3  ;;  %v267_v8 = vrot.slane %v2509_v4, 2  ;;  %s3448_s4 = scalar_lea.vmem %s3845_s0, %s2405_s26 }
  0x11   : > { %368 = vst [vmem:[#allocation1 + $0x20] ss:$4 sm:$0xff] %v2509_v4  ;;  %v268_v9 = vrot.slane %v2509_v4, 4  ;;  %v269_v11 = vrot.slane %v2509_v4, 6  ;;  %v270_v14 = vrot.slane %v2512_v12, 2  ;;  %v271_v15 = vrot.slane %v2512_v12, 4 }
  0x12   : > { %362 = vst [vmem:[#allocation1 + $0x1] ss:$4 sm:$0xff] %v264_v5  ;;  %v272_v17 = vrot.slane %v2512_v12, 6  ;;  %v273_v19 = vrot.slane %v2513_v13, 2  ;;  %v274_v21 = vrot.slane %v2513_v13, 4  ;;  %v275_v23 = vrot.slane %v2513_v13, 6 }
  0x13   : > { %364 = vst [vmem:[#allocation1 + $0x2] ss:$4 sm:$0xff] %v265_v6  ;;  %v276_v26 = vrot.slane %v2516_v24, 2  ;;  %v277_v27 = vrot.slane %v2516_v24, 4  ;;  %v278_v28 = vrot.slane %v2516_v24, 6  ;;  %v279_v30 = vrot.slane %v2517_v25, 2 }
  0x14   : > { %366 = vst [vmem:[#allocation1 + $0x3] ss:$4 sm:$0xff] %v266_v7  ;;  %v280_v32 = vrot.slane %v2517_v25, 4  ;;  %v281_v33 = vrot.slane %v2517_v25, 6  ;;  %v282_v38 = vrot.slane %v2520_v36, 2  ;;  %v283_v39 = vrot.slane %v2520_v36, 4 }
  0x15   : > { %370 = vst [vmem:[#allocation1 + $0x21] ss:$4 sm:$0xff] %v267_v8  ;;  %v284_v41 = vrot.slane %v2520_v36, 6  ;;  %v285_v42 = vrot.slane %v2521_v37, 2  ;;  %v286_v44 = vrot.slane %v2521_v37, 4  ;;  %v287_v46 = vrot.slane %v2521_v37, 6 }
  0x16   : > { %372 = vst [vmem:[#allocation1 + $0x22] ss:$4 sm:$0xff] %v268_v9  ;;  %v2524_v48 = vunpack.c.l.bf16 %v2765_v43  ;;  %v2525_v49 = vunpack.c.h.bf16 %v2765_v43  ;;  %v2528_v60 = vunpack.c.l.bf16 %v2766_v54  ;;  %v2529_v61 = vunpack.c.h.bf16 %v2766_v54 }
  0x17   : > { %374 = vst [vmem:[#allocation1 + $0x23] ss:$4 sm:$0xff] %v269_v11  ;;  %v2532_v7 = vunpack.c.l.bf16 %v2767_v2  ;;  %v2533_v9 = vunpack.c.h.bf16 %v2767_v2  ;;  %vm636_vm2 = vcmask 261312   ;;  %vm640_vm3 = vcmask 326912  }
  0x18   : > { %v288_v50 = vrot.slane %v2524_v48, 2  ;;  %v289_v51 = vrot.slane %v2524_v48, 4  ;;  %v290_v53 = vrot.slane %v2524_v48, 6  ;;  %v291_v55 = vrot.slane %v2525_v49, 2 }
  0x19   : > { %v292_v56 = vrot.slane %v2525_v49, 4  ;;  %v293_v58 = vrot.slane %v2525_v49, 6  ;;  %v294_v62 = vrot.slane %v2528_v60, 2  ;;  %v295_v63 = vrot.slane %v2528_v60, 4 }
  0x1a   : > { %v296_v0 = vrot.slane %v2528_v60, 6  ;;  %v297_v3 = vrot.slane %v2529_v61, 2  ;;  %v298_v4 = vrot.slane %v2529_v61, 4  ;;  %v299_v5 = vrot.slane %v2529_v61, 6 }
  0x1b   : > { %v375_v16 = vld.sshfl [vmem:[#allocation1] sm:$0xff pattern:$0x73625140]  ;;  %v300_v10 = vrot.slane %v2532_v7, 2  ;;  %v301_v11 = vrot.slane %v2532_v7, 4  ;;  %vm644_vm4 = vcmask 392512  }
  0x1c   : > { %377 = vst [vmem:[#allocation1] ss:$4 sm:$0xff] %v2512_v12  ;;  %v302_v12 = vrot.slane %v2532_v7, 6  ;;  %vm648_vm5 = vcmask 458112   ;;  %vm652_vm6 = vcmask 523712   ;;  %vm656_vm7 = vcmask 589312  }
  0x1d   : > { %378 = vst [vmem:[#allocation1 + $0x1] ss:$4 sm:$0xff] %v270_v14  ;;  %v303_v14 = vrot.slane %v2533_v9, 2  ;;  %vm660_vm8 = vcmask 654912   ;;  %vm664_vm9 = vcmask 720512   ;;  %vm668_vm10 = vcmask 786112  }
  0x1e   : > { %v376_v20 = vld.sshfl [vmem:[#allocation1 + $0x20] sm:$0xff pattern:$0x73625140]  ;;  %379 = vst [vmem:[#allocation1 + $0x2] ss:$4 sm:$0xff] %v271_v15  ;;  %v2768_v15 = vld [vmem:[%s3846_s1 + $0x38] sm:$0xff]  }
  0x1f   : > { %v2835_v22 = vpack.i.bf16 %v376_v20, %v375_v16  ;;  %380 = vst [vmem:[#allocation1 + $0x3] ss:$4 sm:$0xff] %v272_v17  ;;  %v304_v16 = vrot.slane %v2533_v9, 4  ;;  %v305_v17 = vrot.slane %v2533_v9, 6  ;;  %v2537_v20 = vunpack.c.h.bf16 %v2768_v15 }
  0x20   : > { %381 = vst [vmem:[#allocation1 + $0x20] ss:$4 sm:$0xff] %v2513_v13  ;;  %vm672_vm11 = vcmask 851712   ;;  %vm676_vm12 = vcmask 917312   ;;  %vm3853_vm13 = vcmask 982912   ;;  %vm3852_vm14 = vcmask 1048512  }
  0x21   : > { %2836 = vperm.xlu0 %2834, %v2835_v22   ;;  %382 = vst [vmem:[#allocation1 + $0x21] ss:$4 sm:$0xff] %v273_v19  ;;  %v2536_v19 = vunpack.c.l.bf16 %v2768_v15  ;;  %vm3849_vm15 = vcmask 1041408  }
  0x22   : > { %383 = vst [vmem:[#allocation1 + $0x22] ss:$4 sm:$0xff] %v274_v21 }
  0x23   : > { %384 = vst [vmem:[#allocation1 + $0x23] ss:$4 sm:$0xff] %v275_v23  ;;  %v306_v21 = vrot.slane %v2536_v19, 2  ;;  %v307_v22 = vrot.slane %v2536_v19, 4 }
  0x26   : > { %v385_v29 = vld.sshfl [vmem:[#allocation1] sm:$0xff pattern:$0x73625140] }
  0x27   : > { %387 = vst [vmem:[#allocation1] ss:$4 sm:$0xff] %v2516_v24  ;;  %v308_v24 = vrot.slane %v2536_v19, 6 }
  0x28   : > { %388 = vst [vmem:[#allocation1 + $0x1] ss:$4 sm:$0xff] %v276_v26  ;;  %v2769_v26 = vld [vmem:[%s3846_s1 + $0x40] sm:$0xff]  }
  0x29   : > { %389 = vst [vmem:[#allocation1 + $0x2] ss:$4 sm:$0xff] %v277_v27  ;;  %v310_v27 = vrot.slane %v2537_v20, 4  ;;  %v2540_v31 = vunpack.c.l.bf16 %v2769_v26 }
  0x2a   : > { %v386_v34 = vld.sshfl [vmem:[#allocation1 + $0x20] sm:$0xff pattern:$0x73625140]  ;;  %390 = vst [vmem:[#allocation1 + $0x3] ss:$4 sm:$0xff] %v278_v28 }
  0x2b   : > { %391 = vst [vmem:[#allocation1 + $0x20] ss:$4 sm:$0xff] %v2517_v25  ;;  %v2840_v35 = vpack.i.bf16 %v386_v34, %v385_v29  ;;  %v309_v25 = vrot.slane %v2537_v20, 2  ;;  %v311_v29 = vrot.slane %v2537_v20, 6  ;;  %v313_v34 = vrot.slane %v2540_v31, 4 }
  0x2c   : > { %392 = vst [vmem:[#allocation1 + $0x21] ss:$4 sm:$0xff] %v279_v30 }
  0x2d   : > { %393 = vst [vmem:[#allocation1 + $0x22] ss:$4 sm:$0xff] %v280_v32  ;;  %2841 = vperm.xlu0 %2834, %v2840_v35   ;;  %v2541_v32 = vunpack.c.h.bf16 %v2769_v26 }
  0x2e   : > { %394 = vst [vmem:[#allocation1 + $0x23] ss:$4 sm:$0xff] %v281_v33  ;;  %v312_v33 = vrot.slane %v2540_v31, 2 }
  0x31   : > { %v395_v40 = vld.sshfl [vmem:[#allocation1] sm:$0xff pattern:$0x73625140] }
  0x32   : > { %397 = vst [vmem:[#allocation1] ss:$4 sm:$0xff] %v2520_v36  ;;  %v314_v36 = vrot.slane %v2540_v31, 6 }
  0x33   : > { %398 = vst [vmem:[#allocation1 + $0x1] ss:$4 sm:$0xff] %v282_v38  ;;  %v315_v38 = vrot.slane %v2541_v32, 2 }
  0x34   : > { %399 = vst [vmem:[#allocation1 + $0x2] ss:$4 sm:$0xff] %v283_v39  ;;  %v316_v39 = vrot.slane %v2541_v32, 4 }
  0x35   : > { %v396_v45 = vld.sshfl [vmem:[#allocation1 + $0x20] sm:$0xff pattern:$0x73625140]  ;;  %400 = vst [vmem:[#allocation1 + $0x3] ss:$4 sm:$0xff] %v284_v41  ;;  %v317_v41 = vrot.slane %v2541_v32, 6 }
  0x36   : > { %v2846_v47 = vpack.i.bf16 %v396_v45, %v395_v40  ;;  %401 = vst [vmem:[#allocation1 + $0x20] ss:$4 sm:$0xff] %v2521_v37  ;;  %v2770_v37 = vld [vmem:[%s3846_s1 + $0x48] sm:$0xff]  }
  0x37   : > { %402 = vst [vmem:[#allocation1 + $0x21] ss:$4 sm:$0xff] %v285_v42  ;;  %v2544_v43 = vunpack.c.l.bf16 %v2770_v37  ;;  %v2545_v45 = vunpack.c.h.bf16 %v2770_v37 }
  0x38   : > { %2847 = vperm.xlu1 %2845, %v2846_v47   ;;  %403 = vst [vmem:[#allocation1 + $0x22] ss:$4 sm:$0xff] %v286_v44 }
  0x39   : > { %404 = vst [vmem:[#allocation1 + $0x23] ss:$4 sm:$0xff] %v287_v46  ;;  %v318_v46 = vrot.slane %v2544_v43, 2  ;;  %v319_v47 = vrot.slane %v2544_v43, 4 }
  0x3c   : > { %v405_v52 = vld.sshfl [vmem:[#allocation1] sm:$0xff pattern:$0x73625140] }
  0x3d   : > { %407 = vst [vmem:[#allocation1] ss:$4 sm:$0xff] %v2524_v48  ;;  %v320_v48 = vrot.slane %v2544_v43, 6 }
  0x3e   : > { %408 = vst [vmem:[#allocation1 + $0x1] ss:$4 sm:$0xff] %v288_v50  ;;  %v321_v50 = vrot.slane %v2545_v45, 2 }
  0x3f   : > { %409 = vst [vmem:[#allocation1 + $0x2] ss:$4 sm:$0xff] %v289_v51  ;;  %v2771_v51 = vld [vmem:[%s3846_s1 + $0x50] sm:$0xff]  }
  0x40   : > { %v406_v57 = vld.sshfl [vmem:[#allocation1 + $0x20] sm:$0xff pattern:$0x73625140]  ;;  %410 = vst [vmem:[#allocation1 + $0x3] ss:$4 sm:$0xff] %v290_v53  ;;  %v323_v53 = vrot.slane %v2545_v45, 6 }
  0x41   : > { %v2851_v59 = vpack.i.bf16 %v406_v57, %v405_v52  ;;  %411 = vst [vmem:[#allocation1 + $0x20] ss:$4 sm:$0xff] %v2525_v49  ;;  %v322_v52 = vrot.slane %v2545_v45, 4 }
  0x42   : > { %412 = vst [vmem:[#allocation1 + $0x21] ss:$4 sm:$0xff] %v291_v55  ;;  %v2548_v55 = vunpack.c.l.bf16 %v2771_v51 }
  0x43   : > { %2852 = vperm.xlu1 %2845, %v2851_v59   ;;  %413 = vst [vmem:[#allocation1 + $0x22] ss:$4 sm:$0xff] %v292_v56  ;;  %v2549_v56 = vunpack.c.h.bf16 %v2771_v51 }
  0x44   : > { %414 = vst [vmem:[#allocation1 + $0x23] ss:$4 sm:$0xff] %v293_v58  ;;  %v324_v57 = vrot.slane %v2548_v55, 2  ;;  %v325_v58 = vrot.slane %v2548_v55, 4 }
  0x47   : > { %v415_v1 = vld.sshfl [vmem:[#allocation1] sm:$0xff pattern:$0x73625140] }
  0x48   : > { %417 = vst [vmem:[#allocation1] ss:$4 sm:$0xff] %v2528_v60  ;;  %v326_v60 = vrot.slane %v2548_v55, 6 }
  0x49   : > { %418 = vst [vmem:[#allocation1 + $0x1] ss:$4 sm:$0xff] %v294_v62  ;;  %v2772_v62 = vld [vmem:[%s3846_s1 + $0x58] sm:$0xff]  }
  0x4a   : > { %419 = vst [vmem:[#allocation1 + $0x2] ss:$4 sm:$0xff] %v295_v63  ;;  %v328_v63 = vrot.slane %v2549_v56, 4 }
  0x4b   : > { %v416_v6 = vld.sshfl [vmem:[#allocation1 + $0x20] sm:$0xff pattern:$0x73625140]  ;;  %420 = vst [vmem:[#allocation1 + $0x3] ss:$4 sm:$0xff] %v296_v0 }
  0x4c   : > { %421 = vst [vmem:[#allocation1 + $0x20] ss:$4 sm:$0xff] %v2529_v61  ;;  %v2857_v8 = vpack.i.bf16 %v416_v6, %v415_v1  ;;  %v327_v61 = vrot.slane %v2549_v56, 2  ;;  %v329_v1 = vrot.slane %v2549_v56, 6 }
  0x4d   : > { %422 = vst [vmem:[#allocation1 + $0x21] ss:$4 sm:$0xff] %v297_v3  ;;  %v2552_v3 = vunpack.c.l.bf16 %v2772_v62 }
  0x4e   : > { %423 = vst [vmem:[#allocation1 + $0x22] ss:$4 sm:$0xff] %v298_v4  ;;  %2858 = vperm.xlu2 %2856, %v2857_v8   ;;  %v2553_v4 = vunpack.c.h.bf16 %v2772_v62 }
  0x4f   : > { %424 = vst [vmem:[#allocation1 + $0x23] ss:$4 sm:$0xff] %v299_v5  ;;  %v330_v5 = vrot.slane %v2552_v3, 2  ;;  %v331_v6 = vrot.slane %v2552_v3, 4  ;;  %v332_v8 = vrot.slane %v2552_v3, 6 }
  0x52   : > { %v425_v13 = vld.sshfl [vmem:[#allocation1] sm:$0xff pattern:$0x73625140] }
  0x53   : > { %427 = vst [vmem:[#allocation1] ss:$4 sm:$0xff] %v2532_v7 }
  0x54   : > { %428 = vst [vmem:[#allocation1 + $0x1] ss:$4 sm:$0xff] %v300_v10  ;;  %v333_v10 = vrot.slane %v2553_v4, 2 }
  0x55   : > { %429 = vst [vmem:[#allocation1 + $0x2] ss:$4 sm:$0xff] %v301_v11  ;;  %v334_v11 = vrot.slane %v2553_v4, 4 }
  0x56   : > { %v426_v18 = vld.sshfl [vmem:[#allocation1 + $0x20] sm:$0xff pattern:$0x73625140]  ;;  %430 = vst [vmem:[#allocation1 + $0x3] ss:$4 sm:$0xff] %v302_v12 }
  0x57   : > { %431 = vst [vmem:[#allocation1 + $0x20] ss:$4 sm:$0xff] %v2533_v9  ;;  %v2862_v44 = vpack.i.bf16 %v426_v18, %v425_v13  ;;  %v2773_v9 = vld [vmem:[%s3846_s1 + $0x60] sm:$0xff]   ;;  %v335_v13 = vrot.slane %v2553_v4, 6 }
  0x58   : > { %432 = vst [vmem:[#allocation1 + $0x21] ss:$4 sm:$0xff] %v303_v14  ;;  %v2556_v15 = vunpack.c.l.bf16 %v2773_v9 }
  0x59   : > { %433 = vst [vmem:[#allocation1 + $0x22] ss:$4 sm:$0xff] %v304_v16  ;;  %2863 = vperm.xlu2 %2856, %v2862_v44  }
  0x5a   : > { %434 = vst [vmem:[#allocation1 + $0x23] ss:$4 sm:$0xff] %v305_v17  ;;  %v2557_v17 = vunpack.c.h.bf16 %v2773_v9  ;;  %v336_v18 = vrot.slane %v2556_v15, 2 }
  0x5d   : > { %v435_v23 = vld.sshfl [vmem:[#allocation1] sm:$0xff pattern:$0x73625140] }
  0x5e   : > { %437 = vst [vmem:[#allocation1] ss:$4 sm:$0xff] %v2536_v19  ;;  %v337_v19 = vrot.slane %v2556_v15, 4 }
  0x5f   : > { %438 = vst [vmem:[#allocation1 + $0x1] ss:$4 sm:$0xff] %v306_v21 }
  0x60   : > { %439 = vst [vmem:[#allocation1 + $0x2] ss:$4 sm:$0xff] %v307_v22  ;;  %v339_v22 = vrot.slane %v2557_v17, 2 }
  0x61   : > { %v436_v28 = vld.sshfl [vmem:[#allocation1 + $0x20] sm:$0xff pattern:$0x73625140]  ;;  %440 = vst [vmem:[#allocation1 + $0x3] ss:$4 sm:$0xff] %v308_v24  ;;  %v340_v24 = vrot.slane %v2557_v17, 4 }
  0x62   : > { %v2867_v30 = vpack.i.bf16 %v436_v28, %v435_v23  ;;  %441 = vst [vmem:[#allocation1 + $0x20] ss:$4 sm:$0xff] %v2537_v20  ;;  %v338_v20 = vrot.slane %v2556_v15, 6  ;;  %v2774_v23 = vld [vmem:[%s3846_s1 + $0x68] sm:$0xff]  }
  0x63   : > { %442 = vst [vmem:[#allocation1 + $0x21] ss:$4 sm:$0xff] %v309_v25  ;;  %v341_v25 = vrot.slane %v2557_v17, 6  ;;  %v2561_v28 = vunpack.c.h.bf16 %v2774_v23 }
  0x64   : > { %2868 = vperm.xlu0 %2834, %v2867_v30   ;;  %443 = vst [vmem:[#allocation1 + $0x22] ss:$4 sm:$0xff] %v310_v27  ;;  %v2560_v27 = vunpack.c.l.bf16 %v2774_v23 }
  0x65   : > { %444 = vst [vmem:[#allocation1 + $0x23] ss:$4 sm:$0xff] %v311_v29  ;;  %v347_v37 = vrot.slane %v2561_v28, 6 }
  0x66   : > { %v342_v29 = vrot.slane %v2560_v27, 2  ;;  %v343_v30 = vrot.slane %v2560_v27, 4 }
  0x68   : > { %v445_v35 = vld.sshfl [vmem:[#allocation1] sm:$0xff pattern:$0x73625140] }
  0x69   : > { %447 = vst [vmem:[#allocation1] ss:$4 sm:$0xff] %v2540_v31 }
  0x6a   : > { %448 = vst [vmem:[#allocation1 + $0x1] ss:$4 sm:$0xff] %v312_v33  ;;  %v345_v33 = vrot.slane %v2561_v28, 2 }
  0x6b   : > { %449 = vst [vmem:[#allocation1 + $0x2] ss:$4 sm:$0xff] %v313_v34  ;;  %v2775_v34 = vld [vmem:[%s3846_s1 + $0x70] sm:$0xff]  }
  0x6c   : > { %v446_v40 = vld.sshfl [vmem:[#allocation1 + $0x20] sm:$0xff pattern:$0x73625140]  ;;  %450 = vst [vmem:[#allocation1 + $0x3] ss:$4 sm:$0xff] %v314_v36 }
  0x6d   : > { %v2872_v42 = vpack.i.bf16 %v446_v40, %v445_v35  ;;  %451 = vst [vmem:[#allocation1 + $0x20] ss:$4 sm:$0xff] %v2541_v32  ;;  %v344_v32 = vrot.slane %v2560_v27, 6  ;;  %v346_v35 = vrot.slane %v2561_v28, 4 }
  0x6e   : > { %452 = vst [vmem:[#allocation1 + $0x21] ss:$4 sm:$0xff] %v315_v38 }
  0x6f   : > { %2873 = vperm.xlu1 %2845, %v2872_v42   ;;  %453 = vst [vmem:[#allocation1 + $0x22] ss:$4 sm:$0xff] %v316_v39  ;;  %v2564_v39 = vunpack.c.l.bf16 %v2775_v34 }
  0x70   : > { %454 = vst [vmem:[#allocation1 + $0x23] ss:$4 sm:$0xff] %v317_v41  ;;  %v2565_v41 = vunpack.c.h.bf16 %v2775_v34 }
  0x71   : > { %v348_v42 = vrot.slane %v2564_v39, 2 }
  0x73   : > { %v455_v49 = vld.sshfl [vmem:[#allocation1] sm:$0xff pattern:$0x73625140] }
  0x74   : > { %457 = vst [vmem:[#allocation1] ss:$4 sm:$0xff] %v2544_v43  ;;  %v349_v43 = vrot.slane %v2564_v39, 4 }
  0x75   : > { %458 = vst [vmem:[#allocation1 + $0x1] ss:$4 sm:$0xff] %v318_v46  ;;  %v2776_v46 = vld [vmem:[%s3846_s1 + $0x78] sm:$0xff]  }
  0x76   : > { %459 = vst [vmem:[#allocation1 + $0x2] ss:$4 sm:$0xff] %v319_v47  ;;  %v351_v47 = vrot.slane %v2565_v41, 2 }
  0x77   : > { %v456_v54 = vld.sshfl [vmem:[#allocation1 + $0x20] sm:$0xff pattern:$0x73625140]  ;;  %460 = vst [vmem:[#allocation1 + $0x3] ss:$4 sm:$0xff] %v320_v48  ;;  %v352_v48 = vrot.slane %v2565_v41, 4 }
  0x78   : > { %461 = vst [vmem:[#allocation1 + $0x20] ss:$4 sm:$0xff] %v2545_v45  ;;  %v2877_v16 = vpack.i.bf16 %v456_v54, %v455_v49  ;;  %v350_v45 = vrot.slane %v2564_v39, 6 }
  0x79   : > { %462 = vst [vmem:[#allocation1 + $0x21] ss:$4 sm:$0xff] %v321_v50  ;;  %v353_v50 = vrot.slane %v2565_v41, 6 }
  0x7a   : > { %463 = vst [vmem:[#allocation1 + $0x22] ss:$4 sm:$0xff] %v322_v52  ;;  %2878 = vperm.xlu2 %2856, %v2877_v16   ;;  %v2568_v52 = vunpack.c.l.bf16 %v2776_v46 }
  0x7b   : > { %464 = vst [vmem:[#allocation1 + $0x23] ss:$4 sm:$0xff] %v323_v53  ;;  %v2569_v53 = vunpack.c.h.bf16 %v2776_v46 }
  0x7c   : > { %v354_v54 = vrot.slane %v2568_v52, 2 }
  0x7e   : > { %v465_v59 = vld.sshfl [vmem:[#allocation1] sm:$0xff pattern:$0x73625140] }
  0x7f   : > { %467 = vst [vmem:[#allocation1] ss:$4 sm:$0xff] %v2548_v55  ;;  %v355_v55 = vrot.slane %v2568_v52, 4 }
  0x80   : > { %468 = vst [vmem:[#allocation1 + $0x1] ss:$4 sm:$0xff] %v324_v57 }
  0x81   : > { %469 = vst [vmem:[#allocation1 + $0x2] ss:$4 sm:$0xff] %v325_v58  ;;  %v357_v58 = vrot.slane %v2569_v53, 2 }
  0x82   : > { %v466_v0 = vld.sshfl [vmem:[#allocation1 + $0x20] sm:$0xff pattern:$0x73625140]  ;;  %470 = vst [vmem:[#allocation1 + $0x3] ss:$4 sm:$0xff] %v326_v60  ;;  %v358_v60 = vrot.slane %v2569_v53, 4 }
  0x83   : > { %v2882_v2 = vpack.i.bf16 %v466_v0, %v465_v59  ;;  %471 = vst [vmem:[#allocation1 + $0x20] ss:$4 sm:$0xff] %v2549_v56  ;;  %v356_v56 = vrot.slane %v2568_v52, 6  ;;  %v2777_v59 = vld [vmem:[%s3846_s1 + $0x80] sm:$0xff]  }
  0x84   : > { %472 = vst [vmem:[#allocation1 + $0x21] ss:$4 sm:$0xff] %v327_v61  ;;  %v359_v61 = vrot.slane %v2569_v53, 6  ;;  %v2572_v0 = vunpack.c.l.bf16 %v2777_v59 }
  0x85   : > { %2883 = vperm.xlu0 %2834, %v2882_v2   ;;  %473 = vst [vmem:[#allocation1 + $0x22] ss:$4 sm:$0xff] %v328_v63 }
  0x86   : > { %474 = vst [vmem:[#allocation1 + $0x23] ss:$4 sm:$0xff] %v329_v1  ;;  %v2573_v1 = vunpack.c.h.bf16 %v2777_v59  ;;  %v833_v2 = vrot.slane %v2572_v0, 2 }
  0x89   : > { %v475_v7 = vld.sshfl [vmem:[#allocation1] sm:$0xff pattern:$0x73625140] }
  0x8a   : > { %477 = vst [vmem:[#allocation1] ss:$4 sm:$0xff] %v2552_v3  ;;  %v834_v3 = vrot.slane %v2572_v0, 4 }
  0x8b   : > { %478 = vst [vmem:[#allocation1 + $0x1] ss:$4 sm:$0xff] %v330_v5  ;;  %v835_v5 = vrot.slane %v2572_v0, 6 }
  0x8c   : > { %479 = vst [vmem:[#allocation1 + $0x2] ss:$4 sm:$0xff] %v331_v6  ;;  %v2778_v6 = vld [vmem:[%s3846_s1 + $0x88] sm:$0xff]  }
  0x8d   : > { %v476_v12 = vld.sshfl [vmem:[#allocation1 + $0x20] sm:$0xff pattern:$0x73625140]  ;;  %480 = vst [vmem:[#allocation1 + $0x3] ss:$4 sm:$0xff] %v332_v8  ;;  %v837_v8 = vrot.slane %v2573_v1, 4 }
  0x8e   : > { %v2887_v14 = vpack.i.bf16 %v476_v12, %v475_v7  ;;  %481 = vst [vmem:[#allocation1 + $0x20] ss:$4 sm:$0xff] %v2553_v4  ;;  %v836_v7 = vrot.slane %v2573_v1, 2  ;;  %v2576_v12 = vunpack.c.l.bf16 %v2778_v6 }
  0x8f   : > { %482 = vst [vmem:[#allocation1 + $0x21] ss:$4 sm:$0xff] %v333_v10  ;;  %v838_v10 = vrot.slane %v2573_v1, 6 }
  0x90   : > { %2888 = vperm.xlu1 %2845, %v2887_v14   ;;  %483 = vst [vmem:[#allocation1 + $0x22] ss:$4 sm:$0xff] %v334_v11  ;;  %v839_v14 = vrot.slane %v2576_v12, 2  ;;  %v841_v16 = vrot.slane %v2576_v12, 6 }
  0x91   : > { %484 = vst [vmem:[#allocation1 + $0x23] ss:$4 sm:$0xff] %v335_v13  ;;  %v2577_v13 = vunpack.c.h.bf16 %v2778_v6 }
  0x94   : > { %v485_v21 = vld.sshfl [vmem:[#allocation1] sm:$0xff pattern:$0x73625140] }
  0x95   : > { %487 = vst [vmem:[#allocation1] ss:$4 sm:$0xff] %v2556_v15  ;;  %v840_v15 = vrot.slane %v2576_v12, 4 }
  0x96   : > { %488 = vst [vmem:[#allocation1 + $0x1] ss:$4 sm:$0xff] %v336_v18  ;;  %v842_v18 = vrot.slane %v2577_v13, 2 }
  0x97   : > { %489 = vst [vmem:[#allocation1 + $0x2] ss:$4 sm:$0xff] %v337_v19  ;;  %v2779_v19 = vld [vmem:[%s3846_s1 + $0x90] sm:$0xff]  }
  0x98   : > { %v486_v26 = vld.sshfl [vmem:[#allocation1 + $0x20] sm:$0xff pattern:$0x73625140]  ;;  %490 = vst [vmem:[#allocation1 + $0x3] ss:$4 sm:$0xff] %v338_v20  ;;  %v843_v20 = vrot.slane %v2577_v13, 4 }
  0x99   : > { %491 = vst [vmem:[#allocation1 + $0x20] ss:$4 sm:$0xff] %v2557_v17  ;;  %v2892_v40 = vpack.i.bf16 %v486_v26, %v485_v21  ;;  %v844_v21 = vrot.slane %v2577_v13, 6 }
  0x9a   : > { %492 = vst [vmem:[#allocation1 + $0x21] ss:$4 sm:$0xff] %v339_v22 }
  0x9b   : > { %493 = vst [vmem:[#allocation1 + $0x22] ss:$4 sm:$0xff] %v340_v24  ;;  %2893 = vperm.xlu2 %2856, %v2892_v40   ;;  %v2580_v24 = vunpack.c.l.bf16 %v2779_v19 }
  0x9c   : > { %494 = vst [vmem:[#allocation1 + $0x23] ss:$4 sm:$0xff] %v341_v25  ;;  %v2581_v25 = vunpack.c.h.bf16 %v2779_v19 }
  0x9d   : > { %v845_v26 = vrot.slane %v2580_v24, 2 }
  0x9e   : > { %v850_v34 = vrot.slane %v2581_v25, 6 }
  0x9f   : > { %v495_v31 = vld.sshfl [vmem:[#allocation1] sm:$0xff pattern:$0x73625140] }
  0xa0   : > { %497 = vst [vmem:[#allocation1] ss:$4 sm:$0xff] %v2560_v27  ;;  %v846_v27 = vrot.slane %v2580_v24, 4 }
  0xa1   : > { %498 = vst [vmem:[#allocation1 + $0x1] ss:$4 sm:$0xff] %v342_v29  ;;  %v847_v29 = vrot.slane %v2580_v24, 6 }
  0xa2   : > { %499 = vst [vmem:[#allocation1 + $0x2] ss:$4 sm:$0xff] %v343_v30  ;;  %v848_v30 = vrot.slane %v2581_v25, 2 }
  0xa3   : > { %v496_v36 = vld.sshfl [vmem:[#allocation1 + $0x20] sm:$0xff pattern:$0x73625140]  ;;  %500 = vst [vmem:[#allocation1 + $0x3] ss:$4 sm:$0xff] %v344_v32  ;;  %v849_v32 = vrot.slane %v2581_v25, 4 }
  0xa4   : > { %v2897_v38 = vpack.i.bf16 %v496_v36, %v495_v31  ;;  %501 = vst [vmem:[#allocation1 + $0x20] ss:$4 sm:$0xff] %v2561_v28  ;;  %v2780_v31 = vld [vmem:[%s3846_s1 + $0x98] sm:$0xff]  }
  0xa5   : > { %502 = vst [vmem:[#allocation1 + $0x21] ss:$4 sm:$0xff] %v345_v33  ;;  %v2584_v36 = vunpack.c.l.bf16 %v2780_v31 }
  0xa6   : > { %2898 = vperm.xlu0 %2834, %v2897_v38   ;;  %503 = vst [vmem:[#allocation1 + $0x22] ss:$4 sm:$0xff] %v346_v35 }
  0xa7   : > { %504 = vst [vmem:[#allocation1 + $0x23] ss:$4 sm:$0xff] %v347_v37  ;;  %v2585_v37 = vunpack.c.h.bf16 %v2780_v31  ;;  %v851_v38 = vrot.slane %v2584_v36, 2 }
  0xa9   : > { %v856_v46 = vrot.slane %v2585_v37, 6 }
  0xaa   : > { %v505_v44 = vld.sshfl [vmem:[#allocation1] sm:$0xff pattern:$0x73625140] }
  0xab   : > { %507 = vst [vmem:[#allocation1] ss:$4 sm:$0xff] %v2564_v39  ;;  %v852_v39 = vrot.slane %v2584_v36, 4 }
  0xac   : > { %508 = vst [vmem:[#allocation1 + $0x1] ss:$4 sm:$0xff] %v348_v42  ;;  %v854_v42 = vrot.slane %v2585_v37, 2 }
  0xad   : > { %509 = vst [vmem:[#allocation1 + $0x2] ss:$4 sm:$0xff] %v349_v43  ;;  %v2781_v43 = vld [vmem:[%s3846_s1 + $0xa0] sm:$0xff]  }
  0xae   : > { %v506_v49 = vld.sshfl [vmem:[#allocation1 + $0x20] sm:$0xff pattern:$0x73625140]  ;;  %510 = vst [vmem:[#allocation1 + $0x3] ss:$4 sm:$0xff] %v350_v45 }
  0xaf   : > { %v2902_v51 = vpack.i.bf16 %v506_v49, %v505_v44  ;;  %511 = vst [vmem:[#allocation1 + $0x20] ss:$4 sm:$0xff] %v2565_v41  ;;  %v853_v41 = vrot.slane %v2584_v36, 6  ;;  %v855_v44 = vrot.slane %v2585_v37, 4  ;;  %v2589_v49 = vunpack.c.h.bf16 %v2781_v43 }
  0xb0   : > { %512 = vst [vmem:[#allocation1 + $0x21] ss:$4 sm:$0xff] %v351_v47 }
  0xb1   : > { %2903 = vperm.xlu1 %2845, %v2902_v51   ;;  %513 = vst [vmem:[#allocation1 + $0x22] ss:$4 sm:$0xff] %v352_v48  ;;  %v2588_v48 = vunpack.c.l.bf16 %v2781_v43 }
  0xb2   : > { %514 = vst [vmem:[#allocation1 + $0x23] ss:$4 sm:$0xff] %v353_v50 }
  0xb3   : > { %v857_v50 = vrot.slane %v2588_v48, 2  ;;  %v858_v51 = vrot.slane %v2588_v48, 4 }
  0xb5   : > { %v515_v57 = vld.sshfl [vmem:[#allocation1] sm:$0xff pattern:$0x73625140] }
  0xb6   : > { %517 = vst [vmem:[#allocation1] ss:$4 sm:$0xff] %v2568_v52 }
  0xb7   : > { %518 = vst [vmem:[#allocation1 + $0x1] ss:$4 sm:$0xff] %v354_v54  ;;  %v860_v54 = vrot.slane %v2589_v49, 2 }
  0xb8   : > { %519 = vst [vmem:[#allocation1 + $0x2] ss:$4 sm:$0xff] %v355_v55  ;;  %v2782_v55 = vld [vmem:[%s3846_s1 + $0xa8] sm:$0xff]  }
  0xb9   : > { %v516_v62 = vld.sshfl [vmem:[#allocation1 + $0x20] sm:$0xff pattern:$0x73625140]  ;;  %520 = vst [vmem:[#allocation1 + $0x3] ss:$4 sm:$0xff] %v356_v56  ;;  %v861_v56 = vrot.slane %v2589_v49, 4 }
  0xba   : > { %521 = vst [vmem:[#allocation1 + $0x20] ss:$4 sm:$0xff] %v2569_v53  ;;  %v2907_v63 = vpack.i.bf16 %v516_v62, %v515_v57  ;;  %v859_v53 = vrot.slane %v2588_v48, 6 }
  0xbb   : > { %522 = vst [vmem:[#allocation1 + $0x21] ss:$4 sm:$0xff] %v357_v58  ;;  %v862_v58 = vrot.slane %v2589_v49, 6 }
  0xbc   : > { %523 = vst [vmem:[#allocation1 + $0x22] ss:$4 sm:$0xff] %v358_v60  ;;  %2908 = vperm.xlu2 %2856, %v2907_v63   ;;  %v2592_v60 = vunpack.c.l.bf16 %v2782_v55 }
  0xbd   : > { %524 = vst [vmem:[#allocation1 + $0x23] ss:$4 sm:$0xff] %v359_v61  ;;  %v2593_v61 = vunpack.c.h.bf16 %v2782_v55  ;;  %v623_v55 = vlaneseq }
  0xbe   : > { %v863_v62 = vrot.slane %v2592_v60, 2  ;;  %v864_v63 = vrot.slane %v2592_v60, 4 }
  0xbf   : > { %v868_v6 = vrot.slane %v2593_v61, 6 }
  0xc0   : > { %v525_v4 = vld.sshfl [vmem:[#allocation1] sm:$0xff pattern:$0x73625140] }
  0xc1   : > { %929 = vst [vmem:[#allocation1] ss:$4 sm:$0xff] %v2572_v0 }
  0xc2   : > { %931 = vst [vmem:[#allocation1 + $0x1] ss:$4 sm:$0xff] %v833_v2  ;;  %v866_v2 = vrot.slane %v2593_v61, 2 }
  0xc3   : > { %933 = vst [vmem:[#allocation1 + $0x2] ss:$4 sm:$0xff] %v834_v3  ;;  %v2783_v3 = vld [vmem:[%s3846_s1 + $0xb0] sm:$0xff]  }
  0xc4   : > { %v526_v9 = vld.sshfl [vmem:[#allocation1 + $0x20] sm:$0xff pattern:$0x73625140]  ;;  %935 = vst [vmem:[#allocation1 + $0x3] ss:$4 sm:$0xff] %v835_v5 }
  0xc5   : > { %v2912_v11 = vpack.i.bf16 %v526_v9, %v525_v4  ;;  %937 = vst [vmem:[#allocation1 + $0x20] ss:$4 sm:$0xff] %v2573_v1  ;;  %v865_v1 = vrot.slane %v2592_v60, 6  ;;  %v867_v4 = vrot.slane %v2593_v61, 4  ;;  %v2597_v9 = vunpack.c.h.bf16 %v2783_v3 }
  0xc6   : > { %939 = vst [vmem:[#allocation1 + $0x21] ss:$4 sm:$0xff] %v836_v7 }
  0xc7   : > { %2913 = vperm.xlu0 %2834, %v2912_v11   ;;  %941 = vst [vmem:[#allocation1 + $0x22] ss:$4 sm:$0xff] %v837_v8  ;;  %v2596_v8 = vunpack.c.l.bf16 %v2783_v3 }
  0xc8   : > { %943 = vst [vmem:[#allocation1 + $0x23] ss:$4 sm:$0xff] %v838_v10 }
  0xc9   : > { %v869_v10 = vrot.slane %v2596_v8, 2  ;;  %v870_v11 = vrot.slane %v2596_v8, 4 }
  0xcb   : > { %v944_v17 = vld.sshfl [vmem:[#allocation1] sm:$0xff pattern:$0x73625140] }
  0xcc   : > { %946 = vst [vmem:[#allocation1] ss:$4 sm:$0xff] %v2576_v12 }
  0xcd   : > { %947 = vst [vmem:[#allocation1 + $0x1] ss:$4 sm:$0xff] %v839_v14  ;;  %v872_v14 = vrot.slane %v2597_v9, 2 }
  0xce   : > { %948 = vst [vmem:[#allocation1 + $0x2] ss:$4 sm:$0xff] %v840_v15  ;;  %v2784_v15 = vld [vmem:[%s3846_s1 + $0xb8] sm:$0xff]  }
  0xcf   : > { %v945_v22 = vld.sshfl [vmem:[#allocation1 + $0x20] sm:$0xff pattern:$0x73625140]  ;;  %949 = vst [vmem:[#allocation1 + $0x3] ss:$4 sm:$0xff] %v841_v16  ;;  %v873_v16 = vrot.slane %v2597_v9, 4 }
  0xd0   : > { %950 = vst [vmem:[#allocation1 + $0x20] ss:$4 sm:$0xff] %v2577_v13  ;;  %v2917_v23 = vpack.i.bf16 %v945_v22, %v944_v17  ;;  %v871_v13 = vrot.slane %v2596_v8, 6 }
  0xd1   : > { %951 = vst [vmem:[#allocation1 + $0x21] ss:$4 sm:$0xff] %v842_v18  ;;  %v874_v18 = vrot.slane %v2597_v9, 6 }
  0xd2   : > { %952 = vst [vmem:[#allocation1 + $0x22] ss:$4 sm:$0xff] %v843_v20  ;;  %2918 = vperm.xlu2 %2856, %v2917_v23   ;;  %v2600_v20 = vunpack.c.l.bf16 %v2784_v15 }
  0xd3   : > { %953 = vst [vmem:[#allocation1 + $0x23] ss:$4 sm:$0xff] %v844_v21  ;;  %v2601_v21 = vunpack.c.h.bf16 %v2784_v15 }
  0xd4   : > { %v875_v22 = vrot.slane %v2600_v20, 2  ;;  %v876_v23 = vrot.slane %v2600_v20, 4 }
  0xd5   : > { %v880_v31 = vrot.slane %v2601_v21, 6 }
  0xd6   : > { %v954_v28 = vld.sshfl [vmem:[#allocation1] sm:$0xff pattern:$0x73625140] }
  0xd7   : > { %956 = vst [vmem:[#allocation1] ss:$4 sm:$0xff] %v2580_v24 }
  0xd8   : > { %957 = vst [vmem:[#allocation1 + $0x1] ss:$4 sm:$0xff] %v845_v26  ;;  %v878_v26 = vrot.slane %v2601_v21, 2 }
  0xd9   : > { %958 = vst [vmem:[#allocation1 + $0x2] ss:$4 sm:$0xff] %v846_v27  ;;  %v2785_v27 = vld [vmem:[%s3846_s1 + $0xc0] sm:$0xff]  }
  0xda   : > { %v955_v33 = vld.sshfl [vmem:[#allocation1 + $0x20] sm:$0xff pattern:$0x73625140]  ;;  %959 = vst [vmem:[#allocation1 + $0x3] ss:$4 sm:$0xff] %v847_v29  ;;  %v3272_v29 = vpop.permute.xlu0 %2836 }
  0xdb   : > { %v2922_v35 = vpack.i.bf16 %v955_v33, %v954_v28  ;;  %960 = vst [vmem:[#allocation1 + $0x20] ss:$4 sm:$0xff] %v2581_v25  ;;  %v877_v25 = vrot.slane %v2600_v20, 6  ;;  %v879_v28 = vrot.slane %v2601_v21, 4  ;;  %v2604_v33 = vunpack.c.l.bf16 %v2785_v27 }
  0xdc   : > { %961 = vst [vmem:[#allocation1 + $0x21] ss:$4 sm:$0xff] %v848_v30 }
  0xdd   : > { %2923 = vperm.xlu0 %2834, %v2922_v35   ;;  %962 = vst [vmem:[#allocation1 + $0x22] ss:$4 sm:$0xff] %v849_v32  ;;  %v881_v35 = vrot.slane %v2604_v33, 2 }
  0xde   : > { %963 = vst [vmem:[#allocation1 + $0x23] ss:$4 sm:$0xff] %v850_v34  ;;  %v2605_v34 = vunpack.c.h.bf16 %v2785_v27 }
  0xe1   : > { %v964_v40 = vld.sshfl [vmem:[#allocation1] sm:$0xff pattern:$0x73625140] }
  0xe2   : > { %966 = vst [vmem:[#allocation1] ss:$4 sm:$0xff] %v2584_v36  ;;  %v882_v36 = vrot.slane %v2604_v33, 4  ;;  %v3281_v43 = vpop.permute.xlu0 %2841 }
  0xe3   : > { %967 = vst [vmem:[#allocation1 + $0x1] ss:$4 sm:$0xff] %v851_v38  ;;  %v2843_v27 = vunpack.i.l.bf16 %v3281_v43 }
  0xe4   : > { %968 = vst [vmem:[#allocation1 + $0x2] ss:$4 sm:$0xff] %v852_v39  ;;  %v883_v39 = vrot.slane %v2604_v33, 6 }
  0xe5   : > { %v965_v45 = vld.sshfl [vmem:[#allocation1 + $0x20] sm:$0xff pattern:$0x73625140]  ;;  %969 = vst [vmem:[#allocation1 + $0x3] ss:$4 sm:$0xff] %v853_v41  ;;  %v884_v41 = vrot.slane %v2605_v34, 2 }
  0xe6   : > { %v2927_v47 = vpack.i.bf16 %v965_v45, %v964_v40  ;;  %970 = vst [vmem:[#allocation1 + $0x20] ss:$4 sm:$0xff] %v2585_v37  ;;  %v3274_v37 = vpop.permute.xlu2 %2858  ;;  %v3276_v40 = vpop.permute.xlu1 %2847 }
  0xe7   : > { %971 = vst [vmem:[#allocation1 + $0x21] ss:$4 sm:$0xff] %v854_v42  ;;  %v2786_v42 = vld [vmem:[%s3846_s1 + $0xc8] sm:$0xff]  }
  0xe8   : > { %2928 = vperm.xlu2 %2856, %v2927_v47   ;;  %972 = vst [vmem:[#allocation1 + $0x22] ss:$4 sm:$0xff] %v855_v44  ;;  %v885_v44 = vrot.slane %v2605_v34, 4 }
  0xe9   : > { %973 = vst [vmem:[#allocation1 + $0x23] ss:$4 sm:$0xff] %v856_v46  ;;  %v886_v46 = vrot.slane %v2605_v34, 6 }
  0xec   : > { %v974_v52 = vld.sshfl [vmem:[#allocation1] sm:$0xff pattern:$0x73625140] }
  0xed   : > { %976 = vst [vmem:[#allocation1] ss:$4 sm:$0xff] %v2588_v48  ;;  %v2608_v48 = vunpack.c.l.bf16 %v2786_v42 }
  0xee   : > { %977 = vst [vmem:[#allocation1 + $0x1] ss:$4 sm:$0xff] %v857_v50 }
  0xef   : > { %978 = vst [vmem:[#allocation1 + $0x2] ss:$4 sm:$0xff] %v858_v51  ;;  %v887_v50 = vrot.slane %v2608_v48, 2  ;;  %v3283_v51 = vpop.permute.xlu2 %2863 }
  0xf0   : > { %v975_v57 = vld.sshfl [vmem:[#allocation1 + $0x20] sm:$0xff pattern:$0x73625140]  ;;  %979 = vst [vmem:[#allocation1 + $0x3] ss:$4 sm:$0xff] %v859_v53  ;;  %v3285_v53 = vpop.permute.xlu1 %2852 }
  0xf1   : > { %v2932_v59 = vpack.i.bf16 %v975_v57, %v974_v52  ;;  %980 = vst [vmem:[#allocation1 + $0x20] ss:$4 sm:$0xff] %v2589_v49  ;;  %v2609_v49 = vunpack.c.h.bf16 %v2786_v42  ;;  %v888_v52 = vrot.slane %v2608_v48, 4  ;;  %v3287_v57 = vpop.permute.xlu0 %2868 }
  0xf2   : > { %981 = vst [vmem:[#allocation1 + $0x21] ss:$4 sm:$0xff] %v860_v54 }
  0xf3   : > { %2933 = vperm.xlu0 %2834, %v2932_v59   ;;  %982 = vst [vmem:[#allocation1 + $0x22] ss:$4 sm:$0xff] %v861_v56  ;;  %v889_v56 = vrot.slane %v2608_v48, 6  ;;  %v2787_v59 = vld [vmem:[%s3846_s1 + $0xd0] sm:$0xff]  }
  0xf4   : > { %983 = vst [vmem:[#allocation1 + $0x23] ss:$4 sm:$0xff] %v862_v58  ;;  %v890_v58 = vrot.slane %v2609_v49, 2 }
  0xf7   : > { %v984_v0 = vld.sshfl [vmem:[#allocation1] sm:$0xff pattern:$0x73625140]  ;;  %v2879_v3 = vpop.permute.xlu2 %2878 }
  0xf8   : > { %986 = vst [vmem:[#allocation1] ss:$4 sm:$0xff] %v2592_v60  ;;  %v891_v60 = vrot.slane %v2609_v49, 4 }
  0xf9   : > { %987 = vst [vmem:[#allocation1 + $0x1] ss:$4 sm:$0xff] %v863_v62 }
  0xfa   : > { %988 = vst [vmem:[#allocation1 + $0x2] ss:$4 sm:$0xff] %v864_v63  ;;  %v3292_v63 = vand.u32 127, %v623_v55 }
  0xfb   : > { %v985_v5 = vld.sshfl [vmem:[#allocation1 + $0x20] sm:$0xff pattern:$0x73625140]  ;;  %989 = vst [vmem:[#allocation1 + $0x3] ss:$4 sm:$0xff] %v865_v1  ;;  %v2612_v1 = vunpack.c.l.bf16 %v2787_v59 }
  0xfc   : > { %v2937_v7 = vpack.i.bf16 %v985_v5, %v984_v0  ;;  %990 = vst [vmem:[#allocation1 + $0x20] ss:$4 sm:$0xff] %v2593_v61  ;;  %v892_v61 = vrot.slane %v2609_v49, 6  ;;  %v3302_v15 = vadd.s32 4294967280, %v3292_v63 }
  0xfd   : > { %991 = vst [vmem:[#allocation1 + $0x21] ss:$4 sm:$0xff] %v866_v2  ;;  %v3295_v2 = vadd.s32 4294967288, %v3292_v63  ;;  %v893_v5 = vrot.slane %v2612_v1, 2 }
  0xfe   : > { %2938 = vperm.xlu2 %2856, %v2937_v7   ;;  %992 = vst [vmem:[#allocation1 + $0x22] ss:$4 sm:$0xff] %v867_v4  ;;  %v2613_v4 = vunpack.c.h.bf16 %v2787_v59  ;;  %v2880_v7 = vunpack.i.l.bf16 %v2879_v3  ;;  %v3334_v59 = vadd.s32 4294967248, %v3292_v63 }
  0xff   : > { %993 = vst [vmem:[#allocation1 + $0x23] ss:$4 sm:$0xff] %v868_v6  ;;  %v2881_v6 = vunpack.i.h.bf16 %v2879_v3 }
 0x102   : > { %v994_v12 = vld.sshfl [vmem:[#allocation1] sm:$0xff pattern:$0x73625140] }
 0x103   : > { %996 = vst [vmem:[#allocation1] ss:$4 sm:$0xff] %v2596_v8  ;;  %v3297_v8 = vpop.permute.xlu1 %2873 }
 0x104   : > { %997 = vst [vmem:[#allocation1 + $0x1] ss:$4 sm:$0xff] %v869_v10  ;;  %v894_v10 = vrot.slane %v2612_v1, 4 }
 0x105   : > { %998 = vst [vmem:[#allocation1 + $0x2] ss:$4 sm:$0xff] %v870_v11  ;;  %v2839_v11 = vunpack.i.h.bf16 %v3272_v29 }
 0x106   : > { %v995_v17 = vld.sshfl [vmem:[#allocation1 + $0x20] sm:$0xff pattern:$0x73625140]  ;;  %999 = vst [vmem:[#allocation1 + $0x3] ss:$4 sm:$0xff] %v871_v13  ;;  %v895_v13 = vrot.slane %v2612_v1, 6 }
 0x107   : > { %v2942_v19 = vpack.i.bf16 %v995_v17, %v994_v12  ;;  %1000 = vst [vmem:[#allocation1 + $0x20] ss:$4 sm:$0xff] %v2597_v9  ;;  %v2838_v9 = vunpack.i.l.bf16 %v3272_v29  ;;  %v896_v17 = vrot.slane %v2613_v4, 2 }
 0x108   : > { %1001 = vst [vmem:[#allocation1 + $0x21] ss:$4 sm:$0xff] %v872_v14  ;;  %v2884_v14 = vpop.permute.xlu0 %2883 }
 0x109   : > { %2943 = vperm.xlu0 %2834, %v2942_v19   ;;  %1002 = vst [vmem:[#allocation1 + $0x22] ss:$4 sm:$0xff] %v873_v16  ;;  %v2885_v16 = vunpack.i.l.bf16 %v2884_v14  ;;  %v686_v19 = vperm.slane %v2880_v7, %v3292_v63 }
 0x10a   : > { %1003 = vst [vmem:[#allocation1 + $0x23] ss:$4 sm:$0xff] %v874_v18  ;;  %v687_v18 = vperm.slane %v2881_v6, %v3295_v2 }
 0x10d   : > { %v1004_v24 = vld.sshfl [vmem:[#allocation1] sm:$0xff pattern:$0x73625140] }
 0x10e   : > { %1006 = vst [vmem:[#allocation1] ss:$4 sm:$0xff] %v2600_v20  ;;  %v2788_v20 = vld [vmem:[%s3846_s1 + $0xd8] sm:$0xff]  }
 0x10f   : > { %1007 = vst [vmem:[#allocation1 + $0x1] ss:$4 sm:$0xff] %v875_v22  ;;  %v897_v22 = vrot.slane %v2613_v4, 4 }
 0x110   : > { %1008 = vst [vmem:[#allocation1 + $0x2] ss:$4 sm:$0xff] %v876_v23  ;;  %v898_v23 = vrot.slane %v2613_v4, 6 }
 0x111   : > { %v1005_v30 = vld.sshfl [vmem:[#allocation1 + $0x20] sm:$0xff pattern:$0x73625140]  ;;  %1009 = vst [vmem:[#allocation1 + $0x3] ss:$4 sm:$0xff] %v877_v25 }
 0x112   : > { %v2947_v32 = vpack.i.bf16 %v1005_v30, %v1004_v24  ;;  %1010 = vst [vmem:[#allocation1 + $0x20] ss:$4 sm:$0xff] %v2601_v21  ;;  %v625_v21 = vperm.slane %v2838_v9, %v3292_v63  ;;  %v627_v24 = vperm.slane %v2839_v11, %v3295_v2  ;;  %v2616_v30 = vunpack.c.l.bf16 %v2788_v20 }
 0x113   : > { %1011 = vst [vmem:[#allocation1 + $0x21] ss:$4 sm:$0xff] %v878_v26  ;;  %v3312_v26 = vadd.s32 4294967272, %v3292_v63  ;;  %v3345_v11 = vadd.s32 4294967240, %v3292_v63 }
 0x114   : > { %2948 = vperm.xlu2 %2856, %v2947_v32   ;;  %1012 = vst [vmem:[#allocation1 + $0x22] ss:$4 sm:$0xff] %v879_v28  ;;  %v2886_v28 = vunpack.i.h.bf16 %v2884_v14  ;;  %v688_v32 = vsel %vm628_vm0, %v687_v18, %v686_v19  ;;  %v899_v42 = vrot.slane %v2616_v30, 2  ;;  %v3352_v19 = vadd.s32 4294967232, %v3292_v63 }
 0x115   : > { %1013 = vst [vmem:[#allocation1 + $0x23] ss:$4 sm:$0xff] %v880_v31  ;;  %v689_v31 = vperm.slane %v2885_v16, %v3302_v15 }
 0x118   : > { %v1014_v38 = vld.sshfl [vmem:[#allocation1] sm:$0xff pattern:$0x73625140]  ;;  %v2899_v18 = vpop.permute.xlu0 %2898 }
 0x119   : > { %1016 = vst [vmem:[#allocation1] ss:$4 sm:$0xff] %v2604_v33  ;;  %v3318_v33 = vadd.s32 4294967264, %v3292_v63 }
 0x11a   : > { %1017 = vst [vmem:[#allocation1 + $0x1] ss:$4 sm:$0xff] %v881_v35  ;;  %v629_v35 = vsel %vm628_vm0, %v627_v24, %v625_v21 }
 0x11b   : > { %1018 = vst [vmem:[#allocation1 + $0x2] ss:$4 sm:$0xff] %v882_v36  ;;  %v631_v36 = vperm.slane %v2843_v27, %v3302_v15 }
 0x11c   : > { %v1015_v45 = vld.sshfl [vmem:[#allocation1 + $0x20] sm:$0xff pattern:$0x73625140]  ;;  %1019 = vst [vmem:[#allocation1 + $0x3] ss:$4 sm:$0xff] %v883_v39  ;;  %v2889_v39 = vpop.permute.xlu1 %2888 }
 0x11d   : > { %v2952_v47 = vpack.i.bf16 %v1015_v45, %v1014_v38  ;;  %1020 = vst [vmem:[#allocation1 + $0x20] ss:$4 sm:$0xff] %v2605_v34  ;;  %v2844_v34 = vunpack.i.h.bf16 %v3281_v43  ;;  %v691_v38 = vperm.slane %v2886_v28, %v3312_v26  ;;  %v2890_v45 = vunpack.i.l.bf16 %v2889_v39 }
 0x11e   : > { %1021 = vst [vmem:[#allocation1 + $0x21] ss:$4 sm:$0xff] %v884_v41  ;;  %v2617_v41 = vunpack.c.h.bf16 %v2788_v20  ;;  %v2891_v43 = vunpack.i.h.bf16 %v2889_v39  ;;  %v633_v55 = vsel %vm632_vm1, %v631_v36, %v629_v35  ;;  %v2860_v20 = vunpack.i.l.bf16 %v3274_v37 }
 0x11f   : > { %2953 = vperm.xlu0 %2834, %v2952_v47   ;;  %1022 = vst [vmem:[#allocation1 + $0x22] ss:$4 sm:$0xff] %v885_v44  ;;  %v690_v44 = vsel %vm632_vm1, %v689_v31, %v688_v32  ;;  %v900_v47 = vrot.slane %v2616_v30, 4  ;;  %v3361_v31 = vadd.s32 4294967224, %v3292_v63  ;;  %v2901_v36 = vunpack.i.h.bf16 %v2899_v18 }
 0x120   : > { %1023 = vst [vmem:[#allocation1 + $0x23] ss:$4 sm:$0xff] %v886_v46  ;;  %v3326_v46 = vadd.s32 4294967256, %v3292_v63  ;;  %v904_v3 = vrot.slane %v2617_v41, 6 }
 0x123   : > { %v1024_v54 = vld.sshfl [vmem:[#allocation1] sm:$0xff pattern:$0x73625140] }
 0x124   : > { %1026 = vst [vmem:[#allocation1] ss:$4 sm:$0xff] %v2608_v48  ;;  %v2849_v48 = vunpack.i.l.bf16 %v3276_v40 }
 0x125   : > { %1027 = vst [vmem:[#allocation1 + $0x1] ss:$4 sm:$0xff] %v887_v50 }
 0x126   : > { %1028 = vst [vmem:[#allocation1 + $0x2] ss:$4 sm:$0xff] %v888_v52  ;;  %v901_v52 = vrot.slane %v2616_v30, 6 }
 0x127   : > { %v1025_v62 = vld.sshfl [vmem:[#allocation1 + $0x20] sm:$0xff pattern:$0x73625140]  ;;  %1029 = vst [vmem:[#allocation1 + $0x3] ss:$4 sm:$0xff] %v889_v56  ;;  %v2894_v56 = vpop.permute.xlu2 %2893 }
 0x128   : > { %v2957_v0 = vpack.i.bf16 %v1025_v62, %v1024_v54  ;;  %1030 = vst [vmem:[#allocation1 + $0x20] ss:$4 sm:$0xff] %v2609_v49  ;;  %v635_v49 = vperm.slane %v2844_v34, %v3312_v26  ;;  %v693_v54 = vperm.slane %v2890_v45, %v3318_v33  ;;  %v2789_v62 = vld [vmem:[%s3846_s1 + $0xe0] sm:$0xff]   ;;  %v2790_v45 = vld [vmem:[%s3846_s1 + $0xe8] sm:$0xff]  }
 0x129   : > { %1031 = vst [vmem:[#allocation1 + $0x21] ss:$4 sm:$0xff] %v890_v58  ;;  %v692_v58 = vsel %vm636_vm2, %v691_v38, %v690_v44  ;;  %v2904_v38 = vpop.permute.xlu1 %2903 }
 0x12a   : > { %2958 = vperm.xlu2 %2856, %v2957_v0   ;;  %1032 = vst [vmem:[#allocation1 + $0x22] ss:$4 sm:$0xff] %v891_v60  ;;  %v902_v60 = vrot.slane %v2617_v41, 2  ;;  %v2850_v0 = vunpack.i.h.bf16 %v3276_v40  ;;  %v637_v6 = vsel %vm636_vm2, %v635_v49, %v633_v55  ;;  %v694_v9 = vsel %vm640_vm3, %v693_v54, %v692_v58 }
 0x12b   : > { %1033 = vst [vmem:[#allocation1 + $0x23] ss:$4 sm:$0xff] %v892_v61  ;;  %v2895_v61 = vunpack.i.l.bf16 %v2894_v56  ;;  %v2896_v40 = vunpack.i.h.bf16 %v2894_v56  ;;  %v655_v49 = vperm.slane %v2860_v20, %v3352_v19  ;;  %v703_v54 = vperm.slane %v2901_v36, %v3361_v31 }
 0x12c   : > { %v643_v16 = vperm.slane %v2850_v0, %v3326_v46  ;;  %v2624_v58 = vunpack.c.l.bf16 %v2790_v45  ;;  %v2871_v36 = vunpack.i.h.bf16 %v3287_v57 }
 0x12d   : > { %v697_v14 = vperm.slane %v2895_v61, %v3334_v59  ;;  %v699_v24 = vperm.slane %v2896_v40, %v3345_v11  ;;  %v2625_v40 = vunpack.c.h.bf16 %v2790_v45 }
 0x12e   : > { %v1034_v12 = vld.sshfl [vmem:[#allocation1] sm:$0xff pattern:$0x73625140] }
 0x12f   : > { %1036 = vst [vmem:[#allocation1] ss:$4 sm:$0xff] %v2612_v1  ;;  %v903_v1 = vrot.slane %v2617_v41, 4 }
 0x130   : > { %1037 = vst [vmem:[#allocation1 + $0x1] ss:$4 sm:$0xff] %v893_v5  ;;  %v639_v5 = vperm.slane %v2849_v48, %v3318_v33  ;;  %v2905_v48 = vunpack.i.l.bf16 %v2904_v38 }
 0x131   : > { %1038 = vst [vmem:[#allocation1 + $0x2] ss:$4 sm:$0xff] %v894_v10 }
 0x132   : > { %v1035_v25 = vld.sshfl [vmem:[#allocation1 + $0x20] sm:$0xff pattern:$0x73625140]  ;;  %1039 = vst [vmem:[#allocation1 + $0x3] ss:$4 sm:$0xff] %v895_v13  ;;  %v2854_v13 = vunpack.i.l.bf16 %v3285_v53  ;;  %v641_v21 = vsel %vm640_vm3, %v639_v5, %v637_v6  ;;  %v3387_v5 = vadd.s32 4294967200, %v3292_v63  ;;  %v2909_v6 = vpop.permute.xlu2 %2908 }
 0x133   : > { %v2962_v29 = vpack.i.bf16 %v1035_v25, %v1034_v12  ;;  %1040 = vst [vmem:[#allocation1 + $0x20] ss:$4 sm:$0xff] %v2613_v4  ;;  %v695_v4 = vperm.slane %v2891_v43, %v3326_v46  ;;  %v2620_v12 = vunpack.c.l.bf16 %v2789_v62  ;;  %v2621_v25 = vunpack.c.h.bf16 %v2789_v62 }
 0x134   : > { %1041 = vst [vmem:[#allocation1 + $0x21] ss:$4 sm:$0xff] %v896_v17  ;;  %v647_v28 = vperm.slane %v2854_v13, %v3334_v59  ;;  %v645_v32 = vsel %vm644_vm4, %v643_v16, %v641_v21  ;;  %v2906_v62 = vunpack.i.h.bf16 %v2904_v38  ;;  %v912_v13 = vrot.slane %v2624_v58, 4 }
 0x135   : > { %2963 = vperm.xlu0 %2834, %v2962_v29   ;;  %1042 = vst [vmem:[#allocation1 + $0x22] ss:$4 sm:$0xff] %v897_v22  ;;  %v696_v17 = vsel %vm644_vm4, %v695_v4, %v694_v9  ;;  %v2900_v22 = vunpack.i.l.bf16 %v2899_v18  ;;  %v905_v27 = vrot.slane %v2620_v12, 2  ;;  %v906_v29 = vrot.slane %v2620_v12, 4 }
 0x136   : > { %1043 = vst [vmem:[#allocation1 + $0x23] ss:$4 sm:$0xff] %v898_v23  ;;  %v2855_v23 = vunpack.i.h.bf16 %v3285_v53  ;;  %v907_v35 = vrot.slane %v2620_v12, 6  ;;  %v2861_v53 = vunpack.i.h.bf16 %v3274_v37  ;;  %v649_v43 = vsel %vm648_vm5, %v647_v28, %v645_v32 }
 0x137   : > { %v701_v39 = vperm.slane %v2900_v22, %v3352_v19  ;;  %v909_v37 = vrot.slane %v2621_v25, 4  ;;  %v2866_v4 = vunpack.i.h.bf16 %v3283_v51  ;;  %v3396_v21 = vadd.s32 4294967192, %v3292_v63 }
 0x138   : > { %v659_v0 = vperm.slane %v2861_v53, %v3361_v31  ;;  %v2911_v22 = vunpack.i.h.bf16 %v2909_v6  ;;  %v914_v28 = vrot.slane %v2625_v40, 2  ;;  %v915_v32 = vrot.slane %v2625_v40, 4 }
 0x139   : > { %v1044_v50 = vld.sshfl [vmem:[#allocation1] sm:$0xff pattern:$0x73625140]  ;;  %v916_v53 = vrot.slane %v2625_v40, 6 }
 0x13a   : > { %1046 = vst [vmem:[#allocation1] ss:$4 sm:$0xff] %v2616_v30  ;;  %v698_v30 = vsel %vm648_vm5, %v697_v14, %v696_v17  ;;  %v913_v17 = vrot.slane %v2624_v58, 6 }
 0x13b   : > { %1047 = vst [vmem:[#allocation1 + $0x1] ss:$4 sm:$0xff] %v899_v42  ;;  %v908_v42 = vrot.slane %v2621_v25, 2  ;;  %v700_v44 = vsel %vm652_vm6, %v699_v24, %v698_v30  ;;  %v3405_v30 = vadd.s32 4294967184, %v3292_v63 }
 0x13c   : > { %1048 = vst [vmem:[#allocation1 + $0x2] ss:$4 sm:$0xff] %v900_v47  ;;  %v3372_v47 = vadd.s32 4294967216, %v3292_v63  ;;  %v702_v56 = vsel %vm656_vm7, %v701_v39, %v700_v44 }
 0x13d   : > { %v1045_v7 = vld.sshfl [vmem:[#allocation1 + $0x20] sm:$0xff pattern:$0x73625140]  ;;  %1049 = vst [vmem:[#allocation1 + $0x3] ss:$4 sm:$0xff] %v901_v52  ;;  %v910_v52 = vrot.slane %v2621_v25, 6 }
 0x13e   : > { %v2967_v10 = vpack.i.bf16 %v1045_v7, %v1044_v50  ;;  %1050 = vst [vmem:[#allocation1 + $0x20] ss:$4 sm:$0xff] %v2617_v41  ;;  %v651_v41 = vperm.slane %v2855_v23, %v3345_v11  ;;  %v704_v7 = vsel %vm660_vm8, %v703_v54, %v702_v56  ;;  %v2914_v23 = vpop.permute.xlu0 %2913 }
 0x13f   : > { %1051 = vst [vmem:[#allocation1 + $0x21] ss:$4 sm:$0xff] %v902_v60  ;;  %v3379_v60 = vadd.s32 4294967208, %v3292_v63  ;;  %v2915_v39 = vunpack.i.l.bf16 %v2914_v23 }
 0x140   : > { %2968 = vperm.xlu2 %2856, %v2967_v10   ;;  %1052 = vst [vmem:[#allocation1 + $0x22] ss:$4 sm:$0xff] %v903_v1  ;;  %v653_v61 = vsel %vm652_vm6, %v651_v41, %v649_v43  ;;  %v2865_v1 = vunpack.i.l.bf16 %v3283_v51  ;;  %v2910_v10 = vunpack.i.l.bf16 %v2909_v6 }
 0x141   : > { %1053 = vst [vmem:[#allocation1 + $0x23] ss:$4 sm:$0xff] %v904_v3  ;;  %v705_v3 = vperm.slane %v2905_v48, %v3372_v47  ;;  %v657_v9 = vsel %vm656_vm7, %v655_v49, %v653_v61  ;;  %v707_v14 = vperm.slane %v2906_v62, %v3379_v60  ;;  %v667_v24 = vperm.slane %v2866_v4, %v3379_v60 }
 0x142   : > { %v663_v16 = vperm.slane %v2865_v1, %v3372_v47  ;;  %v661_v20 = vsel %vm660_vm8, %v659_v0, %v657_v9  ;;  %v2916_v48 = vunpack.i.h.bf16 %v2914_v23  ;;  %v675_v49 = vperm.slane %v2871_v36, %v3396_v21 }
 0x143   : > { %v706_v18 = vsel %vm664_vm9, %v705_v3, %v704_v7  ;;  %v2876_v62 = vunpack.i.h.bf16 %v3297_v8 }
 0x144   : > { %v1054_v34 = vld.sshfl [vmem:[#allocation1] sm:$0xff pattern:$0x73625140] }
 0x145   : > { %1056 = vst [vmem:[#allocation1] ss:$4 sm:$0xff] %v2620_v12  ;;  %v911_v12 = vrot.slane %v2624_v58, 2 }
 0x146   : > { %1057 = vst [vmem:[#allocation1 + $0x1] ss:$4 sm:$0xff] %v905_v27  ;;  %v709_v27 = vperm.slane %v2910_v10, %v3387_v5  ;;  %v2792_v10 = vld [vmem:[%s3846_s1 + $0xf8] sm:$0xff]  }
 0x147   : > { %1058 = vst [vmem:[#allocation1 + $0x2] ss:$4 sm:$0xff] %v906_v29  ;;  %v2791_v29 = vld [vmem:[%s3846_s1 + $0xf0] sm:$0xff]   ;;  %v2633_v23 = vunpack.c.h.bf16 %v2792_v10 }
 0x148   : > { %v1055_v50 = vld.sshfl [vmem:[#allocation1 + $0x20] sm:$0xff pattern:$0x73625140]  ;;  %1059 = vst [vmem:[#allocation1 + $0x3] ss:$4 sm:$0xff] %v907_v35  ;;  %v665_v35 = vsel %vm664_vm9, %v663_v16, %v661_v20  ;;  %v2628_v44 = vunpack.c.l.bf16 %v2791_v29 }
 0x149   : > { %v2972_v55 = vpack.i.bf16 %v1055_v50, %v1054_v34  ;;  %1060 = vst [vmem:[#allocation1 + $0x20] ss:$4 sm:$0xff] %v2621_v25  ;;  %v2870_v25 = vunpack.i.l.bf16 %v3287_v57  ;;  %v708_v34 = vsel %vm668_vm10, %v707_v14, %v706_v18  ;;  %v3421_v57 = vadd.s32 4294967176, %v3292_v63  ;;  %v166_v20 = vld [vmem:[%s3448_s4] sm:$0x3] }
 0x14a   : > { %1061 = vst [vmem:[#allocation1 + $0x21] ss:$4 sm:$0xff] %v908_v42  ;;  %v711_v42 = vperm.slane %v2911_v22, %v3396_v21  ;;  %v710_v43 = vsel %vm672_vm11, %v709_v27, %v708_v34  ;;  %v2875_v50 = vunpack.i.l.bf16 %v3297_v8  ;;  %v917_v56 = vrot.slane %v2628_v44, 2 }
 0x14b   : > { %2973 = vperm.xlu1 %2845, %v2972_v55   ;;  %1062 = vst [vmem:[#allocation1 + $0x22] ss:$4 sm:$0xff] %v909_v37  ;;  %v671_v45 = vperm.slane %v2870_v25, %v3387_v5  ;;  %v669_v37 = vsel %vm668_vm10, %v667_v24, %v665_v35  ;;  %v2629_v55 = vunpack.c.h.bf16 %v2791_v29  ;;  %v918_v61 = vrot.slane %v2628_v44, 4  ;;  %v2793_v35 = vld [vmem:[%s3846_s1 + $0x100] sm:$0xff]  }
 0x14c   : > { %1063 = vst [vmem:[#allocation1 + $0x23] ss:$4 sm:$0xff] %v910_v52  ;;  %v713_v52 = vperm.slane %v2915_v39, %v3405_v30  ;;  %v712_v54 = vsel %vm676_vm12, %v711_v42, %v710_v43  ;;  %v715_v1 = vperm.slane %v2916_v48, %v3421_v57  ;;  %v919_v3 = vrot.slane %v2628_v44, 6 }
 0x14d   : > { %v679_v4 = vperm.slane %v2875_v50, %v3405_v30  ;;  %v920_v9 = vrot.slane %v2629_v55, 2  ;;  %v921_v8 = vrot.slane %v2629_v55, 4  ;;  %v922_v14 = vrot.slane %v2629_v55, 6 }
 0x14e   : > { %v714_v6 = vsel %vm3853_vm13, %v713_v52, %v712_v54  ;;  %v199_v27 = vunpack.c.l.bf16 %v166_v20  ;;  %v926_v34 = vrot.slane %v2633_v23, 2  ;;  %v927_v36 = vrot.slane %v2633_v23, 4 }
 0x14f   : > { %v1064_v51 = vld.sshfl [vmem:[#allocation1] sm:$0xff pattern:$0x73625140]  ;;  %v928_v39 = vrot.slane %v2633_v23, 6  ;;  %v2636_v42 = vunpack.c.l.bf16 %v2793_v35  ;;  %v2637_v43 = vunpack.c.h.bf16 %v2793_v35 }
 0x150   : > { %1066 = vst [vmem:[#allocation1] ss:$4 sm:$0xff] %v2624_v58  ;;  %v673_v58 = vsel %vm672_vm11, %v671_v45, %v669_v37 }
 0x151   : > { %1067 = vst [vmem:[#allocation1 + $0x1] ss:$4 sm:$0xff] %v911_v12  ;;  %v677_v7 = vsel %vm676_vm12, %v675_v49, %v673_v58  ;;  %v1374_v37 = vrot.slane %v2636_v42, 2  ;;  %v1375_v48 = vrot.slane %v2636_v42, 4  ;;  %v1376_v50 = vrot.slane %v2636_v42, 6 }
 0x152   : > { %1068 = vst [vmem:[#allocation1 + $0x2] ss:$4 sm:$0xff] %v912_v13  ;;  %v716_v13 = vsel %vm3852_vm14, %v715_v1, %v714_v6  ;;  %v681_v16 = vsel %vm3853_vm13, %v679_v4, %v677_v7  ;;  %v1378_v58 = vrot.slane %v2637_v43, 4 }
 0x153   : > { %v1065_v38 = vld.sshfl [vmem:[#allocation1 + $0x20] sm:$0xff pattern:$0x73625140]  ;;  %1069 = vst [vmem:[#allocation1 + $0x3] ss:$4 sm:$0xff] %v913_v17  ;;  %v2632_v17 = vunpack.c.l.bf16 %v2792_v10  ;;  %v717_v18 = vrot.slane %v716_v13, 6 }
 0x154   : > { %v2977_v41 = vpack.i.bf16 %v1065_v38, %v1064_v51  ;;  %1070 = vst [vmem:[#allocation1 + $0x20] ss:$4 sm:$0xff] %v2625_v40  ;;  %v683_v40 = vperm.slane %v2876_v62, %v3421_v57 }
 0x155   : > { %1071 = vst [vmem:[#allocation1 + $0x21] ss:$4 sm:$0xff] %v914_v28  ;;  %v923_v24 = vrot.slane %v2632_v17, 2  ;;  %v924_v25 = vrot.slane %v2632_v17, 4  ;;  %v925_v29 = vrot.slane %v2632_v17, 6 }
 0x156   : > { %2978 = vperm.xlu0 %2834, %v2977_v41   ;;  %1072 = vst [vmem:[#allocation1 + $0x22] ss:$4 sm:$0xff] %v915_v32  ;;  %v685_v22 = vsel %vm3852_vm14, %v683_v40, %v681_v16 }
 0x157   : > { %1073 = vst [vmem:[#allocation1 + $0x23] ss:$4 sm:$0xff] %v916_v53  ;;  %v719_v32 = vsel %vm3849_vm15, %v685_v22, %v717_v18  ;;  %vm3850_vm15 = vcmask 1040384  }
 0x158   : > { %v721_v38 = vmul.f32 %v719_v32, %v199_v27 }
 0x15a   : > { %v1074_v0 = vld.sshfl [vmem:[#allocation1] sm:$0xff pattern:$0x73625140]  ;;  %v724_v45 = vperm.slane %v721_v38, 2 }
 0x15b   : > { %1076 = vst [vmem:[#allocation1] ss:$4 sm:$0xff] %v2628_v44  ;;  %v723_v44 = vperm.slane %v721_v38, 0 }
 0x15c   : > { %1077 = vst [vmem:[#allocation1 + $0x1] ss:$4 sm:$0xff] %v917_v56  ;;  %v729_v54 = vsel %vm3850_vm15, %v724_v45, 0.0  ;;  %v2794_v56 = vld [vmem:[%s3846_s1 + $0x108] sm:$0xff]  }
 0x15d   : > { %1078 = vst [vmem:[#allocation1 + $0x2] ss:$4 sm:$0xff] %v918_v61  ;;  %v728_v52 = vsel %vm3850_vm15, %v723_v44, 0.0  ;;  %v2641_v4 = vunpack.c.h.bf16 %v2794_v56  ;;  %vm3855_vm15 = vcmask 1041408  }
 0x15e   : > { %v1075_v12 = vld.sshfl [vmem:[#allocation1 + $0x20] sm:$0xff pattern:$0x73625140]  ;;  %1079 = vst [vmem:[#allocation1 + $0x3] ss:$4 sm:$0xff] %v919_v3  ;;  %v730_v61 = vadd.f32 %v729_v54, %v728_v52  ;;  %v2640_v3 = vunpack.c.l.bf16 %v2794_v56 }
 0x15f   : > { %v2982_v51 = vpack.i.bf16 %v1075_v12, %v1074_v0  ;;  %1080 = vst [vmem:[#allocation1 + $0x20] ss:$4 sm:$0xff] %v2629_v55  ;;  %v1377_v55 = vrot.slane %v2637_v43, 2  ;;  %v1379_v0 = vrot.slane %v2637_v43, 6  ;;  %v1383_v40 = vrot.slane %v2641_v4, 2 }
 0x160   : > { %1081 = vst [vmem:[#allocation1 + $0x21] ss:$4 sm:$0xff] %v920_v9  ;;  %v1380_v6 = vrot.slane %v2640_v3, 2  ;;  %v1381_v7 = vrot.slane %v2640_v3, 4  ;;  %v1382_v10 = vrot.slane %v2640_v3, 6  ;;  %v1384_v12 = vrot.slane %v2641_v4, 4 }
 0x161   : > { %2983 = vperm.xlu2 %2856, %v2982_v51   ;;  %1082 = vst [vmem:[#allocation1 + $0x22] ss:$4 sm:$0xff] %v921_v8  ;;  %v2795_v8 = vld [vmem:[%s3846_s1 + $0x110] sm:$0xff]  }
 0x162   : > { %1083 = vst [vmem:[#allocation1 + $0x23] ss:$4 sm:$0xff] %v922_v14  ;;  %v1385_v14 = vrot.slane %v2641_v4, 6  ;;  %v2644_v51 = vunpack.c.l.bf16 %v2795_v8 }
 0x164   : > { %v1386_v18 = vrot.slane %v2644_v51, 2  ;;  %v1387_v20 = vrot.slane %v2644_v51, 4  ;;  %v1388_v22 = vrot.slane %v2644_v51, 6 }
 0x165   : > { %v1084_v28 = vld.sshfl [vmem:[#allocation1] sm:$0xff pattern:$0x73625140] }
 0x166   : > { %1086 = vst [vmem:[#allocation1] ss:$4 sm:$0xff] %v2632_v17  ;;  %v2645_v17 = vunpack.c.h.bf16 %v2795_v8 }
 0x167   : > { %1087 = vst [vmem:[#allocation1 + $0x1] ss:$4 sm:$0xff] %v923_v24 }
 0x168   : > { %1088 = vst [vmem:[#allocation1 + $0x2] ss:$4 sm:$0xff] %v924_v25  ;;  %v1389_v24 = vrot.slane %v2645_v17, 2  ;;  %v2796_v25 = vld [vmem:[%s3846_s1 + $0x118] sm:$0xff]   ;;  %v1390_v27 = vrot.slane %v2645_v17, 4 }
 0x169   : > { %v1085_v53 = vld.sshfl [vmem:[#allocation1 + $0x20] sm:$0xff pattern:$0x73625140]  ;;  %1089 = vst [vmem:[#allocation1 + $0x3] ss:$4 sm:$0xff] %v925_v29  ;;  %v2649_v35 = vunpack.c.h.bf16 %v2796_v25 }
 0x16a   : > { %v2987_v41 = vpack.i.bf16 %v1085_v53, %v1084_v28  ;;  %1090 = vst [vmem:[#allocation1 + $0x20] ss:$4 sm:$0xff] %v2633_v23  ;;  %v1391_v28 = vrot.slane %v2645_v17, 6 }
 0x16b   : > { %1091 = vst [vmem:[#allocation1 + $0x21] ss:$4 sm:$0xff] %v926_v34  ;;  %v2648_v34 = vunpack.c.l.bf16 %v2796_v25  ;;  %v1396_v44 = vrot.slane %v2649_v35, 4  ;;  %v2800_v25 = vld [vmem:[%s3846_s1 + $0x138] sm:$0xff]  }
 0x16c   : > { %2988 = vperm.xlu0 %2834, %v2987_v41   ;;  %1092 = vst [vmem:[#allocation1 + $0x22] ss:$4 sm:$0xff] %v927_v36  ;;  %v2797_v41 = vld [vmem:[%s3846_s1 + $0x120] sm:$0xff]  }
 0x16d   : > { %1093 = vst [vmem:[#allocation1 + $0x23] ss:$4 sm:$0xff] %v928_v39  ;;  %v1392_v36 = vrot.slane %v2648_v34, 2  ;;  %v1393_v38 = vrot.slane %v2648_v34, 4  ;;  %v1394_v39 = vrot.slane %v2648_v34, 6 }
 0x170   : > { %v1094_v49 = vld.sshfl [vmem:[#allocation1] sm:$0xff pattern:$0x73625140] }
 0x171   : > { %1470 = vst [vmem:[#allocation1] ss:$4 sm:$0xff] %v2636_v42  ;;  %v1395_v42 = vrot.slane %v2649_v35, 2 }
 0x172   : > { %1472 = vst [vmem:[#allocation1 + $0x1] ss:$4 sm:$0xff] %v1374_v37 }
 0x173   : > { %1474 = vst [vmem:[#allocation1 + $0x2] ss:$4 sm:$0xff] %v1375_v48  ;;  %v2652_v48 = vunpack.c.l.bf16 %v2797_v41 }
 0x174   : > { %v1095_v62 = vld.sshfl [vmem:[#allocation1 + $0x20] sm:$0xff pattern:$0x73625140]  ;;  %1476 = vst [vmem:[#allocation1 + $0x3] ss:$4 sm:$0xff] %v1376_v50 }
 0x175   : > { %v2992_v1 = vpack.i.bf16 %v1095_v62, %v1094_v49  ;;  %1478 = vst [vmem:[#allocation1 + $0x20] ss:$4 sm:$0xff] %v2637_v43  ;;  %731 = vadd.xlane.f32.xlu1 %v730_v61  ;;  %v1397_v43 = vrot.slane %v2649_v35, 6  ;;  %v2653_v49 = vunpack.c.h.bf16 %v2797_v41  ;;  %v1398_v50 = vrot.slane %v2652_v48, 2 }
 0x176   : > { %1480 = vst [vmem:[#allocation1 + $0x21] ss:$4 sm:$0xff] %v1377_v55  ;;  %v1399_v52 = vrot.slane %v2652_v48, 4  ;;  %v1400_v54 = vrot.slane %v2652_v48, 6 }
 0x177   : > { %2993 = vperm.xlu2 %2856, %v2992_v1   ;;  %1482 = vst [vmem:[#allocation1 + $0x22] ss:$4 sm:$0xff] %v1378_v58  ;;  %v1401_v56 = vrot.slane %v2653_v49, 2  ;;  %v2798_v58 = vld [vmem:[%s3846_s1 + $0x128] sm:$0xff]   ;;  %v1402_v61 = vrot.slane %v2653_v49, 4  ;;  %v1403_v62 = vrot.slane %v2653_v49, 6 }
 0x178   : > { %1484 = vst [vmem:[#allocation1 + $0x23] ss:$4 sm:$0xff] %v1379_v0 }
 0x17b   : > { %v1485_v9 = vld.sshfl [vmem:[#allocation1] sm:$0xff pattern:$0x73625140] }
 0x17c   : > { %1487 = vst [vmem:[#allocation1] ss:$4 sm:$0xff] %v2640_v3  ;;  %v2656_v3 = vunpack.c.l.bf16 %v2798_v58 }
 0x17d   : > { %1488 = vst [vmem:[#allocation1 + $0x1] ss:$4 sm:$0xff] %v1380_v6 }
 0x17e   : > { %1489 = vst [vmem:[#allocation1 + $0x2] ss:$4 sm:$0xff] %v1381_v7  ;;  %v1404_v6 = vrot.slane %v2656_v3, 2  ;;  %v1405_v7 = vrot.slane %v2656_v3, 4 }
 0x17f   : > { %v1486_v13 = vld.sshfl [vmem:[#allocation1 + $0x20] sm:$0xff pattern:$0x73625140]  ;;  %1490 = vst [vmem:[#allocation1 + $0x3] ss:$4 sm:$0xff] %v1382_v10  ;;  %v1406_v10 = vrot.slane %v2656_v3, 6 }
 0x180   : > { %v2997_v16 = vpack.i.bf16 %v1486_v13, %v1485_v9  ;;  %1491 = vst [vmem:[#allocation1 + $0x20] ss:$4 sm:$0xff] %v2641_v4  ;;  %v2657_v4 = vunpack.c.h.bf16 %v2798_v58 }
 0x181   : > { %1492 = vst [vmem:[#allocation1 + $0x21] ss:$4 sm:$0xff] %v1383_v40  ;;  %v2799_v40 = vld [vmem:[%s3846_s1 + $0x130] sm:$0xff]  }
 0x182   : > { %2998 = vperm.xlu2 %2856, %v2997_v16   ;;  %1493 = vst [vmem:[#allocation1 + $0x22] ss:$4 sm:$0xff] %v1384_v12  ;;  %v1407_v8 = vrot.slane %v2657_v4, 2  ;;  %v1408_v12 = vrot.slane %v2657_v4, 4 }
 0x183   : > { %1494 = vst [vmem:[#allocation1 + $0x23] ss:$4 sm:$0xff] %v1385_v14  ;;  %v1409_v14 = vrot.slane %v2657_v4, 6 }
 0x186   : > { %v1495_v23 = vld.sshfl [vmem:[#allocation1] sm:$0xff pattern:$0x73625140] }
 0x187   : > { %1497 = vst [vmem:[#allocation1] ss:$4 sm:$0xff] %v2644_v51  ;;  %v2660_v51 = vunpack.c.l.bf16 %v2799_v40 }
 0x188   : > { %1498 = vst [vmem:[#allocation1 + $0x1] ss:$4 sm:$0xff] %v1386_v18 }
 0x189   : > { %1499 = vst [vmem:[#allocation1 + $0x2] ss:$4 sm:$0xff] %v1387_v20  ;;  %v1410_v18 = vrot.slane %v2660_v51, 2  ;;  %v1411_v20 = vrot.slane %v2660_v51, 4 }
 0x18a   : > { %v1496_v29 = vld.sshfl [vmem:[#allocation1 + $0x20] sm:$0xff pattern:$0x73625140]  ;;  %1500 = vst [vmem:[#allocation1 + $0x3] ss:$4 sm:$0xff] %v1388_v22 }
 0x18b   : > { %1501 = vst [vmem:[#allocation1 + $0x20] ss:$4 sm:$0xff] %v2645_v17  ;;  %v3002_v32 = vpack.i.bf16 %v1496_v29, %v1495_v23  ;;  %v2661_v17 = vunpack.c.h.bf16 %v2799_v40  ;;  %v1412_v23 = vrot.slane %v2660_v51, 6 }
 0x18c   : > { %1502 = vst [vmem:[#allocation1 + $0x21] ss:$4 sm:$0xff] %v1389_v24 }
 0x18d   : > { %1503 = vst [vmem:[#allocation1 + $0x22] ss:$4 sm:$0xff] %v1390_v27  ;;  %v1413_v24 = vrot.slane %v2661_v17, 2  ;;  %v1414_v27 = vrot.slane %v2661_v17, 4  ;;  %v1415_v29 = vrot.slane %v2661_v17, 6 }
 0x18e   : > { %1504 = vst [vmem:[#allocation1 + $0x23] ss:$4 sm:$0xff] %v1391_v28  ;;  %3003 = vperm.xlu1 %2845, %v3002_v32   ;;  %v3480_v32 = vpop.permute.xlu2 %2918 }
 0x191   : > { %v1505_v53 = vld.sshfl [vmem:[#allocation1] sm:$0xff pattern:$0x73625140] }
 0x192   : > { %1507 = vst [vmem:[#allocation1] ss:$4 sm:$0xff] %v2648_v34 }
 0x193   : > { %1508 = vst [vmem:[#allocation1 + $0x1] ss:$4 sm:$0xff] %v1392_v36  ;;  %v2665_v36 = vunpack.c.h.bf16 %v2800_v25 }
 0x194   : > { %1509 = vst [vmem:[#allocation1 + $0x2] ss:$4 sm:$0xff] %v1393_v38 }
 0x195   : > { %v1506_v45 = vld.sshfl [vmem:[#allocation1 + $0x20] sm:$0xff pattern:$0x73625140]  ;;  %1510 = vst [vmem:[#allocation1 + $0x3] ss:$4 sm:$0xff] %v1394_v39  ;;  %v3482_v39 = vpop.permute.xlu0 %2923 }
 0x196   : > { %v3007_v37 = vpack.i.bf16 %v1506_v45, %v1505_v53  ;;  %1511 = vst [vmem:[#allocation1 + $0x20] ss:$4 sm:$0xff] %v2649_v35  ;;  %v2664_v35 = vunpack.c.l.bf16 %v2800_v25  ;;  %v2801_v45 = vld [vmem:[%s3846_s1 + $0x140] sm:$0xff]  }
 0x197   : > { %1512 = vst [vmem:[#allocation1 + $0x21] ss:$4 sm:$0xff] %v1395_v42 }
 0x198   : > { %3008 = vperm.xlu2 %2856, %v3007_v37   ;;  %1513 = vst [vmem:[#allocation1 + $0x22] ss:$4 sm:$0xff] %v1396_v44  ;;  %v1416_v38 = vrot.slane %v2664_v35, 2  ;;  %v1417_v53 = vrot.slane %v2664_v35, 4  ;;  %v1418_v42 = vrot.slane %v2664_v35, 6  ;;  %v1419_v44 = vrot.slane %v2665_v36, 2  ;;  %v3487_v37 = vpop.permute.xlu2 %2928 }
 0x199   : > { %1514 = vst [vmem:[#allocation1 + $0x23] ss:$4 sm:$0xff] %v1397_v43  ;;  %v1420_v43 = vrot.slane %v2665_v36, 4 }
 0x19c   : > { %v1515_v55 = vld.sshfl [vmem:[#allocation1] sm:$0xff pattern:$0x73625140] }
 0x19d   : > { %1517 = vst [vmem:[#allocation1] ss:$4 sm:$0xff] %v2652_v48 }
 0x19e   : > { %1518 = vst [vmem:[#allocation1 + $0x1] ss:$4 sm:$0xff] %v1398_v50 }
 0x19f   : > { %1519 = vst [vmem:[#allocation1 + $0x2] ss:$4 sm:$0xff] %v1399_v52  ;;  %v2668_v52 = vunpack.c.l.bf16 %v2801_v45 }
 0x1a0   : > { %v1516_v0 = vld.sshfl [vmem:[#allocation1 + $0x20] sm:$0xff pattern:$0x73625140]  ;;  %1520 = vst [vmem:[#allocation1 + $0x3] ss:$4 sm:$0xff] %v1400_v54  ;;  %v3489_v54 = vpop.permute.xlu0 %2933 }
 0x1a1   : > { %1521 = vst [vmem:[#allocation1 + $0x20] ss:$4 sm:$0xff] %v2653_v49  ;;  %v3012_v1 = vpack.i.bf16 %v1516_v0, %v1515_v55  ;;  %v1421_v49 = vrot.slane %v2665_v36, 6  ;;  %v2669_v55 = vunpack.c.h.bf16 %v2801_v45  ;;  %v1423_v58 = vrot.slane %v2668_v52, 4 }
 0x1a2   : > { %1522 = vst [vmem:[#allocation1 + $0x21] ss:$4 sm:$0xff] %v1401_v56  ;;  %v1422_v56 = vrot.slane %v2668_v52, 2 }
 0x1a3   : > { %1523 = vst [vmem:[#allocation1 + $0x22] ss:$4 sm:$0xff] %v1402_v61  ;;  %3013 = vperm.xlu1 %2845, %v3012_v1   ;;  %v1425_v0 = vrot.slane %v2669_v55, 2  ;;  %v2802_v1 = vld [vmem:[%s3846_s1 + $0x148] sm:$0xff]  }
 0x1a4   : > { %1524 = vst [vmem:[#allocation1 + $0x23] ss:$4 sm:$0xff] %v1403_v62  ;;  %v1424_v62 = vrot.slane %v2668_v52, 6  ;;  %v2673_v40 = vunpack.c.h.bf16 %v2802_v1 }
 0x1a7   : > { %v1525_v9 = vld.sshfl [vmem:[#allocation1] sm:$0xff pattern:$0x73625140] }
 0x1a8   : > { %1527 = vst [vmem:[#allocation1] ss:$4 sm:$0xff] %v2656_v3  ;;  %v3494_v3 = vpop.permute.xlu2 %2938 }
 0x1a9   : > { %1528 = vst [vmem:[#allocation1 + $0x1] ss:$4 sm:$0xff] %v1404_v6 }
 0x1aa   : > { %1529 = vst [vmem:[#allocation1 + $0x2] ss:$4 sm:$0xff] %v1405_v7  ;;  %v1427_v7 = vrot.slane %v2669_v55, 6 }
 0x1ab   : > { %v1526_v13 = vld.sshfl [vmem:[#allocation1 + $0x20] sm:$0xff pattern:$0x73625140]  ;;  %1530 = vst [vmem:[#allocation1 + $0x3] ss:$4 sm:$0xff] %v1406_v10 }
 0x1ac   : > { %v3017_v16 = vpack.i.bf16 %v1526_v13, %v1525_v9  ;;  %1531 = vst [vmem:[#allocation1 + $0x20] ss:$4 sm:$0xff] %v2657_v4  ;;  %v1426_v4 = vrot.slane %v2669_v55, 4  ;;  %v3496_v9 = vpop.permute.xlu0 %2943 }
 0x1ad   : > { %1532 = vst [vmem:[#allocation1 + $0x21] ss:$4 sm:$0xff] %v1407_v8  ;;  %v2672_v8 = vunpack.c.l.bf16 %v2802_v1 }
 0x1ae   : > { %3018 = vperm.xlu2 %2856, %v3017_v16   ;;  %1533 = vst [vmem:[#allocation1 + $0x22] ss:$4 sm:$0xff] %v1408_v12 }
 0x1af   : > { %1534 = vst [vmem:[#allocation1 + $0x23] ss:$4 sm:$0xff] %v1409_v14  ;;  %v1428_v12 = vrot.slane %v2672_v8, 2  ;;  %v1429_v13 = vrot.slane %v2672_v8, 4 }
 0x1b0   : > { %v3498_v14 = vpop.permute.xlu2 %2948 }
 0x1b2   : > { %v1535_v22 = vld.sshfl [vmem:[#allocation1] sm:$0xff pattern:$0x73625140] }
 0x1b3   : > { %1537 = vst [vmem:[#allocation1] ss:$4 sm:$0xff] %v2660_v51  ;;  %v1430_v51 = vrot.slane %v2672_v8, 6 }
 0x1b4   : > { %1538 = vst [vmem:[#allocation1 + $0x1] ss:$4 sm:$0xff] %v1410_v18  ;;  %v1431_v18 = vrot.slane %v2673_v40, 2 }
 0x1b5   : > { %1539 = vst [vmem:[#allocation1 + $0x2] ss:$4 sm:$0xff] %v1411_v20  ;;  %v2803_v20 = vld [vmem:[%s3846_s1 + $0x150] sm:$0xff]  }
 0x1b6   : > { %v1536_v28 = vld.sshfl [vmem:[#allocation1 + $0x20] sm:$0xff pattern:$0x73625140]  ;;  %1540 = vst [vmem:[#allocation1 + $0x3] ss:$4 sm:$0xff] %v1412_v23 }
 0x1b7   : > { %v3022_v34 = vpack.i.bf16 %v1536_v28, %v1535_v22  ;;  %1541 = vst [vmem:[#allocation1 + $0x20] ss:$4 sm:$0xff] %v2661_v17  ;;  %v3500_v17 = vpop.permute.xlu0 %2953  ;;  %v1432_v22 = vrot.slane %v2673_v40, 4 }
 0x1b8   : > { %1542 = vst [vmem:[#allocation1 + $0x21] ss:$4 sm:$0xff] %v1413_v24  ;;  %v1433_v24 = vrot.slane %v2673_v40, 6  ;;  %v2959_v28 = vpop.permute.xlu2 %2958 }
 0x1b9   : > { %3023 = vperm.xlu1 %2845, %v3022_v34   ;;  %1543 = vst [vmem:[#allocation1 + $0x22] ss:$4 sm:$0xff] %v1414_v27  ;;  %v2676_v27 = vunpack.c.l.bf16 %v2803_v20 }
 0x1ba   : > { %1544 = vst [vmem:[#allocation1 + $0x23] ss:$4 sm:$0xff] %v1415_v29  ;;  %v2677_v29 = vunpack.c.h.bf16 %v2803_v20  ;;  %v2926_v20 = vunpack.i.h.bf16 %v3482_v39 }
 0x1bb   : > { %v1434_v34 = vrot.slane %v2676_v27, 2 }
 0x1bc   : > { %v1437_v45 = vrot.slane %v2677_v29, 2 }
 0x1bd   : > { %v1545_v41 = vld.sshfl [vmem:[#allocation1] sm:$0xff pattern:$0x73625140] }
 0x1be   : > { %1547 = vst [vmem:[#allocation1] ss:$4 sm:$0xff] %v2664_v35 }
 0x1bf   : > { %1548 = vst [vmem:[#allocation1 + $0x1] ss:$4 sm:$0xff] %v1416_v38  ;;  %v2964_v35 = vpop.permute.xlu0 %2963  ;;  %v2961_v38 = vunpack.i.h.bf16 %v2959_v28 }
 0x1c0   : > { %1549 = vst [vmem:[#allocation1 + $0x2] ss:$4 sm:$0xff] %v1417_v53 }
 0x1c1   : > { %v1546_v48 = vld.sshfl [vmem:[#allocation1 + $0x20] sm:$0xff pattern:$0x73625140]  ;;  %1550 = vst [vmem:[#allocation1 + $0x3] ss:$4 sm:$0xff] %v1418_v42  ;;  %v2960_v42 = vunpack.i.l.bf16 %v2959_v28 }
 0x1c2   : > { %v3027_v50 = vpack.i.bf16 %v1546_v48, %v1545_v41  ;;  %1551 = vst [vmem:[#allocation1 + $0x20] ss:$4 sm:$0xff] %v2665_v36  ;;  %v1435_v36 = vrot.slane %v2676_v27, 4  ;;  %v1436_v41 = vrot.slane %v2676_v27, 6  ;;  %v1438_v48 = vrot.slane %v2677_v29, 4 }
 0x1c3   : > { %1552 = vst [vmem:[#allocation1 + $0x21] ss:$4 sm:$0xff] %v1419_v44  ;;  %v2965_v44 = vunpack.i.l.bf16 %v2964_v35 }
 0x1c4   : > { %3028 = vperm.xlu2 %2856, %v3027_v50   ;;  %1553 = vst [vmem:[#allocation1 + $0x22] ss:$4 sm:$0xff] %v1420_v43  ;;  %v2804_v43 = vld [vmem:[%s3846_s1 + $0x158] sm:$0xff]   ;;  %v1224_v50 = vperm.slane %v2961_v38, %v3295_v2 }
 0x1c5   : > { %1554 = vst [vmem:[#allocation1 + $0x23] ss:$4 sm:$0xff] %v1421_v49  ;;  %v2921_v49 = vunpack.i.h.bf16 %v3480_v32  ;;  %v1226_v1 = vperm.slane %v2965_v44, %v3302_v15 }
 0x1c8   : > { %v1555_v61 = vld.sshfl [vmem:[#allocation1] sm:$0xff pattern:$0x73625140] }
 0x1c9   : > { %1557 = vst [vmem:[#allocation1] ss:$4 sm:$0xff] %v2668_v52 }
 0x1ca   : > { %1558 = vst [vmem:[#allocation1 + $0x1] ss:$4 sm:$0xff] %v1422_v56  ;;  %v1223_v56 = vperm.slane %v2960_v42, %v3292_v63 }
 0x1cb   : > { %1559 = vst [vmem:[#allocation1 + $0x2] ss:$4 sm:$0xff] %v1423_v58  ;;  %v2966_v58 = vunpack.i.h.bf16 %v2964_v35 }
 0x1cc   : > { %v1556_v6 = vld.sshfl [vmem:[#allocation1 + $0x20] sm:$0xff pattern:$0x73625140]  ;;  %1560 = vst [vmem:[#allocation1 + $0x3] ss:$4 sm:$0xff] %v1424_v62  ;;  %v2680_v62 = vunpack.c.l.bf16 %v2804_v43 }
 0x1cd   : > { %v3032_v10 = vpack.i.bf16 %v1556_v6, %v1555_v61  ;;  %1561 = vst [vmem:[#allocation1 + $0x20] ss:$4 sm:$0xff] %v2669_v55  ;;  %v1439_v55 = vrot.slane %v2677_v29, 6  ;;  %v2969_v6 = vpop.permute.xlu2 %2968 }
 0x1ce   : > { %1562 = vst [vmem:[#allocation1 + $0x21] ss:$4 sm:$0xff] %v1425_v0  ;;  %v2920_v0 = vunpack.i.l.bf16 %v3480_v32  ;;  %v2970_v32 = vunpack.i.l.bf16 %v2969_v6 }
 0x1cf   : > { %3033 = vperm.xlu1 %2845, %v3032_v10   ;;  %1563 = vst [vmem:[#allocation1 + $0x22] ss:$4 sm:$0xff] %v1426_v4  ;;  %v2925_v4 = vunpack.i.l.bf16 %v3482_v39  ;;  %v1225_v10 = vsel %vm628_vm0, %v1224_v50, %v1223_v56  ;;  %v2979_v39 = vpop.permute.xlu0 %2978  ;;  %v2930_v50 = vunpack.i.l.bf16 %v3487_v37 }
 0x1d0   : > { %1564 = vst [vmem:[#allocation1 + $0x23] ss:$4 sm:$0xff] %v1427_v7  ;;  %v1193_v7 = vperm.slane %v2921_v49, %v3295_v2  ;;  %v2980_v56 = vunpack.i.l.bf16 %v2979_v39 }
 0x1d3   : > { %v1565_v16 = vld.sshfl [vmem:[#allocation1] sm:$0xff pattern:$0x73625140] }
 0x1d4   : > { %1567 = vst [vmem:[#allocation1] ss:$4 sm:$0xff] %v2672_v8  ;;  %v1228_v8 = vperm.slane %v2966_v58, %v3312_v26  ;;  %v2931_v58 = vunpack.i.h.bf16 %v3487_v37  ;;  %v2936_v37 = vunpack.i.h.bf16 %v3489_v54 }
 0x1d5   : > { %1568 = vst [vmem:[#allocation1 + $0x1] ss:$4 sm:$0xff] %v1428_v12  ;;  %v1440_v12 = vrot.slane %v2680_v62, 2 }
 0x1d6   : > { %1569 = vst [vmem:[#allocation1 + $0x2] ss:$4 sm:$0xff] %v1429_v13  ;;  %v1192_v13 = vperm.slane %v2920_v0, %v3292_v63 }
 0x1d7   : > { %v1566_v23 = vld.sshfl [vmem:[#allocation1 + $0x20] sm:$0xff pattern:$0x73625140]  ;;  %1570 = vst [vmem:[#allocation1 + $0x3] ss:$4 sm:$0xff] %v1430_v51  ;;  %v2974_v51 = vpop.permute.xlu1 %2973 }
 0x1d8   : > { %v3037_v25 = vpack.i.bf16 %v1566_v23, %v1565_v16  ;;  %1571 = vst [vmem:[#allocation1 + $0x20] ss:$4 sm:$0xff] %v2673_v40  ;;  %v2681_v40 = vunpack.c.h.bf16 %v2804_v43  ;;  %v1227_v16 = vsel %vm632_vm1, %v1226_v1, %v1225_v10  ;;  %v2975_v28 = vunpack.i.l.bf16 %v2974_v51 }
 0x1d9   : > { %1572 = vst [vmem:[#allocation1 + $0x21] ss:$4 sm:$0xff] %v1431_v18  ;;  %v1441_v18 = vrot.slane %v2680_v62, 4  ;;  %v1194_v35 = vsel %vm628_vm0, %v1193_v7, %v1192_v13  ;;  %v2976_v43 = vunpack.i.h.bf16 %v2974_v51  ;;  %v1199_v10 = vperm.slane %v2930_v50, %v3318_v33  ;;  %v2984_v13 = vpop.permute.xlu2 %2983 }
 0x1da   : > { %3038 = vperm.xlu2 %2856, %v3037_v25   ;;  %1573 = vst [vmem:[#allocation1 + $0x22] ss:$4 sm:$0xff] %v1432_v22  ;;  %v1195_v22 = vperm.slane %v2925_v4, %v3302_v15  ;;  %v2971_v25 = vunpack.i.h.bf16 %v2969_v6  ;;  %v1444_v38 = vrot.slane %v2681_v40, 4  ;;  %v1445_v44 = vrot.slane %v2681_v40, 6 }
 0x1db   : > { %1574 = vst [vmem:[#allocation1 + $0x23] ss:$4 sm:$0xff] %v1433_v24  ;;  %v1442_v24 = vrot.slane %v2680_v62, 6  ;;  %v1236_v1 = vperm.slane %v2976_v43, %v3345_v11  ;;  %v2981_v4 = vunpack.i.h.bf16 %v2979_v39  ;;  %v2941_v50 = vunpack.i.h.bf16 %v3494_v3 }
 0x1de   : > { %v1575_v53 = vld.sshfl [vmem:[#allocation1] sm:$0xff pattern:$0x73625140] }
 0x1df   : > { %1577 = vst [vmem:[#allocation1] ss:$4 sm:$0xff] %v2676_v27  ;;  %v1229_v27 = vsel %vm636_vm2, %v1228_v8, %v1227_v16 }
 0x1e0   : > { %1578 = vst [vmem:[#allocation1 + $0x1] ss:$4 sm:$0xff] %v1434_v34  ;;  %v2805_v34 = vld [vmem:[%s3846_s1 + $0x160] sm:$0xff]  }
 0x1e1   : > { %1579 = vst [vmem:[#allocation1 + $0x2] ss:$4 sm:$0xff] %v1435_v36  ;;  %v1230_v36 = vperm.slane %v2970_v32, %v3318_v33  ;;  %v2684_v49 = vunpack.c.l.bf16 %v2805_v34  ;;  %v2685_v6 = vunpack.c.h.bf16 %v2805_v34  ;;  %v2940_v34 = vunpack.i.l.bf16 %v3494_v3 }
 0x1e2   : > { %v1576_v52 = vld.sshfl [vmem:[#allocation1 + $0x20] sm:$0xff pattern:$0x73625140]  ;;  %1580 = vst [vmem:[#allocation1 + $0x3] ss:$4 sm:$0xff] %v1436_v41  ;;  %v1196_v41 = vsel %vm632_vm1, %v1195_v22, %v1194_v35 }
 0x1e3   : > { %v3042_v61 = vpack.i.bf16 %v1576_v52, %v1575_v53  ;;  %1581 = vst [vmem:[#allocation1 + $0x20] ss:$4 sm:$0xff] %v2677_v29  ;;  %v1443_v29 = vrot.slane %v2681_v40, 2  ;;  %v1197_v53 = vperm.slane %v2926_v20, %v3312_v26  ;;  %v1232_v52 = vperm.slane %v2971_v25, %v3326_v46  ;;  %v2989_v25 = vpop.permute.xlu0 %2988 }
 0x1e4   : > { %1582 = vst [vmem:[#allocation1 + $0x21] ss:$4 sm:$0xff] %v1437_v45  ;;  %v1231_v45 = vsel %vm640_vm3, %v1230_v36, %v1229_v27  ;;  %v1446_v7 = vrot.slane %v2684_v49, 2  ;;  %v1448_v16 = vrot.slane %v2684_v49, 6  ;;  %v1201_v20 = vperm.slane %v2931_v58, %v3326_v46 }
 0x1e5   : > { %3043 = vperm.xlu1 %2845, %v3042_v61   ;;  %1583 = vst [vmem:[#allocation1 + $0x22] ss:$4 sm:$0xff] %v1438_v48  ;;  %v1198_v61 = vsel %vm636_vm2, %v1197_v53, %v1196_v41  ;;  %v1233_v0 = vsel %vm644_vm4, %v1232_v52, %v1231_v45  ;;  %v2985_v27 = vunpack.i.l.bf16 %v2984_v13  ;;  %v1205_v36 = vperm.slane %v2936_v37, %v3345_v11 }
 0x1e6   : > { %1584 = vst [vmem:[#allocation1 + $0x23] ss:$4 sm:$0xff] %v1439_v55  ;;  %v1234_v55 = vperm.slane %v2975_v28, %v3334_v59  ;;  %v1200_v51 = vsel %vm640_vm3, %v1199_v10, %v1198_v61  ;;  %v2986_v45 = vunpack.i.h.bf16 %v2984_v13  ;;  %v1207_v52 = vperm.slane %v2940_v34, %v3352_v19 }
 0x1e7   : > { %v1202_v35 = vsel %vm644_vm4, %v1201_v20, %v1200_v51  ;;  %v2807_v51 = vld [vmem:[%s3846_s1 + $0x170] sm:$0xff]  }
 0x1e8   : > { %v1235_v8 = vsel %vm648_vm5, %v1234_v55, %v1233_v0  ;;  %v2692_v34 = vunpack.c.l.bf16 %v2807_v51 }
 0x1e9   : > { %v1585_v23 = vld.sshfl [vmem:[#allocation1] sm:$0xff pattern:$0x73625140]  ;;  %v1237_v22 = vsel %vm652_vm6, %v1236_v1, %v1235_v8  ;;  %v2946_v1 = vunpack.i.h.bf16 %v3496_v9 }
 0x1ea   : > { %1587 = vst [vmem:[#allocation1] ss:$4 sm:$0xff] %v2680_v62  ;;  %v2935_v62 = vunpack.i.l.bf16 %v3489_v54  ;;  %v2806_v54 = vld [vmem:[%s3846_s1 + $0x168] sm:$0xff]  }
 0x1eb   : > { %1588 = vst [vmem:[#allocation1 + $0x1] ss:$4 sm:$0xff] %v1440_v12  ;;  %v1447_v12 = vrot.slane %v2684_v49, 4  ;;  %v1213_v20 = vperm.slane %v2946_v1, %v3379_v60 }
 0x1ec   : > { %1589 = vst [vmem:[#allocation1 + $0x2] ss:$4 sm:$0xff] %v1441_v18  ;;  %v1203_v18 = vperm.slane %v2935_v62, %v3334_v59  ;;  %v2689_v62 = vunpack.c.h.bf16 %v2806_v54 }
 0x1ed   : > { %v1586_v42 = vld.sshfl [vmem:[#allocation1 + $0x20] sm:$0xff pattern:$0x73625140]  ;;  %1590 = vst [vmem:[#allocation1 + $0x3] ss:$4 sm:$0xff] %v1442_v24  ;;  %v1449_v24 = vrot.slane %v2685_v6, 2 }
 0x1ee   : > { %v3047_v48 = vpack.i.bf16 %v1586_v42, %v1585_v23  ;;  %1591 = vst [vmem:[#allocation1 + $0x20] ss:$4 sm:$0xff] %v2681_v40  ;;  %v1238_v40 = vperm.slane %v2980_v56, %v3352_v19  ;;  %v1240_v23 = vperm.slane %v2981_v4, %v3361_v31  ;;  %v1204_v53 = vsel %vm648_vm5, %v1203_v18, %v1202_v35 }
 0x1ef   : > { %1592 = vst [vmem:[#allocation1 + $0x21] ss:$4 sm:$0xff] %v1443_v29  ;;  %v1450_v29 = vrot.slane %v2685_v6, 4  ;;  %v2990_v42 = vunpack.i.l.bf16 %v2989_v25  ;;  %v1206_v55 = vsel %vm652_vm6, %v1205_v36, %v1204_v53  ;;  %v2991_v56 = vunpack.i.h.bf16 %v2989_v25 }
 0x1f0   : > { %3048 = vperm.xlu2 %2856, %v3047_v48   ;;  %1593 = vst [vmem:[#allocation1 + $0x22] ss:$4 sm:$0xff] %v1444_v38  ;;  %v1239_v28 = vsel %vm656_vm7, %v1238_v40, %v1237_v22  ;;  %v1451_v38 = vrot.slane %v2685_v6, 6  ;;  %v2945_v48 = vunpack.i.l.bf16 %v3496_v9  ;;  %v1244_v4 = vperm.slane %v2986_v45, %v3379_v60 }
 0x1f1   : > { %1594 = vst [vmem:[#allocation1 + $0x23] ss:$4 sm:$0xff] %v1445_v44  ;;  %v2688_v44 = vunpack.c.l.bf16 %v2806_v54  ;;  %v1241_v43 = vsel %vm660_vm8, %v1240_v23, %v1239_v28  ;;  %v1246_v61 = vperm.slane %v2990_v42, %v3387_v5  ;;  %v1208_v3 = vsel %vm656_vm7, %v1207_v52, %v1206_v55 }
 0x1f2   : > { %v1211_v10 = vperm.slane %v2945_v48, %v3372_v47  ;;  %v1248_v13 = vperm.slane %v2991_v56, %v3396_v21  ;;  %v1456_v22 = vrot.slane %v2689_v62, 4  ;;  %v2950_v23 = vunpack.i.l.bf16 %v3498_v14 }
 0x1f3   : > { %v1452_v0 = vrot.slane %v2688_v44, 2  ;;  %v1454_v40 = vrot.slane %v2688_v44, 6  ;;  %v1457_v54 = vrot.slane %v2689_v62, 6  ;;  %v2955_v35 = vunpack.i.l.bf16 %v3500_v17 }
 0x1f4   : > { %v1595_v32 = vld.sshfl [vmem:[#allocation1] sm:$0xff pattern:$0x73625140]  ;;  %v1215_v53 = vperm.slane %v2950_v23, %v3387_v5  ;;  %v2956_v42 = vunpack.i.h.bf16 %v3500_v17  ;;  %v2693_v45 = vunpack.c.h.bf16 %v2807_v51  ;;  %v1460_v56 = vrot.slane %v2692_v34, 6 }
 0x1f5   : > { %1597 = vst [vmem:[#allocation1] ss:$4 sm:$0xff] %v2684_v49  ;;  %v1242_v49 = vperm.slane %v2985_v27, %v3372_v47 }
 0x1f6   : > { %1598 = vst [vmem:[#allocation1 + $0x1] ss:$4 sm:$0xff] %v1446_v7  ;;  %v1453_v7 = vrot.slane %v2688_v44, 4  ;;  %v1221_v17 = vperm.slane %v2956_v42, %v3421_v57 }
 0x1f7   : > { %1599 = vst [vmem:[#allocation1 + $0x2] ss:$4 sm:$0xff] %v1447_v12  ;;  %v1243_v58 = vsel %vm664_vm9, %v1242_v49, %v1241_v43  ;;  %v1209_v12 = vperm.slane %v2941_v50, %v3361_v31  ;;  %v1458_v43 = vrot.slane %v2692_v34, 2  ;;  %v1219_v49 = vperm.slane %v2955_v35, %v3405_v30 }
 0x1f8   : > { %v1596_v39 = vld.sshfl [vmem:[#allocation1 + $0x20] sm:$0xff pattern:$0x73625140]  ;;  %1600 = vst [vmem:[#allocation1 + $0x3] ss:$4 sm:$0xff] %v1448_v16  ;;  %v1245_v37 = vsel %vm668_vm10, %v1244_v4, %v1243_v58  ;;  %v1455_v16 = vrot.slane %v2689_v62, 2 }
 0x1f9   : > { %v3052_v41 = vpack.i.bf16 %v1596_v39, %v1595_v32  ;;  %1601 = vst [vmem:[#allocation1 + $0x20] ss:$4 sm:$0xff] %v2685_v6  ;;  %v2994_v6 = vpop.permute.xlu2 %2993  ;;  %v1247_v9 = vsel %vm672_vm11, %v1246_v61, %v1245_v37  ;;  %v1210_v18 = vsel %vm660_vm8, %v1209_v12, %v1208_v3  ;;  %v2951_v39 = vunpack.i.h.bf16 %v3498_v14 }
 0x1fa   : > { %1602 = vst [vmem:[#allocation1 + $0x21] ss:$4 sm:$0xff] %v1449_v24  ;;  %v2995_v32 = vunpack.i.l.bf16 %v2994_v6  ;;  %v1212_v24 = vsel %vm664_vm9, %v1211_v10, %v1210_v18  ;;  %v2996_v27 = vunpack.i.h.bf16 %v2994_v6  ;;  %v1459_v14 = vrot.slane %v2692_v34, 4 }
 0x1fb   : > { %3053 = vperm.xlu0 %2834, %v3052_v41   ;;  %1603 = vst [vmem:[#allocation1 + $0x22] ss:$4 sm:$0xff] %v1450_v29  ;;  %v1249_v29 = vsel %vm676_vm12, %v1248_v13, %v1247_v9  ;;  %v1217_v50 = vperm.slane %v2951_v39, %v3396_v21  ;;  %v1461_v61 = vrot.slane %v2693_v45, 2  ;;  %v1462_v4 = vrot.slane %v2693_v45, 4 }
 0x1fc   : > { %1604 = vst [vmem:[#allocation1 + $0x23] ss:$4 sm:$0xff] %v1451_v38  ;;  %v1250_v36 = vperm.slane %v2995_v32, %v3405_v30  ;;  %v1214_v38 = vsel %vm668_vm10, %v1213_v20, %v1212_v24 }
 0x1fd   : > { %v1216_v48 = vsel %vm672_vm11, %v1215_v53, %v1214_v38 }
 0x1fe   : > { %v1251_v41 = vsel %vm3853_vm13, %v1250_v36, %v1249_v29  ;;  %v1218_v58 = vsel %vm676_vm12, %v1217_v50, %v1216_v48 }
 0x1ff   : > { %v1605_v8 = vld.sshfl [vmem:[#allocation1] sm:$0xff pattern:$0x73625140] }
 0x200   : > { %1607 = vst [vmem:[#allocation1] ss:$4 sm:$0xff] %v2688_v44  ;;  %v1252_v44 = vperm.slane %v2996_v27, %v3421_v57 }
 0x201   : > { %1608 = vst [vmem:[#allocation1 + $0x1] ss:$4 sm:$0xff] %v1452_v0  ;;  %v1220_v0 = vsel %vm3853_vm13, %v1219_v49, %v1218_v58 }
 0x202   : > { %1609 = vst [vmem:[#allocation1 + $0x2] ss:$4 sm:$0xff] %v1453_v7  ;;  %v1253_v52 = vsel %vm3852_vm14, %v1252_v44, %v1251_v41  ;;  %v1463_v7 = vrot.slane %v2693_v45, 6  ;;  %v2810_v44 = vld [vmem:[%s3846_s1 + $0x188] sm:$0xff]  }
 0x203   : > { %v1606_v25 = vld.sshfl [vmem:[#allocation1 + $0x20] sm:$0xff pattern:$0x73625140]  ;;  %1610 = vst [vmem:[#allocation1 + $0x3] ss:$4 sm:$0xff] %v1454_v40  ;;  %v1254_v1 = vrot.slane %v1253_v52, 6  ;;  %v2704_v52 = vunpack.c.l.bf16 %v2810_v44 }
 0x204   : > { %v3057_v28 = vpack.i.bf16 %v1606_v25, %v1605_v8  ;;  %1611 = vst [vmem:[#allocation1 + $0x20] ss:$4 sm:$0xff] %v2689_v62  ;;  %v2808_v62 = vld [vmem:[%s3846_s1 + $0x178] sm:$0xff]   ;;  %v1222_v8 = vsel %vm3852_vm14, %v1221_v17, %v1220_v0  ;;  %v734_v40 = vld [vmem:[%s3448_s4] sm:$0x3]  ;;  %v2811_v0 = vld [vmem:[%s3846_s1 + $0x190] sm:$0xff]  }
 0x205   : > { %1612 = vst [vmem:[#allocation1 + $0x21] ss:$4 sm:$0xff] %v1455_v16  ;;  %v2696_v10 = vunpack.c.l.bf16 %v2808_v62  ;;  %v1255_v12 = vsel %vm3855_vm15, %v1222_v8, %v1254_v1  ;;  %v2697_v37 = vunpack.c.h.bf16 %v2808_v62  ;;  %v768_v9 = vunpack.c.l.bf16 %v734_v40 }
 0x206   : > { %3058 = vperm.xlu1 %2845, %v3057_v28   ;;  %1613 = vst [vmem:[#allocation1 + $0x22] ss:$4 sm:$0xff] %v1456_v22  ;;  %v1256_v16 = vrot.slane %v1255_v12, 7  ;;  %v2809_v22 = vld [vmem:[%s3846_s1 + $0x180] sm:$0xff]   ;;  %vm3851_vm15 = vcmask 1041409   ;;  %v1916_v58 = vrot.slane %v2704_v52, 4 }
 0x207   : > { %1614 = vst [vmem:[#allocation1 + $0x23] ss:$4 sm:$0xff] %v1457_v54  ;;  %v1464_v13 = vrot.slane %v2696_v10, 2  ;;  %v1465_v32 = vrot.slane %v2696_v10, 4  ;;  %v1466_v18 = vrot.slane %v2696_v10, 6  ;;  %v1467_v20 = vrot.slane %v2697_v37, 2 }
 0x208   : > { %v1468_v23 = vrot.slane %v2697_v37, 4  ;;  %v1258_v24 = vmul.f32 %v1256_v16, %v768_v9  ;;  %v1469_v54 = vrot.slane %v2697_v37, 6  ;;  %v2700_v28 = vunpack.c.l.bf16 %v2809_v22 }
 0x209   : > { %v2701_v35 = vunpack.c.h.bf16 %v2809_v22  ;;  %v1917_v17 = vrot.slane %v2704_v52, 6 }
 0x20a   : > { %v1615_v55 = vld.sshfl [vmem:[#allocation1] sm:$0xff pattern:$0x73625140]  ;;  %v1260_v29 = vperm.slane %v1258_v24, 1  ;;  %v1909_v36 = vrot.slane %v2700_v28, 2  ;;  %v1910_v39 = vrot.slane %v2700_v28, 4 }
 0x20b   : > { %1617 = vst [vmem:[#allocation1] ss:$4 sm:$0xff] %v2692_v34  ;;  %v1261_v34 = vperm.slane %v1258_v24, 3  ;;  %v1911_v42 = vrot.slane %v2700_v28, 6  ;;  %v1913_v48 = vrot.slane %v2701_v35, 4 }
 0x20c   : > { %1618 = vst [vmem:[#allocation1 + $0x1] ss:$4 sm:$0xff] %v1458_v43  ;;  %v1265_v53 = vsel %vm3851_vm15, %v1260_v29, 0.0 }
 0x20d   : > { %1619 = vst [vmem:[#allocation1 + $0x2] ss:$4 sm:$0xff] %v1459_v14  ;;  %v1266_v41 = vsel %vm3851_vm15, %v1261_v34, 0.0  ;;  %v1914_v14 = vrot.slane %v2701_v35, 6  ;;  %vm3856_vm15 = vcmask 1041408  }
 0x20e   : > { %v1616_v6 = vld.sshfl [vmem:[#allocation1 + $0x20] sm:$0xff pattern:$0x73625140]  ;;  %1620 = vst [vmem:[#allocation1 + $0x3] ss:$4 sm:$0xff] %v1460_v56  ;;  %v1267_v43 = vadd.f32 %v1266_v41, %v1265_v53  ;;  %v1915_v56 = vrot.slane %v2704_v52, 2 }
 0x20f   : > { %v3062_v3 = vpack.i.bf16 %v1616_v6, %v1615_v55  ;;  %1621 = vst [vmem:[#allocation1 + $0x20] ss:$4 sm:$0xff] %v2693_v45  ;;  %v1912_v45 = vrot.slane %v2701_v35, 2  ;;  %v2705_v55 = vunpack.c.h.bf16 %v2810_v44 }
 0x210   : > { %1622 = vst [vmem:[#allocation1 + $0x21] ss:$4 sm:$0xff] %v1461_v61 }
 0x211   : > { %3063 = vperm.xlu2 %2856, %v3062_v3   ;;  %1623 = vst [vmem:[#allocation1 + $0x22] ss:$4 sm:$0xff] %v1462_v4  ;;  %v1918_v62 = vrot.slane %v2705_v55, 2  ;;  %v1919_v1 = vrot.slane %v2705_v55, 4  ;;  %v1920_v4 = vrot.slane %v2705_v55, 6  ;;  %v2709_v3 = vunpack.c.h.bf16 %v2811_v0 }
 0x212   : > { %1624 = vst [vmem:[#allocation1 + $0x23] ss:$4 sm:$0xff] %v1463_v7  ;;  %v2708_v7 = vunpack.c.l.bf16 %v2811_v0 }
 0x213   : > { %v1925_v9 = vrot.slane %v2709_v3, 4 }
 0x214   : > { %v1922_v40 = vrot.slane %v2708_v7, 4 }
 0x215   : > { %v1625_v51 = vld.sshfl [vmem:[#allocation1] sm:$0xff pattern:$0x73625140] }
 0x216   : > { %1627 = vst [vmem:[#allocation1] ss:$4 sm:$0xff] %v2696_v10  ;;  %v1921_v10 = vrot.slane %v2708_v7, 2 }
 0x217   : > { %1628 = vst [vmem:[#allocation1 + $0x1] ss:$4 sm:$0xff] %v1464_v13  ;;  %v2812_v13 = vld [vmem:[%s3846_s1 + $0x198] sm:$0xff]  }
 0x218   : > { %1629 = vst [vmem:[#allocation1 + $0x2] ss:$4 sm:$0xff] %v1465_v32  ;;  %v1924_v32 = vrot.slane %v2709_v3, 2  ;;  %v2713_v22 = vunpack.c.h.bf16 %v2812_v13 }
 0x219   : > { %v1626_v25 = vld.sshfl [vmem:[#allocation1 + $0x20] sm:$0xff pattern:$0x73625140]  ;;  %1630 = vst [vmem:[#allocation1 + $0x3] ss:$4 sm:$0xff] %v1466_v18 }
 0x21a   : > { %v3067_v27 = vpack.i.bf16 %v1626_v25, %v1625_v51  ;;  %1631 = vst [vmem:[#allocation1 + $0x20] ss:$4 sm:$0xff] %v2697_v37  ;;  %v1923_v37 = vrot.slane %v2708_v7, 6  ;;  %v1926_v51 = vrot.slane %v2709_v3, 6  ;;  %v1931_v29 = vrot.slane %v2713_v22, 4 }
 0x21b   : > { %1632 = vst [vmem:[#allocation1 + $0x21] ss:$4 sm:$0xff] %v1467_v20  ;;  %v2712_v20 = vunpack.c.l.bf16 %v2812_v13  ;;  %v1932_v34 = vrot.slane %v2713_v22, 6 }
 0x21c   : > { %3068 = vperm.xlu1 %2845, %v3067_v27   ;;  %1633 = vst [vmem:[#allocation1 + $0x22] ss:$4 sm:$0xff] %v1468_v23  ;;  %v1930_v27 = vrot.slane %v2713_v22, 2 }
 0x21d   : > { %1634 = vst [vmem:[#allocation1 + $0x23] ss:$4 sm:$0xff] %v1469_v54  ;;  %v1927_v23 = vrot.slane %v2712_v20, 2  ;;  %v1928_v24 = vrot.slane %v2712_v20, 4  ;;  %v1929_v25 = vrot.slane %v2712_v20, 6 }
 0x220   : > { %v1635_v38 = vld.sshfl [vmem:[#allocation1] sm:$0xff pattern:$0x73625140] }
 0x221   : > { %2005 = vst [vmem:[#allocation1] ss:$4 sm:$0xff] %v2700_v28  ;;  %v2813_v28 = vld [vmem:[%s3846_s1 + $0x1a0] sm:$0xff]  }
 0x222   : > { %2007 = vst [vmem:[#allocation1 + $0x1] ss:$4 sm:$0xff] %v1909_v36 }
 0x223   : > { %2009 = vst [vmem:[#allocation1 + $0x2] ss:$4 sm:$0xff] %v1910_v39  ;;  %v2716_v39 = vunpack.c.l.bf16 %v2813_v28 }
 0x224   : > { %v1636_v49 = vld.sshfl [vmem:[#allocation1 + $0x20] sm:$0xff pattern:$0x73625140]  ;;  %2011 = vst [vmem:[#allocation1 + $0x3] ss:$4 sm:$0xff] %v1911_v42 }
 0x225   : > { %v3072_v50 = vpack.i.bf16 %v1636_v49, %v1635_v38  ;;  %1268 = vadd.xlane.f32.xlu0 %v1267_v43  ;;  %2013 = vst [vmem:[#allocation1 + $0x20] ss:$4 sm:$0xff] %v2701_v35  ;;  %v2717_v38 = vunpack.c.h.bf16 %v2813_v28  ;;  %v1933_v53 = vrot.slane %v2716_v39, 2  ;;  %v1934_v41 = vrot.slane %v2716_v39, 4 }
 0x226   : > { %2015 = vst [vmem:[#allocation1 + $0x21] ss:$4 sm:$0xff] %v1912_v45  ;;  %v1935_v44 = vrot.slane %v2716_v39, 6  ;;  %v3617_v45 = vpop.xlane.xlu1 %731 }
 0x227   : > { %3073 = vperm.xlu2 %2856, %v3072_v50   ;;  %2017 = vst [vmem:[#allocation1 + $0x22] ss:$4 sm:$0xff] %v1913_v48  ;;  %v1936_v43 = vrot.slane %v2717_v38, 2  ;;  %v2814_v48 = vld [vmem:[%s3846_s1 + $0x1a8] sm:$0xff]   ;;  %v1937_v49 = vrot.slane %v2717_v38, 4  ;;  %v1938_v50 = vrot.slane %v2717_v38, 6 }
 0x228   : > { %2019 = vst [vmem:[#allocation1 + $0x23] ss:$4 sm:$0xff] %v1914_v14 }
 0x22b   : > { %v2020_v61 = vld.sshfl [vmem:[#allocation1] sm:$0xff pattern:$0x73625140] }
 0x22c   : > { %2022 = vst [vmem:[#allocation1] ss:$4 sm:$0xff] %v2704_v52 }
 0x22d   : > { %2023 = vst [vmem:[#allocation1 + $0x1] ss:$4 sm:$0xff] %v1915_v56  ;;  %v2721_v56 = vunpack.c.h.bf16 %v2814_v48 }
 0x22e   : > { %2024 = vst [vmem:[#allocation1 + $0x2] ss:$4 sm:$0xff] %v1916_v58 }
 0x22f   : > { %v2021_v6 = vld.sshfl [vmem:[#allocation1 + $0x20] sm:$0xff pattern:$0x73625140]  ;;  %2025 = vst [vmem:[#allocation1 + $0x3] ss:$4 sm:$0xff] %v1917_v17  ;;  %v3622_v17 = vpop.permute.xlu1 %3003 }
 0x230   : > { %2026 = vst [vmem:[#allocation1 + $0x20] ss:$4 sm:$0xff] %v2705_v55  ;;  %v3077_v8 = vpack.i.bf16 %v2021_v6, %v2020_v61  ;;  %v2720_v55 = vunpack.c.l.bf16 %v2814_v48  ;;  %v2815_v6 = vld [vmem:[%s3846_s1 + $0x1b0] sm:$0xff]  }
 0x231   : > { %2027 = vst [vmem:[#allocation1 + $0x21] ss:$4 sm:$0xff] %v1918_v62 }
 0x232   : > { %2028 = vst [vmem:[#allocation1 + $0x22] ss:$4 sm:$0xff] %v1919_v1  ;;  %v1939_v58 = vrot.slane %v2720_v55, 2  ;;  %v1940_v61 = vrot.slane %v2720_v55, 4  ;;  %v1941_v0 = vrot.slane %v2720_v55, 6  ;;  %v3624_v1 = vpop.permute.xlu2 %2998 }
 0x233   : > { %2029 = vst [vmem:[#allocation1 + $0x23] ss:$4 sm:$0xff] %v1920_v4  ;;  %v1942_v4 = vrot.slane %v2721_v56, 2 }
 0x236   : > { %v2030_v12 = vld.sshfl [vmem:[#allocation1] sm:$0xff pattern:$0x73625140] }
 0x237   : > { %2032 = vst [vmem:[#allocation1] ss:$4 sm:$0xff] %v2708_v7  ;;  %v1943_v7 = vrot.slane %v2721_v56, 4 }
 0x238   : > { %2033 = vst [vmem:[#allocation1 + $0x1] ss:$4 sm:$0xff] %v1921_v10  ;;  %v1944_v10 = vrot.slane %v2721_v56, 6 }
 0x239   : > { %3078 = vperm.xlu0 %2834, %v3077_v8   ;;  %2034 = vst [vmem:[#allocation1 + $0x2] ss:$4 sm:$0xff] %v1922_v40  ;;  %v2724_v40 = vunpack.c.l.bf16 %v2815_v6 }
 0x23a   : > { %v2031_v16 = vld.sshfl [vmem:[#allocation1 + $0x20] sm:$0xff pattern:$0x73625140]  ;;  %2035 = vst [vmem:[#allocation1 + $0x3] ss:$4 sm:$0xff] %v1923_v37  ;;  %v2725_v37 = vunpack.c.h.bf16 %v2815_v6 }
 0x23b   : > { %v3082_v18 = vpack.i.bf16 %v2031_v16, %v2030_v12  ;;  %2036 = vst [vmem:[#allocation1 + $0x20] ss:$4 sm:$0xff] %v2709_v3  ;;  %v3629_v12 = vpop.permute.xlu1 %3013  ;;  %v1945_v13 = vrot.slane %v2724_v40, 2 }
 0x23c   : > { %2037 = vst [vmem:[#allocation1 + $0x21] ss:$4 sm:$0xff] %v1924_v32  ;;  %v3631_v32 = vpop.permute.xlu2 %3008 }
 0x23d   : > { %3083 = vperm.xlu2 %2856, %v3082_v18   ;;  %2038 = vst [vmem:[#allocation1 + $0x22] ss:$4 sm:$0xff] %v1925_v9  ;;  %v1946_v9 = vrot.slane %v2724_v40, 4  ;;  %v1948_v18 = vrot.slane %v2725_v37, 2 }
 0x23e   : > { %2039 = vst [vmem:[#allocation1 + $0x23] ss:$4 sm:$0xff] %v1926_v51  ;;  %v1947_v51 = vrot.slane %v2724_v40, 6 }
 0x241   : > { %v2040_v54 = vld.sshfl [vmem:[#allocation1] sm:$0xff pattern:$0x73625140] }
 0x242   : > { %2042 = vst [vmem:[#allocation1] ss:$4 sm:$0xff] %v2712_v20  ;;  %v2816_v20 = vld [vmem:[%s3846_s1 + $0x1b8] sm:$0xff]  }
 0x243   : > { %2043 = vst [vmem:[#allocation1 + $0x1] ss:$4 sm:$0xff] %v1927_v23  ;;  %v3638_v28 = vpop.permute.xlu1 %3023 }
 0x244   : > { %2044 = vst [vmem:[#allocation1 + $0x2] ss:$4 sm:$0xff] %v1928_v24  ;;  %v1950_v24 = vrot.slane %v2725_v37, 6 }
 0x245   : > { %v2041_v35 = vld.sshfl [vmem:[#allocation1 + $0x20] sm:$0xff pattern:$0x73625140]  ;;  %2045 = vst [vmem:[#allocation1 + $0x3] ss:$4 sm:$0xff] %v1929_v25 }
 0x246   : > { %2046 = vst [vmem:[#allocation1 + $0x20] ss:$4 sm:$0xff] %v2713_v22  ;;  %v3087_v36 = vpack.i.bf16 %v2041_v35, %v2040_v54  ;;  %v1949_v22 = vrot.slane %v2725_v37, 4  ;;  %v2728_v54 = vunpack.c.l.bf16 %v2816_v20 }
 0x247   : > { %2047 = vst [vmem:[#allocation1 + $0x21] ss:$4 sm:$0xff] %v1930_v27  ;;  %v3636_v27 = vpop.permute.xlu2 %3018 }
 0x248   : > { %2048 = vst [vmem:[#allocation1 + $0x22] ss:$4 sm:$0xff] %v1931_v29  ;;  %3088 = vperm.xlu0 %2834, %v3087_v36   ;;  %v2729_v29 = vunpack.c.h.bf16 %v2816_v20  ;;  %v1952_v35 = vrot.slane %v2728_v54, 4  ;;  %v3006_v20 = vunpack.i.h.bf16 %v3622_v17 }
 0x249   : > { %2049 = vst [vmem:[#allocation1 + $0x23] ss:$4 sm:$0xff] %v1932_v34  ;;  %v1951_v34 = vrot.slane %v2728_v54, 2 }
 0x24b   : > { %v3645_v48 = vpop.permute.xlu1 %3033 }
 0x24c   : > { %v2050_v42 = vld.sshfl [vmem:[#allocation1] sm:$0xff pattern:$0x73625140] }
 0x24d   : > { %2052 = vst [vmem:[#allocation1] ss:$4 sm:$0xff] %v2716_v39  ;;  %v1953_v39 = vrot.slane %v2728_v54, 6 }
 0x24e   : > { %2053 = vst [vmem:[#allocation1 + $0x1] ss:$4 sm:$0xff] %v1933_v53  ;;  %v2817_v53 = vld [vmem:[%s3846_s1 + $0x1c0] sm:$0xff]  }
 0x24f   : > { %2054 = vst [vmem:[#allocation1 + $0x2] ss:$4 sm:$0xff] %v1934_v41  ;;  %v1955_v41 = vrot.slane %v2729_v29, 4 }
 0x250   : > { %v2051_v14 = vld.sshfl [vmem:[#allocation1 + $0x20] sm:$0xff pattern:$0x73625140]  ;;  %2055 = vst [vmem:[#allocation1 + $0x3] ss:$4 sm:$0xff] %v1935_v44 }
 0x251   : > { %v3092_v52 = vpack.i.bf16 %v2051_v14, %v2050_v42  ;;  %2056 = vst [vmem:[#allocation1 + $0x20] ss:$4 sm:$0xff] %v2717_v38  ;;  %v1954_v38 = vrot.slane %v2729_v29, 2  ;;  %v3643_v42 = vpop.permute.xlu2 %3028  ;;  %v2732_v14 = vunpack.c.l.bf16 %v2817_v53 }
 0x252   : > { %2057 = vst [vmem:[#allocation1 + $0x21] ss:$4 sm:$0xff] %v1936_v43  ;;  %v1956_v43 = vrot.slane %v2729_v29, 6 }
 0x253   : > { %3093 = vperm.xlu2 %2856, %v3092_v52   ;;  %2058 = vst [vmem:[#allocation1 + $0x22] ss:$4 sm:$0xff] %v1937_v49  ;;  %v1957_v52 = vrot.slane %v2732_v14, 2 }
 0x254   : > { %2059 = vst [vmem:[#allocation1 + $0x23] ss:$4 sm:$0xff] %v1938_v50  ;;  %v2733_v50 = vunpack.c.h.bf16 %v2817_v53 }
 0x256   : > { %v1960_v6 = vrot.slane %v2733_v50, 2 }
 0x257   : > { %v2060_v62 = vld.sshfl [vmem:[#allocation1] sm:$0xff pattern:$0x73625140] }
 0x258   : > { %2062 = vst [vmem:[#allocation1] ss:$4 sm:$0xff] %v2720_v55  ;;  %v1958_v55 = vrot.slane %v2732_v14, 4 }
 0x259   : > { %2063 = vst [vmem:[#allocation1 + $0x1] ss:$4 sm:$0xff] %v1939_v58  ;;  %v1959_v58 = vrot.slane %v2732_v14, 6 }
 0x25a   : > { %2064 = vst [vmem:[#allocation1 + $0x2] ss:$4 sm:$0xff] %v1940_v61  ;;  %v3039_v61 = vpop.permute.xlu2 %3038 }
 0x25b   : > { %v2061_v3 = vld.sshfl [vmem:[#allocation1 + $0x20] sm:$0xff pattern:$0x73625140]  ;;  %2065 = vst [vmem:[#allocation1 + $0x3] ss:$4 sm:$0xff] %v1941_v0  ;;  %v3000_v0 = vunpack.i.l.bf16 %v3624_v1 }
 0x25c   : > { %v3097_v8 = vpack.i.bf16 %v2061_v3, %v2060_v62  ;;  %2066 = vst [vmem:[#allocation1 + $0x20] ss:$4 sm:$0xff] %v2721_v56  ;;  %v3001_v62 = vunpack.i.h.bf16 %v3624_v1  ;;  %v3005_v3 = vunpack.i.l.bf16 %v3622_v17 }
 0x25d   : > { %2067 = vst [vmem:[#allocation1 + $0x21] ss:$4 sm:$0xff] %v1942_v4  ;;  %v3044_v4 = vpop.permute.xlu1 %3043 }
 0x25e   : > { %3098 = vperm.xlu0 %2834, %v3097_v8   ;;  %2068 = vst [vmem:[#allocation1 + $0x22] ss:$4 sm:$0xff] %v1943_v7  ;;  %v2818_v7 = vld [vmem:[%s3846_s1 + $0x1c8] sm:$0xff]   ;;  %v3041_v8 = vunpack.i.h.bf16 %v3039_v61 }
 0x25f   : > { %2069 = vst [vmem:[#allocation1 + $0x23] ss:$4 sm:$0xff] %v1944_v10  ;;  %v1961_v10 = vrot.slane %v2733_v50, 4  ;;  %v2736_v1 = vunpack.c.l.bf16 %v2818_v7 }
 0x262   : > { %v2070_v16 = vld.sshfl [vmem:[#allocation1] sm:$0xff pattern:$0x73625140]  ;;  %v3049_v17 = vpop.permute.xlu2 %3048 }
 0x263   : > { %2072 = vst [vmem:[#allocation1] ss:$4 sm:$0xff] %v2724_v40  ;;  %v3040_v40 = vunpack.i.l.bf16 %v3039_v61  ;;  %v3011_v61 = vunpack.i.h.bf16 %v3631_v32 }
 0x264   : > { %2073 = vst [vmem:[#allocation1 + $0x1] ss:$4 sm:$0xff] %v1945_v13  ;;  %v1962_v13 = vrot.slane %v2733_v50, 6 }
 0x265   : > { %2074 = vst [vmem:[#allocation1 + $0x2] ss:$4 sm:$0xff] %v1946_v9 }
 0x266   : > { %v2071_v23 = vld.sshfl [vmem:[#allocation1 + $0x20] sm:$0xff pattern:$0x73625140]  ;;  %2075 = vst [vmem:[#allocation1 + $0x3] ss:$4 sm:$0xff] %v1947_v51  ;;  %v1734_v51 = vperm.slane %v3001_v62, %v3295_v2 }
 0x267   : > { %v3102_v25 = vpack.i.bf16 %v2071_v23, %v2070_v16  ;;  %2076 = vst [vmem:[#allocation1 + $0x20] ss:$4 sm:$0xff] %v2725_v37  ;;  %v3045_v16 = vunpack.i.l.bf16 %v3044_v4  ;;  %v1765_v23 = vperm.slane %v3041_v8, %v3295_v2 }
 0x268   : > { %2077 = vst [vmem:[#allocation1 + $0x21] ss:$4 sm:$0xff] %v1948_v18  ;;  %v1733_v18 = vperm.slane %v3000_v0, %v3292_v63 }
 0x269   : > { %3103 = vperm.xlu2 %2856, %v3102_v25   ;;  %2078 = vst [vmem:[#allocation1 + $0x22] ss:$4 sm:$0xff] %v1949_v22  ;;  %v1736_v22 = vperm.slane %v3005_v3, %v3302_v15  ;;  %v3046_v25 = vunpack.i.h.bf16 %v3044_v4 }
 0x26a   : > { %2079 = vst [vmem:[#allocation1 + $0x23] ss:$4 sm:$0xff] %v1950_v24  ;;  %v1764_v24 = vperm.slane %v3040_v40, %v3292_v63 }
 0x26d   : > { %v2080_v36 = vld.sshfl [vmem:[#allocation1] sm:$0xff pattern:$0x73625140] }
 0x26e   : > { %2082 = vst [vmem:[#allocation1] ss:$4 sm:$0xff] %v2728_v54  ;;  %v1767_v54 = vperm.slane %v3045_v16, %v3302_v15 }
 0x26f   : > { %2083 = vst [vmem:[#allocation1 + $0x1] ss:$4 sm:$0xff] %v1951_v34  ;;  %v1963_v34 = vrot.slane %v2736_v1, 2 }
 0x270   : > { %2084 = vst [vmem:[#allocation1 + $0x2] ss:$4 sm:$0xff] %v1952_v35  ;;  %v1735_v35 = vsel %vm628_vm0, %v1734_v51, %v1733_v18  ;;  %v1742_v51 = vperm.slane %v3011_v61, %v3326_v46 }
 0x271   : > { %v2081_v44 = vld.sshfl [vmem:[#allocation1 + $0x20] sm:$0xff pattern:$0x73625140]  ;;  %2085 = vst [vmem:[#allocation1 + $0x3] ss:$4 sm:$0xff] %v1953_v39  ;;  %v1964_v39 = vrot.slane %v2736_v1, 4  ;;  %v1737_v53 = vsel %vm632_vm1, %v1736_v22, %v1735_v35 }
 0x272   : > { %v3107_v49 = vpack.i.bf16 %v2081_v44, %v2080_v36  ;;  %2086 = vst [vmem:[#allocation1 + $0x20] ss:$4 sm:$0xff] %v2729_v29  ;;  %v2737_v29 = vunpack.c.h.bf16 %v2818_v7  ;;  %v1738_v36 = vperm.slane %v3006_v20, %v3312_v26  ;;  %v1965_v44 = vrot.slane %v2736_v1, 6 }
 0x273   : > { %2087 = vst [vmem:[#allocation1 + $0x21] ss:$4 sm:$0xff] %v1954_v38  ;;  %v3010_v38 = vunpack.i.l.bf16 %v3631_v32  ;;  %v3016_v32 = vunpack.i.h.bf16 %v3629_v12 }
 0x274   : > { %3108 = vperm.xlu0 %2834, %v3107_v49   ;;  %2088 = vst [vmem:[#allocation1 + $0x22] ss:$4 sm:$0xff] %v1955_v41  ;;  %v1769_v49 = vperm.slane %v3046_v25, %v3312_v26  ;;  %v1739_v62 = vsel %vm636_vm2, %v1738_v36, %v1737_v53  ;;  %v1967_v0 = vrot.slane %v2737_v29, 4  ;;  %v1968_v7 = vrot.slane %v2737_v29, 6 }
 0x275   : > { %2089 = vst [vmem:[#allocation1 + $0x23] ss:$4 sm:$0xff] %v1956_v43  ;;  %v1766_v43 = vsel %vm628_vm0, %v1765_v23, %v1764_v24  ;;  %v1740_v4 = vperm.slane %v3010_v38, %v3318_v33 }
 0x278   : > { %v2090_v56 = vld.sshfl [vmem:[#allocation1] sm:$0xff pattern:$0x73625140] }
 0x279   : > { %2092 = vst [vmem:[#allocation1] ss:$4 sm:$0xff] %v2732_v14  ;;  %v3054_v14 = vpop.permute.xlu0 %3053 }
 0x27a   : > { %2093 = vst [vmem:[#allocation1 + $0x1] ss:$4 sm:$0xff] %v1957_v52  ;;  %v3050_v52 = vunpack.i.l.bf16 %v3049_v17  ;;  %v3055_v3 = vunpack.i.l.bf16 %v3054_v14  ;;  %v3056_v18 = vunpack.i.h.bf16 %v3054_v14  ;;  %v2820_v14 = vld [vmem:[%s3846_s1 + $0x1d8] sm:$0xff]  }
 0x27b   : > { %2094 = vst [vmem:[#allocation1 + $0x2] ss:$4 sm:$0xff] %v1958_v55  ;;  %v1768_v55 = vsel %vm632_vm1, %v1767_v54, %v1766_v43 }
 0x27c   : > { %v2091_v37 = vld.sshfl [vmem:[#allocation1 + $0x20] sm:$0xff pattern:$0x73625140]  ;;  %2095 = vst [vmem:[#allocation1 + $0x3] ss:$4 sm:$0xff] %v1959_v58  ;;  %v2819_v58 = vld [vmem:[%s3846_s1 + $0x1d0] sm:$0xff]   ;;  %v1770_v8 = vsel %vm636_vm2, %v1769_v49, %v1768_v55  ;;  %v1775_v22 = vperm.slane %v3055_v3, %v3334_v59  ;;  %v3064_v49 = vpop.permute.xlu2 %3063 }
 0x27d   : > { %v3112_v9 = vpack.i.bf16 %v2091_v37, %v2090_v56  ;;  %2096 = vst [vmem:[#allocation1 + $0x20] ss:$4 sm:$0xff] %v2733_v50  ;;  %v3015_v50 = vunpack.i.l.bf16 %v3629_v12  ;;  %v1966_v56 = vrot.slane %v2737_v29, 2  ;;  %v3059_v37 = vpop.permute.xlu1 %3058  ;;  %v2741_v25 = vunpack.c.h.bf16 %v2819_v58 }
 0x27e   : > { %2097 = vst [vmem:[#allocation1 + $0x21] ss:$4 sm:$0xff] %v1960_v6  ;;  %v3060_v23 = vunpack.i.l.bf16 %v3059_v37  ;;  %v3061_v53 = vunpack.i.h.bf16 %v3059_v37  ;;  %v3026_v37 = vunpack.i.h.bf16 %v3638_v28 }
 0x27f   : > { %3113 = vperm.xlu2 %2856, %v3112_v9   ;;  %2098 = vst [vmem:[#allocation1 + $0x22] ss:$4 sm:$0xff] %v1961_v10  ;;  %v3051_v10 = vunpack.i.h.bf16 %v3049_v17  ;;  %v1741_v9 = vsel %vm640_vm3, %v1740_v4, %v1739_v62  ;;  %v1744_v16 = vperm.slane %v3015_v50, %v3334_v59  ;;  %v1972_v50 = vrot.slane %v2741_v25, 2 }
 0x280   : > { %2099 = vst [vmem:[#allocation1 + $0x23] ss:$4 sm:$0xff] %v1962_v13  ;;  %v2740_v13 = vunpack.c.l.bf16 %v2819_v58  ;;  %v1743_v24 = vsel %vm644_vm4, %v1742_v51, %v1741_v9  ;;  %v1779_v43 = vperm.slane %v3060_v23, %v3352_v19  ;;  %v3025_v58 = vunpack.i.l.bf16 %v3638_v28 }
 0x281   : > { %v1773_v12 = vperm.slane %v3051_v10, %v3326_v46  ;;  %v1745_v35 = vsel %vm648_vm5, %v1744_v16, %v1743_v24  ;;  %v1974_v4 = vrot.slane %v2741_v25, 6  ;;  %v2744_v10 = vunpack.c.l.bf16 %v2820_v14 }
 0x282   : > { %v1969_v54 = vrot.slane %v2740_v13, 2  ;;  %v1970_v36 = vrot.slane %v2740_v13, 4  ;;  %v3066_v9 = vunpack.i.h.bf16 %v3064_v49  ;;  %v2745_v51 = vunpack.c.h.bf16 %v2820_v14 }
 0x283   : > { %v2100_v41 = vld.sshfl [vmem:[#allocation1] sm:$0xff pattern:$0x73625140] }
 0x284   : > { %2102 = vst [vmem:[#allocation1] ss:$4 sm:$0xff] %v2736_v1  ;;  %v1771_v1 = vperm.slane %v3050_v52, %v3318_v33  ;;  %v1980_v14 = vrot.slane %v2745_v51, 6 }
 0x285   : > { %2103 = vst [vmem:[#allocation1 + $0x1] ss:$4 sm:$0xff] %v1963_v34  ;;  %v1746_v34 = vperm.slane %v3016_v32, %v3345_v11 }
 0x286   : > { %2104 = vst [vmem:[#allocation1 + $0x2] ss:$4 sm:$0xff] %v1964_v39  ;;  %v1772_v20 = vsel %vm640_vm3, %v1771_v1, %v1770_v8  ;;  %v1777_v39 = vperm.slane %v3056_v18, %v3345_v11  ;;  %v3021_v8 = vunpack.i.h.bf16 %v3636_v27  ;;  %v1975_v18 = vrot.slane %v2744_v10, 2 }
 0x287   : > { %v2101_v6 = vld.sshfl [vmem:[#allocation1 + $0x20] sm:$0xff pattern:$0x73625140]  ;;  %2105 = vst [vmem:[#allocation1 + $0x3] ss:$4 sm:$0xff] %v1965_v44  ;;  %v1774_v38 = vsel %vm644_vm4, %v1773_v12, %v1772_v20  ;;  %v1747_v55 = vsel %vm652_vm6, %v1746_v34, %v1745_v35  ;;  %v1977_v12 = vrot.slane %v2744_v10, 6  ;;  %v1785_v34 = vperm.slane %v3066_v9, %v3379_v60  ;;  %v3074_v35 = vpop.permute.xlu2 %3073 }
 0x288   : > { %v3117_v40 = vpack.i.bf16 %v2101_v6, %v2100_v41  ;;  %2106 = vst [vmem:[#allocation1 + $0x20] ss:$4 sm:$0xff] %v2737_v29  ;;  %v3020_v29 = vunpack.i.l.bf16 %v3636_v27  ;;  %v1971_v41 = vrot.slane %v2740_v13, 6  ;;  %v1776_v44 = vsel %vm648_vm5, %v1775_v22, %v1774_v38  ;;  %v2821_v38 = vld [vmem:[%s3846_s1 + $0x1e0] sm:$0xff]  }
 0x289   : > { %2107 = vst [vmem:[#allocation1 + $0x21] ss:$4 sm:$0xff] %v1966_v56  ;;  %v1973_v56 = vrot.slane %v2741_v25, 4  ;;  %v1778_v62 = vsel %vm652_vm6, %v1777_v39, %v1776_v44  ;;  %v3065_v6 = vunpack.i.l.bf16 %v3064_v49  ;;  %v1750_v27 = vperm.slane %v3021_v8, %v3361_v31 }
 0x28a   : > { %3118 = vperm.xlu0 %2834, %v3117_v40   ;;  %2108 = vst [vmem:[#allocation1 + $0x22] ss:$4 sm:$0xff] %v1967_v0  ;;  %v1748_v52 = vperm.slane %v3020_v29, %v3352_v19  ;;  %v1781_v0 = vperm.slane %v3061_v53, %v3361_v31  ;;  %v1780_v3 = vsel %vm656_vm7, %v1779_v43, %v1778_v62  ;;  %v1976_v22 = vrot.slane %v2744_v10, 4 }
 0x28b   : > { %2109 = vst [vmem:[#allocation1 + $0x23] ss:$4 sm:$0xff] %v1968_v7  ;;  %v1783_v1 = vperm.slane %v3065_v6, %v3372_v47  ;;  %v1978_v39 = vrot.slane %v2745_v51, 2  ;;  %v1979_v53 = vrot.slane %v2745_v51, 4  ;;  %v3035_v43 = vunpack.i.l.bf16 %v3645_v48 }
 0x28c   : > { %v1749_v40 = vsel %vm656_vm7, %v1748_v52, %v1747_v55  ;;  %v1782_v32 = vsel %vm660_vm8, %v1781_v0, %v1780_v3  ;;  %v3075_v49 = vunpack.i.l.bf16 %v3074_v35  ;;  %v3031_v55 = vunpack.i.h.bf16 %v3643_v42 }
 0x28d   : > { %v1784_v24 = vsel %vm664_vm9, %v1783_v1, %v1782_v32  ;;  %v1751_v29 = vsel %vm660_vm8, %v1750_v27, %v1749_v40  ;;  %v3036_v62 = vunpack.i.h.bf16 %v3645_v48  ;;  %v3076_v0 = vunpack.i.h.bf16 %v3074_v35 }
 0x28e   : > { %v2110_v17 = vld.sshfl [vmem:[#allocation1] sm:$0xff pattern:$0x73625140]  ;;  %v3069_v16 = vpop.permute.xlu1 %3068  ;;  %v1786_v44 = vsel %vm668_vm10, %v1785_v34, %v1784_v24  ;;  %v1791_v3 = vperm.slane %v3075_v49, %v3405_v30 }
 0x28f   : > { %2112 = vst [vmem:[#allocation1] ss:$4 sm:$0xff] %v2740_v13  ;;  %v1752_v13 = vperm.slane %v3025_v58, %v3372_v47  ;;  %v3070_v20 = vunpack.i.l.bf16 %v3069_v16  ;;  %v3071_v23 = vunpack.i.h.bf16 %v3069_v16  ;;  %v2748_v58 = vunpack.c.l.bf16 %v2821_v38 }
 0x290   : > { %2113 = vst [vmem:[#allocation1 + $0x1] ss:$4 sm:$0xff] %v1969_v54  ;;  %v1754_v54 = vperm.slane %v3026_v37, %v3379_v60  ;;  %v1762_v48 = vperm.slane %v3036_v62, %v3421_v57  ;;  %v1793_v9 = vperm.slane %v3076_v0, %v3421_v57 }
 0x291   : > { %2114 = vst [vmem:[#allocation1 + $0x2] ss:$4 sm:$0xff] %v1970_v36  ;;  %v3030_v36 = vunpack.i.l.bf16 %v3643_v42  ;;  %v1758_v42 = vperm.slane %v3031_v55, %v3396_v21  ;;  %v1981_v8 = vrot.slane %v2748_v58, 2  ;;  %v1982_v40 = vrot.slane %v2748_v58, 4 }
 0x292   : > { %v2111_v61 = vld.sshfl [vmem:[#allocation1 + $0x20] sm:$0xff pattern:$0x73625140]  ;;  %2115 = vst [vmem:[#allocation1 + $0x3] ss:$4 sm:$0xff] %v1971_v41  ;;  %v1789_v41 = vperm.slane %v3071_v23, %v3396_v21  ;;  %v1983_v16 = vrot.slane %v2748_v58, 6 }
 0x293   : > { %v3122_v7 = vpack.i.bf16 %v2111_v61, %v2110_v17  ;;  %2116 = vst [vmem:[#allocation1 + $0x20] ss:$4 sm:$0xff] %v2741_v25  ;;  %v1787_v25 = vperm.slane %v3070_v20, %v3387_v5  ;;  %v1753_v17 = vsel %vm664_vm9, %v1752_v13, %v1751_v29  ;;  %v1756_v61 = vperm.slane %v3030_v36, %v3387_v5 }
 0x294   : > { %2117 = vst [vmem:[#allocation1 + $0x21] ss:$4 sm:$0xff] %v1972_v50 }
 0x295   : > { %3123 = vperm.xlu2 %2856, %v3122_v7   ;;  %2118 = vst [vmem:[#allocation1 + $0x22] ss:$4 sm:$0xff] %v1973_v56  ;;  %v1788_v52 = vsel %vm672_vm11, %v1787_v25, %v1786_v44  ;;  %v1755_v56 = vsel %vm668_vm10, %v1754_v54, %v1753_v17  ;;  %v1760_v7 = vperm.slane %v3035_v43, %v3405_v30 }
 0x296   : > { %2119 = vst [vmem:[#allocation1 + $0x23] ss:$4 sm:$0xff] %v1974_v4  ;;  %v1790_v4 = vsel %vm676_vm12, %v1789_v41, %v1788_v52  ;;  %v1757_v6 = vsel %vm672_vm11, %v1756_v61, %v1755_v56  ;;  %v2823_v56 = vld [vmem:[%s3846_s1 + $0x1f0] sm:$0xff]  }
 0x297   : > { %v1792_v37 = vsel %vm3853_vm13, %v1791_v3, %v1790_v4  ;;  %v1759_v13 = vsel %vm676_vm12, %v1758_v42, %v1757_v6  ;;  %v2756_v4 = vunpack.c.l.bf16 %v2823_v56  ;;  %v2757_v6 = vunpack.c.h.bf16 %v2823_v56 }
 0x298   : > { %v1761_v1 = vsel %vm3853_vm13, %v1760_v7, %v1759_v13  ;;  %v1794_v20 = vsel %vm3852_vm14, %v1793_v9, %v1792_v37 }
 0x299   : > { %v3708_v28 = vld.sshfl [vmem:[#allocation1] sm:$0xff pattern:$0x73625140]  ;;  %v1795_v23 = vrot.slane %v1794_v20, 6  ;;  %v1763_v24 = vsel %vm3852_vm14, %v1762_v48, %v1761_v1  ;;  %vm3857_vm14 = vcmask 1040384   ;;  %v1993_v7 = vrot.slane %v2756_v4, 2 }
 0x29a   : > { %2122 = vst [vmem:[#allocation1] ss:$4 sm:$0xff] %v2744_v10  ;;  %v2749_v10 = vunpack.c.h.bf16 %v2821_v38  ;;  %vm3858_vm13 = vmmov %vm3857_vm14  ;;  %v1994_v3 = vrot.slane %v2756_v4, 4  ;;  %v1997_v37 = vrot.slane %v2757_v6, 4  ;;  %v1998_v13 = vrot.slane %v2757_v6, 6 }
 0x29b   : > { %2123 = vst [vmem:[#allocation1 + $0x1] ss:$4 sm:$0xff] %v1975_v18  ;;  %v2822_v18 = vld [vmem:[%s3846_s1 + $0x1e8] sm:$0xff]   ;;  %v1796_v35 = vsel %vm3856_vm15, %v1763_v24, %v1795_v23 }
 0x29c   : > { %2124 = vst [vmem:[#allocation1 + $0x2] ss:$4 sm:$0xff] %v1976_v22  ;;  %v1985_v27 = vrot.slane %v2749_v10, 4  ;;  %v2438_v22 = vld [vmem:[%s3448_s4 + $0x2] sm:$0x3]  ;;  %v1986_v25 = vrot.slane %v2749_v10, 6  ;;  %v2752_v34 = vunpack.c.l.bf16 %v2822_v18  ;;  %v2753_v38 = vunpack.c.h.bf16 %v2822_v18 }
 0x29d   : > { %v3722_v50 = vld.sshfl [vmem:[#allocation1 + $0x20] sm:$0xff pattern:$0x73625140]  ;;  %2125 = vst [vmem:[#allocation1 + $0x3] ss:$4 sm:$0xff] %v1977_v12  ;;  %v1309_v54 = vunpack.c.l.bf16 %v2438_v22 }
 0x29e   : > { %2126 = vst [vmem:[#allocation1 + $0x20] ss:$4 sm:$0xff] %v2745_v51  ;;  %v1984_v51 = vrot.slane %v2749_v10, 2  ;;  %v1988_v41 = vrot.slane %v2752_v34, 4  ;;  %v1990_v55 = vrot.slane %v2753_v38, 2  ;;  %v1992_v62 = vrot.slane %v2753_v38, 6 }
 0x29f   : > { %2127 = vst [vmem:[#allocation1 + $0x21] ss:$4 sm:$0xff] %v1978_v39  ;;  %v1798_v36 = vmul.f32 %v1796_v35, %v1309_v54  ;;  %v1269_v35 = vpop.xlane.xlu0 %1268 }
 0x2a0   : > { %2128 = vst [vmem:[#allocation1 + $0x22] ss:$4 sm:$0xff] %v1979_v53  ;;  %v1987_v53 = vrot.slane %v2752_v34, 2 }
 0x2a1   : > { %2129 = vst [vmem:[#allocation1 + $0x23] ss:$4 sm:$0xff] %v1980_v14  ;;  %v1800_v17 = vperm.slane %v1798_v36, 0  ;;  %v1801_v39 = vperm.slane %v1798_v36, 2  ;;  %v1989_v14 = vrot.slane %v2752_v34, 6 }
 0x2a3   : > { %v1804_v44 = vsel %vm3857_vm14, %v1800_v17, 0.0  ;;  %v1805_v43 = vsel %vm3858_vm13, %v1801_v39, 0.0 }
 0x2a4   : > { %v2130_v32 = vld.sshfl [vmem:[#allocation1] sm:$0xff pattern:$0x73625140]  ;;  %v1806_v52 = vadd.f32 %v1805_v43, %v1804_v44 }
 0x2a5   : > { %2132 = vst [vmem:[#allocation1] ss:$4 sm:$0xff] %v2748_v58  ;;  %v1991_v58 = vrot.slane %v2753_v38, 4 }
 0x2a6   : > { %2133 = vst [vmem:[#allocation1 + $0x1] ss:$4 sm:$0xff] %v1981_v8  ;;  %1807 = vadd.xlane.f32.xlu1 %v1806_v52  ;;  %v1996_v8 = vrot.slane %v2757_v6, 2 }
 0x2a7   : > { %2134 = vst [vmem:[#allocation1 + $0x2] ss:$4 sm:$0xff] %v1982_v40  ;;  %v2824_v40 = vld [vmem:[%s3846_s1 + $0x1f8] sm:$0xff]  }
 0x2a8   : > { %v2131_v12 = vld.sshfl [vmem:[#allocation1 + $0x20] sm:$0xff pattern:$0x73625140]  ;;  %2135 = vst [vmem:[#allocation1 + $0x3] ss:$4 sm:$0xff] %v1983_v16  ;;  %v2761_v16 = vunpack.c.h.bf16 %v2824_v40 }
 0x2a9   : > { %v3132_v29 = vpack.i.bf16 %v2131_v12, %v2130_v32  ;;  %2136 = vst [vmem:[#allocation1 + $0x20] ss:$4 sm:$0xff] %v2749_v10  ;;  %v1995_v10 = vrot.slane %v2756_v4, 6  ;;  %v2760_v32 = vunpack.c.l.bf16 %v2824_v40 }
 0x2aa   : > { %2137 = vst [vmem:[#allocation1 + $0x21] ss:$4 sm:$0xff] %v1984_v51  ;;  %v2002_v22 = vrot.slane %v2761_v16, 2  ;;  %v2003_v23 = vrot.slane %v2761_v16, 4  ;;  %v2004_v12 = vrot.slane %v2761_v16, 6 }
 0x2ab   : > { %3133 = vperm.xlu0 %2834, %v3132_v29   ;;  %2138 = vst [vmem:[#allocation1 + $0x22] ss:$4 sm:$0xff] %v1985_v27  ;;  %v1999_v1 = vrot.slane %v2760_v32, 2  ;;  %v2000_v51 = vrot.slane %v2760_v32, 4  ;;  %v2001_v20 = vrot.slane %v2760_v32, 6  ;;  %v3127_v27 = vpack.i.bf16 %v3722_v50, %v3708_v28  ;;  %v3079_v28 = vpop.permute.xlu0 %3078  ;;  %v3084_v50 = vpop.permute.xlu2 %3083 }
 0x2ac   : > { %2139 = vst [vmem:[#allocation1 + $0x23] ss:$4 sm:$0xff] %v1986_v25  ;;  %v3081_v44 = vunpack.i.h.bf16 %v3079_v28  ;;  %v3080_v43 = vunpack.i.l.bf16 %v3079_v28 }
 0x2ae   : > { %v2268_v56 = vperm.slane %v3080_v43, %v3292_v63 }
 0x2af   : > { %v2140_v49 = vld.sshfl [vmem:[#allocation1] sm:$0xff pattern:$0x73625140] }
 0x2b0   : > { %2142 = vst [vmem:[#allocation1] ss:$4 sm:$0xff] %v2752_v34 }
 0x2b1   : > { %2143 = vst [vmem:[#allocation1 + $0x1] ss:$4 sm:$0xff] %v1987_v53 }
 0x2b2   : > { %2144 = vst [vmem:[#allocation1 + $0x2] ss:$4 sm:$0xff] %v1988_v41 }
 0x2b3   : > { %v2141_v61 = vld.sshfl [vmem:[#allocation1 + $0x20] sm:$0xff pattern:$0x73625140]  ;;  %2145 = vst [vmem:[#allocation1 + $0x3] ss:$4 sm:$0xff] %v1989_v14  ;;  %v3094_v17 = vpop.permute.xlu2 %3093 }
 0x2b4   : > { %v3137_v0 = vpack.i.bf16 %v2141_v61, %v2140_v49  ;;  %2146 = vst [vmem:[#allocation1 + $0x20] ss:$4 sm:$0xff] %v2753_v38  ;;  %v1271_v38 = vrot.slane %v1269_v35, 1  ;;  %v3085_v61 = vunpack.i.l.bf16 %v3084_v50 }
 0x2b5   : > { %2147 = vst [vmem:[#allocation1 + $0x21] ss:$4 sm:$0xff] %v1990_v55  ;;  %v2269_v55 = vperm.slane %v3081_v44, %v3295_v2 }
 0x2b6   : > { %3138 = vperm.xlu2 %2856, %v3137_v0   ;;  %2148 = vst [vmem:[#allocation1 + $0x22] ss:$4 sm:$0xff] %v1991_v58  ;;  %v1273_v41 = vadd.f32 %v1271_v38, %v3617_v45  ;;  %v3086_v0 = vunpack.i.h.bf16 %v3084_v50  ;;  %v2271_v45 = vperm.slane %v3085_v61, %v3302_v15 }
 0x2b7   : > { %2149 = vst [vmem:[#allocation1 + $0x23] ss:$4 sm:$0xff] %v1992_v62 }
 0x2ba   : > { %v2150_v42 = vld.sshfl [vmem:[#allocation1] sm:$0xff pattern:$0x73625140]  ;;  %v3089_v36 = vpop.permute.xlu0 %3088 }
 0x2bb   : > { %2152 = vst [vmem:[#allocation1] ss:$4 sm:$0xff] %v2756_v4  ;;  %v3090_v62 = vunpack.i.l.bf16 %v3089_v36  ;;  %v2270_v4 = vsel %vm628_vm0, %v2269_v55, %v2268_v56 }
 0x2bc   : > { %2153 = vst [vmem:[#allocation1 + $0x1] ss:$4 sm:$0xff] %v1993_v7 }
 0x2bd   : > { %2154 = vst [vmem:[#allocation1 + $0x2] ss:$4 sm:$0xff] %v1994_v3  ;;  %v2272_v3 = vsel %vm632_vm1, %v2271_v45, %v2270_v4 }
 0x2be   : > { %v2151_v48 = vld.sshfl [vmem:[#allocation1 + $0x20] sm:$0xff pattern:$0x73625140]  ;;  %2155 = vst [vmem:[#allocation1 + $0x3] ss:$4 sm:$0xff] %v1995_v10  ;;  %v2273_v10 = vperm.slane %v3086_v0, %v3312_v26 }
 0x2bf   : > { %v3142_v9 = vpack.i.bf16 %v2151_v48, %v2150_v42  ;;  %2156 = vst [vmem:[#allocation1 + $0x20] ss:$4 sm:$0xff] %v2757_v6  ;;  %3128 = vperm.xlu1 %2845, %v3127_v27   ;;  %v3091_v6 = vunpack.i.h.bf16 %v3089_v36  ;;  %v2275_v42 = vperm.slane %v3090_v62, %v3318_v33 }
 0x2c0   : > { %2157 = vst [vmem:[#allocation1 + $0x21] ss:$4 sm:$0xff] %v1996_v8 }
 0x2c1   : > { %3143 = vperm.xlu0 %2834, %v3142_v9   ;;  %2158 = vst [vmem:[#allocation1 + $0x22] ss:$4 sm:$0xff] %v1997_v37  ;;  %v2277_v40 = vperm.slane %v3091_v6, %v3326_v46  ;;  %v2274_v37 = vsel %vm636_vm2, %v2273_v10, %v2272_v3  ;;  %v3095_v9 = vunpack.i.l.bf16 %v3094_v17 }
 0x2c2   : > { %2159 = vst [vmem:[#allocation1 + $0x23] ss:$4 sm:$0xff] %v1998_v13 }
 0x2c3   : > { %v3756_v53 = vpop.permute.xlu2 %3103 }
 0x2c4   : > { %v3106_v62 = vunpack.i.h.bf16 %v3756_v53 }
 0x2c5   : > { %v2160_v18 = vld.sshfl [vmem:[#allocation1] sm:$0xff pattern:$0x73625140] }
 0x2c6   : > { %2162 = vst [vmem:[#allocation1] ss:$4 sm:$0xff] %v2760_v32  ;;  %v2276_v32 = vsel %vm640_vm3, %v2275_v42, %v2274_v37 }
 0x2c7   : > { %2163 = vst [vmem:[#allocation1 + $0x1] ss:$4 sm:$0xff] %v1999_v1  ;;  %v2278_v1 = vsel %vm644_vm4, %v2277_v40, %v2276_v32 }
 0x2c8   : > { %2164 = vst [vmem:[#allocation1 + $0x2] ss:$4 sm:$0xff] %v2000_v51 }
 0x2c9   : > { %v2161_v24 = vld.sshfl [vmem:[#allocation1 + $0x20] sm:$0xff pattern:$0x73625140]  ;;  %2165 = vst [vmem:[#allocation1 + $0x3] ss:$4 sm:$0xff] %v2001_v20 }
 0x2ca   : > { %v3147_v25 = vpack.i.bf16 %v2161_v24, %v2160_v18  ;;  %2166 = vst [vmem:[#allocation1 + $0x20] ss:$4 sm:$0xff] %v2761_v16  ;;  %v3096_v16 = vunpack.i.h.bf16 %v3094_v17 }
 0x2cb   : > { %2167 = vst [vmem:[#allocation1 + $0x21] ss:$4 sm:$0xff] %v2002_v22  ;;  %v2279_v22 = vperm.slane %v3095_v9, %v3334_v59 }
 0x2cc   : > { %3148 = vperm.xlu2 %2856, %v3147_v25   ;;  %2168 = vst [vmem:[#allocation1 + $0x22] ss:$4 sm:$0xff] %v2003_v23 }
 0x2cd   : > { %2169 = vst [vmem:[#allocation1 + $0x23] ss:$4 sm:$0xff] %v2004_v12  ;;  %v2280_v25 = vsel %vm648_vm5, %v2279_v22, %v2278_v1 }
 0x2d0   : > { %v2170_v54 = vld.sshfl [vmem:[#allocation1] sm:$0xff pattern:$0x73625140]  ;;  %v3099_v39 = vpop.permute.xlu0 %3098 }
 0x2d1   : > { %v3100_v51 = vunpack.i.l.bf16 %v3099_v39  ;;  %v3101_v24 = vunpack.i.h.bf16 %v3099_v39 }
 0x2d4   : > { %v2171_v29 = vld.sshfl [vmem:[#allocation1 + $0x20] sm:$0xff pattern:$0x73625140] }
 0x2d5   : > { %v3152_v34 = vpack.i.bf16 %v2171_v29, %v2170_v54  ;;  %v2281_v54 = vperm.slane %v3096_v16, %v3345_v11  ;;  %v2283_v29 = vperm.slane %v3100_v51, %v3352_v19 }
 0x2d7   : > { %3153 = vperm.xlu0 %2834, %v3152_v34  }
 0x2d9   : > { %v3765_v58 = vpop.permute.xlu2 %3113 }
 0x2da   : > { %v3115_v22 = vunpack.i.l.bf16 %v3765_v58 }
 0x2e6   : > { %v3761_v52 = vpop.permute.xlu0 %3108 }
 0x2e7   : > { %v3110_v0 = vunpack.i.l.bf16 %v3761_v52 }
 0x2ef   : > { %v3124_v8 = vpop.permute.xlu2 %3123 }
 0x2f0   : > { %v3125_v23 = vunpack.i.l.bf16 %v3124_v8  ;;  %v3126_v34 = vunpack.i.h.bf16 %v3124_v8  ;;  %v3111_v8 = vunpack.i.h.bf16 %v3761_v52 }
 0x2f2   : > { %v2302_v28 = vperm.slane %v3125_v23, %v3302_v15  ;;  %v2304_v43 = vperm.slane %v3126_v34, %v3312_v26 }
 0x2fc   : > { %v3119_v7 = vpop.permute.xlu0 %3118 }
 0x2fd   : > { %v3121_v48 = vunpack.i.h.bf16 %v3119_v7  ;;  %v3120_v13 = vunpack.i.l.bf16 %v3119_v7 }
 0x2ff   : > { %v2300_v18 = vperm.slane %v3121_v48, %v3295_v2  ;;  %v2299_v20 = vperm.slane %v3120_v13, %v3292_v63  ;;  %v2285_v2 = vperm.slane %v3101_v24, %v3361_v31  ;;  %v2282_v63 = vsel %vm652_vm6, %v2281_v54, %v2280_v25 }
 0x300   : > { %v2284_v44 = vsel %vm656_vm7, %v2283_v29, %v2282_v63  ;;  %v3116_v29 = vunpack.i.h.bf16 %v3765_v58 }
 0x301   : > { %v2301_v35 = vsel %vm628_vm0, %v2300_v18, %v2299_v20  ;;  %v2286_v7 = vsel %vm660_vm8, %v2285_v2, %v2284_v44  ;;  %v2293_v18 = vperm.slane %v3111_v8, %v3396_v21  ;;  %vm3859_vm0 = vcmask 982912  }
 0x302   : > { %v2303_v36 = vsel %vm632_vm1, %v2302_v28, %v2301_v35  ;;  %v2295_v35 = vperm.slane %v3115_v22, %v3405_v30  ;;  %vm3860_vm1 = vmmov %vm3859_vm0 }
 0x303   : > { %v2305_v6 = vsel %vm636_vm2, %v2304_v43, %v2303_v36  ;;  %v2297_v36 = vperm.slane %v3116_v29, %v3421_v57  ;;  %vm3861_vm2 = vcmask 1048512  }
 0x310   : > { %v3139_v12 = vpop.permute.xlu2 %3138 }
 0x311   : > { %v3140_v56 = vunpack.i.l.bf16 %v3139_v12  ;;  %v3141_v4 = vunpack.i.h.bf16 %v3139_v12 }
 0x313   : > { %v2314_v40 = vperm.slane %v3140_v56, %v3352_v19  ;;  %v2316_v9 = vperm.slane %v3141_v4, %v3361_v31 }
 0x319   : > { %v1808_v49 = vpop.xlane.xlu1 %1807 }
 0x31a   : > { %v3759_v14 = vadd.f32 %v1808_v49, %v1273_v41  ;;  %v3105_v41 = vunpack.i.l.bf16 %v3756_v53 }
 0x31c   : > { %v2287_v10 = vperm.slane %v3105_v41, %v3372_v47 }
 0x31d   : > { %v3134_v27 = vpop.permute.xlu0 %3133 }
 0x31e   : > { %v3135_v17 = vunpack.i.l.bf16 %v3134_v27  ;;  %v3136_v49 = vunpack.i.h.bf16 %v3134_v27  ;;  %v2288_v13 = vsel %vm664_vm9, %v2287_v10, %v2286_v7 }
 0x320   : > { %v2310_v3 = vperm.slane %v3135_v17, %v3334_v59  ;;  %v2291_v59 = vperm.slane %v3110_v0, %v3387_v5 }
 0x326   : > { %v3149_v45 = vpop.permute.xlu2 %3148 }
 0x327   : > { %v3150_v37 = vunpack.i.l.bf16 %v3149_v45  ;;  %v3151_v16 = vunpack.i.h.bf16 %v3149_v45 }
 0x329   : > { %v2322_v27 = vperm.slane %v3150_v37, %v3387_v5  ;;  %v2324_v24 = vperm.slane %v3151_v16, %v3396_v21  ;;  %v2471_v21 = vld [vmem:[%s3448_s4 + $0x2] sm:$0x3] }
 0x331   : > { %v3129_v50 = vpop.permute.xlu1 %3128 }
 0x332   : > { %v3131_v39 = vunpack.i.h.bf16 %v3129_v50  ;;  %v3130_v38 = vunpack.i.l.bf16 %v3129_v50 }
 0x333   : > { %v3144_v55 = vpop.permute.xlu0 %3143 }
 0x334   : > { %v2308_v15 = vperm.slane %v3131_v39, %v3326_v46  ;;  %v2306_v61 = vperm.slane %v3130_v38, %v3318_v33  ;;  %v3145_v26 = vunpack.i.l.bf16 %v3144_v55  ;;  %v2312_v46 = vperm.slane %v3136_v49, %v3345_v11 }
 0x335   : > { %v3146_v33 = vunpack.i.h.bf16 %v3144_v55  ;;  %v2289_v11 = vperm.slane %v3106_v62, %v3379_v60  ;;  %v1844_v39 = vunpack.c.l.bf16 %v2471_v21  ;;  %v2349_v62 = vld [vmem:[#allocation2] sm:$0x1] }
 0x336   : > { %v2307_v42 = vsel %vm640_vm3, %v2306_v61, %v2305_v6  ;;  %v2318_v1 = vperm.slane %v3145_v26, %v3372_v47  ;;  %vm3862_vm3 = vmmov %vm3861_vm2 }
 0x337   : > { %v2309_v53 = vsel %vm644_vm4, %v2308_v15, %v2307_v42  ;;  %v2320_v19 = vperm.slane %v3146_v33, %v3379_v60  ;;  %v2290_v20 = vsel %vm668_vm10, %v2289_v11, %v2288_v13  ;;  %vm3863_vm4 = vmmov %vm3856_vm15 }
 0x338   : > { %v2311_v48 = vsel %vm648_vm5, %v2310_v3, %v2309_v53  ;;  %v2292_v23 = vsel %vm672_vm11, %v2291_v59, %v2290_v20  ;;  %vm3864_vm5 = vcmask 1041409  }
 0x339   : > { %v2313_v32 = vsel %vm652_vm6, %v2312_v46, %v2311_v48  ;;  %v2294_v5 = vsel %vm676_vm12, %v2293_v18, %v2292_v23  ;;  %vm3865_vm6 = vmmov %vm3864_vm5 }
 0x33a   : > { %v2315_v52 = vsel %vm656_vm7, %v2314_v40, %v2313_v32  ;;  %v2296_v63 = vsel %vm3859_vm0, %v2295_v35, %v2294_v5  ;;  %vm2351_vm7 = vcmask 0  }
 0x33b   : > { %v2317_v51 = vsel %vm660_vm8, %v2316_v9, %v2315_v52  ;;  %v2298_v38 = vsel %vm3862_vm3, %v2297_v36, %v2296_v63 }
 0x33c   : > { %v2319_v31 = vsel %vm664_vm9, %v2318_v1, %v2317_v51 }
 0x33d   : > { %v2321_v47 = vsel %vm668_vm10, %v2320_v19, %v2319_v31 }
 0x33e   : > { %v2323_v12 = vsel %vm672_vm11, %v2322_v27, %v2321_v47 }
 0x33f   : > { %v2325_v34 = vsel %vm676_vm12, %v2324_v24, %v2323_v12 }
 0x349   : > { %v3154_v60 = vpop.permute.xlu0 %3153 }
 0x34a   : > { %v3156_v25 = vunpack.i.h.bf16 %v3154_v60  ;;  %v3155_v54 = vunpack.i.l.bf16 %v3154_v60 }
 0x34c   : > { %v2326_v28 = vperm.slane %v3155_v54, %v3405_v30  ;;  %v2328_v2 = vperm.slane %v3156_v25, %v3421_v57 }
 0x34e   : > { %v2327_v50 = vsel %vm3860_vm1, %v2326_v28, %v2325_v34 }
 0x34f   : > { %v2329_v17 = vsel %vm3861_vm2, %v2328_v2, %v2327_v50 }
 0x350   : > { %v2330_v58 = vrot.slane %v2329_v17, 6 }
 0x352   : > { %v2331_v41 = vsel %vm3863_vm4, %v2298_v38, %v2330_v58 }
 0x353   : > { %v2332_v44 = vrot.slane %v2331_v41, 7 }
 0x355   : > { %v2334_v30 = vmul.f32 %v2332_v44, %v1844_v39 }
 0x357   : > { %v2336_v43 = vperm.slane %v2334_v30, 1  ;;  %v2337_v49 = vperm.slane %v2334_v30, 3 }
 0x359   : > { %v2340_v55 = vsel %vm3864_vm5, %v2336_v43, 0.0  ;;  %v2341_v56 = vsel %vm3865_vm6, %v2337_v49, 0.0 }
 0x35a   : > { %v2342_v15 = vadd.f32 %v2341_v56, %v2340_v55 }
 0x35c   : > { %2343 = vadd.xlane.f32.xlu2 %v2342_v15 }
 0x3cf   : > { %v2344_v57 = vpop.xlane.xlu2 %2343 }
 0x3d0   : > { %v2346_v61 = vrot.slane %v2344_v57, 1 }
 0x3d2   : > { %v2348_v0 = vadd.f32 %v2346_v61, %v3759_v14 }
 0x3d4   : > { %v2350_v4 = vadd.f32 %v2349_v62, %v2348_v0 }
 0x3d6   : > { %2352 = vst.msk [vmem:[%s165_s21] sm:$0x1] %vm2351_vm7, %v2350_v4 }
 0x3d7 PF: > { %s15_s14 = sadd.s32 1, %s3163_s14  }
 0x3d8   : > { %p12_p4 = scmp.ge.s32.totalorder %s15_s14, 4  }
 0x3da   :  { %14 = sbr.rel (!%p12_p4) target bundleno = 3 (0x3), region = 94 }

</bundles_post_ra>
